<compile_context>
chip_gen: v6e
topology: v6e:2x2x1
jax: 0.10.0
libtpu: 0.0.40
codegen_flags: <defaults>
</compile_context>

<pallas_src>
import numpy as np
import jax
import jax.numpy as jnp
from jax import lax
from jax.experimental import pallas as pl
from jax.experimental.pallas import tpu as pltpu

# Fixed dimensions implied by the PyTorch module (fc1 input 64*1*13 => H=4, W=13).
C_IN, H_IN, W_IN = 5, 4, 13
C1, K1H, K1W = 32, 4, 5
C2, K2W = 64, 3
FC1_IN, FC1_OUT = C2 * 1 * W_IN, 128          # 832, 128
FC2_OUT = 1
CH = C_IN * H_IN                              # 20 = flattened (channel, height) lanes


def big2cnn_kernel(x_ref, w1_ref, b1_ref, w2_ref, b2_ref,
                   wfc1_ref, bfc1_ref, wfc2_ref, bfc2_ref,
                   o_ref, h1_ref, acc_ref):
    f32 = jnp.float32

    # ---- conv1 + relu: h1[w] (C1, TB) = relu(sum_kw W1[kw] @ x[w+kw-2] + b1) ----
    for w in range(W_IN):
        acc = None
        for kw in range(K1W):
            wi = w + kw - 2
            if 0 <= wi < W_IN:                       # width zero-padding handled statically
                t = jnp.dot(w1_ref[kw], x_ref[wi], preferred_element_type=f32)
                acc = t if acc is None else acc + t
        h1_ref[w] = jnp.maximum(acc + b1_ref[...], 0.0)

    # ---- conv2 + relu fused with the fc1 accumulation --------------------------
    acc_ref[...] = jnp.broadcast_to(bfc1_ref[...], acc_ref.shape)     # (FC1_OUT, TB)
    for w in range(W_IN):
        a2 = None
        for kw in range(K2W):
            wi = w + kw - 1
            if 0 <= wi < W_IN:
                t = jnp.dot(w2_ref[kw], h1_ref[wi], preferred_element_type=f32)
                a2 = t if a2 is None else a2 + t
        h2w = jnp.maximum(a2 + b2_ref[...], 0.0)                      # (C2, TB)
        acc_ref[...] += jnp.dot(wfc1_ref[w], h2w, preferred_element_type=f32)

    # ---- fc1 relu + fc2 (lane-dense (1, TB) output row) -------------------------
    h3 = jnp.maximum(acc_ref[...], 0.0)                               # (FC1_OUT, TB)
    o_ref[...] = jnp.dot(wfc2_ref[...], h3, preferred_element_type=f32) + bfc2_ref[...]


def _round_up(n, m):
    return (n + m - 1) // m * m


def big2cnn_pallas(x, params):
    w1, b1, w2, b2, wfc1, bfc1, wfc2, bfc2 = params
    B = x.shape[0]
    assert x.shape[1:] == (C_IN, H_IN, W_IN)

    # Batch tile: lane-aligned (multiple of 128), capped at 512 so double-buffered
    # input blocks + scratch stay far under v7x's 64 MiB VMEM while still
    # amortizing per-step overhead on v5e/v6e.
    TB = max(128, min(512, _round_up(B, 128)))
    B_pad = _round_up(B, TB)
    n_blocks = B_pad // TB

    # ---- cheap layout glue (fuses under jit) ----
    # input: (B, C, H, W) -> (W, C*H, B_pad): features on sublanes, batch on lanes.
    xt = jnp.transpose(x, (3, 1, 2, 0)).reshape(W_IN, CH, B)
    xt = jnp.pad(xt, ((0, 0), (0, 0), (0, B_pad - B)))

    w1s = jnp.transpose(w1, (3, 0, 1, 2)).reshape(K1W, C1, CH)          # (5, 32, 20)
    w2s = jnp.transpose(w2[:, :, 0, :], (2, 0, 1))                      # (3, 64, 32)
    wfc1s = jnp.transpose(wfc1.reshape(FC1_OUT, C2, W_IN), (2, 0, 1))   # (13, 128, 64)

    operands = (
        xt,
        w1s, b1.reshape(C1, 1),
        w2s, b2.reshape(C2, 1),
        wfc1s, bfc1.reshape(FC1_OUT, 1),
        wfc2, bfc2.reshape(1, 1),
    )

    macs = 59 * CH * C1 + 37 * C1 * C2 + W_IN * C2 * FC1_OUT + FC1_OUT
    weight_bytes = sum(int(np.prod(o.shape)) * 4 for o in operands[1:])
    cost = pl.CostEstimate(
        flops=int(2 * macs * B_pad),
        transcendentals=0,
        bytes_accessed=int(B_pad * (W_IN * CH * 4 + 4) + n_blocks * weight_bytes),
    )

    grid_spec = pltpu.PrefetchScalarGridSpec(
        num_scalar_prefetch=0,
        grid=(n_blocks,),
        in_specs=[
            pl.BlockSpec((W_IN, CH, TB), lambda b: (0, 0, b)),          # input block
            pl.BlockSpec((K1W, C1, CH), lambda b: (0, 0, 0)),           # conv1 weights
            pl.BlockSpec((C1, 1), lambda b: (0, 0)),                    # conv1 bias
            pl.BlockSpec((K2W, C2, C1), lambda b: (0, 0, 0)),           # conv2 weights
            pl.BlockSpec((C2, 1), lambda b: (0, 0)),                    # conv2 bias
            pl.BlockSpec((W_IN, FC1_OUT, C2), lambda b: (0, 0, 0)),     # fc1 weights
            pl.BlockSpec((FC1_OUT, 1), lambda b: (0, 0)),               # fc1 bias
            pl.BlockSpec((FC2_OUT, FC1_OUT), lambda b: (0, 0)),         # fc2 weights
            pl.BlockSpec((1, 1), lambda b: (0, 0)),                     # fc2 bias
        ],
        out_specs=pl.BlockSpec((1, TB), lambda b: (0, b)),              # lane-dense output
        scratch_shapes=[
            pltpu.VMEM((W_IN, C1, TB), jnp.float32),                    # h1 (conv1 output)
            pltpu.VMEM((FC1_OUT, TB), jnp.float32),                     # fc1 accumulator
        ],
    )

    out = pl.pallas_call(
        big2cnn_kernel,
        out_shape=jax.ShapeDtypeStruct((1, B_pad), jnp.float32),
        grid_spec=grid_spec,
        compiler_params=pltpu.CompilerParams(dimension_semantics=("parallel",)),
        cost_estimate=cost,
    )(*operands)

    return out[0, :B].reshape(B, 1)


def big2cnn_ref(x, params):
    """Pure-JAX reference mirroring the PyTorch forward exactly."""
    (w1, b1, w2, b2, wfc1, bfc1, wfc2, bfc2) = params
    dn = ('NCHW', 'OIHW', 'NCHW')
    y = lax.conv_general_dilated(x, w1, (1, 1), [(0, 0), (2, 2)], dimension_numbers=dn)
    y = jnp.maximum(y + b1[None, :, None, None], 0.0)
    y = lax.conv_general_dilated(y, w2, (1, 1), [(0, 0), (1, 1)], dimension_numbers=dn)
    y = jnp.maximum(y + b2[None, :, None, None], 0.0)
    y = y.reshape(x.shape[0], -1)                  # torch flatten(start_dim=1)
    y = jnp.maximum(y @ wfc1.T + bfc1, 0.0)
    y = y @ wfc2.T + bfc2
    return y


if __name__ == "__main__":
    kp = jax.random.split(jax.random.PRNGKey(0), 9)

    def uinit(k, shape, fan_in):
        bound = 1.0 / np.sqrt(fan_in)
        return jax.random.uniform(k, shape, jnp.float32, -bound, bound)

    params = (
        uinit(kp[0], (C1, C_IN, K1H, K1W), C_IN * K1H * K1W),   # conv1 weight
        uinit(kp[1], (C1,), C_IN * K1H * K1W),                  # conv1 bias
        uinit(kp[2], (C2, C1, 1, K2W), C1 * K2W),               # conv2 weight
        uinit(kp[3], (C2,), C1 * K2W),                          # conv2 bias
        uinit(kp[4], (FC1_OUT, FC1_IN), FC1_IN),                # fc1 weight (out, in)
        uinit(kp[5], (FC1_OUT,), FC1_IN),                       # fc1 bias
        uinit(kp[6], (FC2_OUT, FC1_OUT), FC1_OUT),              # fc2 weight (out, in)
        uinit(kp[7], (FC2_OUT,), FC1_OUT),                      # fc2 bias
    )

    fwd = jax.jit(big2cnn_pallas)

    # Small sanity batch (B=2).
    x_small = jax.random.normal(kp[8], (2, C_IN, H_IN, W_IN), jnp.float32)
    out_small = jax.block_until_ready(fwd(x_small, params))
    np.testing.assert_allclose(np.asarray(out_small),
                               np.asarray(big2cnn_ref(x_small, params)),
                               atol=2e-4, rtol=1e-3)

    # Batch that exercises multiple grid blocks + batch padding (B=600 -> TB=512).
    x_big = jax.random.normal(jax.random.PRNGKey(1), (600, C_IN, H_IN, W_IN), jnp.float32)
    out_big = jax.block_until_ready(fwd(x_big, params))
    np.testing.assert_allclose(np.asarray(out_big),
                               np.asarray(big2cnn_ref(x_big, params)),
                               atol=2e-4, rtol=1e-3)

    print("KERNEL_OK")
</pallas_src>

<mosaic_0001>
module attributes {stable_mosaic.version = 11 : i64} {
  func.func @big2cnn_kernel(%arg0: i32, %arg1: memref<13x20x128xf32, #tpu.memory_space<vmem>>, %arg2: memref<5x32x20xf32, #tpu.memory_space<vmem>>, %arg3: memref<32x1xf32, #tpu.memory_space<vmem>>, %arg4: memref<3x64x32xf32, #tpu.memory_space<vmem>>, %arg5: memref<64x1xf32, #tpu.memory_space<vmem>>, %arg6: memref<13x128x64xf32, #tpu.memory_space<vmem>>, %arg7: memref<128x1xf32, #tpu.memory_space<vmem>>, %arg8: memref<1x128xf32, #tpu.memory_space<vmem>>, %arg9: memref<1x1xf32, #tpu.memory_space<vmem>>, %arg10: memref<1x128xf32, #tpu.memory_space<vmem>>, %arg11: memref<13x32x128xf32, #tpu.memory_space<vmem>>, %arg12: memref<128x128xf32, #tpu.memory_space<vmem>>) attributes {dimension_semantics = [#tpu.dimension_semantics<parallel>], iteration_bounds = array<i64: 1>, scalar_prefetch = 0 : i64, scratch_operands = 2 : i64, tpu.core_type = #tpu.core_type<tc>, window_params = [{transform_indices = @transform_0, window_bounds = array<i64: 13, 20, 128>}, {pipeline_mode = #tpu.pipeline_mode<synchronous>, transform_indices = @transform_1, window_bounds = array<i64: 5, 32, 20>}, {pipeline_mode = #tpu.pipeline_mode<synchronous>, transform_indices = @transform_2, window_bounds = array<i64: 32, 1>}, {pipeline_mode = #tpu.pipeline_mode<synchronous>, transform_indices = @transform_3, window_bounds = array<i64: 3, 64, 32>}, {pipeline_mode = #tpu.pipeline_mode<synchronous>, transform_indices = @transform_4, window_bounds = array<i64: 64, 1>}, {pipeline_mode = #tpu.pipeline_mode<synchronous>, transform_indices = @transform_5, window_bounds = array<i64: 13, 128, 64>}, {pipeline_mode = #tpu.pipeline_mode<synchronous>, transform_indices = @transform_6, window_bounds = array<i64: 128, 1>}, {pipeline_mode = #tpu.pipeline_mode<synchronous>, transform_indices = @transform_7, window_bounds = array<i64: 1, 128>}, {pipeline_mode = #tpu.pipeline_mode<synchronous>, transform_indices = @transform_8, window_bounds = array<i64: 1, 1>}, {transform_indices = @transform_9, window_bounds = array<i64: 1, 128>}]} {
    %c2 = arith.constant 2 : index
    %c0 = arith.constant 0 : index
    %c0_0 = arith.constant 0 : index
    %0 = vector.load %arg2[%c2, %c0, %c0_0] : memref<5x32x20xf32, #tpu.memory_space<vmem>>, vector<1x32x20xf32>
    %1 = vector.shape_cast %0 : vector<1x32x20xf32> to vector<32x20xf32>
    %c0_1 = arith.constant 0 : index
    %c0_2 = arith.constant 0 : index
    %c0_3 = arith.constant 0 : index
    %2 = vector.load %arg1[%c0_1, %c0_2, %c0_3] : memref<13x20x128xf32, #tpu.memory_space<vmem>>, vector<1x20x128xf32>
    %3 = vector.shape_cast %2 : vector<1x20x128xf32> to vector<20x128xf32>
    %cst = arith.constant dense<0.000000e+00> : vector<32x128xf32>
    %4 = tpu.matmul %1, %3, %cst {dimension_numbers = #tpu.dot_dimension_numbers<[1], [0], [0], [1], [0, 0, 1, 1], [], []>} : vector<32x20xf32>, vector<20x128xf32>, vector<32x128xf32> -> vector<32x128xf32>
    %c3 = arith.constant 3 : index
    %c0_4 = arith.constant 0 : index
    %c0_5 = arith.constant 0 : index
    %5 = vector.load %arg2[%c3, %c0_4, %c0_5] : memref<5x32x20xf32, #tpu.memory_space<vmem>>, vector<1x32x20xf32>
    %6 = vector.shape_cast %5 : vector<1x32x20xf32> to vector<32x20xf32>
    %c1 = arith.constant 1 : index
    %c0_6 = arith.constant 0 : index
    %c0_7 = arith.constant 0 : index
    %7 = vector.load %arg1[%c1, %c0_6, %c0_7] : memref<13x20x128xf32, #tpu.memory_space<vmem>>, vector<1x20x128xf32>
    %8 = vector.shape_cast %7 : vector<1x20x128xf32> to vector<20x128xf32>
    %cst_8 = arith.constant dense<0.000000e+00> : vector<32x128xf32>
    %9 = tpu.matmul %6, %8, %cst_8 {dimension_numbers = #tpu.dot_dimension_numbers<[1], [0], [0], [1], [0, 0, 1, 1], [], []>} : vector<32x20xf32>, vector<20x128xf32>, vector<32x128xf32> -> vector<32x128xf32>
    %10 = arith.addf %4, %9 : vector<32x128xf32>
    %c4 = arith.constant 4 : index
    %c0_9 = arith.constant 0 : index
    %c0_10 = arith.constant 0 : index
    %11 = vector.load %arg2[%c4, %c0_9, %c0_10] : memref<5x32x20xf32, #tpu.memory_space<vmem>>, vector<1x32x20xf32>
    %12 = vector.shape_cast %11 : vector<1x32x20xf32> to vector<32x20xf32>
    %c2_11 = arith.constant 2 : index
    %c0_12 = arith.constant 0 : index
    %c0_13 = arith.constant 0 : index
    %13 = vector.load %arg1[%c2_11, %c0_12, %c0_13] : memref<13x20x128xf32, #tpu.memory_space<vmem>>, vector<1x20x128xf32>
    %14 = vector.shape_cast %13 : vector<1x20x128xf32> to vector<20x128xf32>
    %cst_14 = arith.constant dense<0.000000e+00> : vector<32x128xf32>
    %15 = tpu.matmul %12, %14, %cst_14 {dimension_numbers = #tpu.dot_dimension_numbers<[1], [0], [0], [1], [0, 0, 1, 1], [], []>} : vector<32x20xf32>, vector<20x128xf32>, vector<32x128xf32> -> vector<32x128xf32>
    %16 = arith.addf %10, %15 : vector<32x128xf32>
    %c0_15 = arith.constant 0 : index
    %c0_16 = arith.constant 0 : index
    %17 = vector.load %arg3[%c0_15, %c0_16] : memref<32x1xf32, #tpu.memory_space<vmem>>, vector<32x1xf32>
    %18 = vector.broadcast %17 : vector<32x1xf32> to vector<32x128xf32>
    %19 = arith.addf %16, %18 : vector<32x128xf32>
    %cst_17 = arith.constant 0.000000e+00 : f32
    %20 = vector.broadcast %cst_17 : f32 to vector<32x128xf32>
    %21 = arith.maximumf %19, %20 : vector<32x128xf32>
    %c0_18 = arith.constant 0 : index
    %c0_19 = arith.constant 0 : index
    %c0_20 = arith.constant 0 : index
    %22 = vector.load %arg11[%c0_18, %c0_19, %c0_20] : memref<13x32x128xf32, #tpu.memory_space<vmem>>, vector<1x32x128xf32>
    %23 = vector.shape_cast %22 : vector<1x32x128xf32> to vector<32x128xf32>
    %24 = vector.shape_cast %21 : vector<32x128xf32> to vector<1x32x128xf32>
    tpu.vector_store %arg11[%c0_18, %c0_19, %c0_20], %24 {strides = array<i32>} : memref<13x32x128xf32, #tpu.memory_space<vmem>>, vector<1x32x128xf32>,
    %c1_21 = arith.constant 1 : index
    %c0_22 = arith.constant 0 : index
    %c0_23 = arith.constant 0 : index
    %25 = vector.load %arg2[%c1_21, %c0_22, %c0_23] : memref<5x32x20xf32, #tpu.memory_space<vmem>>, vector<1x32x20xf32>
    %26 = vector.shape_cast %25 : vector<1x32x20xf32> to vector<32x20xf32>
    %c0_24 = arith.constant 0 : index
    %c0_25 = arith.constant 0 : index
    %c0_26 = arith.constant 0 : index
    %27 = vector.load %arg1[%c0_24, %c0_25, %c0_26] : memref<13x20x128xf32, #tpu.memory_space<vmem>>, vector<1x20x128xf32>
    %28 = vector.shape_cast %27 : vector<1x20x128xf32> to vector<20x128xf32>
    %cst_27 = arith.constant dense<0.000000e+00> : vector<32x128xf32>
    %29 = tpu.matmul %26, %28, %cst_27 {dimension_numbers = #tpu.dot_dimension_numbers<[1], [0], [0], [1], [0, 0, 1, 1], [], []>} : vector<32x20xf32>, vector<20x128xf32>, vector<32x128xf32> -> vector<32x128xf32>
    %c2_28 = arith.constant 2 : index
    %c0_29 = arith.constant 0 : index
    %c0_30 = arith.constant 0 : index
    %30 = vector.load %arg2[%c2_28, %c0_29, %c0_30] : memref<5x32x20xf32, #tpu.memory_space<vmem>>, vector<1x32x20xf32>
    %31 = vector.shape_cast %30 : vector<1x32x20xf32> to vector<32x20xf32>
    %c1_31 = arith.constant 1 : index
    %c0_32 = arith.constant 0 : index
    %c0_33 = arith.constant 0 : index
    %32 = vector.load %arg1[%c1_31, %c0_32, %c0_33] : memref<13x20x128xf32, #tpu.memory_space<vmem>>, vector<1x20x128xf32>
    %33 = vector.shape_cast %32 : vector<1x20x128xf32> to vector<20x128xf32>
    %cst_34 = arith.constant dense<0.000000e+00> : vector<32x128xf32>
    %34 = tpu.matmul %31, %33, %cst_34 {dimension_numbers = #tpu.dot_dimension_numbers<[1], [0], [0], [1], [0, 0, 1, 1], [], []>} : vector<32x20xf32>, vector<20x128xf32>, vector<32x128xf32> -> vector<32x128xf32>
    %35 = arith.addf %29, %34 : vector<32x128xf32>
    %c3_35 = arith.constant 3 : index
    %c0_36 = arith.constant 0 : index
    %c0_37 = arith.constant 0 : index
    %36 = vector.load %arg2[%c3_35, %c0_36, %c0_37] : memref<5x32x20xf32, #tpu.memory_space<vmem>>, vector<1x32x20xf32>
    %37 = vector.shape_cast %36 : vector<1x32x20xf32> to vector<32x20xf32>
    %c2_38 = arith.constant 2 : index
    %c0_39 = arith.constant 0 : index
    %c0_40 = arith.constant 0 : index
    %38 = vector.load %arg1[%c2_38, %c0_39, %c0_40] : memref<13x20x128xf32, #tpu.memory_space<vmem>>, vector<1x20x128xf32>
    %39 = vector.shape_cast %38 : vector<1x20x128xf32> to vector<20x128xf32>
    %cst_41 = arith.constant dense<0.000000e+00> : vector<32x128xf32>
    %40 = tpu.matmul %37, %39, %cst_41 {dimension_numbers = #tpu.dot_dimension_numbers<[1], [0], [0], [1], [0, 0, 1, 1], [], []>} : vector<32x20xf32>, vector<20x128xf32>, vector<32x128xf32> -> vector<32x128xf32>
    %41 = arith.addf %35, %40 : vector<32x128xf32>
    %c4_42 = arith.constant 4 : index
    %c0_43 = arith.constant 0 : index
    %c0_44 = arith.constant 0 : index
    %42 = vector.load %arg2[%c4_42, %c0_43, %c0_44] : memref<5x32x20xf32, #tpu.memory_space<vmem>>, vector<1x32x20xf32>
    %43 = vector.shape_cast %42 : vector<1x32x20xf32> to vector<32x20xf32>
    %c3_45 = arith.constant 3 : index
    %c0_46 = arith.constant 0 : index
    %c0_47 = arith.constant 0 : index
    %44 = vector.load %arg1[%c3_45, %c0_46, %c0_47] : memref<13x20x128xf32, #tpu.memory_space<vmem>>, vector<1x20x128xf32>
    %45 = vector.shape_cast %44 : vector<1x20x128xf32> to vector<20x128xf32>
    %cst_48 = arith.constant dense<0.000000e+00> : vector<32x128xf32>
    %46 = tpu.matmul %43, %45, %cst_48 {dimension_numbers = #tpu.dot_dimension_numbers<[1], [0], [0], [1], [0, 0, 1, 1], [], []>} : vector<32x20xf32>, vector<20x128xf32>, vector<32x128xf32> -> vector<32x128xf32>
    %47 = arith.addf %41, %46 : vector<32x128xf32>
    %c0_49 = arith.constant 0 : index
    %c0_50 = arith.constant 0 : index
    %48 = vector.load %arg3[%c0_49, %c0_50] : memref<32x1xf32, #tpu.memory_space<vmem>>, vector<32x1xf32>
    %49 = vector.broadcast %48 : vector<32x1xf32> to vector<32x128xf32>
    %50 = arith.addf %47, %49 : vector<32x128xf32>
    %cst_51 = arith.constant 0.000000e+00 : f32
    %51 = vector.broadcast %cst_51 : f32 to vector<32x128xf32>
    %52 = arith.maximumf %50, %51 : vector<32x128xf32>
    %c1_52 = arith.constant 1 : index
    %c0_53 = arith.constant 0 : index
    %c0_54 = arith.constant 0 : index
    %53 = vector.load %arg11[%c1_52, %c0_53, %c0_54] : memref<13x32x128xf32, #tpu.memory_space<vmem>>, vector<1x32x128xf32>
    %54 = vector.shape_cast %53 : vector<1x32x128xf32> to vector<32x128xf32>
    %55 = vector.shape_cast %52 : vector<32x128xf32> to vector<1x32x128xf32>
    tpu.vector_store %arg11[%c1_52, %c0_53, %c0_54], %55 {strides = array<i32>} : memref<13x32x128xf32, #tpu.memory_space<vmem>>, vector<1x32x128xf32>,
    %c0_55 = arith.constant 0 : index
    %c0_56 = arith.constant 0 : index
    %c0_57 = arith.constant 0 : index
    %56 = vector.load %arg2[%c0_55, %c0_56, %c0_57] : memref<5x32x20xf32, #tpu.memory_space<vmem>>, vector<1x32x20xf32>
    %57 = vector.shape_cast %56 : vector<1x32x20xf32> to vector<32x20xf32>
    %c0_58 = arith.constant 0 : index
    %c0_59 = arith.constant 0 : index
    %c0_60 = arith.constant 0 : index
    %58 = vector.load %arg1[%c0_58, %c0_59, %c0_60] : memref<13x20x128xf32, #tpu.memory_space<vmem>>, vector<1x20x128xf32>
    %59 = vector.shape_cast %58 : vector<1x20x128xf32> to vector<20x128xf32>
    %cst_61 = arith.constant dense<0.000000e+00> : vector<32x128xf32>
    %60 = tpu.matmul %57, %59, %cst_61 {dimension_numbers = #tpu.dot_dimension_numbers<[1], [0], [0], [1], [0, 0, 1, 1], [], []>} : vector<32x20xf32>, vector<20x128xf32>, vector<32x128xf32> -> vector<32x128xf32>
    %c1_62 = arith.constant 1 : index
    %c0_63 = arith.constant 0 : index
    %c0_64 = arith.constant 0 : index
    %61 = vector.load %arg2[%c1_62, %c0_63, %c0_64] : memref<5x32x20xf32, #tpu.memory_space<vmem>>, vector<1x32x20xf32>
    %62 = vector.shape_cast %61 : vector<1x32x20xf32> to vector<32x20xf32>
    %c1_65 = arith.constant 1 : index
    %c0_66 = arith.constant 0 : index
    %c0_67 = arith.constant 0 : index
    %63 = vector.load %arg1[%c1_65, %c0_66, %c0_67] : memref<13x20x128xf32, #tpu.memory_space<vmem>>, vector<1x20x128xf32>
    %64 = vector.shape_cast %63 : vector<1x20x128xf32> to vector<20x128xf32>
    %cst_68 = arith.constant dense<0.000000e+00> : vector<32x128xf32>
    %65 = tpu.matmul %62, %64, %cst_68 {dimension_numbers = #tpu.dot_dimension_numbers<[1], [0], [0], [1], [0, 0, 1, 1], [], []>} : vector<32x20xf32>, vector<20x128xf32>, vector<32x128xf32> -> vector<32x128xf32>
    %66 = arith.addf %60, %65 : vector<32x128xf32>
    %c2_69 = arith.constant 2 : index
    %c0_70 = arith.constant 0 : index
    %c0_71 = arith.constant 0 : index
    %67 = vector.load %arg2[%c2_69, %c0_70, %c0_71] : memref<5x32x20xf32, #tpu.memory_space<vmem>>, vector<1x32x20xf32>
    %68 = vector.shape_cast %67 : vector<1x32x20xf32> to vector<32x20xf32>
    %c2_72 = arith.constant 2 : index
    %c0_73 = arith.constant 0 : index
    %c0_74 = arith.constant 0 : index
    %69 = vector.load %arg1[%c2_72, %c0_73, %c0_74] : memref<13x20x128xf32, #tpu.memory_space<vmem>>, vector<1x20x128xf32>
    %70 = vector.shape_cast %69 : vector<1x20x128xf32> to vector<20x128xf32>
    %cst_75 = arith.constant dense<0.000000e+00> : vector<32x128xf32>
    %71 = tpu.matmul %68, %70, %cst_75 {dimension_numbers = #tpu.dot_dimension_numbers<[1], [0], [0], [1], [0, 0, 1, 1], [], []>} : vector<32x20xf32>, vector<20x128xf32>, vector<32x128xf32> -> vector<32x128xf32>
    %72 = arith.addf %66, %71 : vector<32x128xf32>
    %c3_76 = arith.constant 3 : index
    %c0_77 = arith.constant 0 : index
    %c0_78 = arith.constant 0 : index
    %73 = vector.load %arg2[%c3_76, %c0_77, %c0_78] : memref<5x32x20xf32, #tpu.memory_space<vmem>>, vector<1x32x20xf32>
    %74 = vector.shape_cast %73 : vector<1x32x20xf32> to vector<32x20xf32>
    %c3_79 = arith.constant 3 : index
    %c0_80 = arith.constant 0 : index
    %c0_81 = arith.constant 0 : index
    %75 = vector.load %arg1[%c3_79, %c0_80, %c0_81] : memref<13x20x128xf32, #tpu.memory_space<vmem>>, vector<1x20x128xf32>
    %76 = vector.shape_cast %75 : vector<1x20x128xf32> to vector<20x128xf32>
    %cst_82 = arith.constant dense<0.000000e+00> : vector<32x128xf32>
    %77 = tpu.matmul %74, %76, %cst_82 {dimension_numbers = #tpu.dot_dimension_numbers<[1], [0], [0], [1], [0, 0, 1, 1], [], []>} : vector<32x20xf32>, vector<20x128xf32>, vector<32x128xf32> -> vector<32x128xf32>
    %78 = arith.addf %72, %77 : vector<32x128xf32>
    %c4_83 = arith.constant 4 : index
    %c0_84 = arith.constant 0 : index
    %c0_85 = arith.constant 0 : index
    %79 = vector.load %arg2[%c4_83, %c0_84, %c0_85] : memref<5x32x20xf32, #tpu.memory_space<vmem>>, vector<1x32x20xf32>
    %80 = vector.shape_cast %79 : vector<1x32x20xf32> to vector<32x20xf32>
    %c4_86 = arith.constant 4 : index
    %c0_87 = arith.constant 0 : index
    %c0_88 = arith.constant 0 : index
    %81 = vector.load %arg1[%c4_86, %c0_87, %c0_88] : memref<13x20x128xf32, #tpu.memory_space<vmem>>, vector<1x20x128xf32>
    %82 = vector.shape_cast %81 : vector<1x20x128xf32> to vector<20x128xf32>
    %cst_89 = arith.constant dense<0.000000e+00> : vector<32x128xf32>
    %83 = tpu.matmul %80, %82, %cst_89 {dimension_numbers = #tpu.dot_dimension_numbers<[1], [0], [0], [1], [0, 0, 1, 1], [], []>} : vector<32x20xf32>, vector<20x128xf32>, vector<32x128xf32> -> vector<32x128xf32>
    %84 = arith.addf %78, %83 : vector<32x128xf32>
    %c0_90 = arith.constant 0 : index
    %c0_91 = arith.constant 0 : index
    %85 = vector.load %arg3[%c0_90, %c0_91] : memref<32x1xf32, #tpu.memory_space<vmem>>, vector<32x1xf32>
    %86 = vector.broadcast %85 : vector<32x1xf32> to vector<32x128xf32>
    %87 = arith.addf %84, %86 : vector<32x128xf32>
    %cst_92 = arith.constant 0.000000e+00 : f32
    %88 = vector.broadcast %cst_92 : f32 to vector<32x128xf32>
    %89 = arith.maximumf %87, %88 : vector<32x128xf32>
    %c2_93 = arith.constant 2 : index
    %c0_94 = arith.constant 0 : index
    %c0_95 = arith.constant 0 : index
    %90 = vector.load %arg11[%c2_93, %c0_94, %c0_95] : memref<13x32x128xf32, #tpu.memory_space<vmem>>, vector<1x32x128xf32>
    %91 = vector.shape_cast %90 : vector<1x32x128xf32> to vector<32x128xf32>
    %92 = vector.shape_cast %89 : vector<32x128xf32> to vector<1x32x128xf32>
    tpu.vector_store %arg11[%c2_93, %c0_94, %c0_95], %92 {strides = array<i32>} : memref<13x32x128xf32, #tpu.memory_space<vmem>>, vector<1x32x128xf32>,
    %c0_96 = arith.constant 0 : index
    %c0_97 = arith.constant 0 : index
    %c0_98 = arith.constant 0 : index
    %93 = vector.load %arg2[%c0_96, %c0_97, %c0_98] : memref<5x32x20xf32, #tpu.memory_space<vmem>>, vector<1x32x20xf32>
    %94 = vector.shape_cast %93 : vector<1x32x20xf32> to vector<32x20xf32>
    %c1_99 = arith.constant 1 : index
    %c0_100 = arith.constant 0 : index
    %c0_101 = arith.constant 0 : index
    %95 = vector.load %arg1[%c1_99, %c0_100, %c0_101] : memref<13x20x128xf32, #tpu.memory_space<vmem>>, vector<1x20x128xf32>
    %96 = vector.shape_cast %95 : vector<1x20x128xf32> to vector<20x128xf32>
    %cst_102 = arith.constant dense<0.000000e+00> : vector<32x128xf32>
    %97 = tpu.matmul %94, %96, %cst_102 {dimension_numbers = #tpu.dot_dimension_numbers<[1], [0], [0], [1], [0, 0, 1, 1], [], []>} : vector<32x20xf32>, vector<20x128xf32>, vector<32x128xf32> -> vector<32x128xf32>
    %c1_103 = arith.constant 1 : index
    %c0_104 = arith.constant 0 : index
    %c0_105 = arith.constant 0 : index
    %98 = vector.load %arg2[%c1_103, %c0_104, %c0_105] : memref<5x32x20xf32, #tpu.memory_space<vmem>>, vector<1x32x20xf32>
    %99 = vector.shape_cast %98 : vector<1x32x20xf32> to vector<32x20xf32>
    %c2_106 = arith.constant 2 : index
    %c0_107 = arith.constant 0 : index
    %c0_108 = arith.constant 0 : index
    %100 = vector.load %arg1[%c2_106, %c0_107, %c0_108] : memref<13x20x128xf32, #tpu.memory_space<vmem>>, vector<1x20x128xf32>
    %101 = vector.shape_cast %100 : vector<1x20x128xf32> to vector<20x128xf32>
    %cst_109 = arith.constant dense<0.000000e+00> : vector<32x128xf32>
    %102 = tpu.matmul %99, %101, %cst_109 {dimension_numbers = #tpu.dot_dimension_numbers<[1], [0], [0], [1], [0, 0, 1, 1], [], []>} : vector<32x20xf32>, vector<20x128xf32>, vector<32x128xf32> -> vector<32x128xf32>
    %103 = arith.addf %97, %102 : vector<32x128xf32>
    %c2_110 = arith.constant 2 : index
    %c0_111 = arith.constant 0 : index
    %c0_112 = arith.constant 0 : index
    %104 = vector.load %arg2[%c2_110, %c0_111, %c0_112] : memref<5x32x20xf32, #tpu.memory_space<vmem>>, vector<1x32x20xf32>
    %105 = vector.shape_cast %104 : vector<1x32x20xf32> to vector<32x20xf32>
    %c3_113 = arith.constant 3 : index
    %c0_114 = arith.constant 0 : index
    %c0_115 = arith.constant 0 : index
    %106 = vector.load %arg1[%c3_113, %c0_114, %c0_115] : memref<13x20x128xf32, #tpu.memory_space<vmem>>, vector<1x20x128xf32>
    %107 = vector.shape_cast %106 : vector<1x20x128xf32> to vector<20x128xf32>
    %cst_116 = arith.constant dense<0.000000e+00> : vector<32x128xf32>
    %108 = tpu.matmul %105, %107, %cst_116 {dimension_numbers = #tpu.dot_dimension_numbers<[1], [0], [0], [1], [0, 0, 1, 1], [], []>} : vector<32x20xf32>, vector<20x128xf32>, vector<32x128xf32> -> vector<32x128xf32>
    %109 = arith.addf %103, %108 : vector<32x128xf32>
    %c3_117 = arith.constant 3 : index
    %c0_118 = arith.constant 0 : index
    %c0_119 = arith.constant 0 : index
    %110 = vector.load %arg2[%c3_117, %c0_118, %c0_119] : memref<5x32x20xf32, #tpu.memory_space<vmem>>, vector<1x32x20xf32>
    %111 = vector.shape_cast %110 : vector<1x32x20xf32> to vector<32x20xf32>
    %c4_120 = arith.constant 4 : index
    %c0_121 = arith.constant 0 : index
    %c0_122 = arith.constant 0 : index
    %112 = vector.load %arg1[%c4_120, %c0_121, %c0_122] : memref<13x20x128xf32, #tpu.memory_space<vmem>>, vector<1x20x128xf32>
    %113 = vector.shape_cast %112 : vector<1x20x128xf32> to vector<20x128xf32>
    %cst_123 = arith.constant dense<0.000000e+00> : vector<32x128xf32>
    %114 = tpu.matmul %111, %113, %cst_123 {dimension_numbers = #tpu.dot_dimension_numbers<[1], [0], [0], [1], [0, 0, 1, 1], [], []>} : vector<32x20xf32>, vector<20x128xf32>, vector<32x128xf32> -> vector<32x128xf32>
    %115 = arith.addf %109, %114 : vector<32x128xf32>
    %c4_124 = arith.constant 4 : index
    %c0_125 = arith.constant 0 : index
    %c0_126 = arith.constant 0 : index
    %116 = vector.load %arg2[%c4_124, %c0_125, %c0_126] : memref<5x32x20xf32, #tpu.memory_space<vmem>>, vector<1x32x20xf32>
    %117 = vector.shape_cast %116 : vector<1x32x20xf32> to vector<32x20xf32>
    %c5 = arith.constant 5 : index
    %c0_127 = arith.constant 0 : index
    %c0_128 = arith.constant 0 : index
    %118 = vector.load %arg1[%c5, %c0_127, %c0_128] : memref<13x20x128xf32, #tpu.memory_space<vmem>>, vector<1x20x128xf32>
    %119 = vector.shape_cast %118 : vector<1x20x128xf32> to vector<20x128xf32>
    %cst_129 = arith.constant dense<0.000000e+00> : vector<32x128xf32>
    %120 = tpu.matmul %117, %119, %cst_129 {dimension_numbers = #tpu.dot_dimension_numbers<[1], [0], [0], [1], [0, 0, 1, 1], [], []>} : vector<32x20xf32>, vector<20x128xf32>, vector<32x128xf32> -> vector<32x128xf32>
    %121 = arith.addf %115, %120 : vector<32x128xf32>
    %c0_130 = arith.constant 0 : index
    %c0_131 = arith.constant 0 : index
    %122 = vector.load %arg3[%c0_130, %c0_131] : memref<32x1xf32, #tpu.memory_space<vmem>>, vector<32x1xf32>
    %123 = vector.broadcast %122 : vector<32x1xf32> to vector<32x128xf32>
    %124 = arith.addf %121, %123 : vector<32x128xf32>
    %cst_132 = arith.constant 0.000000e+00 : f32
    %125 = vector.broadcast %cst_132 : f32 to vector<32x128xf32>
    %126 = arith.maximumf %124, %125 : vector<32x128xf32>
    %c3_133 = arith.constant 3 : index
    %c0_134 = arith.constant 0 : index
    %c0_135 = arith.constant 0 : index
    %127 = vector.load %arg11[%c3_133, %c0_134, %c0_135] : memref<13x32x128xf32, #tpu.memory_space<vmem>>, vector<1x32x128xf32>
    %128 = vector.shape_cast %127 : vector<1x32x128xf32> to vector<32x128xf32>
    %129 = vector.shape_cast %126 : vector<32x128xf32> to vector<1x32x128xf32>
    tpu.vector_store %arg11[%c3_133, %c0_134, %c0_135], %129 {strides = array<i32>} : memref<13x32x128xf32, #tpu.memory_space<vmem>>, vector<1x32x128xf32>,
    %c0_136 = arith.constant 0 : index
    %c0_137 = arith.constant 0 : index
    %c0_138 = arith.constant 0 : index
    %130 = vector.load %arg2[%c0_136, %c0_137, %c0_138] : memref<5x32x20xf32, #tpu.memory_space<vmem>>, vector<1x32x20xf32>
    %131 = vector.shape_cast %130 : vector<1x32x20xf32> to vector<32x20xf32>
    %c2_139 = arith.constant 2 : index
    %c0_140 = arith.constant 0 : index
    %c0_141 = arith.constant 0 : index
    %132 = vector.load %arg1[%c2_139, %c0_140, %c0_141] : memref<13x20x128xf32, #tpu.memory_space<vmem>>, vector<1x20x128xf32>
    %133 = vector.shape_cast %132 : vector<1x20x128xf32> to vector<20x128xf32>
    %cst_142 = arith.constant dense<0.000000e+00> : vector<32x128xf32>
    %134 = tpu.matmul %131, %133, %cst_142 {dimension_numbers = #tpu.dot_dimension_numbers<[1], [0], [0], [1], [0, 0, 1, 1], [], []>} : vector<32x20xf32>, vector<20x128xf32>, vector<32x128xf32> -> vector<32x128xf32>
    %c1_143 = arith.constant 1 : index
    %c0_144 = arith.constant 0 : index
    %c0_145 = arith.constant 0 : index
    %135 = vector.load %arg2[%c1_143, %c0_144, %c0_145] : memref<5x32x20xf32, #tpu.memory_space<vmem>>, vector<1x32x20xf32>
    %136 = vector.shape_cast %135 : vector<1x32x20xf32> to vector<32x20xf32>
    %c3_146 = arith.constant 3 : index
    %c0_147 = arith.constant 0 : index
    %c0_148 = arith.constant 0 : index
    %137 = vector.load %arg1[%c3_146, %c0_147, %c0_148] : memref<13x20x128xf32, #tpu.memory_space<vmem>>, vector<1x20x128xf32>
    %138 = vector.shape_cast %137 : vector<1x20x128xf32> to vector<20x128xf32>
    %cst_149 = arith.constant dense<0.000000e+00> : vector<32x128xf32>
    %139 = tpu.matmul %136, %138, %cst_149 {dimension_numbers = #tpu.dot_dimension_numbers<[1], [0], [0], [1], [0, 0, 1, 1], [], []>} : vector<32x20xf32>, vector<20x128xf32>, vector<32x128xf32> -> vector<32x128xf32>
    %140 = arith.addf %134, %139 : vector<32x128xf32>
    %c2_150 = arith.constant 2 : index
    %c0_151 = arith.constant 0 : index
    %c0_152 = arith.constant 0 : index
    %141 = vector.load %arg2[%c2_150, %c0_151, %c0_152] : memref<5x32x20xf32, #tpu.memory_space<vmem>>, vector<1x32x20xf32>
    %142 = vector.shape_cast %141 : vector<1x32x20xf32> to vector<32x20xf32>
    %c4_153 = arith.constant 4 : index
    %c0_154 = arith.constant 0 : index
    %c0_155 = arith.constant 0 : index
    %143 = vector.load %arg1[%c4_153, %c0_154, %c0_155] : memref<13x20x128xf32, #tpu.memory_space<vmem>>, vector<1x20x128xf32>
    %144 = vector.shape_cast %143 : vector<1x20x128xf32> to vector<20x128xf32>
    %cst_156 = arith.constant dense<0.000000e+00> : vector<32x128xf32>
    %145 = tpu.matmul %142, %144, %cst_156 {dimension_numbers = #tpu.dot_dimension_numbers<[1], [0], [0], [1], [0, 0, 1, 1], [], []>} : vector<32x20xf32>, vector<20x128xf32>, vector<32x128xf32> -> vector<32x128xf32>
    %146 = arith.addf %140, %145 : vector<32x128xf32>
    %c3_157 = arith.constant 3 : index
    %c0_158 = arith.constant 0 : index
    %c0_159 = arith.constant 0 : index
    %147 = vector.load %arg2[%c3_157, %c0_158, %c0_159] : memref<5x32x20xf32, #tpu.memory_space<vmem>>, vector<1x32x20xf32>
    %148 = vector.shape_cast %147 : vector<1x32x20xf32> to vector<32x20xf32>
    %c5_160 = arith.constant 5 : index
    %c0_161 = arith.constant 0 : index
    %c0_162 = arith.constant 0 : index
    %149 = vector.load %arg1[%c5_160, %c0_161, %c0_162] : memref<13x20x128xf32, #tpu.memory_space<vmem>>, vector<1x20x128xf32>
    %150 = vector.shape_cast %149 : vector<1x20x128xf32> to vector<20x128xf32>
    %cst_163 = arith.constant dense<0.000000e+00> : vector<32x128xf32>
    %151 = tpu.matmul %148, %150, %cst_163 {dimension_numbers = #tpu.dot_dimension_numbers<[1], [0], [0], [1], [0, 0, 1, 1], [], []>} : vector<32x20xf32>, vector<20x128xf32>, vector<32x128xf32> -> vector<32x128xf32>
    %152 = arith.addf %146, %151 : vector<32x128xf32>
    %c4_164 = arith.constant 4 : index
    %c0_165 = arith.constant 0 : index
    %c0_166 = arith.constant 0 : index
    %153 = vector.load %arg2[%c4_164, %c0_165, %c0_166] : memref<5x32x20xf32, #tpu.memory_space<vmem>>, vector<1x32x20xf32>
    %154 = vector.shape_cast %153 : vector<1x32x20xf32> to vector<32x20xf32>
    %c6 = arith.constant 6 : index
    %c0_167 = arith.constant 0 : index
    %c0_168 = arith.constant 0 : index
    %155 = vector.load %arg1[%c6, %c0_167, %c0_168] : memref<13x20x128xf32, #tpu.memory_space<vmem>>, vector<1x20x128xf32>
    %156 = vector.shape_cast %155 : vector<1x20x128xf32> to vector<20x128xf32>
    %cst_169 = arith.constant dense<0.000000e+00> : vector<32x128xf32>
    %157 = tpu.matmul %154, %156, %cst_169 {dimension_numbers = #tpu.dot_dimension_numbers<[1], [0], [0], [1], [0, 0, 1, 1], [], []>} : vector<32x20xf32>, vector<20x128xf32>, vector<32x128xf32> -> vector<32x128xf32>
    %158 = arith.addf %152, %157 : vector<32x128xf32>
    %c0_170 = arith.constant 0 : index
    %c0_171 = arith.constant 0 : index
    %159 = vector.load %arg3[%c0_170, %c0_171] : memref<32x1xf32, #tpu.memory_space<vmem>>, vector<32x1xf32>
    %160 = vector.broadcast %159 : vector<32x1xf32> to vector<32x128xf32>
    %161 = arith.addf %158, %160 : vector<32x128xf32>
    %cst_172 = arith.constant 0.000000e+00 : f32
    %162 = vector.broadcast %cst_172 : f32 to vector<32x128xf32>
    %163 = arith.maximumf %161, %162 : vector<32x128xf32>
    %c4_173 = arith.constant 4 : index
    %c0_174 = arith.constant 0 : index
    %c0_175 = arith.constant 0 : index
    %164 = vector.load %arg11[%c4_173, %c0_174, %c0_175] : memref<13x32x128xf32, #tpu.memory_space<vmem>>, vector<1x32x128xf32>
    %165 = vector.shape_cast %164 : vector<1x32x128xf32> to vector<32x128xf32>
    %166 = vector.shape_cast %163 : vector<32x128xf32> to vector<1x32x128xf32>
    tpu.vector_store %arg11[%c4_173, %c0_174, %c0_175], %166 {strides = array<i32>} : memref<13x32x128xf32, #tpu.memory_space<vmem>>, vector<1x32x128xf32>,
    %c0_176 = arith.constant 0 : index
    %c0_177 = arith.constant 0 : index
    %c0_178 = arith.constant 0 : index
    %167 = vector.load %arg2[%c0_176, %c0_177, %c0_178] : memref<5x32x20xf32, #tpu.memory_space<vmem>>, vector<1x32x20xf32>
    %168 = vector.shape_cast %167 : vector<1x32x20xf32> to vector<32x20xf32>
    %c3_179 = arith.constant 3 : index
    %c0_180 = arith.constant 0 : index
    %c0_181 = arith.constant 0 : index
    %169 = vector.load %arg1[%c3_179, %c0_180, %c0_181] : memref<13x20x128xf32, #tpu.memory_space<vmem>>, vector<1x20x128xf32>
    %170 = vector.shape_cast %169 : vector<1x20x128xf32> to vector<20x128xf32>
    %cst_182 = arith.constant dense<0.000000e+00> : vector<32x128xf32>
    %171 = tpu.matmul %168, %170, %cst_182 {dimension_numbers = #tpu.dot_dimension_numbers<[1], [0], [0], [1], [0, 0, 1, 1], [], []>} : vector<32x20xf32>, vector<20x128xf32>, vector<32x128xf32> -> vector<32x128xf32>
    %c1_183 = arith.constant 1 : index
    %c0_184 = arith.constant 0 : index
    %c0_185 = arith.constant 0 : index
    %172 = vector.load %arg2[%c1_183, %c0_184, %c0_185] : memref<5x32x20xf32, #tpu.memory_space<vmem>>, vector<1x32x20xf32>
    %173 = vector.shape_cast %172 : vector<1x32x20xf32> to vector<32x20xf32>
    %c4_186 = arith.constant 4 : index
    %c0_187 = arith.constant 0 : index
    %c0_188 = arith.constant 0 : index
    %174 = vector.load %arg1[%c4_186, %c0_187, %c0_188] : memref<13x20x128xf32, #tpu.memory_space<vmem>>, vector<1x20x128xf32>
    %175 = vector.shape_cast %174 : vector<1x20x128xf32> to vector<20x128xf32>
    %cst_189 = arith.constant dense<0.000000e+00> : vector<32x128xf32>
    %176 = tpu.matmul %173, %175, %cst_189 {dimension_numbers = #tpu.dot_dimension_numbers<[1], [0], [0], [1], [0, 0, 1, 1], [], []>} : vector<32x20xf32>, vector<20x128xf32>, vector<32x128xf32> -> vector<32x128xf32>
    %177 = arith.addf %171, %176 : vector<32x128xf32>
    %c2_190 = arith.constant 2 : index
    %c0_191 = arith.constant 0 : index
    %c0_192 = arith.constant 0 : index
    %178 = vector.load %arg2[%c2_190, %c0_191, %c0_192] : memref<5x32x20xf32, #tpu.memory_space<vmem>>, vector<1x32x20xf32>
    %179 = vector.shape_cast %178 : vector<1x32x20xf32> to vector<32x20xf32>
    %c5_193 = arith.constant 5 : index
    %c0_194 = arith.constant 0 : index
    %c0_195 = arith.constant 0 : index
    %180 = vector.load %arg1[%c5_193, %c0_194, %c0_195] : memref<13x20x128xf32, #tpu.memory_space<vmem>>, vector<1x20x128xf32>
    %181 = vector.shape_cast %180 : vector<1x20x128xf32> to vector<20x128xf32>
    %cst_196 = arith.constant dense<0.000000e+00> : vector<32x128xf32>
    %182 = tpu.matmul %179, %181, %cst_196 {dimension_numbers = #tpu.dot_dimension_numbers<[1], [0], [0], [1], [0, 0, 1, 1], [], []>} : vector<32x20xf32>, vector<20x128xf32>, vector<32x128xf32> -> vector<32x128xf32>
    %183 = arith.addf %177, %182 : vector<32x128xf32>
    %c3_197 = arith.constant 3 : index
    %c0_198 = arith.constant 0 : index
    %c0_199 = arith.constant 0 : index
    %184 = vector.load %arg2[%c3_197, %c0_198, %c0_199] : memref<5x32x20xf32, #tpu.memory_space<vmem>>, vector<1x32x20xf32>
    %185 = vector.shape_cast %184 : vector<1x32x20xf32> to vector<32x20xf32>
    %c6_200 = arith.constant 6 : index
    %c0_201 = arith.constant 0 : index
    %c0_202 = arith.constant 0 : index
    %186 = vector.load %arg1[%c6_200, %c0_201, %c0_202] : memref<13x20x128xf32, #tpu.memory_space<vmem>>, vector<1x20x128xf32>
    %187 = vector.shape_cast %186 : vector<1x20x128xf32> to vector<20x128xf32>
    %cst_203 = arith.constant dense<0.000000e+00> : vector<32x128xf32>
    %188 = tpu.matmul %185, %187, %cst_203 {dimension_numbers = #tpu.dot_dimension_numbers<[1], [0], [0], [1], [0, 0, 1, 1], [], []>} : vector<32x20xf32>, vector<20x128xf32>, vector<32x128xf32> -> vector<32x128xf32>
    %189 = arith.addf %183, %188 : vector<32x128xf32>
    %c4_204 = arith.constant 4 : index
    %c0_205 = arith.constant 0 : index
    %c0_206 = arith.constant 0 : index
    %190 = vector.load %arg2[%c4_204, %c0_205, %c0_206] : memref<5x32x20xf32, #tpu.memory_space<vmem>>, vector<1x32x20xf32>
    %191 = vector.shape_cast %190 : vector<1x32x20xf32> to vector<32x20xf32>
    %c7 = arith.constant 7 : index
    %c0_207 = arith.constant 0 : index
    %c0_208 = arith.constant 0 : index
    %192 = vector.load %arg1[%c7, %c0_207, %c0_208] : memref<13x20x128xf32, #tpu.memory_space<vmem>>, vector<1x20x128xf32>
    %193 = vector.shape_cast %192 : vector<1x20x128xf32> to vector<20x128xf32>
    %cst_209 = arith.constant dense<0.000000e+00> : vector<32x128xf32>
    %194 = tpu.matmul %191, %193, %cst_209 {dimension_numbers = #tpu.dot_dimension_numbers<[1], [0], [0], [1], [0, 0, 1, 1], [], []>} : vector<32x20xf32>, vector<20x128xf32>, vector<32x128xf32> -> vector<32x128xf32>
    %195 = arith.addf %189, %194 : vector<32x128xf32>
    %c0_210 = arith.constant 0 : index
    %c0_211 = arith.constant 0 : index
    %196 = vector.load %arg3[%c0_210, %c0_211] : memref<32x1xf32, #tpu.memory_space<vmem>>, vector<32x1xf32>
    %197 = vector.broadcast %196 : vector<32x1xf32> to vector<32x128xf32>
    %198 = arith.addf %195, %197 : vector<32x128xf32>
    %cst_212 = arith.constant 0.000000e+00 : f32
    %199 = vector.broadcast %cst_212 : f32 to vector<32x128xf32>
    %200 = arith.maximumf %198, %199 : vector<32x128xf32>
    %c5_213 = arith.constant 5 : index
    %c0_214 = arith.constant 0 : index
    %c0_215 = arith.constant 0 : index
    %201 = vector.load %arg11[%c5_213, %c0_214, %c0_215] : memref<13x32x128xf32, #tpu.memory_space<vmem>>, vector<1x32x128xf32>
    %202 = vector.shape_cast %201 : vector<1x32x128xf32> to vector<32x128xf32>
    %203 = vector.shape_cast %200 : vector<32x128xf32> to vector<1x32x128xf32>
    tpu.vector_store %arg11[%c5_213, %c0_214, %c0_215], %203 {strides = array<i32>} : memref<13x32x128xf32, #tpu.memory_space<vmem>>, vector<1x32x128xf32>,
    %c0_216 = arith.constant 0 : index
    %c0_217 = arith.constant 0 : index
    %c0_218 = arith.constant 0 : index
    %204 = vector.load %arg2[%c0_216, %c0_217, %c0_218] : memref<5x32x20xf32, #tpu.memory_space<vmem>>, vector<1x32x20xf32>
    %205 = vector.shape_cast %204 : vector<1x32x20xf32> to vector<32x20xf32>
    %c4_219 = arith.constant 4 : index
    %c0_220 = arith.constant 0 : index
    %c0_221 = arith.constant 0 : index
    %206 = vector.load %arg1[%c4_219, %c0_220, %c0_221] : memref<13x20x128xf32, #tpu.memory_space<vmem>>, vector<1x20x128xf32>
    %207 = vector.shape_cast %206 : vector<1x20x128xf32> to vector<20x128xf32>
    %cst_222 = arith.constant dense<0.000000e+00> : vector<32x128xf32>
    %208 = tpu.matmul %205, %207, %cst_222 {dimension_numbers = #tpu.dot_dimension_numbers<[1], [0], [0], [1], [0, 0, 1, 1], [], []>} : vector<32x20xf32>, vector<20x128xf32>, vector<32x128xf32> -> vector<32x128xf32>
    %c1_223 = arith.constant 1 : index
    %c0_224 = arith.constant 0 : index
    %c0_225 = arith.constant 0 : index
    %209 = vector.load %arg2[%c1_223, %c0_224, %c0_225] : memref<5x32x20xf32, #tpu.memory_space<vmem>>, vector<1x32x20xf32>
    %210 = vector.shape_cast %209 : vector<1x32x20xf32> to vector<32x20xf32>
    %c5_226 = arith.constant 5 : index
    %c0_227 = arith.constant 0 : index
    %c0_228 = arith.constant 0 : index
    %211 = vector.load %arg1[%c5_226, %c0_227, %c0_228] : memref<13x20x128xf32, #tpu.memory_space<vmem>>, vector<1x20x128xf32>
    %212 = vector.shape_cast %211 : vector<1x20x128xf32> to vector<20x128xf32>
    %cst_229 = arith.constant dense<0.000000e+00> : vector<32x128xf32>
    %213 = tpu.matmul %210, %212, %cst_229 {dimension_numbers = #tpu.dot_dimension_numbers<[1], [0], [0], [1], [0, 0, 1, 1], [], []>} : vector<32x20xf32>, vector<20x128xf32>, vector<32x128xf32> -> vector<32x128xf32>
    %214 = arith.addf %208, %213 : vector<32x128xf32>
    %c2_230 = arith.constant 2 : index
    %c0_231 = arith.constant 0 : index
    %c0_232 = arith.constant 0 : index
    %215 = vector.load %arg2[%c2_230, %c0_231, %c0_232] : memref<5x32x20xf32, #tpu.memory_space<vmem>>, vector<1x32x20xf32>
    %216 = vector.shape_cast %215 : vector<1x32x20xf32> to vector<32x20xf32>
    %c6_233 = arith.constant 6 : index
    %c0_234 = arith.constant 0 : index
    %c0_235 = arith.constant 0 : index
    %217 = vector.load %arg1[%c6_233, %c0_234, %c0_235] : memref<13x20x128xf32, #tpu.memory_space<vmem>>, vector<1x20x128xf32>
    %218 = vector.shape_cast %217 : vector<1x20x128xf32> to vector<20x128xf32>
    %cst_236 = arith.constant dense<0.000000e+00> : vector<32x128xf32>
    %219 = tpu.matmul %216, %218, %cst_236 {dimension_numbers = #tpu.dot_dimension_numbers<[1], [0], [0], [1], [0, 0, 1, 1], [], []>} : vector<32x20xf32>, vector<20x128xf32>, vector<32x128xf32> -> vector<32x128xf32>
    %220 = arith.addf %214, %219 : vector<32x128xf32>
    %c3_237 = arith.constant 3 : index
    %c0_238 = arith.constant 0 : index
    %c0_239 = arith.constant 0 : index
    %221 = vector.load %arg2[%c3_237, %c0_238, %c0_239] : memref<5x32x20xf32, #tpu.memory_space<vmem>>, vector<1x32x20xf32>
    %222 = vector.shape_cast %221 : vector<1x32x20xf32> to vector<32x20xf32>
    %c7_240 = arith.constant 7 : index
    %c0_241 = arith.constant 0 : index
    %c0_242 = arith.constant 0 : index
    %223 = vector.load %arg1[%c7_240, %c0_241, %c0_242] : memref<13x20x128xf32, #tpu.memory_space<vmem>>, vector<1x20x128xf32>
    %224 = vector.shape_cast %223 : vector<1x20x128xf32> to vector<20x128xf32>
    %cst_243 = arith.constant dense<0.000000e+00> : vector<32x128xf32>
    %225 = tpu.matmul %222, %224, %cst_243 {dimension_numbers = #tpu.dot_dimension_numbers<[1], [0], [0], [1], [0, 0, 1, 1], [], []>} : vector<32x20xf32>, vector<20x128xf32>, vector<32x128xf32> -> vector<32x128xf32>
    %226 = arith.addf %220, %225 : vector<32x128xf32>
    %c4_244 = arith.constant 4 : index
    %c0_245 = arith.constant 0 : index
    %c0_246 = arith.constant 0 : index
    %227 = vector.load %arg2[%c4_244, %c0_245, %c0_246] : memref<5x32x20xf32, #tpu.memory_space<vmem>>, vector<1x32x20xf32>
    %228 = vector.shape_cast %227 : vector<1x32x20xf32> to vector<32x20xf32>
    %c8 = arith.constant 8 : index
    %c0_247 = arith.constant 0 : index
    %c0_248 = arith.constant 0 : index
    %229 = vector.load %arg1[%c8, %c0_247, %c0_248] : memref<13x20x128xf32, #tpu.memory_space<vmem>>, vector<1x20x128xf32>
    %230 = vector.shape_cast %229 : vector<1x20x128xf32> to vector<20x128xf32>
    %cst_249 = arith.constant dense<0.000000e+00> : vector<32x128xf32>
    %231 = tpu.matmul %228, %230, %cst_249 {dimension_numbers = #tpu.dot_dimension_numbers<[1], [0], [0], [1], [0, 0, 1, 1], [], []>} : vector<32x20xf32>, vector<20x128xf32>, vector<32x128xf32> -> vector<32x128xf32>
    %232 = arith.addf %226, %231 : vector<32x128xf32>
    %c0_250 = arith.constant 0 : index
    %c0_251 = arith.constant 0 : index
    %233 = vector.load %arg3[%c0_250, %c0_251] : memref<32x1xf32, #tpu.memory_space<vmem>>, vector<32x1xf32>
    %234 = vector.broadcast %233 : vector<32x1xf32> to vector<32x128xf32>
    %235 = arith.addf %232, %234 : vector<32x128xf32>
    %cst_252 = arith.constant 0.000000e+00 : f32
    %236 = vector.broadcast %cst_252 : f32 to vector<32x128xf32>
    %237 = arith.maximumf %235, %236 : vector<32x128xf32>
    %c6_253 = arith.constant 6 : index
    %c0_254 = arith.constant 0 : index
    %c0_255 = arith.constant 0 : index
    %238 = vector.load %arg11[%c6_253, %c0_254, %c0_255] : memref<13x32x128xf32, #tpu.memory_space<vmem>>, vector<1x32x128xf32>
    %239 = vector.shape_cast %238 : vector<1x32x128xf32> to vector<32x128xf32>
    %240 = vector.shape_cast %237 : vector<32x128xf32> to vector<1x32x128xf32>
    tpu.vector_store %arg11[%c6_253, %c0_254, %c0_255], %240 {strides = array<i32>} : memref<13x32x128xf32, #tpu.memory_space<vmem>>, vector<1x32x128xf32>,
    %c0_256 = arith.constant 0 : index
    %c0_257 = arith.constant 0 : index
    %c0_258 = arith.constant 0 : index
    %241 = vector.load %arg2[%c0_256, %c0_257, %c0_258] : memref<5x32x20xf32, #tpu.memory_space<vmem>>, vector<1x32x20xf32>
    %242 = vector.shape_cast %241 : vector<1x32x20xf32> to vector<32x20xf32>
    %c5_259 = arith.constant 5 : index
    %c0_260 = arith.constant 0 : index
    %c0_261 = arith.constant 0 : index
    %243 = vector.load %arg1[%c5_259, %c0_260, %c0_261] : memref<13x20x128xf32, #tpu.memory_space<vmem>>, vector<1x20x128xf32>
    %244 = vector.shape_cast %243 : vector<1x20x128xf32> to vector<20x128xf32>
    %cst_262 = arith.constant dense<0.000000e+00> : vector<32x128xf32>
    %245 = tpu.matmul %242, %244, %cst_262 {dimension_numbers = #tpu.dot_dimension_numbers<[1], [0], [0], [1], [0, 0, 1, 1], [], []>} : vector<32x20xf32>, vector<20x128xf32>, vector<32x128xf32> -> vector<32x128xf32>
    %c1_263 = arith.constant 1 : index
    %c0_264 = arith.constant 0 : index
    %c0_265 = arith.constant 0 : index
    %246 = vector.load %arg2[%c1_263, %c0_264, %c0_265] : memref<5x32x20xf32, #tpu.memory_space<vmem>>, vector<1x32x20xf32>
    %247 = vector.shape_cast %246 : vector<1x32x20xf32> to vector<32x20xf32>
    %c6_266 = arith.constant 6 : index
    %c0_267 = arith.constant 0 : index
    %c0_268 = arith.constant 0 : index
    %248 = vector.load %arg1[%c6_266, %c0_267, %c0_268] : memref<13x20x128xf32, #tpu.memory_space<vmem>>, vector<1x20x128xf32>
    %249 = vector.shape_cast %248 : vector<1x20x128xf32> to vector<20x128xf32>
    %cst_269 = arith.constant dense<0.000000e+00> : vector<32x128xf32>
    %250 = tpu.matmul %247, %249, %cst_269 {dimension_numbers = #tpu.dot_dimension_numbers<[1], [0], [0], [1], [0, 0, 1, 1], [], []>} : vector<32x20xf32>, vector<20x128xf32>, vector<32x128xf32> -> vector<32x128xf32>
    %251 = arith.addf %245, %250 : vector<32x128xf32>
    %c2_270 = arith.constant 2 : index
    %c0_271 = arith.constant 0 : index
    %c0_272 = arith.constant 0 : index
    %252 = vector.load %arg2[%c2_270, %c0_271, %c0_272] : memref<5x32x20xf32, #tpu.memory_space<vmem>>, vector<1x32x20xf32>
    %253 = vector.shape_cast %252 : vector<1x32x20xf32> to vector<32x20xf32>
    %c7_273 = arith.constant 7 : index
    %c0_274 = arith.constant 0 : index
    %c0_275 = arith.constant 0 : index
    %254 = vector.load %arg1[%c7_273, %c0_274, %c0_275] : memref<13x20x128xf32, #tpu.memory_space<vmem>>, vector<1x20x128xf32>
    %255 = vector.shape_cast %254 : vector<1x20x128xf32> to vector<20x128xf32>
    %cst_276 = arith.constant dense<0.000000e+00> : vector<32x128xf32>
    %256 = tpu.matmul %253, %255, %cst_276 {dimension_numbers = #tpu.dot_dimension_numbers<[1], [0], [0], [1], [0, 0, 1, 1], [], []>} : vector<32x20xf32>, vector<20x128xf32>, vector<32x128xf32> -> vector<32x128xf32>
    %257 = arith.addf %251, %256 : vector<32x128xf32>
    %c3_277 = arith.constant 3 : index
    %c0_278 = arith.constant 0 : index
    %c0_279 = arith.constant 0 : index
    %258 = vector.load %arg2[%c3_277, %c0_278, %c0_279] : memref<5x32x20xf32, #tpu.memory_space<vmem>>, vector<1x32x20xf32>
    %259 = vector.shape_cast %258 : vector<1x32x20xf32> to vector<32x20xf32>
    %c8_280 = arith.constant 8 : index
    %c0_281 = arith.constant 0 : index
    %c0_282 = arith.constant 0 : index
    %260 = vector.load %arg1[%c8_280, %c0_281, %c0_282] : memref<13x20x128xf32, #tpu.memory_space<vmem>>, vector<1x20x128xf32>
    %261 = vector.shape_cast %260 : vector<1x20x128xf32> to vector<20x128xf32>
    %cst_283 = arith.constant dense<0.000000e+00> : vector<32x128xf32>
    %262 = tpu.matmul %259, %261, %cst_283 {dimension_numbers = #tpu.dot_dimension_numbers<[1], [0], [0], [1], [0, 0, 1, 1], [], []>} : vector<32x20xf32>, vector<20x128xf32>, vector<32x128xf32> -> vector<32x128xf32>
    %263 = arith.addf %257, %262 : vector<32x128xf32>
    %c4_284 = arith.constant 4 : index
    %c0_285 = arith.constant 0 : index
    %c0_286 = arith.constant 0 : index
    %264 = vector.load %arg2[%c4_284, %c0_285, %c0_286] : memref<5x32x20xf32, #tpu.memory_space<vmem>>, vector<1x32x20xf32>
    %265 = vector.shape_cast %264 : vector<1x32x20xf32> to vector<32x20xf32>
    %c9 = arith.constant 9 : index
    %c0_287 = arith.constant 0 : index
    %c0_288 = arith.constant 0 : index
    %266 = vector.load %arg1[%c9, %c0_287, %c0_288] : memref<13x20x128xf32, #tpu.memory_space<vmem>>, vector<1x20x128xf32>
    %267 = vector.shape_cast %266 : vector<1x20x128xf32> to vector<20x128xf32>
    %cst_289 = arith.constant dense<0.000000e+00> : vector<32x128xf32>
    %268 = tpu.matmul %265, %267, %cst_289 {dimension_numbers = #tpu.dot_dimension_numbers<[1], [0], [0], [1], [0, 0, 1, 1], [], []>} : vector<32x20xf32>, vector<20x128xf32>, vector<32x128xf32> -> vector<32x128xf32>
    %269 = arith.addf %263, %268 : vector<32x128xf32>
    %c0_290 = arith.constant 0 : index
    %c0_291 = arith.constant 0 : index
    %270 = vector.load %arg3[%c0_290, %c0_291] : memref<32x1xf32, #tpu.memory_space<vmem>>, vector<32x1xf32>
    %271 = vector.broadcast %270 : vector<32x1xf32> to vector<32x128xf32>
    %272 = arith.addf %269, %271 : vector<32x128xf32>
    %cst_292 = arith.constant 0.000000e+00 : f32
    %273 = vector.broadcast %cst_292 : f32 to vector<32x128xf32>
    %274 = arith.maximumf %272, %273 : vector<32x128xf32>
    %c7_293 = arith.constant 7 : index
    %c0_294 = arith.constant 0 : index
    %c0_295 = arith.constant 0 : index
    %275 = vector.load %arg11[%c7_293, %c0_294, %c0_295] : memref<13x32x128xf32, #tpu.memory_space<vmem>>, vector<1x32x128xf32>
    %276 = vector.shape_cast %275 : vector<1x32x128xf32> to vector<32x128xf32>
    %277 = vector.shape_cast %274 : vector<32x128xf32> to vector<1x32x128xf32>
    tpu.vector_store %arg11[%c7_293, %c0_294, %c0_295], %277 {strides = array<i32>} : memref<13x32x128xf32, #tpu.memory_space<vmem>>, vector<1x32x128xf32>,
    %c0_296 = arith.constant 0 : index
    %c0_297 = arith.constant 0 : index
    %c0_298 = arith.constant 0 : index
    %278 = vector.load %arg2[%c0_296, %c0_297, %c0_298] : memref<5x32x20xf32, #tpu.memory_space<vmem>>, vector<1x32x20xf32>
    %279 = vector.shape_cast %278 : vector<1x32x20xf32> to vector<32x20xf32>
    %c6_299 = arith.constant 6 : index
    %c0_300 = arith.constant 0 : index
    %c0_301 = arith.constant 0 : index
    %280 = vector.load %arg1[%c6_299, %c0_300, %c0_301] : memref<13x20x128xf32, #tpu.memory_space<vmem>>, vector<1x20x128xf32>
    %281 = vector.shape_cast %280 : vector<1x20x128xf32> to vector<20x128xf32>
    %cst_302 = arith.constant dense<0.000000e+00> : vector<32x128xf32>
    %282 = tpu.matmul %279, %281, %cst_302 {dimension_numbers = #tpu.dot_dimension_numbers<[1], [0], [0], [1], [0, 0, 1, 1], [], []>} : vector<32x20xf32>, vector<20x128xf32>, vector<32x128xf32> -> vector<32x128xf32>
    %c1_303 = arith.constant 1 : index
    %c0_304 = arith.constant 0 : index
    %c0_305 = arith.constant 0 : index
    %283 = vector.load %arg2[%c1_303, %c0_304, %c0_305] : memref<5x32x20xf32, #tpu.memory_space<vmem>>, vector<1x32x20xf32>
    %284 = vector.shape_cast %283 : vector<1x32x20xf32> to vector<32x20xf32>
    %c7_306 = arith.constant 7 : index
    %c0_307 = arith.constant 0 : index
    %c0_308 = arith.constant 0 : index
    %285 = vector.load %arg1[%c7_306, %c0_307, %c0_308] : memref<13x20x128xf32, #tpu.memory_space<vmem>>, vector<1x20x128xf32>
    %286 = vector.shape_cast %285 : vector<1x20x128xf32> to vector<20x128xf32>
    %cst_309 = arith.constant dense<0.000000e+00> : vector<32x128xf32>
    %287 = tpu.matmul %284, %286, %cst_309 {dimension_numbers = #tpu.dot_dimension_numbers<[1], [0], [0], [1], [0, 0, 1, 1], [], []>} : vector<32x20xf32>, vector<20x128xf32>, vector<32x128xf32> -> vector<32x128xf32>
    %288 = arith.addf %282, %287 : vector<32x128xf32>
    %c2_310 = arith.constant 2 : index
    %c0_311 = arith.constant 0 : index
    %c0_312 = arith.constant 0 : index
    %289 = vector.load %arg2[%c2_310, %c0_311, %c0_312] : memref<5x32x20xf32, #tpu.memory_space<vmem>>, vector<1x32x20xf32>
    %290 = vector.shape_cast %289 : vector<1x32x20xf32> to vector<32x20xf32>
    %c8_313 = arith.constant 8 : index
    %c0_314 = arith.constant 0 : index
    %c0_315 = arith.constant 0 : index
    %291 = vector.load %arg1[%c8_313, %c0_314, %c0_315] : memref<13x20x128xf32, #tpu.memory_space<vmem>>, vector<1x20x128xf32>
    %292 = vector.shape_cast %291 : vector<1x20x128xf32> to vector<20x128xf32>
    %cst_316 = arith.constant dense<0.000000e+00> : vector<32x128xf32>
    %293 = tpu.matmul %290, %292, %cst_316 {dimension_numbers = #tpu.dot_dimension_numbers<[1], [0], [0], [1], [0, 0, 1, 1], [], []>} : vector<32x20xf32>, vector<20x128xf32>, vector<32x128xf32> -> vector<32x128xf32>
    %294 = arith.addf %288, %293 : vector<32x128xf32>
    %c3_317 = arith.constant 3 : index
    %c0_318 = arith.constant 0 : index
    %c0_319 = arith.constant 0 : index
    %295 = vector.load %arg2[%c3_317, %c0_318, %c0_319] : memref<5x32x20xf32, #tpu.memory_space<vmem>>, vector<1x32x20xf32>
    %296 = vector.shape_cast %295 : vector<1x32x20xf32> to vector<32x20xf32>
    %c9_320 = arith.constant 9 : index
    %c0_321 = arith.constant 0 : index
    %c0_322 = arith.constant 0 : index
    %297 = vector.load %arg1[%c9_320, %c0_321, %c0_322] : memref<13x20x128xf32, #tpu.memory_space<vmem>>, vector<1x20x128xf32>
    %298 = vector.shape_cast %297 : vector<1x20x128xf32> to vector<20x128xf32>
    %cst_323 = arith.constant dense<0.000000e+00> : vector<32x128xf32>
    %299 = tpu.matmul %296, %298, %cst_323 {dimension_numbers = #tpu.dot_dimension_numbers<[1], [0], [0], [1], [0, 0, 1, 1], [], []>} : vector<32x20xf32>, vector<20x128xf32>, vector<32x128xf32> -> vector<32x128xf32>
    %300 = arith.addf %294, %299 : vector<32x128xf32>
    %c4_324 = arith.constant 4 : index
    %c0_325 = arith.constant 0 : index
    %c0_326 = arith.constant 0 : index
    %301 = vector.load %arg2[%c4_324, %c0_325, %c0_326] : memref<5x32x20xf32, #tpu.memory_space<vmem>>, vector<1x32x20xf32>
    %302 = vector.shape_cast %301 : vector<1x32x20xf32> to vector<32x20xf32>
    %c10 = arith.constant 10 : index
    %c0_327 = arith.constant 0 : index
    %c0_328 = arith.constant 0 : index
    %303 = vector.load %arg1[%c10, %c0_327, %c0_328] : memref<13x20x128xf32, #tpu.memory_space<vmem>>, vector<1x20x128xf32>
    %304 = vector.shape_cast %303 : vector<1x20x128xf32> to vector<20x128xf32>
    %cst_329 = arith.constant dense<0.000000e+00> : vector<32x128xf32>
    %305 = tpu.matmul %302, %304, %cst_329 {dimension_numbers = #tpu.dot_dimension_numbers<[1], [0], [0], [1], [0, 0, 1, 1], [], []>} : vector<32x20xf32>, vector<20x128xf32>, vector<32x128xf32> -> vector<32x128xf32>
    %306 = arith.addf %300, %305 : vector<32x128xf32>
    %c0_330 = arith.constant 0 : index
    %c0_331 = arith.constant 0 : index
    %307 = vector.load %arg3[%c0_330, %c0_331] : memref<32x1xf32, #tpu.memory_space<vmem>>, vector<32x1xf32>
    %308 = vector.broadcast %307 : vector<32x1xf32> to vector<32x128xf32>
    %309 = arith.addf %306, %308 : vector<32x128xf32>
    %cst_332 = arith.constant 0.000000e+00 : f32
    %310 = vector.broadcast %cst_332 : f32 to vector<32x128xf32>
    %311 = arith.maximumf %309, %310 : vector<32x128xf32>
    %c8_333 = arith.constant 8 : index
    %c0_334 = arith.constant 0 : index
    %c0_335 = arith.constant 0 : index
    %312 = vector.load %arg11[%c8_333, %c0_334, %c0_335] : memref<13x32x128xf32, #tpu.memory_space<vmem>>, vector<1x32x128xf32>
    %313 = vector.shape_cast %312 : vector<1x32x128xf32> to vector<32x128xf32>
    %314 = vector.shape_cast %311 : vector<32x128xf32> to vector<1x32x128xf32>
    tpu.vector_store %arg11[%c8_333, %c0_334, %c0_335], %314 {strides = array<i32>} : memref<13x32x128xf32, #tpu.memory_space<vmem>>, vector<1x32x128xf32>,
    %c0_336 = arith.constant 0 : index
    %c0_337 = arith.constant 0 : index
    %c0_338 = arith.constant 0 : index
    %315 = vector.load %arg2[%c0_336, %c0_337, %c0_338] : memref<5x32x20xf32, #tpu.memory_space<vmem>>, vector<1x32x20xf32>
    %316 = vector.shape_cast %315 : vector<1x32x20xf32> to vector<32x20xf32>
    %c7_339 = arith.constant 7 : index
    %c0_340 = arith.constant 0 : index
    %c0_341 = arith.constant 0 : index
    %317 = vector.load %arg1[%c7_339, %c0_340, %c0_341] : memref<13x20x128xf32, #tpu.memory_space<vmem>>, vector<1x20x128xf32>
    %318 = vector.shape_cast %317 : vector<1x20x128xf32> to vector<20x128xf32>
    %cst_342 = arith.constant dense<0.000000e+00> : vector<32x128xf32>
    %319 = tpu.matmul %316, %318, %cst_342 {dimension_numbers = #tpu.dot_dimension_numbers<[1], [0], [0], [1], [0, 0, 1, 1], [], []>} : vector<32x20xf32>, vector<20x128xf32>, vector<32x128xf32> -> vector<32x128xf32>
    %c1_343 = arith.constant 1 : index
    %c0_344 = arith.constant 0 : index
    %c0_345 = arith.constant 0 : index
    %320 = vector.load %arg2[%c1_343, %c0_344, %c0_345] : memref<5x32x20xf32, #tpu.memory_space<vmem>>, vector<1x32x20xf32>
    %321 = vector.shape_cast %320 : vector<1x32x20xf32> to vector<32x20xf32>
    %c8_346 = arith.constant 8 : index
    %c0_347 = arith.constant 0 : index
    %c0_348 = arith.constant 0 : index
    %322 = vector.load %arg1[%c8_346, %c0_347, %c0_348] : memref<13x20x128xf32, #tpu.memory_space<vmem>>, vector<1x20x128xf32>
    %323 = vector.shape_cast %322 : vector<1x20x128xf32> to vector<20x128xf32>
    %cst_349 = arith.constant dense<0.000000e+00> : vector<32x128xf32>
    %324 = tpu.matmul %321, %323, %cst_349 {dimension_numbers = #tpu.dot_dimension_numbers<[1], [0], [0], [1], [0, 0, 1, 1], [], []>} : vector<32x20xf32>, vector<20x128xf32>, vector<32x128xf32> -> vector<32x128xf32>
    %325 = arith.addf %319, %324 : vector<32x128xf32>
    %c2_350 = arith.constant 2 : index
    %c0_351 = arith.constant 0 : index
    %c0_352 = arith.constant 0 : index
    %326 = vector.load %arg2[%c2_350, %c0_351, %c0_352] : memref<5x32x20xf32, #tpu.memory_space<vmem>>, vector<1x32x20xf32>
    %327 = vector.shape_cast %326 : vector<1x32x20xf32> to vector<32x20xf32>
    %c9_353 = arith.constant 9 : index
    %c0_354 = arith.constant 0 : index
    %c0_355 = arith.constant 0 : index
    %328 = vector.load %arg1[%c9_353, %c0_354, %c0_355] : memref<13x20x128xf32, #tpu.memory_space<vmem>>, vector<1x20x128xf32>
    %329 = vector.shape_cast %328 : vector<1x20x128xf32> to vector<20x128xf32>
    %cst_356 = arith.constant dense<0.000000e+00> : vector<32x128xf32>
    %330 = tpu.matmul %327, %329, %cst_356 {dimension_numbers = #tpu.dot_dimension_numbers<[1], [0], [0], [1], [0, 0, 1, 1], [], []>} : vector<32x20xf32>, vector<20x128xf32>, vector<32x128xf32> -> vector<32x128xf32>
    %331 = arith.addf %325, %330 : vector<32x128xf32>
    %c3_357 = arith.constant 3 : index
    %c0_358 = arith.constant 0 : index
    %c0_359 = arith.constant 0 : index
    %332 = vector.load %arg2[%c3_357, %c0_358, %c0_359] : memref<5x32x20xf32, #tpu.memory_space<vmem>>, vector<1x32x20xf32>
    %333 = vector.shape_cast %332 : vector<1x32x20xf32> to vector<32x20xf32>
    %c10_360 = arith.constant 10 : index
    %c0_361 = arith.constant 0 : index
    %c0_362 = arith.constant 0 : index
    %334 = vector.load %arg1[%c10_360, %c0_361, %c0_362] : memref<13x20x128xf32, #tpu.memory_space<vmem>>, vector<1x20x128xf32>
    %335 = vector.shape_cast %334 : vector<1x20x128xf32> to vector<20x128xf32>
    %cst_363 = arith.constant dense<0.000000e+00> : vector<32x128xf32>
    %336 = tpu.matmul %333, %335, %cst_363 {dimension_numbers = #tpu.dot_dimension_numbers<[1], [0], [0], [1], [0, 0, 1, 1], [], []>} : vector<32x20xf32>, vector<20x128xf32>, vector<32x128xf32> -> vector<32x128xf32>
    %337 = arith.addf %331, %336 : vector<32x128xf32>
    %c4_364 = arith.constant 4 : index
    %c0_365 = arith.constant 0 : index
    %c0_366 = arith.constant 0 : index
    %338 = vector.load %arg2[%c4_364, %c0_365, %c0_366] : memref<5x32x20xf32, #tpu.memory_space<vmem>>, vector<1x32x20xf32>
    %339 = vector.shape_cast %338 : vector<1x32x20xf32> to vector<32x20xf32>
    %c11 = arith.constant 11 : index
    %c0_367 = arith.constant 0 : index
    %c0_368 = arith.constant 0 : index
    %340 = vector.load %arg1[%c11, %c0_367, %c0_368] : memref<13x20x128xf32, #tpu.memory_space<vmem>>, vector<1x20x128xf32>
    %341 = vector.shape_cast %340 : vector<1x20x128xf32> to vector<20x128xf32>
    %cst_369 = arith.constant dense<0.000000e+00> : vector<32x128xf32>
    %342 = tpu.matmul %339, %341, %cst_369 {dimension_numbers = #tpu.dot_dimension_numbers<[1], [0], [0], [1], [0, 0, 1, 1], [], []>} : vector<32x20xf32>, vector<20x128xf32>, vector<32x128xf32> -> vector<32x128xf32>
    %343 = arith.addf %337, %342 : vector<32x128xf32>
    %c0_370 = arith.constant 0 : index
    %c0_371 = arith.constant 0 : index
    %344 = vector.load %arg3[%c0_370, %c0_371] : memref<32x1xf32, #tpu.memory_space<vmem>>, vector<32x1xf32>
    %345 = vector.broadcast %344 : vector<32x1xf32> to vector<32x128xf32>
    %346 = arith.addf %343, %345 : vector<32x128xf32>
    %cst_372 = arith.constant 0.000000e+00 : f32
    %347 = vector.broadcast %cst_372 : f32 to vector<32x128xf32>
    %348 = arith.maximumf %346, %347 : vector<32x128xf32>
    %c9_373 = arith.constant 9 : index
    %c0_374 = arith.constant 0 : index
    %c0_375 = arith.constant 0 : index
    %349 = vector.load %arg11[%c9_373, %c0_374, %c0_375] : memref<13x32x128xf32, #tpu.memory_space<vmem>>, vector<1x32x128xf32>
    %350 = vector.shape_cast %349 : vector<1x32x128xf32> to vector<32x128xf32>
    %351 = vector.shape_cast %348 : vector<32x128xf32> to vector<1x32x128xf32>
    tpu.vector_store %arg11[%c9_373, %c0_374, %c0_375], %351 {strides = array<i32>} : memref<13x32x128xf32, #tpu.memory_space<vmem>>, vector<1x32x128xf32>,
    %c0_376 = arith.constant 0 : index
    %c0_377 = arith.constant 0 : index
    %c0_378 = arith.constant 0 : index
    %352 = vector.load %arg2[%c0_376, %c0_377, %c0_378] : memref<5x32x20xf32, #tpu.memory_space<vmem>>, vector<1x32x20xf32>
    %353 = vector.shape_cast %352 : vector<1x32x20xf32> to vector<32x20xf32>
    %c8_379 = arith.constant 8 : index
    %c0_380 = arith.constant 0 : index
    %c0_381 = arith.constant 0 : index
    %354 = vector.load %arg1[%c8_379, %c0_380, %c0_381] : memref<13x20x128xf32, #tpu.memory_space<vmem>>, vector<1x20x128xf32>
    %355 = vector.shape_cast %354 : vector<1x20x128xf32> to vector<20x128xf32>
    %cst_382 = arith.constant dense<0.000000e+00> : vector<32x128xf32>
    %356 = tpu.matmul %353, %355, %cst_382 {dimension_numbers = #tpu.dot_dimension_numbers<[1], [0], [0], [1], [0, 0, 1, 1], [], []>} : vector<32x20xf32>, vector<20x128xf32>, vector<32x128xf32> -> vector<32x128xf32>
    %c1_383 = arith.constant 1 : index
    %c0_384 = arith.constant 0 : index
    %c0_385 = arith.constant 0 : index
    %357 = vector.load %arg2[%c1_383, %c0_384, %c0_385] : memref<5x32x20xf32, #tpu.memory_space<vmem>>, vector<1x32x20xf32>
    %358 = vector.shape_cast %357 : vector<1x32x20xf32> to vector<32x20xf32>
    %c9_386 = arith.constant 9 : index
    %c0_387 = arith.constant 0 : index
    %c0_388 = arith.constant 0 : index
    %359 = vector.load %arg1[%c9_386, %c0_387, %c0_388] : memref<13x20x128xf32, #tpu.memory_space<vmem>>, vector<1x20x128xf32>
    %360 = vector.shape_cast %359 : vector<1x20x128xf32> to vector<20x128xf32>
    %cst_389 = arith.constant dense<0.000000e+00> : vector<32x128xf32>
    %361 = tpu.matmul %358, %360, %cst_389 {dimension_numbers = #tpu.dot_dimension_numbers<[1], [0], [0], [1], [0, 0, 1, 1], [], []>} : vector<32x20xf32>, vector<20x128xf32>, vector<32x128xf32> -> vector<32x128xf32>
    %362 = arith.addf %356, %361 : vector<32x128xf32>
    %c2_390 = arith.constant 2 : index
    %c0_391 = arith.constant 0 : index
    %c0_392 = arith.constant 0 : index
    %363 = vector.load %arg2[%c2_390, %c0_391, %c0_392] : memref<5x32x20xf32, #tpu.memory_space<vmem>>, vector<1x32x20xf32>
    %364 = vector.shape_cast %363 : vector<1x32x20xf32> to vector<32x20xf32>
    %c10_393 = arith.constant 10 : index
    %c0_394 = arith.constant 0 : index
    %c0_395 = arith.constant 0 : index
    %365 = vector.load %arg1[%c10_393, %c0_394, %c0_395] : memref<13x20x128xf32, #tpu.memory_space<vmem>>, vector<1x20x128xf32>
    %366 = vector.shape_cast %365 : vector<1x20x128xf32> to vector<20x128xf32>
    %cst_396 = arith.constant dense<0.000000e+00> : vector<32x128xf32>
    %367 = tpu.matmul %364, %366, %cst_396 {dimension_numbers = #tpu.dot_dimension_numbers<[1], [0], [0], [1], [0, 0, 1, 1], [], []>} : vector<32x20xf32>, vector<20x128xf32>, vector<32x128xf32> -> vector<32x128xf32>
    %368 = arith.addf %362, %367 : vector<32x128xf32>
    %c3_397 = arith.constant 3 : index
    %c0_398 = arith.constant 0 : index
    %c0_399 = arith.constant 0 : index
    %369 = vector.load %arg2[%c3_397, %c0_398, %c0_399] : memref<5x32x20xf32, #tpu.memory_space<vmem>>, vector<1x32x20xf32>
    %370 = vector.shape_cast %369 : vector<1x32x20xf32> to vector<32x20xf32>
    %c11_400 = arith.constant 11 : index
    %c0_401 = arith.constant 0 : index
    %c0_402 = arith.constant 0 : index
    %371 = vector.load %arg1[%c11_400, %c0_401, %c0_402] : memref<13x20x128xf32, #tpu.memory_space<vmem>>, vector<1x20x128xf32>
    %372 = vector.shape_cast %371 : vector<1x20x128xf32> to vector<20x128xf32>
    %cst_403 = arith.constant dense<0.000000e+00> : vector<32x128xf32>
    %373 = tpu.matmul %370, %372, %cst_403 {dimension_numbers = #tpu.dot_dimension_numbers<[1], [0], [0], [1], [0, 0, 1, 1], [], []>} : vector<32x20xf32>, vector<20x128xf32>, vector<32x128xf32> -> vector<32x128xf32>
    %374 = arith.addf %368, %373 : vector<32x128xf32>
    %c4_404 = arith.constant 4 : index
    %c0_405 = arith.constant 0 : index
    %c0_406 = arith.constant 0 : index
    %375 = vector.load %arg2[%c4_404, %c0_405, %c0_406] : memref<5x32x20xf32, #tpu.memory_space<vmem>>, vector<1x32x20xf32>
    %376 = vector.shape_cast %375 : vector<1x32x20xf32> to vector<32x20xf32>
    %c12 = arith.constant 12 : index
    %c0_407 = arith.constant 0 : index
    %c0_408 = arith.constant 0 : index
    %377 = vector.load %arg1[%c12, %c0_407, %c0_408] : memref<13x20x128xf32, #tpu.memory_space<vmem>>, vector<1x20x128xf32>
    %378 = vector.shape_cast %377 : vector<1x20x128xf32> to vector<20x128xf32>
    %cst_409 = arith.constant dense<0.000000e+00> : vector<32x128xf32>
    %379 = tpu.matmul %376, %378, %cst_409 {dimension_numbers = #tpu.dot_dimension_numbers<[1], [0], [0], [1], [0, 0, 1, 1], [], []>} : vector<32x20xf32>, vector<20x128xf32>, vector<32x128xf32> -> vector<32x128xf32>
    %380 = arith.addf %374, %379 : vector<32x128xf32>
    %c0_410 = arith.constant 0 : index
    %c0_411 = arith.constant 0 : index
    %381 = vector.load %arg3[%c0_410, %c0_411] : memref<32x1xf32, #tpu.memory_space<vmem>>, vector<32x1xf32>
    %382 = vector.broadcast %381 : vector<32x1xf32> to vector<32x128xf32>
    %383 = arith.addf %380, %382 : vector<32x128xf32>
    %cst_412 = arith.constant 0.000000e+00 : f32
    %384 = vector.broadcast %cst_412 : f32 to vector<32x128xf32>
    %385 = arith.maximumf %383, %384 : vector<32x128xf32>
    %c10_413 = arith.constant 10 : index
    %c0_414 = arith.constant 0 : index
    %c0_415 = arith.constant 0 : index
    %386 = vector.load %arg11[%c10_413, %c0_414, %c0_415] : memref<13x32x128xf32, #tpu.memory_space<vmem>>, vector<1x32x128xf32>
    %387 = vector.shape_cast %386 : vector<1x32x128xf32> to vector<32x128xf32>
    %388 = vector.shape_cast %385 : vector<32x128xf32> to vector<1x32x128xf32>
    tpu.vector_store %arg11[%c10_413, %c0_414, %c0_415], %388 {strides = array<i32>} : memref<13x32x128xf32, #tpu.memory_space<vmem>>, vector<1x32x128xf32>,
    %c0_416 = arith.constant 0 : index
    %c0_417 = arith.constant 0 : index
    %c0_418 = arith.constant 0 : index
    %389 = vector.load %arg2[%c0_416, %c0_417, %c0_418] : memref<5x32x20xf32, #tpu.memory_space<vmem>>, vector<1x32x20xf32>
    %390 = vector.shape_cast %389 : vector<1x32x20xf32> to vector<32x20xf32>
    %c9_419 = arith.constant 9 : index
    %c0_420 = arith.constant 0 : index
    %c0_421 = arith.constant 0 : index
    %391 = vector.load %arg1[%c9_419, %c0_420, %c0_421] : memref<13x20x128xf32, #tpu.memory_space<vmem>>, vector<1x20x128xf32>
    %392 = vector.shape_cast %391 : vector<1x20x128xf32> to vector<20x128xf32>
    %cst_422 = arith.constant dense<0.000000e+00> : vector<32x128xf32>
    %393 = tpu.matmul %390, %392, %cst_422 {dimension_numbers = #tpu.dot_dimension_numbers<[1], [0], [0], [1], [0, 0, 1, 1], [], []>} : vector<32x20xf32>, vector<20x128xf32>, vector<32x128xf32> -> vector<32x128xf32>
    %c1_423 = arith.constant 1 : index
    %c0_424 = arith.constant 0 : index
    %c0_425 = arith.constant 0 : index
    %394 = vector.load %arg2[%c1_423, %c0_424, %c0_425] : memref<5x32x20xf32, #tpu.memory_space<vmem>>, vector<1x32x20xf32>
    %395 = vector.shape_cast %394 : vector<1x32x20xf32> to vector<32x20xf32>
    %c10_426 = arith.constant 10 : index
    %c0_427 = arith.constant 0 : index
    %c0_428 = arith.constant 0 : index
    %396 = vector.load %arg1[%c10_426, %c0_427, %c0_428] : memref<13x20x128xf32, #tpu.memory_space<vmem>>, vector<1x20x128xf32>
    %397 = vector.shape_cast %396 : vector<1x20x128xf32> to vector<20x128xf32>
    %cst_429 = arith.constant dense<0.000000e+00> : vector<32x128xf32>
    %398 = tpu.matmul %395, %397, %cst_429 {dimension_numbers = #tpu.dot_dimension_numbers<[1], [0], [0], [1], [0, 0, 1, 1], [], []>} : vector<32x20xf32>, vector<20x128xf32>, vector<32x128xf32> -> vector<32x128xf32>
    %399 = arith.addf %393, %398 : vector<32x128xf32>
    %c2_430 = arith.constant 2 : index
    %c0_431 = arith.constant 0 : index
    %c0_432 = arith.constant 0 : index
    %400 = vector.load %arg2[%c2_430, %c0_431, %c0_432] : memref<5x32x20xf32, #tpu.memory_space<vmem>>, vector<1x32x20xf32>
    %401 = vector.shape_cast %400 : vector<1x32x20xf32> to vector<32x20xf32>
    %c11_433 = arith.constant 11 : index
    %c0_434 = arith.constant 0 : index
    %c0_435 = arith.constant 0 : index
    %402 = vector.load %arg1[%c11_433, %c0_434, %c0_435] : memref<13x20x128xf32, #tpu.memory_space<vmem>>, vector<1x20x128xf32>
    %403 = vector.shape_cast %402 : vector<1x20x128xf32> to vector<20x128xf32>
    %cst_436 = arith.constant dense<0.000000e+00> : vector<32x128xf32>
    %404 = tpu.matmul %401, %403, %cst_436 {dimension_numbers = #tpu.dot_dimension_numbers<[1], [0], [0], [1], [0, 0, 1, 1], [], []>} : vector<32x20xf32>, vector<20x128xf32>, vector<32x128xf32> -> vector<32x128xf32>
    %405 = arith.addf %399, %404 : vector<32x128xf32>
    %c3_437 = arith.constant 3 : index
    %c0_438 = arith.constant 0 : index
    %c0_439 = arith.constant 0 : index
    %406 = vector.load %arg2[%c3_437, %c0_438, %c0_439] : memref<5x32x20xf32, #tpu.memory_space<vmem>>, vector<1x32x20xf32>
    %407 = vector.shape_cast %406 : vector<1x32x20xf32> to vector<32x20xf32>
    %c12_440 = arith.constant 12 : index
    %c0_441 = arith.constant 0 : index
    %c0_442 = arith.constant 0 : index
    %408 = vector.load %arg1[%c12_440, %c0_441, %c0_442] : memref<13x20x128xf32, #tpu.memory_space<vmem>>, vector<1x20x128xf32>
    %409 = vector.shape_cast %408 : vector<1x20x128xf32> to vector<20x128xf32>
    %cst_443 = arith.constant dense<0.000000e+00> : vector<32x128xf32>
    %410 = tpu.matmul %407, %409, %cst_443 {dimension_numbers = #tpu.dot_dimension_numbers<[1], [0], [0], [1], [0, 0, 1, 1], [], []>} : vector<32x20xf32>, vector<20x128xf32>, vector<32x128xf32> -> vector<32x128xf32>
    %411 = arith.addf %405, %410 : vector<32x128xf32>
    %c0_444 = arith.constant 0 : index
    %c0_445 = arith.constant 0 : index
    %412 = vector.load %arg3[%c0_444, %c0_445] : memref<32x1xf32, #tpu.memory_space<vmem>>, vector<32x1xf32>
    %413 = vector.broadcast %412 : vector<32x1xf32> to vector<32x128xf32>
    %414 = arith.addf %411, %413 : vector<32x128xf32>
    %cst_446 = arith.constant 0.000000e+00 : f32
    %415 = vector.broadcast %cst_446 : f32 to vector<32x128xf32>
    %416 = arith.maximumf %414, %415 : vector<32x128xf32>
    %c11_447 = arith.constant 11 : index
    %c0_448 = arith.constant 0 : index
    %c0_449 = arith.constant 0 : index
    %417 = vector.load %arg11[%c11_447, %c0_448, %c0_449] : memref<13x32x128xf32, #tpu.memory_space<vmem>>, vector<1x32x128xf32>
    %418 = vector.shape_cast %417 : vector<1x32x128xf32> to vector<32x128xf32>
    %419 = vector.shape_cast %416 : vector<32x128xf32> to vector<1x32x128xf32>
    tpu.vector_store %arg11[%c11_447, %c0_448, %c0_449], %419 {strides = array<i32>} : memref<13x32x128xf32, #tpu.memory_space<vmem>>, vector<1x32x128xf32>,
    %c0_450 = arith.constant 0 : index
    %c0_451 = arith.constant 0 : index
    %c0_452 = arith.constant 0 : index
    %420 = vector.load %arg2[%c0_450, %c0_451, %c0_452] : memref<5x32x20xf32, #tpu.memory_space<vmem>>, vector<1x32x20xf32>
    %421 = vector.shape_cast %420 : vector<1x32x20xf32> to vector<32x20xf32>
    %c10_453 = arith.constant 10 : index
    %c0_454 = arith.constant 0 : index
    %c0_455 = arith.constant 0 : index
    %422 = vector.load %arg1[%c10_453, %c0_454, %c0_455] : memref<13x20x128xf32, #tpu.memory_space<vmem>>, vector<1x20x128xf32>
    %423 = vector.shape_cast %422 : vector<1x20x128xf32> to vector<20x128xf32>
    %cst_456 = arith.constant dense<0.000000e+00> : vector<32x128xf32>
    %424 = tpu.matmul %421, %423, %cst_456 {dimension_numbers = #tpu.dot_dimension_numbers<[1], [0], [0], [1], [0, 0, 1, 1], [], []>} : vector<32x20xf32>, vector<20x128xf32>, vector<32x128xf32> -> vector<32x128xf32>
    %c1_457 = arith.constant 1 : index
    %c0_458 = arith.constant 0 : index
    %c0_459 = arith.constant 0 : index
    %425 = vector.load %arg2[%c1_457, %c0_458, %c0_459] : memref<5x32x20xf32, #tpu.memory_space<vmem>>, vector<1x32x20xf32>
    %426 = vector.shape_cast %425 : vector<1x32x20xf32> to vector<32x20xf32>
    %c11_460 = arith.constant 11 : index
    %c0_461 = arith.constant 0 : index
    %c0_462 = arith.constant 0 : index
    %427 = vector.load %arg1[%c11_460, %c0_461, %c0_462] : memref<13x20x128xf32, #tpu.memory_space<vmem>>, vector<1x20x128xf32>
    %428 = vector.shape_cast %427 : vector<1x20x128xf32> to vector<20x128xf32>
    %cst_463 = arith.constant dense<0.000000e+00> : vector<32x128xf32>
    %429 = tpu.matmul %426, %428, %cst_463 {dimension_numbers = #tpu.dot_dimension_numbers<[1], [0], [0], [1], [0, 0, 1, 1], [], []>} : vector<32x20xf32>, vector<20x128xf32>, vector<32x128xf32> -> vector<32x128xf32>
    %430 = arith.addf %424, %429 : vector<32x128xf32>
    %c2_464 = arith.constant 2 : index
    %c0_465 = arith.constant 0 : index
    %c0_466 = arith.constant 0 : index
    %431 = vector.load %arg2[%c2_464, %c0_465, %c0_466] : memref<5x32x20xf32, #tpu.memory_space<vmem>>, vector<1x32x20xf32>
    %432 = vector.shape_cast %431 : vector<1x32x20xf32> to vector<32x20xf32>
    %c12_467 = arith.constant 12 : index
    %c0_468 = arith.constant 0 : index
    %c0_469 = arith.constant 0 : index
    %433 = vector.load %arg1[%c12_467, %c0_468, %c0_469] : memref<13x20x128xf32, #tpu.memory_space<vmem>>, vector<1x20x128xf32>
    %434 = vector.shape_cast %433 : vector<1x20x128xf32> to vector<20x128xf32>
    %cst_470 = arith.constant dense<0.000000e+00> : vector<32x128xf32>
    %435 = tpu.matmul %432, %434, %cst_470 {dimension_numbers = #tpu.dot_dimension_numbers<[1], [0], [0], [1], [0, 0, 1, 1], [], []>} : vector<32x20xf32>, vector<20x128xf32>, vector<32x128xf32> -> vector<32x128xf32>
    %436 = arith.addf %430, %435 : vector<32x128xf32>
    %c0_471 = arith.constant 0 : index
    %c0_472 = arith.constant 0 : index
    %437 = vector.load %arg3[%c0_471, %c0_472] : memref<32x1xf32, #tpu.memory_space<vmem>>, vector<32x1xf32>
    %438 = vector.broadcast %437 : vector<32x1xf32> to vector<32x128xf32>
    %439 = arith.addf %436, %438 : vector<32x128xf32>
    %cst_473 = arith.constant 0.000000e+00 : f32
    %440 = vector.broadcast %cst_473 : f32 to vector<32x128xf32>
    %441 = arith.maximumf %439, %440 : vector<32x128xf32>
    %c12_474 = arith.constant 12 : index
    %c0_475 = arith.constant 0 : index
    %c0_476 = arith.constant 0 : index
    %442 = vector.load %arg11[%c12_474, %c0_475, %c0_476] : memref<13x32x128xf32, #tpu.memory_space<vmem>>, vector<1x32x128xf32>
    %443 = vector.shape_cast %442 : vector<1x32x128xf32> to vector<32x128xf32>
    %444 = vector.shape_cast %441 : vector<32x128xf32> to vector<1x32x128xf32>
    tpu.vector_store %arg11[%c12_474, %c0_475, %c0_476], %444 {strides = array<i32>} : memref<13x32x128xf32, #tpu.memory_space<vmem>>, vector<1x32x128xf32>,
    %c0_477 = arith.constant 0 : index
    %c0_478 = arith.constant 0 : index
    %445 = vector.load %arg7[%c0_477, %c0_478] : memref<128x1xf32, #tpu.memory_space<vmem>>, vector<128x1xf32>
    %446 = vector.shape_cast %445 : vector<128x1xf32> to vector<128x1xf32>
    %447 = vector.broadcast %446 : vector<128x1xf32> to vector<128x128xf32>
    %c0_479 = arith.constant 0 : index
    %c0_480 = arith.constant 0 : index
    %448 = vector.load %arg12[%c0_479, %c0_480] : memref<128x128xf32, #tpu.memory_space<vmem>>, vector<128x128xf32>
    tpu.vector_store %arg12[%c0_479, %c0_480], %447 {strides = array<i32>} : memref<128x128xf32, #tpu.memory_space<vmem>>, vector<128x128xf32>,
    %c1_481 = arith.constant 1 : index
    %c0_482 = arith.constant 0 : index
    %c0_483 = arith.constant 0 : index
    %449 = vector.load %arg4[%c1_481, %c0_482, %c0_483] : memref<3x64x32xf32, #tpu.memory_space<vmem>>, vector<1x64x32xf32>
    %450 = vector.shape_cast %449 : vector<1x64x32xf32> to vector<64x32xf32>
    %c0_484 = arith.constant 0 : index
    %c0_485 = arith.constant 0 : index
    %c0_486 = arith.constant 0 : index
    %451 = vector.load %arg11[%c0_484, %c0_485, %c0_486] : memref<13x32x128xf32, #tpu.memory_space<vmem>>, vector<1x32x128xf32>
    %452 = vector.shape_cast %451 : vector<1x32x128xf32> to vector<32x128xf32>
    %cst_487 = arith.constant dense<0.000000e+00> : vector<64x128xf32>
    %453 = tpu.matmul %450, %452, %cst_487 {dimension_numbers = #tpu.dot_dimension_numbers<[1], [0], [0], [1], [0, 0, 1, 1], [], []>} : vector<64x32xf32>, vector<32x128xf32>, vector<64x128xf32> -> vector<64x128xf32>
    %c2_488 = arith.constant 2 : index
    %c0_489 = arith.constant 0 : index
    %c0_490 = arith.constant 0 : index
    %454 = vector.load %arg4[%c2_488, %c0_489, %c0_490] : memref<3x64x32xf32, #tpu.memory_space<vmem>>, vector<1x64x32xf32>
    %455 = vector.shape_cast %454 : vector<1x64x32xf32> to vector<64x32xf32>
    %c1_491 = arith.constant 1 : index
    %c0_492 = arith.constant 0 : index
    %c0_493 = arith.constant 0 : index
    %456 = vector.load %arg11[%c1_491, %c0_492, %c0_493] : memref<13x32x128xf32, #tpu.memory_space<vmem>>, vector<1x32x128xf32>
    %457 = vector.shape_cast %456 : vector<1x32x128xf32> to vector<32x128xf32>
    %cst_494 = arith.constant dense<0.000000e+00> : vector<64x128xf32>
    %458 = tpu.matmul %455, %457, %cst_494 {dimension_numbers = #tpu.dot_dimension_numbers<[1], [0], [0], [1], [0, 0, 1, 1], [], []>} : vector<64x32xf32>, vector<32x128xf32>, vector<64x128xf32> -> vector<64x128xf32>
    %459 = arith.addf %453, %458 : vector<64x128xf32>
    %c0_495 = arith.constant 0 : index
    %c0_496 = arith.constant 0 : index
    %460 = vector.load %arg5[%c0_495, %c0_496] : memref<64x1xf32, #tpu.memory_space<vmem>>, vector<64x1xf32>
    %461 = vector.broadcast %460 : vector<64x1xf32> to vector<64x128xf32>
    %462 = arith.addf %459, %461 : vector<64x128xf32>
    %cst_497 = arith.constant 0.000000e+00 : f32
    %463 = vector.broadcast %cst_497 : f32 to vector<64x128xf32>
    %464 = arith.maximumf %462, %463 : vector<64x128xf32>
    %c0_498 = arith.constant 0 : index
    %c0_499 = arith.constant 0 : index
    %465 = vector.load %arg12[%c0_498, %c0_499] : memref<128x128xf32, #tpu.memory_space<vmem>>, vector<128x128xf32>
    %c0_500 = arith.constant 0 : index
    %c0_501 = arith.constant 0 : index
    %c0_502 = arith.constant 0 : index
    %466 = vector.load %arg6[%c0_500, %c0_501, %c0_502] : memref<13x128x64xf32, #tpu.memory_space<vmem>>, vector<1x128x64xf32>
    %467 = vector.shape_cast %466 : vector<1x128x64xf32> to vector<128x64xf32>
    %cst_503 = arith.constant dense<0.000000e+00> : vector<128x128xf32>
    %468 = tpu.matmul %467, %464, %cst_503 {dimension_numbers = #tpu.dot_dimension_numbers<[1], [0], [0], [1], [0, 0, 1, 1], [], []>} : vector<128x64xf32>, vector<64x128xf32>, vector<128x128xf32> -> vector<128x128xf32>
    %469 = arith.addf %465, %468 : vector<128x128xf32>
    %c0_504 = arith.constant 0 : index
    %c0_505 = arith.constant 0 : index
    %470 = vector.load %arg12[%c0_504, %c0_505] : memref<128x128xf32, #tpu.memory_space<vmem>>, vector<128x128xf32>
    tpu.vector_store %arg12[%c0_504, %c0_505], %469 {strides = array<i32>} : memref<128x128xf32, #tpu.memory_space<vmem>>, vector<128x128xf32>,
    %c0_506 = arith.constant 0 : index
    %c0_507 = arith.constant 0 : index
    %c0_508 = arith.constant 0 : index
    %471 = vector.load %arg4[%c0_506, %c0_507, %c0_508] : memref<3x64x32xf32, #tpu.memory_space<vmem>>, vector<1x64x32xf32>
    %472 = vector.shape_cast %471 : vector<1x64x32xf32> to vector<64x32xf32>
    %c0_509 = arith.constant 0 : index
    %c0_510 = arith.constant 0 : index
    %c0_511 = arith.constant 0 : index
    %473 = vector.load %arg11[%c0_509, %c0_510, %c0_511] : memref<13x32x128xf32, #tpu.memory_space<vmem>>, vector<1x32x128xf32>
    %474 = vector.shape_cast %473 : vector<1x32x128xf32> to vector<32x128xf32>
    %cst_512 = arith.constant dense<0.000000e+00> : vector<64x128xf32>
    %475 = tpu.matmul %472, %474, %cst_512 {dimension_numbers = #tpu.dot_dimension_numbers<[1], [0], [0], [1], [0, 0, 1, 1], [], []>} : vector<64x32xf32>, vector<32x128xf32>, vector<64x128xf32> -> vector<64x128xf32>
    %c1_513 = arith.constant 1 : index
    %c0_514 = arith.constant 0 : index
    %c0_515 = arith.constant 0 : index
    %476 = vector.load %arg4[%c1_513, %c0_514, %c0_515] : memref<3x64x32xf32, #tpu.memory_space<vmem>>, vector<1x64x32xf32>
    %477 = vector.shape_cast %476 : vector<1x64x32xf32> to vector<64x32xf32>
    %c1_516 = arith.constant 1 : index
    %c0_517 = arith.constant 0 : index
    %c0_518 = arith.constant 0 : index
    %478 = vector.load %arg11[%c1_516, %c0_517, %c0_518] : memref<13x32x128xf32, #tpu.memory_space<vmem>>, vector<1x32x128xf32>
    %479 = vector.shape_cast %478 : vector<1x32x128xf32> to vector<32x128xf32>
    %cst_519 = arith.constant dense<0.000000e+00> : vector<64x128xf32>
    %480 = tpu.matmul %477, %479, %cst_519 {dimension_numbers = #tpu.dot_dimension_numbers<[1], [0], [0], [1], [0, 0, 1, 1], [], []>} : vector<64x32xf32>, vector<32x128xf32>, vector<64x128xf32> -> vector<64x128xf32>
    %481 = arith.addf %475, %480 : vector<64x128xf32>
    %c2_520 = arith.constant 2 : index
    %c0_521 = arith.constant 0 : index
    %c0_522 = arith.constant 0 : index
    %482 = vector.load %arg4[%c2_520, %c0_521, %c0_522] : memref<3x64x32xf32, #tpu.memory_space<vmem>>, vector<1x64x32xf32>
    %483 = vector.shape_cast %482 : vector<1x64x32xf32> to vector<64x32xf32>
    %c2_523 = arith.constant 2 : index
    %c0_524 = arith.constant 0 : index
    %c0_525 = arith.constant 0 : index
    %484 = vector.load %arg11[%c2_523, %c0_524, %c0_525] : memref<13x32x128xf32, #tpu.memory_space<vmem>>, vector<1x32x128xf32>
    %485 = vector.shape_cast %484 : vector<1x32x128xf32> to vector<32x128xf32>
    %cst_526 = arith.constant dense<0.000000e+00> : vector<64x128xf32>
    %486 = tpu.matmul %483, %485, %cst_526 {dimension_numbers = #tpu.dot_dimension_numbers<[1], [0], [0], [1], [0, 0, 1, 1], [], []>} : vector<64x32xf32>, vector<32x128xf32>, vector<64x128xf32> -> vector<64x128xf32>
    %487 = arith.addf %481, %486 : vector<64x128xf32>
    %c0_527 = arith.constant 0 : index
    %c0_528 = arith.constant 0 : index
    %488 = vector.load %arg5[%c0_527, %c0_528] : memref<64x1xf32, #tpu.memory_space<vmem>>, vector<64x1xf32>
    %489 = vector.broadcast %488 : vector<64x1xf32> to vector<64x128xf32>
    %490 = arith.addf %487, %489 : vector<64x128xf32>
    %cst_529 = arith.constant 0.000000e+00 : f32
    %491 = vector.broadcast %cst_529 : f32 to vector<64x128xf32>
    %492 = arith.maximumf %490, %491 : vector<64x128xf32>
    %c0_530 = arith.constant 0 : index
    %c0_531 = arith.constant 0 : index
    %493 = vector.load %arg12[%c0_530, %c0_531] : memref<128x128xf32, #tpu.memory_space<vmem>>, vector<128x128xf32>
    %c1_532 = arith.constant 1 : index
    %c0_533 = arith.constant 0 : index
    %c0_534 = arith.constant 0 : index
    %494 = vector.load %arg6[%c1_532, %c0_533, %c0_534] : memref<13x128x64xf32, #tpu.memory_space<vmem>>, vector<1x128x64xf32>
    %495 = vector.shape_cast %494 : vector<1x128x64xf32> to vector<128x64xf32>
    %cst_535 = arith.constant dense<0.000000e+00> : vector<128x128xf32>
    %496 = tpu.matmul %495, %492, %cst_535 {dimension_numbers = #tpu.dot_dimension_numbers<[1], [0], [0], [1], [0, 0, 1, 1], [], []>} : vector<128x64xf32>, vector<64x128xf32>, vector<128x128xf32> -> vector<128x128xf32>
    %497 = arith.addf %493, %496 : vector<128x128xf32>
    %c0_536 = arith.constant 0 : index
    %c0_537 = arith.constant 0 : index
    %498 = vector.load %arg12[%c0_536, %c0_537] : memref<128x128xf32, #tpu.memory_space<vmem>>, vector<128x128xf32>
    tpu.vector_store %arg12[%c0_536, %c0_537], %497 {strides = array<i32>} : memref<128x128xf32, #tpu.memory_space<vmem>>, vector<128x128xf32>,
    %c0_538 = arith.constant 0 : index
    %c0_539 = arith.constant 0 : index
    %c0_540 = arith.constant 0 : index
    %499 = vector.load %arg4[%c0_538, %c0_539, %c0_540] : memref<3x64x32xf32, #tpu.memory_space<vmem>>, vector<1x64x32xf32>
    %500 = vector.shape_cast %499 : vector<1x64x32xf32> to vector<64x32xf32>
    %c1_541 = arith.constant 1 : index
    %c0_542 = arith.constant 0 : index
    %c0_543 = arith.constant 0 : index
    %501 = vector.load %arg11[%c1_541, %c0_542, %c0_543] : memref<13x32x128xf32, #tpu.memory_space<vmem>>, vector<1x32x128xf32>
    %502 = vector.shape_cast %501 : vector<1x32x128xf32> to vector<32x128xf32>
    %cst_544 = arith.constant dense<0.000000e+00> : vector<64x128xf32>
    %503 = tpu.matmul %500, %502, %cst_544 {dimension_numbers = #tpu.dot_dimension_numbers<[1], [0], [0], [1], [0, 0, 1, 1], [], []>} : vector<64x32xf32>, vector<32x128xf32>, vector<64x128xf32> -> vector<64x128xf32>
    %c1_545 = arith.constant 1 : index
    %c0_546 = arith.constant 0 : index
    %c0_547 = arith.constant 0 : index
    %504 = vector.load %arg4[%c1_545, %c0_546, %c0_547] : memref<3x64x32xf32, #tpu.memory_space<vmem>>, vector<1x64x32xf32>
    %505 = vector.shape_cast %504 : vector<1x64x32xf32> to vector<64x32xf32>
    %c2_548 = arith.constant 2 : index
    %c0_549 = arith.constant 0 : index
    %c0_550 = arith.constant 0 : index
    %506 = vector.load %arg11[%c2_548, %c0_549, %c0_550] : memref<13x32x128xf32, #tpu.memory_space<vmem>>, vector<1x32x128xf32>
    %507 = vector.shape_cast %506 : vector<1x32x128xf32> to vector<32x128xf32>
    %cst_551 = arith.constant dense<0.000000e+00> : vector<64x128xf32>
    %508 = tpu.matmul %505, %507, %cst_551 {dimension_numbers = #tpu.dot_dimension_numbers<[1], [0], [0], [1], [0, 0, 1, 1], [], []>} : vector<64x32xf32>, vector<32x128xf32>, vector<64x128xf32> -> vector<64x128xf32>
    %509 = arith.addf %503, %508 : vector<64x128xf32>
    %c2_552 = arith.constant 2 : index
    %c0_553 = arith.constant 0 : index
    %c0_554 = arith.constant 0 : index
    %510 = vector.load %arg4[%c2_552, %c0_553, %c0_554] : memref<3x64x32xf32, #tpu.memory_space<vmem>>, vector<1x64x32xf32>
    %511 = vector.shape_cast %510 : vector<1x64x32xf32> to vector<64x32xf32>
    %c3_555 = arith.constant 3 : index
    %c0_556 = arith.constant 0 : index
    %c0_557 = arith.constant 0 : index
    %512 = vector.load %arg11[%c3_555, %c0_556, %c0_557] : memref<13x32x128xf32, #tpu.memory_space<vmem>>, vector<1x32x128xf32>
    %513 = vector.shape_cast %512 : vector<1x32x128xf32> to vector<32x128xf32>
    %cst_558 = arith.constant dense<0.000000e+00> : vector<64x128xf32>
    %514 = tpu.matmul %511, %513, %cst_558 {dimension_numbers = #tpu.dot_dimension_numbers<[1], [0], [0], [1], [0, 0, 1, 1], [], []>} : vector<64x32xf32>, vector<32x128xf32>, vector<64x128xf32> -> vector<64x128xf32>
    %515 = arith.addf %509, %514 : vector<64x128xf32>
    %c0_559 = arith.constant 0 : index
    %c0_560 = arith.constant 0 : index
    %516 = vector.load %arg5[%c0_559, %c0_560] : memref<64x1xf32, #tpu.memory_space<vmem>>, vector<64x1xf32>
    %517 = vector.broadcast %516 : vector<64x1xf32> to vector<64x128xf32>
    %518 = arith.addf %515, %517 : vector<64x128xf32>
    %cst_561 = arith.constant 0.000000e+00 : f32
    %519 = vector.broadcast %cst_561 : f32 to vector<64x128xf32>
    %520 = arith.maximumf %518, %519 : vector<64x128xf32>
    %c0_562 = arith.constant 0 : index
    %c0_563 = arith.constant 0 : index
    %521 = vector.load %arg12[%c0_562, %c0_563] : memref<128x128xf32, #tpu.memory_space<vmem>>, vector<128x128xf32>
    %c2_564 = arith.constant 2 : index
    %c0_565 = arith.constant 0 : index
    %c0_566 = arith.constant 0 : index
    %522 = vector.load %arg6[%c2_564, %c0_565, %c0_566] : memref<13x128x64xf32, #tpu.memory_space<vmem>>, vector<1x128x64xf32>
    %523 = vector.shape_cast %522 : vector<1x128x64xf32> to vector<128x64xf32>
    %cst_567 = arith.constant dense<0.000000e+00> : vector<128x128xf32>
    %524 = tpu.matmul %523, %520, %cst_567 {dimension_numbers = #tpu.dot_dimension_numbers<[1], [0], [0], [1], [0, 0, 1, 1], [], []>} : vector<128x64xf32>, vector<64x128xf32>, vector<128x128xf32> -> vector<128x128xf32>
    %525 = arith.addf %521, %524 : vector<128x128xf32>
    %c0_568 = arith.constant 0 : index
    %c0_569 = arith.constant 0 : index
    %526 = vector.load %arg12[%c0_568, %c0_569] : memref<128x128xf32, #tpu.memory_space<vmem>>, vector<128x128xf32>
    tpu.vector_store %arg12[%c0_568, %c0_569], %525 {strides = array<i32>} : memref<128x128xf32, #tpu.memory_space<vmem>>, vector<128x128xf32>,
    %c0_570 = arith.constant 0 : index
    %c0_571 = arith.constant 0 : index
    %c0_572 = arith.constant 0 : index
    %527 = vector.load %arg4[%c0_570, %c0_571, %c0_572] : memref<3x64x32xf32, #tpu.memory_space<vmem>>, vector<1x64x32xf32>
    %528 = vector.shape_cast %527 : vector<1x64x32xf32> to vector<64x32xf32>
    %c2_573 = arith.constant 2 : index
    %c0_574 = arith.constant 0 : index
    %c0_575 = arith.constant 0 : index
    %529 = vector.load %arg11[%c2_573, %c0_574, %c0_575] : memref<13x32x128xf32, #tpu.memory_space<vmem>>, vector<1x32x128xf32>
    %530 = vector.shape_cast %529 : vector<1x32x128xf32> to vector<32x128xf32>
    %cst_576 = arith.constant dense<0.000000e+00> : vector<64x128xf32>
    %531 = tpu.matmul %528, %530, %cst_576 {dimension_numbers = #tpu.dot_dimension_numbers<[1], [0], [0], [1], [0, 0, 1, 1], [], []>} : vector<64x32xf32>, vector<32x128xf32>, vector<64x128xf32> -> vector<64x128xf32>
    %c1_577 = arith.constant 1 : index
    %c0_578 = arith.constant 0 : index
    %c0_579 = arith.constant 0 : index
    %532 = vector.load %arg4[%c1_577, %c0_578, %c0_579] : memref<3x64x32xf32, #tpu.memory_space<vmem>>, vector<1x64x32xf32>
    %533 = vector.shape_cast %532 : vector<1x64x32xf32> to vector<64x32xf32>
    %c3_580 = arith.constant 3 : index
    %c0_581 = arith.constant 0 : index
    %c0_582 = arith.constant 0 : index
    %534 = vector.load %arg11[%c3_580, %c0_581, %c0_582] : memref<13x32x128xf32, #tpu.memory_space<vmem>>, vector<1x32x128xf32>
    %535 = vector.shape_cast %534 : vector<1x32x128xf32> to vector<32x128xf32>
    %cst_583 = arith.constant dense<0.000000e+00> : vector<64x128xf32>
    %536 = tpu.matmul %533, %535, %cst_583 {dimension_numbers = #tpu.dot_dimension_numbers<[1], [0], [0], [1], [0, 0, 1, 1], [], []>} : vector<64x32xf32>, vector<32x128xf32>, vector<64x128xf32> -> vector<64x128xf32>
    %537 = arith.addf %531, %536 : vector<64x128xf32>
    %c2_584 = arith.constant 2 : index
    %c0_585 = arith.constant 0 : index
    %c0_586 = arith.constant 0 : index
    %538 = vector.load %arg4[%c2_584, %c0_585, %c0_586] : memref<3x64x32xf32, #tpu.memory_space<vmem>>, vector<1x64x32xf32>
    %539 = vector.shape_cast %538 : vector<1x64x32xf32> to vector<64x32xf32>
    %c4_587 = arith.constant 4 : index
    %c0_588 = arith.constant 0 : index
    %c0_589 = arith.constant 0 : index
    %540 = vector.load %arg11[%c4_587, %c0_588, %c0_589] : memref<13x32x128xf32, #tpu.memory_space<vmem>>, vector<1x32x128xf32>
    %541 = vector.shape_cast %540 : vector<1x32x128xf32> to vector<32x128xf32>
    %cst_590 = arith.constant dense<0.000000e+00> : vector<64x128xf32>
    %542 = tpu.matmul %539, %541, %cst_590 {dimension_numbers = #tpu.dot_dimension_numbers<[1], [0], [0], [1], [0, 0, 1, 1], [], []>} : vector<64x32xf32>, vector<32x128xf32>, vector<64x128xf32> -> vector<64x128xf32>
    %543 = arith.addf %537, %542 : vector<64x128xf32>
    %c0_591 = arith.constant 0 : index
    %c0_592 = arith.constant 0 : index
    %544 = vector.load %arg5[%c0_591, %c0_592] : memref<64x1xf32, #tpu.memory_space<vmem>>, vector<64x1xf32>
    %545 = vector.broadcast %544 : vector<64x1xf32> to vector<64x128xf32>
    %546 = arith.addf %543, %545 : vector<64x128xf32>
    %cst_593 = arith.constant 0.000000e+00 : f32
    %547 = vector.broadcast %cst_593 : f32 to vector<64x128xf32>
    %548 = arith.maximumf %546, %547 : vector<64x128xf32>
    %c0_594 = arith.constant 0 : index
    %c0_595 = arith.constant 0 : index
    %549 = vector.load %arg12[%c0_594, %c0_595] : memref<128x128xf32, #tpu.memory_space<vmem>>, vector<128x128xf32>
    %c3_596 = arith.constant 3 : index
    %c0_597 = arith.constant 0 : index
    %c0_598 = arith.constant 0 : index
    %550 = vector.load %arg6[%c3_596, %c0_597, %c0_598] : memref<13x128x64xf32, #tpu.memory_space<vmem>>, vector<1x128x64xf32>
    %551 = vector.shape_cast %550 : vector<1x128x64xf32> to vector<128x64xf32>
    %cst_599 = arith.constant dense<0.000000e+00> : vector<128x128xf32>
    %552 = tpu.matmul %551, %548, %cst_599 {dimension_numbers = #tpu.dot_dimension_numbers<[1], [0], [0], [1], [0, 0, 1, 1], [], []>} : vector<128x64xf32>, vector<64x128xf32>, vector<128x128xf32> -> vector<128x128xf32>
    %553 = arith.addf %549, %552 : vector<128x128xf32>
    %c0_600 = arith.constant 0 : index
    %c0_601 = arith.constant 0 : index
    %554 = vector.load %arg12[%c0_600, %c0_601] : memref<128x128xf32, #tpu.memory_space<vmem>>, vector<128x128xf32>
    tpu.vector_store %arg12[%c0_600, %c0_601], %553 {strides = array<i32>} : memref<128x128xf32, #tpu.memory_space<vmem>>, vector<128x128xf32>,
    %c0_602 = arith.constant 0 : index
    %c0_603 = arith.constant 0 : index
    %c0_604 = arith.constant 0 : index
    %555 = vector.load %arg4[%c0_602, %c0_603, %c0_604] : memref<3x64x32xf32, #tpu.memory_space<vmem>>, vector<1x64x32xf32>
    %556 = vector.shape_cast %555 : vector<1x64x32xf32> to vector<64x32xf32>
    %c3_605 = arith.constant 3 : index
    %c0_606 = arith.constant 0 : index
    %c0_607 = arith.constant 0 : index
    %557 = vector.load %arg11[%c3_605, %c0_606, %c0_607] : memref<13x32x128xf32, #tpu.memory_space<vmem>>, vector<1x32x128xf32>
    %558 = vector.shape_cast %557 : vector<1x32x128xf32> to vector<32x128xf32>
    %cst_608 = arith.constant dense<0.000000e+00> : vector<64x128xf32>
    %559 = tpu.matmul %556, %558, %cst_608 {dimension_numbers = #tpu.dot_dimension_numbers<[1], [0], [0], [1], [0, 0, 1, 1], [], []>} : vector<64x32xf32>, vector<32x128xf32>, vector<64x128xf32> -> vector<64x128xf32>
    %c1_609 = arith.constant 1 : index
    %c0_610 = arith.constant 0 : index
    %c0_611 = arith.constant 0 : index
    %560 = vector.load %arg4[%c1_609, %c0_610, %c0_611] : memref<3x64x32xf32, #tpu.memory_space<vmem>>, vector<1x64x32xf32>
    %561 = vector.shape_cast %560 : vector<1x64x32xf32> to vector<64x32xf32>
    %c4_612 = arith.constant 4 : index
    %c0_613 = arith.constant 0 : index
    %c0_614 = arith.constant 0 : index
    %562 = vector.load %arg11[%c4_612, %c0_613, %c0_614] : memref<13x32x128xf32, #tpu.memory_space<vmem>>, vector<1x32x128xf32>
    %563 = vector.shape_cast %562 : vector<1x32x128xf32> to vector<32x128xf32>
    %cst_615 = arith.constant dense<0.000000e+00> : vector<64x128xf32>
    %564 = tpu.matmul %561, %563, %cst_615 {dimension_numbers = #tpu.dot_dimension_numbers<[1], [0], [0], [1], [0, 0, 1, 1], [], []>} : vector<64x32xf32>, vector<32x128xf32>, vector<64x128xf32> -> vector<64x128xf32>
    %565 = arith.addf %559, %564 : vector<64x128xf32>
    %c2_616 = arith.constant 2 : index
    %c0_617 = arith.constant 0 : index
    %c0_618 = arith.constant 0 : index
    %566 = vector.load %arg4[%c2_616, %c0_617, %c0_618] : memref<3x64x32xf32, #tpu.memory_space<vmem>>, vector<1x64x32xf32>
    %567 = vector.shape_cast %566 : vector<1x64x32xf32> to vector<64x32xf32>
    %c5_619 = arith.constant 5 : index
    %c0_620 = arith.constant 0 : index
    %c0_621 = arith.constant 0 : index
    %568 = vector.load %arg11[%c5_619, %c0_620, %c0_621] : memref<13x32x128xf32, #tpu.memory_space<vmem>>, vector<1x32x128xf32>
    %569 = vector.shape_cast %568 : vector<1x32x128xf32> to vector<32x128xf32>
    %cst_622 = arith.constant dense<0.000000e+00> : vector<64x128xf32>
    %570 = tpu.matmul %567, %569, %cst_622 {dimension_numbers = #tpu.dot_dimension_numbers<[1], [0], [0], [1], [0, 0, 1, 1], [], []>} : vector<64x32xf32>, vector<32x128xf32>, vector<64x128xf32> -> vector<64x128xf32>
    %571 = arith.addf %565, %570 : vector<64x128xf32>
    %c0_623 = arith.constant 0 : index
    %c0_624 = arith.constant 0 : index
    %572 = vector.load %arg5[%c0_623, %c0_624] : memref<64x1xf32, #tpu.memory_space<vmem>>, vector<64x1xf32>
    %573 = vector.broadcast %572 : vector<64x1xf32> to vector<64x128xf32>
    %574 = arith.addf %571, %573 : vector<64x128xf32>
    %cst_625 = arith.constant 0.000000e+00 : f32
    %575 = vector.broadcast %cst_625 : f32 to vector<64x128xf32>
    %576 = arith.maximumf %574, %575 : vector<64x128xf32>
    %c0_626 = arith.constant 0 : index
    %c0_627 = arith.constant 0 : index
    %577 = vector.load %arg12[%c0_626, %c0_627] : memref<128x128xf32, #tpu.memory_space<vmem>>, vector<128x128xf32>
    %c4_628 = arith.constant 4 : index
    %c0_629 = arith.constant 0 : index
    %c0_630 = arith.constant 0 : index
    %578 = vector.load %arg6[%c4_628, %c0_629, %c0_630] : memref<13x128x64xf32, #tpu.memory_space<vmem>>, vector<1x128x64xf32>
    %579 = vector.shape_cast %578 : vector<1x128x64xf32> to vector<128x64xf32>
    %cst_631 = arith.constant dense<0.000000e+00> : vector<128x128xf32>
    %580 = tpu.matmul %579, %576, %cst_631 {dimension_numbers = #tpu.dot_dimension_numbers<[1], [0], [0], [1], [0, 0, 1, 1], [], []>} : vector<128x64xf32>, vector<64x128xf32>, vector<128x128xf32> -> vector<128x128xf32>
    %581 = arith.addf %577, %580 : vector<128x128xf32>
    %c0_632 = arith.constant 0 : index
    %c0_633 = arith.constant 0 : index
    %582 = vector.load %arg12[%c0_632, %c0_633] : memref<128x128xf32, #tpu.memory_space<vmem>>, vector<128x128xf32>
    tpu.vector_store %arg12[%c0_632, %c0_633], %581 {strides = array<i32>} : memref<128x128xf32, #tpu.memory_space<vmem>>, vector<128x128xf32>,
    %c0_634 = arith.constant 0 : index
    %c0_635 = arith.constant 0 : index
    %c0_636 = arith.constant 0 : index
    %583 = vector.load %arg4[%c0_634, %c0_635, %c0_636] : memref<3x64x32xf32, #tpu.memory_space<vmem>>, vector<1x64x32xf32>
    %584 = vector.shape_cast %583 : vector<1x64x32xf32> to vector<64x32xf32>
    %c4_637 = arith.constant 4 : index
    %c0_638 = arith.constant 0 : index
    %c0_639 = arith.constant 0 : index
    %585 = vector.load %arg11[%c4_637, %c0_638, %c0_639] : memref<13x32x128xf32, #tpu.memory_space<vmem>>, vector<1x32x128xf32>
    %586 = vector.shape_cast %585 : vector<1x32x128xf32> to vector<32x128xf32>
    %cst_640 = arith.constant dense<0.000000e+00> : vector<64x128xf32>
    %587 = tpu.matmul %584, %586, %cst_640 {dimension_numbers = #tpu.dot_dimension_numbers<[1], [0], [0], [1], [0, 0, 1, 1], [], []>} : vector<64x32xf32>, vector<32x128xf32>, vector<64x128xf32> -> vector<64x128xf32>
    %c1_641 = arith.constant 1 : index
    %c0_642 = arith.constant 0 : index
    %c0_643 = arith.constant 0 : index
    %588 = vector.load %arg4[%c1_641, %c0_642, %c0_643] : memref<3x64x32xf32, #tpu.memory_space<vmem>>, vector<1x64x32xf32>
    %589 = vector.shape_cast %588 : vector<1x64x32xf32> to vector<64x32xf32>
    %c5_644 = arith.constant 5 : index
    %c0_645 = arith.constant 0 : index
    %c0_646 = arith.constant 0 : index
    %590 = vector.load %arg11[%c5_644, %c0_645, %c0_646] : memref<13x32x128xf32, #tpu.memory_space<vmem>>, vector<1x32x128xf32>
    %591 = vector.shape_cast %590 : vector<1x32x128xf32> to vector<32x128xf32>
    %cst_647 = arith.constant dense<0.000000e+00> : vector<64x128xf32>
    %592 = tpu.matmul %589, %591, %cst_647 {dimension_numbers = #tpu.dot_dimension_numbers<[1], [0], [0], [1], [0, 0, 1, 1], [], []>} : vector<64x32xf32>, vector<32x128xf32>, vector<64x128xf32> -> vector<64x128xf32>
    %593 = arith.addf %587, %592 : vector<64x128xf32>
    %c2_648 = arith.constant 2 : index
    %c0_649 = arith.constant 0 : index
    %c0_650 = arith.constant 0 : index
    %594 = vector.load %arg4[%c2_648, %c0_649, %c0_650] : memref<3x64x32xf32, #tpu.memory_space<vmem>>, vector<1x64x32xf32>
    %595 = vector.shape_cast %594 : vector<1x64x32xf32> to vector<64x32xf32>
    %c6_651 = arith.constant 6 : index
    %c0_652 = arith.constant 0 : index
    %c0_653 = arith.constant 0 : index
    %596 = vector.load %arg11[%c6_651, %c0_652, %c0_653] : memref<13x32x128xf32, #tpu.memory_space<vmem>>, vector<1x32x128xf32>
    %597 = vector.shape_cast %596 : vector<1x32x128xf32> to vector<32x128xf32>
    %cst_654 = arith.constant dense<0.000000e+00> : vector<64x128xf32>
    %598 = tpu.matmul %595, %597, %cst_654 {dimension_numbers = #tpu.dot_dimension_numbers<[1], [0], [0], [1], [0, 0, 1, 1], [], []>} : vector<64x32xf32>, vector<32x128xf32>, vector<64x128xf32> -> vector<64x128xf32>
    %599 = arith.addf %593, %598 : vector<64x128xf32>
    %c0_655 = arith.constant 0 : index
    %c0_656 = arith.constant 0 : index
    %600 = vector.load %arg5[%c0_655, %c0_656] : memref<64x1xf32, #tpu.memory_space<vmem>>, vector<64x1xf32>
    %601 = vector.broadcast %600 : vector<64x1xf32> to vector<64x128xf32>
    %602 = arith.addf %599, %601 : vector<64x128xf32>
    %cst_657 = arith.constant 0.000000e+00 : f32
    %603 = vector.broadcast %cst_657 : f32 to vector<64x128xf32>
    %604 = arith.maximumf %602, %603 : vector<64x128xf32>
    %c0_658 = arith.constant 0 : index
    %c0_659 = arith.constant 0 : index
    %605 = vector.load %arg12[%c0_658, %c0_659] : memref<128x128xf32, #tpu.memory_space<vmem>>, vector<128x128xf32>
    %c5_660 = arith.constant 5 : index
    %c0_661 = arith.constant 0 : index
    %c0_662 = arith.constant 0 : index
    %606 = vector.load %arg6[%c5_660, %c0_661, %c0_662] : memref<13x128x64xf32, #tpu.memory_space<vmem>>, vector<1x128x64xf32>
    %607 = vector.shape_cast %606 : vector<1x128x64xf32> to vector<128x64xf32>
    %cst_663 = arith.constant dense<0.000000e+00> : vector<128x128xf32>
    %608 = tpu.matmul %607, %604, %cst_663 {dimension_numbers = #tpu.dot_dimension_numbers<[1], [0], [0], [1], [0, 0, 1, 1], [], []>} : vector<128x64xf32>, vector<64x128xf32>, vector<128x128xf32> -> vector<128x128xf32>
    %609 = arith.addf %605, %608 : vector<128x128xf32>
    %c0_664 = arith.constant 0 : index
    %c0_665 = arith.constant 0 : index
    %610 = vector.load %arg12[%c0_664, %c0_665] : memref<128x128xf32, #tpu.memory_space<vmem>>, vector<128x128xf32>
    tpu.vector_store %arg12[%c0_664, %c0_665], %609 {strides = array<i32>} : memref<128x128xf32, #tpu.memory_space<vmem>>, vector<128x128xf32>,
    %c0_666 = arith.constant 0 : index
    %c0_667 = arith.constant 0 : index
    %c0_668 = arith.constant 0 : index
    %611 = vector.load %arg4[%c0_666, %c0_667, %c0_668] : memref<3x64x32xf32, #tpu.memory_space<vmem>>, vector<1x64x32xf32>
    %612 = vector.shape_cast %611 : vector<1x64x32xf32> to vector<64x32xf32>
    %c5_669 = arith.constant 5 : index
    %c0_670 = arith.constant 0 : index
    %c0_671 = arith.constant 0 : index
    %613 = vector.load %arg11[%c5_669, %c0_670, %c0_671] : memref<13x32x128xf32, #tpu.memory_space<vmem>>, vector<1x32x128xf32>
    %614 = vector.shape_cast %613 : vector<1x32x128xf32> to vector<32x128xf32>
    %cst_672 = arith.constant dense<0.000000e+00> : vector<64x128xf32>
    %615 = tpu.matmul %612, %614, %cst_672 {dimension_numbers = #tpu.dot_dimension_numbers<[1], [0], [0], [1], [0, 0, 1, 1], [], []>} : vector<64x32xf32>, vector<32x128xf32>, vector<64x128xf32> -> vector<64x128xf32>
    %c1_673 = arith.constant 1 : index
    %c0_674 = arith.constant 0 : index
    %c0_675 = arith.constant 0 : index
    %616 = vector.load %arg4[%c1_673, %c0_674, %c0_675] : memref<3x64x32xf32, #tpu.memory_space<vmem>>, vector<1x64x32xf32>
    %617 = vector.shape_cast %616 : vector<1x64x32xf32> to vector<64x32xf32>
    %c6_676 = arith.constant 6 : index
    %c0_677 = arith.constant 0 : index
    %c0_678 = arith.constant 0 : index
    %618 = vector.load %arg11[%c6_676, %c0_677, %c0_678] : memref<13x32x128xf32, #tpu.memory_space<vmem>>, vector<1x32x128xf32>
    %619 = vector.shape_cast %618 : vector<1x32x128xf32> to vector<32x128xf32>
    %cst_679 = arith.constant dense<0.000000e+00> : vector<64x128xf32>
    %620 = tpu.matmul %617, %619, %cst_679 {dimension_numbers = #tpu.dot_dimension_numbers<[1], [0], [0], [1], [0, 0, 1, 1], [], []>} : vector<64x32xf32>, vector<32x128xf32>, vector<64x128xf32> -> vector<64x128xf32>
    %621 = arith.addf %615, %620 : vector<64x128xf32>
    %c2_680 = arith.constant 2 : index
    %c0_681 = arith.constant 0 : index
    %c0_682 = arith.constant 0 : index
    %622 = vector.load %arg4[%c2_680, %c0_681, %c0_682] : memref<3x64x32xf32, #tpu.memory_space<vmem>>, vector<1x64x32xf32>
    %623 = vector.shape_cast %622 : vector<1x64x32xf32> to vector<64x32xf32>
    %c7_683 = arith.constant 7 : index
    %c0_684 = arith.constant 0 : index
    %c0_685 = arith.constant 0 : index
    %624 = vector.load %arg11[%c7_683, %c0_684, %c0_685] : memref<13x32x128xf32, #tpu.memory_space<vmem>>, vector<1x32x128xf32>
    %625 = vector.shape_cast %624 : vector<1x32x128xf32> to vector<32x128xf32>
    %cst_686 = arith.constant dense<0.000000e+00> : vector<64x128xf32>
    %626 = tpu.matmul %623, %625, %cst_686 {dimension_numbers = #tpu.dot_dimension_numbers<[1], [0], [0], [1], [0, 0, 1, 1], [], []>} : vector<64x32xf32>, vector<32x128xf32>, vector<64x128xf32> -> vector<64x128xf32>
    %627 = arith.addf %621, %626 : vector<64x128xf32>
    %c0_687 = arith.constant 0 : index
    %c0_688 = arith.constant 0 : index
    %628 = vector.load %arg5[%c0_687, %c0_688] : memref<64x1xf32, #tpu.memory_space<vmem>>, vector<64x1xf32>
    %629 = vector.broadcast %628 : vector<64x1xf32> to vector<64x128xf32>
    %630 = arith.addf %627, %629 : vector<64x128xf32>
    %cst_689 = arith.constant 0.000000e+00 : f32
    %631 = vector.broadcast %cst_689 : f32 to vector<64x128xf32>
    %632 = arith.maximumf %630, %631 : vector<64x128xf32>
    %c0_690 = arith.constant 0 : index
    %c0_691 = arith.constant 0 : index
    %633 = vector.load %arg12[%c0_690, %c0_691] : memref<128x128xf32, #tpu.memory_space<vmem>>, vector<128x128xf32>
    %c6_692 = arith.constant 6 : index
    %c0_693 = arith.constant 0 : index
    %c0_694 = arith.constant 0 : index
    %634 = vector.load %arg6[%c6_692, %c0_693, %c0_694] : memref<13x128x64xf32, #tpu.memory_space<vmem>>, vector<1x128x64xf32>
    %635 = vector.shape_cast %634 : vector<1x128x64xf32> to vector<128x64xf32>
    %cst_695 = arith.constant dense<0.000000e+00> : vector<128x128xf32>
    %636 = tpu.matmul %635, %632, %cst_695 {dimension_numbers = #tpu.dot_dimension_numbers<[1], [0], [0], [1], [0, 0, 1, 1], [], []>} : vector<128x64xf32>, vector<64x128xf32>, vector<128x128xf32> -> vector<128x128xf32>
    %637 = arith.addf %633, %636 : vector<128x128xf32>
    %c0_696 = arith.constant 0 : index
    %c0_697 = arith.constant 0 : index
    %638 = vector.load %arg12[%c0_696, %c0_697] : memref<128x128xf32, #tpu.memory_space<vmem>>, vector<128x128xf32>
    tpu.vector_store %arg12[%c0_696, %c0_697], %637 {strides = array<i32>} : memref<128x128xf32, #tpu.memory_space<vmem>>, vector<128x128xf32>,
    %c0_698 = arith.constant 0 : index
    %c0_699 = arith.constant 0 : index
    %c0_700 = arith.constant 0 : index
    %639 = vector.load %arg4[%c0_698, %c0_699, %c0_700] : memref<3x64x32xf32, #tpu.memory_space<vmem>>, vector<1x64x32xf32>
    %640 = vector.shape_cast %639 : vector<1x64x32xf32> to vector<64x32xf32>
    %c6_701 = arith.constant 6 : index
    %c0_702 = arith.constant 0 : index
    %c0_703 = arith.constant 0 : index
    %641 = vector.load %arg11[%c6_701, %c0_702, %c0_703] : memref<13x32x128xf32, #tpu.memory_space<vmem>>, vector<1x32x128xf32>
    %642 = vector.shape_cast %641 : vector<1x32x128xf32> to vector<32x128xf32>
    %cst_704 = arith.constant dense<0.000000e+00> : vector<64x128xf32>
    %643 = tpu.matmul %640, %642, %cst_704 {dimension_numbers = #tpu.dot_dimension_numbers<[1], [0], [0], [1], [0, 0, 1, 1], [], []>} : vector<64x32xf32>, vector<32x128xf32>, vector<64x128xf32> -> vector<64x128xf32>
    %c1_705 = arith.constant 1 : index
    %c0_706 = arith.constant 0 : index
    %c0_707 = arith.constant 0 : index
    %644 = vector.load %arg4[%c1_705, %c0_706, %c0_707] : memref<3x64x32xf32, #tpu.memory_space<vmem>>, vector<1x64x32xf32>
    %645 = vector.shape_cast %644 : vector<1x64x32xf32> to vector<64x32xf32>
    %c7_708 = arith.constant 7 : index
    %c0_709 = arith.constant 0 : index
    %c0_710 = arith.constant 0 : index
    %646 = vector.load %arg11[%c7_708, %c0_709, %c0_710] : memref<13x32x128xf32, #tpu.memory_space<vmem>>, vector<1x32x128xf32>
    %647 = vector.shape_cast %646 : vector<1x32x128xf32> to vector<32x128xf32>
    %cst_711 = arith.constant dense<0.000000e+00> : vector<64x128xf32>
    %648 = tpu.matmul %645, %647, %cst_711 {dimension_numbers = #tpu.dot_dimension_numbers<[1], [0], [0], [1], [0, 0, 1, 1], [], []>} : vector<64x32xf32>, vector<32x128xf32>, vector<64x128xf32> -> vector<64x128xf32>
    %649 = arith.addf %643, %648 : vector<64x128xf32>
    %c2_712 = arith.constant 2 : index
    %c0_713 = arith.constant 0 : index
    %c0_714 = arith.constant 0 : index
    %650 = vector.load %arg4[%c2_712, %c0_713, %c0_714] : memref<3x64x32xf32, #tpu.memory_space<vmem>>, vector<1x64x32xf32>
    %651 = vector.shape_cast %650 : vector<1x64x32xf32> to vector<64x32xf32>
    %c8_715 = arith.constant 8 : index
    %c0_716 = arith.constant 0 : index
    %c0_717 = arith.constant 0 : index
    %652 = vector.load %arg11[%c8_715, %c0_716, %c0_717] : memref<13x32x128xf32, #tpu.memory_space<vmem>>, vector<1x32x128xf32>
    %653 = vector.shape_cast %652 : vector<1x32x128xf32> to vector<32x128xf32>
    %cst_718 = arith.constant dense<0.000000e+00> : vector<64x128xf32>
    %654 = tpu.matmul %651, %653, %cst_718 {dimension_numbers = #tpu.dot_dimension_numbers<[1], [0], [0], [1], [0, 0, 1, 1], [], []>} : vector<64x32xf32>, vector<32x128xf32>, vector<64x128xf32> -> vector<64x128xf32>
    %655 = arith.addf %649, %654 : vector<64x128xf32>
    %c0_719 = arith.constant 0 : index
    %c0_720 = arith.constant 0 : index
    %656 = vector.load %arg5[%c0_719, %c0_720] : memref<64x1xf32, #tpu.memory_space<vmem>>, vector<64x1xf32>
    %657 = vector.broadcast %656 : vector<64x1xf32> to vector<64x128xf32>
    %658 = arith.addf %655, %657 : vector<64x128xf32>
    %cst_721 = arith.constant 0.000000e+00 : f32
    %659 = vector.broadcast %cst_721 : f32 to vector<64x128xf32>
    %660 = arith.maximumf %658, %659 : vector<64x128xf32>
    %c0_722 = arith.constant 0 : index
    %c0_723 = arith.constant 0 : index
    %661 = vector.load %arg12[%c0_722, %c0_723] : memref<128x128xf32, #tpu.memory_space<vmem>>, vector<128x128xf32>
    %c7_724 = arith.constant 7 : index
    %c0_725 = arith.constant 0 : index
    %c0_726 = arith.constant 0 : index
    %662 = vector.load %arg6[%c7_724, %c0_725, %c0_726] : memref<13x128x64xf32, #tpu.memory_space<vmem>>, vector<1x128x64xf32>
    %663 = vector.shape_cast %662 : vector<1x128x64xf32> to vector<128x64xf32>
    %cst_727 = arith.constant dense<0.000000e+00> : vector<128x128xf32>
    %664 = tpu.matmul %663, %660, %cst_727 {dimension_numbers = #tpu.dot_dimension_numbers<[1], [0], [0], [1], [0, 0, 1, 1], [], []>} : vector<128x64xf32>, vector<64x128xf32>, vector<128x128xf32> -> vector<128x128xf32>
    %665 = arith.addf %661, %664 : vector<128x128xf32>
    %c0_728 = arith.constant 0 : index
    %c0_729 = arith.constant 0 : index
    %666 = vector.load %arg12[%c0_728, %c0_729] : memref<128x128xf32, #tpu.memory_space<vmem>>, vector<128x128xf32>
    tpu.vector_store %arg12[%c0_728, %c0_729], %665 {strides = array<i32>} : memref<128x128xf32, #tpu.memory_space<vmem>>, vector<128x128xf32>,
    %c0_730 = arith.constant 0 : index
    %c0_731 = arith.constant 0 : index
    %c0_732 = arith.constant 0 : index
    %667 = vector.load %arg4[%c0_730, %c0_731, %c0_732] : memref<3x64x32xf32, #tpu.memory_space<vmem>>, vector<1x64x32xf32>
    %668 = vector.shape_cast %667 : vector<1x64x32xf32> to vector<64x32xf32>
    %c7_733 = arith.constant 7 : index
    %c0_734 = arith.constant 0 : index
    %c0_735 = arith.constant 0 : index
    %669 = vector.load %arg11[%c7_733, %c0_734, %c0_735] : memref<13x32x128xf32, #tpu.memory_space<vmem>>, vector<1x32x128xf32>
    %670 = vector.shape_cast %669 : vector<1x32x128xf32> to vector<32x128xf32>
    %cst_736 = arith.constant dense<0.000000e+00> : vector<64x128xf32>
    %671 = tpu.matmul %668, %670, %cst_736 {dimension_numbers = #tpu.dot_dimension_numbers<[1], [0], [0], [1], [0, 0, 1, 1], [], []>} : vector<64x32xf32>, vector<32x128xf32>, vector<64x128xf32> -> vector<64x128xf32>
    %c1_737 = arith.constant 1 : index
    %c0_738 = arith.constant 0 : index
    %c0_739 = arith.constant 0 : index
    %672 = vector.load %arg4[%c1_737, %c0_738, %c0_739] : memref<3x64x32xf32, #tpu.memory_space<vmem>>, vector<1x64x32xf32>
    %673 = vector.shape_cast %672 : vector<1x64x32xf32> to vector<64x32xf32>
    %c8_740 = arith.constant 8 : index
    %c0_741 = arith.constant 0 : index
    %c0_742 = arith.constant 0 : index
    %674 = vector.load %arg11[%c8_740, %c0_741, %c0_742] : memref<13x32x128xf32, #tpu.memory_space<vmem>>, vector<1x32x128xf32>
    %675 = vector.shape_cast %674 : vector<1x32x128xf32> to vector<32x128xf32>
    %cst_743 = arith.constant dense<0.000000e+00> : vector<64x128xf32>
    %676 = tpu.matmul %673, %675, %cst_743 {dimension_numbers = #tpu.dot_dimension_numbers<[1], [0], [0], [1], [0, 0, 1, 1], [], []>} : vector<64x32xf32>, vector<32x128xf32>, vector<64x128xf32> -> vector<64x128xf32>
    %677 = arith.addf %671, %676 : vector<64x128xf32>
    %c2_744 = arith.constant 2 : index
    %c0_745 = arith.constant 0 : index
    %c0_746 = arith.constant 0 : index
    %678 = vector.load %arg4[%c2_744, %c0_745, %c0_746] : memref<3x64x32xf32, #tpu.memory_space<vmem>>, vector<1x64x32xf32>
    %679 = vector.shape_cast %678 : vector<1x64x32xf32> to vector<64x32xf32>
    %c9_747 = arith.constant 9 : index
    %c0_748 = arith.constant 0 : index
    %c0_749 = arith.constant 0 : index
    %680 = vector.load %arg11[%c9_747, %c0_748, %c0_749] : memref<13x32x128xf32, #tpu.memory_space<vmem>>, vector<1x32x128xf32>
    %681 = vector.shape_cast %680 : vector<1x32x128xf32> to vector<32x128xf32>
    %cst_750 = arith.constant dense<0.000000e+00> : vector<64x128xf32>
    %682 = tpu.matmul %679, %681, %cst_750 {dimension_numbers = #tpu.dot_dimension_numbers<[1], [0], [0], [1], [0, 0, 1, 1], [], []>} : vector<64x32xf32>, vector<32x128xf32>, vector<64x128xf32> -> vector<64x128xf32>
    %683 = arith.addf %677, %682 : vector<64x128xf32>
    %c0_751 = arith.constant 0 : index
    %c0_752 = arith.constant 0 : index
    %684 = vector.load %arg5[%c0_751, %c0_752] : memref<64x1xf32, #tpu.memory_space<vmem>>, vector<64x1xf32>
    %685 = vector.broadcast %684 : vector<64x1xf32> to vector<64x128xf32>
    %686 = arith.addf %683, %685 : vector<64x128xf32>
    %cst_753 = arith.constant 0.000000e+00 : f32
    %687 = vector.broadcast %cst_753 : f32 to vector<64x128xf32>
    %688 = arith.maximumf %686, %687 : vector<64x128xf32>
    %c0_754 = arith.constant 0 : index
    %c0_755 = arith.constant 0 : index
    %689 = vector.load %arg12[%c0_754, %c0_755] : memref<128x128xf32, #tpu.memory_space<vmem>>, vector<128x128xf32>
    %c8_756 = arith.constant 8 : index
    %c0_757 = arith.constant 0 : index
    %c0_758 = arith.constant 0 : index
    %690 = vector.load %arg6[%c8_756, %c0_757, %c0_758] : memref<13x128x64xf32, #tpu.memory_space<vmem>>, vector<1x128x64xf32>
    %691 = vector.shape_cast %690 : vector<1x128x64xf32> to vector<128x64xf32>
    %cst_759 = arith.constant dense<0.000000e+00> : vector<128x128xf32>
    %692 = tpu.matmul %691, %688, %cst_759 {dimension_numbers = #tpu.dot_dimension_numbers<[1], [0], [0], [1], [0, 0, 1, 1], [], []>} : vector<128x64xf32>, vector<64x128xf32>, vector<128x128xf32> -> vector<128x128xf32>
    %693 = arith.addf %689, %692 : vector<128x128xf32>
    %c0_760 = arith.constant 0 : index
    %c0_761 = arith.constant 0 : index
    %694 = vector.load %arg12[%c0_760, %c0_761] : memref<128x128xf32, #tpu.memory_space<vmem>>, vector<128x128xf32>
    tpu.vector_store %arg12[%c0_760, %c0_761], %693 {strides = array<i32>} : memref<128x128xf32, #tpu.memory_space<vmem>>, vector<128x128xf32>,
    %c0_762 = arith.constant 0 : index
    %c0_763 = arith.constant 0 : index
    %c0_764 = arith.constant 0 : index
    %695 = vector.load %arg4[%c0_762, %c0_763, %c0_764] : memref<3x64x32xf32, #tpu.memory_space<vmem>>, vector<1x64x32xf32>
    %696 = vector.shape_cast %695 : vector<1x64x32xf32> to vector<64x32xf32>
    %c8_765 = arith.constant 8 : index
    %c0_766 = arith.constant 0 : index
    %c0_767 = arith.constant 0 : index
    %697 = vector.load %arg11[%c8_765, %c0_766, %c0_767] : memref<13x32x128xf32, #tpu.memory_space<vmem>>, vector<1x32x128xf32>
    %698 = vector.shape_cast %697 : vector<1x32x128xf32> to vector<32x128xf32>
    %cst_768 = arith.constant dense<0.000000e+00> : vector<64x128xf32>
    %699 = tpu.matmul %696, %698, %cst_768 {dimension_numbers = #tpu.dot_dimension_numbers<[1], [0], [0], [1], [0, 0, 1, 1], [], []>} : vector<64x32xf32>, vector<32x128xf32>, vector<64x128xf32> -> vector<64x128xf32>
    %c1_769 = arith.constant 1 : index
    %c0_770 = arith.constant 0 : index
    %c0_771 = arith.constant 0 : index
    %700 = vector.load %arg4[%c1_769, %c0_770, %c0_771] : memref<3x64x32xf32, #tpu.memory_space<vmem>>, vector<1x64x32xf32>
    %701 = vector.shape_cast %700 : vector<1x64x32xf32> to vector<64x32xf32>
    %c9_772 = arith.constant 9 : index
    %c0_773 = arith.constant 0 : index
    %c0_774 = arith.constant 0 : index
    %702 = vector.load %arg11[%c9_772, %c0_773, %c0_774] : memref<13x32x128xf32, #tpu.memory_space<vmem>>, vector<1x32x128xf32>
    %703 = vector.shape_cast %702 : vector<1x32x128xf32> to vector<32x128xf32>
    %cst_775 = arith.constant dense<0.000000e+00> : vector<64x128xf32>
    %704 = tpu.matmul %701, %703, %cst_775 {dimension_numbers = #tpu.dot_dimension_numbers<[1], [0], [0], [1], [0, 0, 1, 1], [], []>} : vector<64x32xf32>, vector<32x128xf32>, vector<64x128xf32> -> vector<64x128xf32>
    %705 = arith.addf %699, %704 : vector<64x128xf32>
    %c2_776 = arith.constant 2 : index
    %c0_777 = arith.constant 0 : index
    %c0_778 = arith.constant 0 : index
    %706 = vector.load %arg4[%c2_776, %c0_777, %c0_778] : memref<3x64x32xf32, #tpu.memory_space<vmem>>, vector<1x64x32xf32>
    %707 = vector.shape_cast %706 : vector<1x64x32xf32> to vector<64x32xf32>
    %c10_779 = arith.constant 10 : index
    %c0_780 = arith.constant 0 : index
    %c0_781 = arith.constant 0 : index
    %708 = vector.load %arg11[%c10_779, %c0_780, %c0_781] : memref<13x32x128xf32, #tpu.memory_space<vmem>>, vector<1x32x128xf32>
    %709 = vector.shape_cast %708 : vector<1x32x128xf32> to vector<32x128xf32>
    %cst_782 = arith.constant dense<0.000000e+00> : vector<64x128xf32>
    %710 = tpu.matmul %707, %709, %cst_782 {dimension_numbers = #tpu.dot_dimension_numbers<[1], [0], [0], [1], [0, 0, 1, 1], [], []>} : vector<64x32xf32>, vector<32x128xf32>, vector<64x128xf32> -> vector<64x128xf32>
    %711 = arith.addf %705, %710 : vector<64x128xf32>
    %c0_783 = arith.constant 0 : index
    %c0_784 = arith.constant 0 : index
    %712 = vector.load %arg5[%c0_783, %c0_784] : memref<64x1xf32, #tpu.memory_space<vmem>>, vector<64x1xf32>
    %713 = vector.broadcast %712 : vector<64x1xf32> to vector<64x128xf32>
    %714 = arith.addf %711, %713 : vector<64x128xf32>
    %cst_785 = arith.constant 0.000000e+00 : f32
    %715 = vector.broadcast %cst_785 : f32 to vector<64x128xf32>
    %716 = arith.maximumf %714, %715 : vector<64x128xf32>
    %c0_786 = arith.constant 0 : index
    %c0_787 = arith.constant 0 : index
    %717 = vector.load %arg12[%c0_786, %c0_787] : memref<128x128xf32, #tpu.memory_space<vmem>>, vector<128x128xf32>
    %c9_788 = arith.constant 9 : index
    %c0_789 = arith.constant 0 : index
    %c0_790 = arith.constant 0 : index
    %718 = vector.load %arg6[%c9_788, %c0_789, %c0_790] : memref<13x128x64xf32, #tpu.memory_space<vmem>>, vector<1x128x64xf32>
    %719 = vector.shape_cast %718 : vector<1x128x64xf32> to vector<128x64xf32>
    %cst_791 = arith.constant dense<0.000000e+00> : vector<128x128xf32>
    %720 = tpu.matmul %719, %716, %cst_791 {dimension_numbers = #tpu.dot_dimension_numbers<[1], [0], [0], [1], [0, 0, 1, 1], [], []>} : vector<128x64xf32>, vector<64x128xf32>, vector<128x128xf32> -> vector<128x128xf32>
    %721 = arith.addf %717, %720 : vector<128x128xf32>
    %c0_792 = arith.constant 0 : index
    %c0_793 = arith.constant 0 : index
    %722 = vector.load %arg12[%c0_792, %c0_793] : memref<128x128xf32, #tpu.memory_space<vmem>>, vector<128x128xf32>
    tpu.vector_store %arg12[%c0_792, %c0_793], %721 {strides = array<i32>} : memref<128x128xf32, #tpu.memory_space<vmem>>, vector<128x128xf32>,
    %c0_794 = arith.constant 0 : index
    %c0_795 = arith.constant 0 : index
    %c0_796 = arith.constant 0 : index
    %723 = vector.load %arg4[%c0_794, %c0_795, %c0_796] : memref<3x64x32xf32, #tpu.memory_space<vmem>>, vector<1x64x32xf32>
    %724 = vector.shape_cast %723 : vector<1x64x32xf32> to vector<64x32xf32>
    %c9_797 = arith.constant 9 : index
    %c0_798 = arith.constant 0 : index
    %c0_799 = arith.constant 0 : index
    %725 = vector.load %arg11[%c9_797, %c0_798, %c0_799] : memref<13x32x128xf32, #tpu.memory_space<vmem>>, vector<1x32x128xf32>
    %726 = vector.shape_cast %725 : vector<1x32x128xf32> to vector<32x128xf32>
    %cst_800 = arith.constant dense<0.000000e+00> : vector<64x128xf32>
    %727 = tpu.matmul %724, %726, %cst_800 {dimension_numbers = #tpu.dot_dimension_numbers<[1], [0], [0], [1], [0, 0, 1, 1], [], []>} : vector<64x32xf32>, vector<32x128xf32>, vector<64x128xf32> -> vector<64x128xf32>
    %c1_801 = arith.constant 1 : index
    %c0_802 = arith.constant 0 : index
    %c0_803 = arith.constant 0 : index
    %728 = vector.load %arg4[%c1_801, %c0_802, %c0_803] : memref<3x64x32xf32, #tpu.memory_space<vmem>>, vector<1x64x32xf32>
    %729 = vector.shape_cast %728 : vector<1x64x32xf32> to vector<64x32xf32>
    %c10_804 = arith.constant 10 : index
    %c0_805 = arith.constant 0 : index
    %c0_806 = arith.constant 0 : index
    %730 = vector.load %arg11[%c10_804, %c0_805, %c0_806] : memref<13x32x128xf32, #tpu.memory_space<vmem>>, vector<1x32x128xf32>
    %731 = vector.shape_cast %730 : vector<1x32x128xf32> to vector<32x128xf32>
    %cst_807 = arith.constant dense<0.000000e+00> : vector<64x128xf32>
    %732 = tpu.matmul %729, %731, %cst_807 {dimension_numbers = #tpu.dot_dimension_numbers<[1], [0], [0], [1], [0, 0, 1, 1], [], []>} : vector<64x32xf32>, vector<32x128xf32>, vector<64x128xf32> -> vector<64x128xf32>
    %733 = arith.addf %727, %732 : vector<64x128xf32>
    %c2_808 = arith.constant 2 : index
    %c0_809 = arith.constant 0 : index
    %c0_810 = arith.constant 0 : index
    %734 = vector.load %arg4[%c2_808, %c0_809, %c0_810] : memref<3x64x32xf32, #tpu.memory_space<vmem>>, vector<1x64x32xf32>
    %735 = vector.shape_cast %734 : vector<1x64x32xf32> to vector<64x32xf32>
    %c11_811 = arith.constant 11 : index
    %c0_812 = arith.constant 0 : index
    %c0_813 = arith.constant 0 : index
    %736 = vector.load %arg11[%c11_811, %c0_812, %c0_813] : memref<13x32x128xf32, #tpu.memory_space<vmem>>, vector<1x32x128xf32>
    %737 = vector.shape_cast %736 : vector<1x32x128xf32> to vector<32x128xf32>
    %cst_814 = arith.constant dense<0.000000e+00> : vector<64x128xf32>
    %738 = tpu.matmul %735, %737, %cst_814 {dimension_numbers = #tpu.dot_dimension_numbers<[1], [0], [0], [1], [0, 0, 1, 1], [], []>} : vector<64x32xf32>, vector<32x128xf32>, vector<64x128xf32> -> vector<64x128xf32>
    %739 = arith.addf %733, %738 : vector<64x128xf32>
    %c0_815 = arith.constant 0 : index
    %c0_816 = arith.constant 0 : index
    %740 = vector.load %arg5[%c0_815, %c0_816] : memref<64x1xf32, #tpu.memory_space<vmem>>, vector<64x1xf32>
    %741 = vector.broadcast %740 : vector<64x1xf32> to vector<64x128xf32>
    %742 = arith.addf %739, %741 : vector<64x128xf32>
    %cst_817 = arith.constant 0.000000e+00 : f32
    %743 = vector.broadcast %cst_817 : f32 to vector<64x128xf32>
    %744 = arith.maximumf %742, %743 : vector<64x128xf32>
    %c0_818 = arith.constant 0 : index
    %c0_819 = arith.constant 0 : index
    %745 = vector.load %arg12[%c0_818, %c0_819] : memref<128x128xf32, #tpu.memory_space<vmem>>, vector<128x128xf32>
    %c10_820 = arith.constant 10 : index
    %c0_821 = arith.constant 0 : index
    %c0_822 = arith.constant 0 : index
    %746 = vector.load %arg6[%c10_820, %c0_821, %c0_822] : memref<13x128x64xf32, #tpu.memory_space<vmem>>, vector<1x128x64xf32>
    %747 = vector.shape_cast %746 : vector<1x128x64xf32> to vector<128x64xf32>
    %cst_823 = arith.constant dense<0.000000e+00> : vector<128x128xf32>
    %748 = tpu.matmul %747, %744, %cst_823 {dimension_numbers = #tpu.dot_dimension_numbers<[1], [0], [0], [1], [0, 0, 1, 1], [], []>} : vector<128x64xf32>, vector<64x128xf32>, vector<128x128xf32> -> vector<128x128xf32>
    %749 = arith.addf %745, %748 : vector<128x128xf32>
    %c0_824 = arith.constant 0 : index
    %c0_825 = arith.constant 0 : index
    %750 = vector.load %arg12[%c0_824, %c0_825] : memref<128x128xf32, #tpu.memory_space<vmem>>, vector<128x128xf32>
    tpu.vector_store %arg12[%c0_824, %c0_825], %749 {strides = array<i32>} : memref<128x128xf32, #tpu.memory_space<vmem>>, vector<128x128xf32>,
    %c0_826 = arith.constant 0 : index
    %c0_827 = arith.constant 0 : index
    %c0_828 = arith.constant 0 : index
    %751 = vector.load %arg4[%c0_826, %c0_827, %c0_828] : memref<3x64x32xf32, #tpu.memory_space<vmem>>, vector<1x64x32xf32>
    %752 = vector.shape_cast %751 : vector<1x64x32xf32> to vector<64x32xf32>
    %c10_829 = arith.constant 10 : index
    %c0_830 = arith.constant 0 : index
    %c0_831 = arith.constant 0 : index
    %753 = vector.load %arg11[%c10_829, %c0_830, %c0_831] : memref<13x32x128xf32, #tpu.memory_space<vmem>>, vector<1x32x128xf32>
    %754 = vector.shape_cast %753 : vector<1x32x128xf32> to vector<32x128xf32>
    %cst_832 = arith.constant dense<0.000000e+00> : vector<64x128xf32>
    %755 = tpu.matmul %752, %754, %cst_832 {dimension_numbers = #tpu.dot_dimension_numbers<[1], [0], [0], [1], [0, 0, 1, 1], [], []>} : vector<64x32xf32>, vector<32x128xf32>, vector<64x128xf32> -> vector<64x128xf32>
    %c1_833 = arith.constant 1 : index
    %c0_834 = arith.constant 0 : index
    %c0_835 = arith.constant 0 : index
    %756 = vector.load %arg4[%c1_833, %c0_834, %c0_835] : memref<3x64x32xf32, #tpu.memory_space<vmem>>, vector<1x64x32xf32>
    %757 = vector.shape_cast %756 : vector<1x64x32xf32> to vector<64x32xf32>
    %c11_836 = arith.constant 11 : index
    %c0_837 = arith.constant 0 : index
    %c0_838 = arith.constant 0 : index
    %758 = vector.load %arg11[%c11_836, %c0_837, %c0_838] : memref<13x32x128xf32, #tpu.memory_space<vmem>>, vector<1x32x128xf32>
    %759 = vector.shape_cast %758 : vector<1x32x128xf32> to vector<32x128xf32>
    %cst_839 = arith.constant dense<0.000000e+00> : vector<64x128xf32>
    %760 = tpu.matmul %757, %759, %cst_839 {dimension_numbers = #tpu.dot_dimension_numbers<[1], [0], [0], [1], [0, 0, 1, 1], [], []>} : vector<64x32xf32>, vector<32x128xf32>, vector<64x128xf32> -> vector<64x128xf32>
    %761 = arith.addf %755, %760 : vector<64x128xf32>
    %c2_840 = arith.constant 2 : index
    %c0_841 = arith.constant 0 : index
    %c0_842 = arith.constant 0 : index
    %762 = vector.load %arg4[%c2_840, %c0_841, %c0_842] : memref<3x64x32xf32, #tpu.memory_space<vmem>>, vector<1x64x32xf32>
    %763 = vector.shape_cast %762 : vector<1x64x32xf32> to vector<64x32xf32>
    %c12_843 = arith.constant 12 : index
    %c0_844 = arith.constant 0 : index
    %c0_845 = arith.constant 0 : index
    %764 = vector.load %arg11[%c12_843, %c0_844, %c0_845] : memref<13x32x128xf32, #tpu.memory_space<vmem>>, vector<1x32x128xf32>
    %765 = vector.shape_cast %764 : vector<1x32x128xf32> to vector<32x128xf32>
    %cst_846 = arith.constant dense<0.000000e+00> : vector<64x128xf32>
    %766 = tpu.matmul %763, %765, %cst_846 {dimension_numbers = #tpu.dot_dimension_numbers<[1], [0], [0], [1], [0, 0, 1, 1], [], []>} : vector<64x32xf32>, vector<32x128xf32>, vector<64x128xf32> -> vector<64x128xf32>
    %767 = arith.addf %761, %766 : vector<64x128xf32>
    %c0_847 = arith.constant 0 : index
    %c0_848 = arith.constant 0 : index
    %768 = vector.load %arg5[%c0_847, %c0_848] : memref<64x1xf32, #tpu.memory_space<vmem>>, vector<64x1xf32>
    %769 = vector.broadcast %768 : vector<64x1xf32> to vector<64x128xf32>
    %770 = arith.addf %767, %769 : vector<64x128xf32>
    %cst_849 = arith.constant 0.000000e+00 : f32
    %771 = vector.broadcast %cst_849 : f32 to vector<64x128xf32>
    %772 = arith.maximumf %770, %771 : vector<64x128xf32>
    %c0_850 = arith.constant 0 : index
    %c0_851 = arith.constant 0 : index
    %773 = vector.load %arg12[%c0_850, %c0_851] : memref<128x128xf32, #tpu.memory_space<vmem>>, vector<128x128xf32>
    %c11_852 = arith.constant 11 : index
    %c0_853 = arith.constant 0 : index
    %c0_854 = arith.constant 0 : index
    %774 = vector.load %arg6[%c11_852, %c0_853, %c0_854] : memref<13x128x64xf32, #tpu.memory_space<vmem>>, vector<1x128x64xf32>
    %775 = vector.shape_cast %774 : vector<1x128x64xf32> to vector<128x64xf32>
    %cst_855 = arith.constant dense<0.000000e+00> : vector<128x128xf32>
    %776 = tpu.matmul %775, %772, %cst_855 {dimension_numbers = #tpu.dot_dimension_numbers<[1], [0], [0], [1], [0, 0, 1, 1], [], []>} : vector<128x64xf32>, vector<64x128xf32>, vector<128x128xf32> -> vector<128x128xf32>
    %777 = arith.addf %773, %776 : vector<128x128xf32>
    %c0_856 = arith.constant 0 : index
    %c0_857 = arith.constant 0 : index
    %778 = vector.load %arg12[%c0_856, %c0_857] : memref<128x128xf32, #tpu.memory_space<vmem>>, vector<128x128xf32>
    tpu.vector_store %arg12[%c0_856, %c0_857], %777 {strides = array<i32>} : memref<128x128xf32, #tpu.memory_space<vmem>>, vector<128x128xf32>,
    %c0_858 = arith.constant 0 : index
    %c0_859 = arith.constant 0 : index
    %c0_860 = arith.constant 0 : index
    %779 = vector.load %arg4[%c0_858, %c0_859, %c0_860] : memref<3x64x32xf32, #tpu.memory_space<vmem>>, vector<1x64x32xf32>
    %780 = vector.shape_cast %779 : vector<1x64x32xf32> to vector<64x32xf32>
    %c11_861 = arith.constant 11 : index
    %c0_862 = arith.constant 0 : index
    %c0_863 = arith.constant 0 : index
    %781 = vector.load %arg11[%c11_861, %c0_862, %c0_863] : memref<13x32x128xf32, #tpu.memory_space<vmem>>, vector<1x32x128xf32>
    %782 = vector.shape_cast %781 : vector<1x32x128xf32> to vector<32x128xf32>
    %cst_864 = arith.constant dense<0.000000e+00> : vector<64x128xf32>
    %783 = tpu.matmul %780, %782, %cst_864 {dimension_numbers = #tpu.dot_dimension_numbers<[1], [0], [0], [1], [0, 0, 1, 1], [], []>} : vector<64x32xf32>, vector<32x128xf32>, vector<64x128xf32> -> vector<64x128xf32>
    %c1_865 = arith.constant 1 : index
    %c0_866 = arith.constant 0 : index
    %c0_867 = arith.constant 0 : index
    %784 = vector.load %arg4[%c1_865, %c0_866, %c0_867] : memref<3x64x32xf32, #tpu.memory_space<vmem>>, vector<1x64x32xf32>
    %785 = vector.shape_cast %784 : vector<1x64x32xf32> to vector<64x32xf32>
    %c12_868 = arith.constant 12 : index
    %c0_869 = arith.constant 0 : index
    %c0_870 = arith.constant 0 : index
    %786 = vector.load %arg11[%c12_868, %c0_869, %c0_870] : memref<13x32x128xf32, #tpu.memory_space<vmem>>, vector<1x32x128xf32>
    %787 = vector.shape_cast %786 : vector<1x32x128xf32> to vector<32x128xf32>
    %cst_871 = arith.constant dense<0.000000e+00> : vector<64x128xf32>
    %788 = tpu.matmul %785, %787, %cst_871 {dimension_numbers = #tpu.dot_dimension_numbers<[1], [0], [0], [1], [0, 0, 1, 1], [], []>} : vector<64x32xf32>, vector<32x128xf32>, vector<64x128xf32> -> vector<64x128xf32>
    %789 = arith.addf %783, %788 : vector<64x128xf32>
    %c0_872 = arith.constant 0 : index
    %c0_873 = arith.constant 0 : index
    %790 = vector.load %arg5[%c0_872, %c0_873] : memref<64x1xf32, #tpu.memory_space<vmem>>, vector<64x1xf32>
    %791 = vector.broadcast %790 : vector<64x1xf32> to vector<64x128xf32>
    %792 = arith.addf %789, %791 : vector<64x128xf32>
    %cst_874 = arith.constant 0.000000e+00 : f32
    %793 = vector.broadcast %cst_874 : f32 to vector<64x128xf32>
    %794 = arith.maximumf %792, %793 : vector<64x128xf32>
    %c0_875 = arith.constant 0 : index
    %c0_876 = arith.constant 0 : index
    %795 = vector.load %arg12[%c0_875, %c0_876] : memref<128x128xf32, #tpu.memory_space<vmem>>, vector<128x128xf32>
    %c12_877 = arith.constant 12 : index
    %c0_878 = arith.constant 0 : index
    %c0_879 = arith.constant 0 : index
    %796 = vector.load %arg6[%c12_877, %c0_878, %c0_879] : memref<13x128x64xf32, #tpu.memory_space<vmem>>, vector<1x128x64xf32>
    %797 = vector.shape_cast %796 : vector<1x128x64xf32> to vector<128x64xf32>
    %cst_880 = arith.constant dense<0.000000e+00> : vector<128x128xf32>
    %798 = tpu.matmul %797, %794, %cst_880 {dimension_numbers = #tpu.dot_dimension_numbers<[1], [0], [0], [1], [0, 0, 1, 1], [], []>} : vector<128x64xf32>, vector<64x128xf32>, vector<128x128xf32> -> vector<128x128xf32>
    %799 = arith.addf %795, %798 : vector<128x128xf32>
    %c0_881 = arith.constant 0 : index
    %c0_882 = arith.constant 0 : index
    %800 = vector.load %arg12[%c0_881, %c0_882] : memref<128x128xf32, #tpu.memory_space<vmem>>, vector<128x128xf32>
    tpu.vector_store %arg12[%c0_881, %c0_882], %799 {strides = array<i32>} : memref<128x128xf32, #tpu.memory_space<vmem>>, vector<128x128xf32>,
    %c0_883 = arith.constant 0 : index
    %c0_884 = arith.constant 0 : index
    %801 = vector.load %arg12[%c0_883, %c0_884] : memref<128x128xf32, #tpu.memory_space<vmem>>, vector<128x128xf32>
    %cst_885 = arith.constant 0.000000e+00 : f32
    %802 = vector.broadcast %cst_885 : f32 to vector<128x128xf32>
    %803 = arith.maximumf %801, %802 : vector<128x128xf32>
    %c0_886 = arith.constant 0 : index
    %c0_887 = arith.constant 0 : index
    %804 = vector.load %arg8[%c0_886, %c0_887] : memref<1x128xf32, #tpu.memory_space<vmem>>, vector<1x128xf32>
    %cst_888 = arith.constant dense<0.000000e+00> : vector<1x128xf32>
    %805 = tpu.matmul %804, %803, %cst_888 {dimension_numbers = #tpu.dot_dimension_numbers<[1], [0], [0], [1], [0, 0, 1, 1], [], []>} : vector<1x128xf32>, vector<128x128xf32>, vector<1x128xf32> -> vector<1x128xf32>
    %c0_889 = arith.constant 0 : index
    %c0_890 = arith.constant 0 : index
    %806 = vector.load %arg9[%c0_889, %c0_890] : memref<1x1xf32, #tpu.memory_space<vmem>>, vector<1x1xf32>
    %807 = vector.broadcast %806 : vector<1x1xf32> to vector<1x128xf32>
    %808 = arith.addf %805, %807 : vector<1x128xf32>
    %c0_891 = arith.constant 0 : index
    %c0_892 = arith.constant 0 : index
    %809 = vector.load %arg10[%c0_891, %c0_892] : memref<1x128xf32, #tpu.memory_space<vmem>>, vector<1x128xf32>
    tpu.vector_store %arg10[%c0_891, %c0_892], %808 {strides = array<i32>} : memref<1x128xf32, #tpu.memory_space<vmem>>, vector<1x128xf32>,
    return
  }
  func.func @transform_0(%arg0: i32) -> (i32, i32, i32) {
    %c0_i32 = arith.constant 0 : i32
    %c0_i32_0 = arith.constant 0 : i32
    %c0_i32_1 = arith.constant 0 : i32
    return %c0_i32, %c0_i32_0, %arg0 : i32, i32, i32
  }
  func.func @transform_1(%arg0: i32) -> (i32, i32, i32) {
    %c0_i32 = arith.constant 0 : i32
    %c0_i32_0 = arith.constant 0 : i32
    %c0_i32_1 = arith.constant 0 : i32
    %c0_i32_2 = arith.constant 0 : i32
    return %c0_i32, %c0_i32_0, %c0_i32_1 : i32, i32, i32
  }
  func.func @transform_2(%arg0: i32) -> (i32, i32) {
    %c0_i32 = arith.constant 0 : i32
    %c0_i32_0 = arith.constant 0 : i32
    %c0_i32_1 = arith.constant 0 : i32
    return %c0_i32, %c0_i32_0 : i32, i32
  }
  func.func @transform_3(%arg0: i32) -> (i32, i32, i32) {
    %c0_i32 = arith.constant 0 : i32
    %c0_i32_0 = arith.constant 0 : i32
    %c0_i32_1 = arith.constant 0 : i32
    %c0_i32_2 = arith.constant 0 : i32
    return %c0_i32, %c0_i32_0, %c0_i32_1 : i32, i32, i32
  }
  func.func @transform_4(%arg0: i32) -> (i32, i32) {
    %c0_i32 = arith.constant 0 : i32
    %c0_i32_0 = arith.constant 0 : i32
    %c0_i32_1 = arith.constant 0 : i32
    return %c0_i32, %c0_i32_0 : i32, i32
  }
  func.func @transform_5(%arg0: i32) -> (i32, i32, i32) {
    %c0_i32 = arith.constant 0 : i32
    %c0_i32_0 = arith.constant 0 : i32
    %c0_i32_1 = arith.constant 0 : i32
    %c0_i32_2 = arith.constant 0 : i32
    return %c0_i32, %c0_i32_0, %c0_i32_1 : i32, i32, i32
  }
  func.func @transform_6(%arg0: i32) -> (i32, i32) {
    %c0_i32 = arith.constant 0 : i32
    %c0_i32_0 = arith.constant 0 : i32
    %c0_i32_1 = arith.constant 0 : i32
    return %c0_i32, %c0_i32_0 : i32, i32
  }
  func.func @transform_7(%arg0: i32) -> (i32, i32) {
    %c0_i32 = arith.constant 0 : i32
    %c0_i32_0 = arith.constant 0 : i32
    %c0_i32_1 = arith.constant 0 : i32
    return %c0_i32, %c0_i32_0 : i32, i32
  }
  func.func @transform_8(%arg0: i32) -> (i32, i32) {
    %c0_i32 = arith.constant 0 : i32
    %c0_i32_0 = arith.constant 0 : i32
    %c0_i32_1 = arith.constant 0 : i32
    return %c0_i32, %c0_i32_0 : i32, i32
  }
  func.func @transform_9(%arg0: i32) -> (i32, i32) {
    %c0_i32 = arith.constant 0 : i32
    %c0_i32_0 = arith.constant 0 : i32
    return %c0_i32, %arg0 : i32, i32
  }
}

</mosaic_0001>

<bundles_post_ra>
// kernel: big2cnn_pallas.1
= control target key start
LH: loop header
LB: loop body
LE: loop exit
PB: predicated region body
PF: predicated region fallthrough
CT: control target
= control target key end

     0   :  { %vm64_vm0 = vcmask 1043456   ;;  %v21446_v0 = vmov 0   ;;  %vm51_vm1 = vcmask 162816   ;;  %vm7115_vm2 = vcmask 261120   ;;  %s27165_s2 = inlined_call_operand.vmem [shape: f32[32,1], index: 2, kind: input, shape index: {}]   ;;  %s27166_s0 = inlined_call_operand.vmem [shape: f32[13,20,128], index: 0, kind: input, shape index: {}]   ;;  %s27167_s1 = inlined_call_operand.vmem [shape: f32[5,32,20], index: 1, kind: input, shape index: {}]   ;;  %s27168_s4 = inlined_call_operand.vmem [shape: f32[64,1], index: 4, kind: input, shape index: {}]   ;;  %s27169_s8 = inlined_call_operand.<no memory space> [shape: f32[1,1], index: 8, kind: input, shape index: {}]   ;;  %s27170_s3 = inlined_call_operand.vmem [shape: f32[3,64,32], index: 3, kind: input, shape index: {}]   ;;  %s27171_s6 = inlined_call_operand.vmem [shape: f32[128,1], index: 6, kind: input, shape index: {}]   ;;  %s27172_s5 = inlined_call_operand.vmem [shape: f32[13,128,64], index: 5, kind: input, shape index: {}]   ;;  %s27173_s7 = inlined_call_operand.vmem [shape: f32[1,128], index: 7, kind: input, shape index: {}]   ;;  %s27174_s9 = inlined_call_operand.vmem [shape: f32[1,128], index: 9, kind: output, shape index: {}]  }
   0x1   :  { %21445 = vset.pattern.permute.xlu1 %v21446_v0  ;;  %21444 = vset.pattern.permute.xlu0 %v21446_v0  ;;  %v21502_v1 = vld [vmem:[%s27165_s2 + $0x18] sm:$0xff]  ;;  %v21507_v2 = vld [vmem:[%s27165_s2 + $0x10] sm:$0xff]  ;;  %v16711_v3 = vld [vmem:[%s27166_s0 + $0x28] sm:$0xf]  ;;  %vm7470_vm3 = vcmask 523264   ;;  %vm21448_vm4 = vmmov 0  }
   0x2   :  { %387 = vperm.xlu0 %21444, %v21502_v1   ;;  %382 = vperm.xlu1 %21445, %v21507_v2   ;;  %v41_v4 = vld [vmem:[%s27166_s0 + $0x10] sm:$0xf]  ;;  %v21520_v5 = vld [vmem:[%s27166_s0 + $0x20] sm:$0xff]  ;;  %v21525_v6 = vld [vmem:[%s27166_s0 + $0x8] sm:$0xff] }
   0x3   :  { %19438 = vmatprep.subr.msk.mxu0 %vm64_vm0, %v16711_v3  ;;  %19450 = vmatprep.subr.msk.mxu1 %vm64_vm0, %v41_v4  ;;  %v21536_v7 = vld [vmem:[%s27166_s0 + $0x18] sm:$0xff]  ;;  %v21541_v8 = vld [vmem:[%s27166_s0] sm:$0xff]  ;;  %v21562_v11 = vld [vmem:[%s27167_s1 + $0x68] sm:$0xff] }
   0x4   :  { %19439 = vmatpush3.msk.msra.mxu0 %vm64_vm0, %v16711_v3  ;;  %19451 = vmatpush3.msk.msra.mxu1 %vm64_vm0, %v41_v4  ;;  %v21548_v9 = vld [vmem:[%s27167_s1 + $0x60] sm:$0xff]  ;;  %v21567_v12 = vld [vmem:[%s27167_s1 + $0x48] sm:$0xff]  ;;  %v21593_v16 = vld [vmem:[%s27167_s1 + $0x70] sm:$0xff] }
   0x5   :  { %19440 = vmatprep.subr.mxu0 %v21520_v5  ;;  %19452 = vmatprep.subr.mxu1 %v21525_v6  ;;  %v21555_v10 = vld [vmem:[%s27167_s1 + $0x40] sm:$0xff]  ;;  %v21575_v13 = vld [vmem:[%s27165_s2 + $0x8] sm:$0xff]  ;;  %v21598_v17 = vld [vmem:[%s27167_s1 + $0x50] sm:$0xff] }
   0x6   :  { %19441 = vmatpush3.msra.mxu0 %v21520_v5  ;;  %19453 = vmatpush3.msra.mxu1 %v21525_v6  ;;  %v16728_v14 = vld [vmem:[%s27166_s0 + $0x40] sm:$0xf]  ;;  %v16744_v15 = vld [vmem:[%s27166_s0 + $0x28] sm:$0xf]  ;;  %v21607_v18 = vld [vmem:[%s27167_s1 + $0x78] sm:$0xff] }
   0x7   :  { %861 = vperm.xlu0 %21444, %v21502_v1   ;;  %856 = vperm.xlu1 %21445, %v21507_v2   ;;  %v21612_v19 = vld [vmem:[%s27167_s1 + $0x58] sm:$0xff]  ;;  %v21632_v21 = vld [vmem:[%s27165_s2] sm:$0xff]  ;;  %v21639_v22 = vld [vmem:[%s27166_s0 + $0x30] sm:$0xff] }
   0x8   :  { %19442 = vmatprep.subr.mxu0 %v21536_v7  ;;  %19454 = vmatprep.subr.mxu1 %v21541_v8  ;;  %v21621_v20 = vld [vmem:[%s27166_s0 + $0x38] sm:$0xff]  ;;  %v21646_v23 = vld [vmem:[%s27167_s1 + $0x80] sm:$0xff]  ;;  %v21655_v24 = vld [vmem:[%s27167_s1 + $0x88] sm:$0xff] }
   0x9   :  { %19443 = vmatpush3.msra.mxu0 %v21536_v7  ;;  %19444 = vmatprep.mubr.msk.f32.mxu0 %vm51_vm1, %v21548_v9  ;;  %v21663_v25 = vld [vmem:[%s27168_s4 + $0x30] sm:$0xff]  ;;  %v21668_v26 = vld [vmem:[%s27168_s4 + $0x38] sm:$0xff]  ;;  %v16761_v28 = vld [vmem:[%s27166_s0 + $0x40] sm:$0xf] }
   0xa   :  { %19455 = vmatpush3.msra.mxu1 %v21541_v8  ;;  %19456 = vmatprep.mubr.msk.f32.mxu1 %vm51_vm1, %v21555_v10  ;;  %v409_v27 = vld [vmem:[%s27166_s0 + $0x10] sm:$0xf]  ;;  %v21695_v30 = vld [vmem:[%s27167_s1 + $0x98] sm:$0xff]  ;;  %v21710_v31 = vld [vmem:[%s27168_s4 + $0x20] sm:$0xff] }
   0xb   :  { %19445 = vmatmul.mubr.msk.f32.vlgmr.msra.gmra.mxu0 %vm51_vm1, %v21562_v11  ;;  %19457 = vmatmul.mubr.msk.f32.vlgmr.msra.gmra.mxu1 %vm51_vm1, %v21567_v12  ;;  %v21686_v29 = vld [vmem:[%s27167_s1 + $0x90] sm:$0xff]  ;;  %v21715_v32 = vld [vmem:[%s27168_s4 + $0x28] sm:$0xff]  ;;  %v21724_v33 = vld [vmem:[%s27167_s1 + $0x20] sm:$0xff] }
   0xc   :  { %851 = vperm.xlu1 %21445, %v21575_v13   ;;  %377 = vperm.xlu0 %21444, %v21575_v13   ;;  %v21733_v34 = vld [vmem:[%s27167_s1 + $0x28] sm:$0xff]  ;;  %v21741_v35 = vld [vmem:[%s27168_s4 + $0x10] sm:$0xff]  ;;  %v21746_v36 = vld [vmem:[%s27168_s4 + $0x18] sm:$0xff] }
   0xd   :  { %19462 = vmatprep.subr.msk.mxu0 %vm64_vm0, %v16728_v14  ;;  %19474 = vmatprep.subr.msk.mxu1 %vm64_vm0, %v16744_v15  ;;  %v16773_v37 = vld [vmem:[%s27166_s0 + $0x58] sm:$0xf]  ;;  %v16785_v38 = vld [vmem:[%s27166_s0 + $0x28] sm:$0xf]  ;;  %v21764_v39 = vld [vmem:[%s27167_s1 + $0x30] sm:$0xff] }
   0xe   :  { %19447 = vmatprep.mubr.msk.f32.mxu0 %vm51_vm1, %v21593_v16  ;;  %19459 = vmatprep.mubr.msk.f32.mxu1 %vm51_vm1, %v21598_v17  ;;  %v21773_v40 = vld [vmem:[%s27167_s1 + $0x38] sm:$0xff]  ;;  %v21782_v41 = vld [vmem:[%s27166_s0 + $0x50] sm:$0xff]  ;;  %v21793_v42 = vld [vmem:[%s27168_s4] sm:$0xff] }
   0xf   :  { %19463 = vmatpush3.msk.msra.mxu0 %vm64_vm0, %v16728_v14  ;;  %19475 = vmatpush3.msk.msra.mxu1 %vm64_vm0, %v16744_v15  ;;  %v21798_v43 = vld [vmem:[%s27168_s4 + $0x8] sm:$0xff]  ;;  %v883_v45 = vld [vmem:[%s27166_s0 + $0x10] sm:$0xf]  ;;  %v16802_v46 = vld [vmem:[%s27166_s0 + $0x40] sm:$0xf] }
  0x10   :  { %19448 = vmatmul.mubr.msk.f32.gmra.mxu0 %vm51_vm1, %v21607_v18  ;;  %19460 = vmatmul.mubr.msk.f32.gmra.mxu1 %vm51_vm1, %v21612_v19  ;;  %v21805_v44 = vld [vmem:[%s27166_s0 + $0x48] sm:$0xff]  ;;  %v21850_v47 = vld [vmem:[%s27167_s1] sm:$0xff]  ;;  %v16814_v49 = vld [vmem:[%s27166_s0 + $0x58] sm:$0xf] }
  0x11   :  { %19464 = vmatprep.subr.mxu0 %v21621_v20  ;;  %19476 = vmatprep.subr.mxu1 %v21520_v5  ;;  %v21859_v48 = vld [vmem:[%s27167_s1 + $0x8] sm:$0xff]  ;;  %v16826_v50 = vld [vmem:[%s27166_s0 + $0x70] sm:$0xf]  ;;  %v21889_v52 = vld [vmem:[%s27167_s1 + $0x18] sm:$0xff] }
  0x12   :  { %19465 = vmatpush3.msra.mxu0 %v21621_v20  ;;  %19477 = vmatpush3.msra.mxu1 %v21520_v5  ;;  %v21880_v51 = vld [vmem:[%s27167_s1 + $0x10] sm:$0xff]  ;;  %v21898_v53 = vld [vmem:[%s27166_s0 + $0x68] sm:$0xff]  ;;  %v21911_v54 = vld [vmem:[%s27166_s0 + $0x60] sm:$0xff] }
  0x13   :  { %846 = vperm.xlu1 %21445, %v21632_v21   ;;  %372 = vperm.xlu0 %21444, %v21632_v21   ;;  %v16841_v55 = vld [vmem:[%s27166_s0 + $0x40] sm:$0xf]  ;;  %v16834_v56 = vld [vmem:[%s27166_s0 + $0x28] sm:$0xf]  ;;  %v16858_v57 = vld [vmem:[%s27166_s0 + $0x58] sm:$0xf] }
  0x14   :  { %19466 = vmatprep.subr.mxu0 %v21639_v22  ;;  %19478 = vmatprep.subr.mxu1 %v21536_v7  ;;  %v16870_v58 = vld [vmem:[%s27166_s0 + $0x70] sm:$0xf]  ;;  %v16882_v59 = vld [vmem:[%s27166_s0 + $0x88] sm:$0xf]  ;;  %v16897_v60 = vld [vmem:[%s27166_s0 + $0x58] sm:$0xf] }
  0x15   :  { %19467 = vmatpush3.msra.mxu0 %v21639_v22  ;;  %19468 = vmatprep.mubr.msk.f32.mxu0 %vm51_vm1, %v21646_v23  ;;  %v22022_v61 = vld [vmem:[%s27166_s0 + $0x80] sm:$0xff]  ;;  %v22035_v62 = vld [vmem:[%s27166_s0 + $0x78] sm:$0xff]  ;;  %v16914_v0 = vld [vmem:[%s27166_s0 + $0x70] sm:$0xf] }
  0x16   :  { %19479 = vmatpush3.msra.mxu1 %v21536_v7  ;;  %19480 = vmatprep.mubr.msk.f32.mxu1 %vm51_vm1, %v21555_v10  ;;  %v16890_v63 = vld [vmem:[%s27166_s0 + $0x40] sm:$0xf]  ;;  %v16926_v3 = vld [vmem:[%s27166_s0 + $0x88] sm:$0xf]  ;;  %v22216_v14 = vld [vmem:[%s27165_s2 + $0x18] sm:$0xff] }
  0x17   :  { %19469 = vmatmul.mubr.msk.f32.vlgmr.msra.gmra.mxu0 %vm51_vm1, %v21655_v24  ;;  %19481 = vmatmul.mubr.msk.f32.vlgmr.msra.gmra.mxu1 %vm51_vm1, %v21567_v12  ;;  %v16938_v4 = vld [vmem:[%s27166_s0 + $0xa0] sm:$0xf]  ;;  %v16994_v15 = vld [vmem:[%s27166_s0 + $0xb8] sm:$0xf] }
  0x18   :  { %7414 = vperm.xlu1 %21445, %v21663_v25   ;;  %7419 = vperm.xlu0 %21444, %v21668_v26  }
  0x19   :  { %19486 = vmatprep.subr.msk.mxu0 %vm64_vm0, %v409_v27  ;;  %19498 = vmatprep.subr.msk.mxu1 %vm64_vm0, %v16761_v28 }
  0x1a   :  { %19471 = vmatprep.mubr.msk.f32.mxu0 %vm51_vm1, %v21686_v29  ;;  %19483 = vmatprep.mubr.msk.f32.mxu1 %vm51_vm1, %v21598_v17 }
  0x1b   :  { %19487 = vmatpush3.msk.msra.mxu0 %vm64_vm0, %v409_v27  ;;  %19499 = vmatpush3.msk.msra.mxu1 %vm64_vm0, %v16761_v28  ;;  %v22380_v27 = vld [vmem:[%s27167_s1 + $0x80] sm:$0xff]  ;;  %v22387_v28 = vld [vmem:[%s27167_s1 + $0x68] sm:$0xff] }
  0x1c   :  { %19472 = vmatmul.mubr.msk.f32.gmra.mxu0 %vm51_vm1, %v21695_v30  ;;  %19484 = vmatmul.mubr.msk.f32.gmra.mxu1 %vm51_vm1, %v21612_v19 }
  0x1d   :  { %19488 = vmatprep.subr.mxu0 %v21525_v6  ;;  %19500 = vmatprep.subr.mxu1 %v21621_v20 }
  0x1e   :  { %19489 = vmatpush3.msra.mxu0 %v21525_v6  ;;  %19501 = vmatpush3.msra.mxu1 %v21621_v20 }
  0x1f   :  { %7404 = vperm.xlu1 %21445, %v21710_v31   ;;  %7409 = vperm.xlu0 %21444, %v21715_v32  }
  0x20   :  { %19490 = vmatprep.subr.mxu0 %v21541_v8  ;;  %19502 = vmatprep.subr.mxu1 %v21639_v22 }
  0x21   :  { %19491 = vmatpush3.msra.mxu0 %v21541_v8  ;;  %19492 = vmatprep.mubr.msk.f32.mxu0 %vm51_vm1, %v21724_v33 }
  0x22   :  { %19503 = vmatpush3.msra.mxu1 %v21639_v22  ;;  %19504 = vmatprep.mubr.msk.f32.mxu1 %vm51_vm1, %v21548_v9 }
  0x23   :  { %19493 = vmatmul.mubr.msk.f32.vlgmr.msra.gmra.mxu0 %vm51_vm1, %v21733_v34  ;;  %19505 = vmatmul.mubr.msk.f32.vlgmr.msra.gmra.mxu1 %vm51_vm1, %v21562_v11 }
  0x24   :  { %7394 = vperm.xlu1 %21445, %v21741_v35   ;;  %7399 = vperm.xlu0 %21444, %v21746_v36  }
  0x25   :  { %19510 = vmatprep.subr.msk.mxu0 %vm64_vm0, %v16773_v37  ;;  %19522 = vmatprep.subr.msk.mxu1 %vm64_vm0, %v16785_v38 }
  0x26   :  { %19495 = vmatprep.mubr.msk.f32.mxu0 %vm51_vm1, %v21764_v39  ;;  %19507 = vmatprep.mubr.msk.f32.mxu1 %vm51_vm1, %v21593_v16 }
  0x27   :  { %19511 = vmatpush3.msk.msra.mxu0 %vm64_vm0, %v16773_v37  ;;  %19523 = vmatpush3.msk.msra.mxu1 %vm64_vm0, %v16785_v38  ;;  %v22456_v37 = vld [vmem:[%s27167_s1 + $0x20] sm:$0xff] }
  0x28   :  { %19496 = vmatmul.mubr.msk.f32.gmra.mxu0 %vm51_vm1, %v21773_v40  ;;  %19508 = vmatmul.mubr.msk.f32.gmra.mxu1 %vm51_vm1, %v21607_v18  ;;  %v22463_v38 = vld [vmem:[%s27167_s1] sm:$0xff] }
  0x29   :  { %19512 = vmatprep.subr.mxu0 %v21782_v41  ;;  %19524 = vmatprep.subr.mxu1 %v21520_v5 }
  0x2a   :  { %19513 = vmatpush3.msra.mxu0 %v21782_v41  ;;  %19525 = vmatpush3.msra.mxu1 %v21520_v5 }
  0x2b   :  { %7384 = vperm.xlu1 %21445, %v21793_v42   ;;  %7389 = vperm.xlu0 %21444, %v21798_v43  }
  0x2c   :  { %19514 = vmatprep.subr.mxu0 %v21805_v44  ;;  %19526 = vmatprep.subr.mxu1 %v21536_v7 }
  0x2d   :  { %19515 = vmatpush3.msra.mxu0 %v21805_v44  ;;  %19516 = vmatprep.mubr.msk.f32.mxu0 %vm51_vm1, %v21646_v23 }
  0x2e   :  { %19527 = vmatpush3.msra.mxu1 %v21536_v7  ;;  %19528 = vmatprep.mubr.msk.f32.mxu1 %vm51_vm1, %v21724_v33 }
  0x2f   :  { %19517 = vmatmul.mubr.msk.f32.vlgmr.msra.gmra.mxu0 %vm51_vm1, %v21655_v24  ;;  %19529 = vmatmul.mubr.msk.f32.vlgmr.msra.gmra.mxu1 %vm51_vm1, %v21733_v34 }
  0x30   :  { %1441 = vperm.xlu1 %21445, %v21507_v2   ;;  %1446 = vperm.xlu0 %21444, %v21502_v1  }
  0x31   :  { %19534 = vmatprep.subr.msk.mxu0 %vm64_vm0, %v883_v45  ;;  %19546 = vmatprep.subr.msk.mxu1 %vm64_vm0, %v16802_v46 }
  0x32   :  { %19519 = vmatprep.mubr.msk.f32.mxu0 %vm51_vm1, %v21686_v29  ;;  %19531 = vmatprep.mubr.msk.f32.mxu1 %vm51_vm1, %v21764_v39 }
  0x33   :  { %19535 = vmatpush3.msk.msra.mxu0 %vm64_vm0, %v883_v45  ;;  %19547 = vmatpush3.msk.msra.mxu1 %vm64_vm0, %v16802_v46  ;;  %v22506_v45 = vld [vmem:[%s27167_s1 + $0x10] sm:$0xff] }
  0x34   :  { %19520 = vmatmul.mubr.msk.f32.gmra.mxu0 %vm51_vm1, %v21695_v30  ;;  %19532 = vmatmul.mubr.msk.f32.gmra.mxu1 %vm51_vm1, %v21773_v40 }
  0x35   :  { %19536 = vmatprep.subr.mxu0 %v21525_v6  ;;  %19548 = vmatprep.subr.mxu1 %v21621_v20 }
  0x36   :  { %19537 = vmatpush3.msra.mxu0 %v21525_v6  ;;  %19549 = vmatpush3.msra.mxu1 %v21621_v20  ;;  %v16946_v6 = vld [vmem:[%s27166_s0 + $0x58] sm:$0xf] }
  0x37   :  { %1431 = vperm.xlu1 %21445, %v21632_v21   ;;  %1436 = vperm.xlu0 %21444, %v21575_v13  }
  0x38   :  { %19538 = vmatprep.subr.mxu0 %v21541_v8  ;;  %19550 = vmatprep.subr.mxu1 %v21639_v22 }
  0x39   :  { %19539 = vmatpush3.msra.mxu0 %v21541_v8  ;;  %19540 = vmatprep.mubr.msk.f32.mxu0 %vm51_vm1, %v21850_v47  ;;  %v16982_v8 = vld [vmem:[%s27166_s0 + $0xa0] sm:$0xf] }
  0x3a   :  { %19551 = vmatpush3.msra.mxu1 %v21639_v22  ;;  %19552 = vmatprep.mubr.msk.f32.mxu1 %vm51_vm1, %v21555_v10 }
  0x3b   :  { %19541 = vmatmul.mubr.msk.f32.vlgmr.msra.gmra.mxu0 %vm51_vm1, %v21859_v48  ;;  %19553 = vmatmul.mubr.msk.f32.vlgmr.msra.gmra.mxu1 %vm51_vm1, %v21567_v12 }
  0x3c   :  { %8167 = vperm.xlu1 %21445, %v21663_v25   ;;  %8172 = vperm.xlu0 %21444, %v21668_v26  }
  0x3d   :  { %19558 = vmatprep.subr.msk.mxu0 %vm64_vm0, %v16814_v49  ;;  %19570 = vmatprep.subr.msk.mxu1 %vm64_vm0, %v16826_v50 }
  0x3e   :  { %19543 = vmatprep.mubr.msk.f32.mxu0 %vm51_vm1, %v21880_v51  ;;  %19555 = vmatprep.mubr.msk.f32.mxu1 %vm51_vm1, %v21598_v17 }
  0x3f   :  { %19559 = vmatpush3.msk.msra.mxu0 %vm64_vm0, %v16814_v49  ;;  %19571 = vmatpush3.msk.msra.mxu1 %vm64_vm0, %v16826_v50  ;;  %v22524_v49 = vld [vmem:[%s27167_s1 + $0x18] sm:$0xff] }
  0x40   :  { %19544 = vmatmul.mubr.msk.f32.gmra.mxu0 %vm51_vm1, %v21889_v52  ;;  %19556 = vmatmul.mubr.msk.f32.gmra.mxu1 %vm51_vm1, %v21612_v19 }
  0x41   :  { %19560 = vmatprep.subr.mxu0 %v21782_v41  ;;  %19572 = vmatprep.subr.mxu1 %v21898_v53 }
  0x42   :  { %19561 = vmatpush3.msra.mxu0 %v21782_v41  ;;  %19573 = vmatpush3.msra.mxu1 %v21898_v53 }
  0x43   :  { %8157 = vperm.xlu1 %21445, %v21710_v31   ;;  %8162 = vperm.xlu0 %21444, %v21715_v32  }
  0x44   :  { %19562 = vmatprep.subr.mxu0 %v21805_v44  ;;  %19574 = vmatprep.subr.mxu1 %v21911_v54 }
  0x45   :  { %19563 = vmatpush3.msra.mxu0 %v21805_v44  ;;  %19564 = vmatprep.mubr.msk.f32.mxu0 %vm51_vm1, %v21548_v9 }
  0x46   :  { %19575 = vmatpush3.msra.mxu1 %v21911_v54  ;;  %19576 = vmatprep.mubr.msk.f32.mxu1 %vm51_vm1, %v21646_v23 }
  0x47   :  { %19565 = vmatmul.mubr.msk.f32.vlgmr.msra.gmra.mxu0 %vm51_vm1, %v21562_v11  ;;  %19577 = vmatmul.mubr.msk.f32.vlgmr.msra.gmra.mxu1 %vm51_vm1, %v21655_v24 }
  0x48   :  { %8147 = vperm.xlu1 %21445, %v21741_v35   ;;  %8152 = vperm.xlu0 %21444, %v21746_v36  }
  0x49   :  { %19582 = vmatprep.subr.msk.mxu0 %vm64_vm0, %v16841_v55  ;;  %19594 = vmatprep.subr.msk.mxu1 %vm64_vm0, %v16834_v56 }
  0x4a   :  { %19567 = vmatprep.mubr.msk.f32.mxu0 %vm51_vm1, %v21593_v16  ;;  %19579 = vmatprep.mubr.msk.f32.mxu1 %vm51_vm1, %v21686_v29 }
  0x4b   :  { %19583 = vmatpush3.msk.msra.mxu0 %vm64_vm0, %v16841_v55  ;;  %19595 = vmatpush3.msk.msra.mxu1 %vm64_vm0, %v16834_v56 }
  0x4c   :  { %19568 = vmatmul.mubr.msk.f32.gmra.mxu0 %vm51_vm1, %v21607_v18  ;;  %19580 = vmatmul.mubr.msk.f32.gmra.mxu1 %vm51_vm1, %v21695_v30 }
  0x4d   :  { %19584 = vmatprep.subr.mxu0 %v21621_v20  ;;  %19596 = vmatprep.subr.mxu1 %v21520_v5 }
  0x4e   :  { %19585 = vmatpush3.msra.mxu0 %v21621_v20  ;;  %19597 = vmatpush3.msra.mxu1 %v21520_v5  ;;  %v22108_v5 = vld [vmem:[%s27166_s0 + $0x98] sm:$0xff] }
  0x4f   :  { %8137 = vperm.xlu1 %21445, %v21793_v42   ;;  %8142 = vperm.xlu0 %21444, %v21798_v43  }
  0x50   :  { %19586 = vmatprep.subr.mxu0 %v21639_v22  ;;  %19598 = vmatprep.subr.mxu1 %v21536_v7 }
  0x51   :  { %19587 = vmatpush3.msra.mxu0 %v21639_v22  ;;  %19588 = vmatprep.mubr.msk.f32.mxu0 %vm51_vm1, %v21724_v33 }
  0x52   :  { %19599 = vmatpush3.msra.mxu1 %v21536_v7  ;;  %19600 = vmatprep.mubr.msk.f32.mxu1 %vm51_vm1, %v21850_v47  ;;  %v16970_v7 = vld [vmem:[%s27166_s0 + $0x88] sm:$0xf] }
  0x53   :  { %19589 = vmatmul.mubr.msk.f32.vlgmr.msra.gmra.mxu0 %vm51_vm1, %v21733_v34  ;;  %19601 = vmatmul.mubr.msk.f32.vlgmr.msra.gmra.mxu1 %vm51_vm1, %v21859_v48 }
  0x54   :  { %2026 = vperm.xlu1 %21445, %v21507_v2   ;;  %2031 = vperm.xlu0 %21444, %v21502_v1  }
  0x55   :  { %19606 = vmatprep.subr.msk.mxu0 %vm64_vm0, %v16858_v57  ;;  %19618 = vmatprep.subr.msk.mxu1 %vm64_vm0, %v16870_v58 }
  0x56   :  { %19591 = vmatprep.mubr.msk.f32.mxu0 %vm51_vm1, %v21764_v39  ;;  %19603 = vmatprep.mubr.msk.f32.mxu1 %vm51_vm1, %v21880_v51 }
  0x57   :  { %19607 = vmatpush3.msk.msra.mxu0 %vm64_vm0, %v16858_v57  ;;  %19619 = vmatpush3.msk.msra.mxu1 %vm64_vm0, %v16870_v58  ;;  %v22572_v58 = vld [vmem:[%s27168_s4 + $0x10] sm:$0xff] }
  0x58   :  { %19592 = vmatmul.mubr.msk.f32.gmra.mxu0 %vm51_vm1, %v21773_v40  ;;  %19604 = vmatmul.mubr.msk.f32.gmra.mxu1 %vm51_vm1, %v21889_v52 }
  0x59   :  { %19608 = vmatprep.subr.mxu0 %v21782_v41  ;;  %19620 = vmatprep.subr.mxu1 %v21898_v53 }
  0x5a   :  { %19609 = vmatpush3.msra.mxu0 %v21782_v41  ;;  %19621 = vmatpush3.msra.mxu1 %v21898_v53 }
  0x5b   :  { %2016 = vperm.xlu1 %21445, %v21632_v21   ;;  %2021 = vperm.xlu0 %21444, %v21575_v13  }
  0x5c   :  { %19610 = vmatprep.subr.mxu0 %v21805_v44  ;;  %19622 = vmatprep.subr.mxu1 %v21911_v54 }
  0x5d   :  { %19611 = vmatpush3.msra.mxu0 %v21805_v44  ;;  %19612 = vmatprep.mubr.msk.f32.mxu0 %vm51_vm1, %v21555_v10 }
  0x5e   :  { %19623 = vmatpush3.msra.mxu1 %v21911_v54  ;;  %19624 = vmatprep.mubr.msk.f32.mxu1 %vm51_vm1, %v21548_v9 }
  0x5f   :  { %19613 = vmatmul.mubr.msk.f32.vlgmr.msra.gmra.mxu0 %vm51_vm1, %v21567_v12  ;;  %19625 = vmatmul.mubr.msk.f32.vlgmr.msra.gmra.mxu1 %vm51_vm1, %v21562_v11 }
  0x60   :  { %8920 = vperm.xlu1 %21445, %v21663_v25   ;;  %8925 = vperm.xlu0 %21444, %v21668_v26  }
  0x61   :  { %19630 = vmatprep.subr.msk.mxu0 %vm64_vm0, %v16882_v59  ;;  %19642 = vmatprep.subr.msk.mxu1 %vm64_vm0, %v16897_v60 }
  0x62   :  { %19615 = vmatprep.mubr.msk.f32.mxu0 %vm51_vm1, %v21598_v17  ;;  %19627 = vmatprep.mubr.msk.f32.mxu1 %vm51_vm1, %v21593_v16 }
  0x63   :  { %19631 = vmatpush3.msk.msra.mxu0 %vm64_vm0, %v16882_v59  ;;  %19643 = vmatpush3.msk.msra.mxu1 %vm64_vm0, %v16897_v60  ;;  %v22577_v59 = vld [vmem:[%s27168_s4 + $0x18] sm:$0xff]  ;;  %v17106_v60 = vld [vmem:[%s27166_s0 + $0xe8] sm:$0xf] }
  0x64   :  { %19616 = vmatmul.mubr.msk.f32.gmra.mxu0 %vm51_vm1, %v21612_v19  ;;  %19628 = vmatmul.mubr.msk.f32.gmra.mxu1 %vm51_vm1, %v21607_v18 }
  0x65   :  { %19632 = vmatprep.subr.mxu0 %v22022_v61  ;;  %19644 = vmatprep.subr.mxu1 %v21782_v41 }
  0x66   :  { %19633 = vmatpush3.msra.mxu0 %v22022_v61  ;;  %19645 = vmatpush3.msra.mxu1 %v21782_v41 }
  0x67   :  { %8910 = vperm.xlu1 %21445, %v21710_v31   ;;  %8915 = vperm.xlu0 %21444, %v21715_v32  }
  0x68   :  { %19634 = vmatprep.subr.mxu0 %v22035_v62  ;;  %19646 = vmatprep.subr.mxu1 %v21805_v44 }
  0x69   :  { %19635 = vmatpush3.msra.mxu0 %v22035_v62  ;;  %19636 = vmatprep.mubr.msk.f32.mxu0 %vm51_vm1, %v21646_v23 }
  0x6a   :  { %19647 = vmatpush3.msra.mxu1 %v21805_v44  ;;  %19648 = vmatprep.mubr.msk.f32.mxu1 %vm51_vm1, %v21724_v33 }
  0x6b   :  { %19637 = vmatmul.mubr.msk.f32.vlgmr.msra.gmra.mxu0 %vm51_vm1, %v21655_v24  ;;  %19649 = vmatmul.mubr.msk.f32.vlgmr.msra.gmra.mxu1 %vm51_vm1, %v21733_v34 }
  0x6c   :  { %8900 = vperm.xlu1 %21445, %v21741_v35   ;;  %8905 = vperm.xlu0 %21444, %v21746_v36  }
  0x6d   :  { %19654 = vmatprep.subr.msk.mxu0 %vm64_vm0, %v16890_v63  ;;  %19666 = vmatprep.subr.msk.mxu1 %vm64_vm0, %v16914_v0 }
  0x6e   :  { %19639 = vmatprep.mubr.msk.f32.mxu0 %vm51_vm1, %v21686_v29  ;;  %19651 = vmatprep.mubr.msk.f32.mxu1 %vm51_vm1, %v21764_v39 }
  0x6f   :  { %19655 = vmatpush3.msk.msra.mxu0 %vm64_vm0, %v16890_v63  ;;  %19667 = vmatpush3.msk.msra.mxu1 %vm64_vm0, %v16914_v0 }
  0x70   :  { %19640 = vmatmul.mubr.msk.f32.gmra.mxu0 %vm51_vm1, %v21695_v30  ;;  %19652 = vmatmul.mubr.msk.f32.gmra.mxu1 %vm51_vm1, %v21773_v40 }
  0x71   :  { %19656 = vmatprep.subr.mxu0 %v21621_v20  ;;  %19668 = vmatprep.subr.mxu1 %v21898_v53 }
  0x72   :  { %19657 = vmatpush3.msra.mxu0 %v21621_v20  ;;  %19669 = vmatpush3.msra.mxu1 %v21898_v53  ;;  %v17038_v20 = vld [vmem:[%s27166_s0 + $0xb8] sm:$0xf] }
  0x73   :  { %8890 = vperm.xlu1 %21445, %v21793_v42   ;;  %8895 = vperm.xlu0 %21444, %v21798_v43  }
  0x74   :  { %19658 = vmatprep.subr.mxu0 %v21639_v22  ;;  %19670 = vmatprep.subr.mxu1 %v21911_v54 }
  0x75   :  { %19659 = vmatpush3.msra.mxu0 %v21639_v22  ;;  %19660 = vmatprep.mubr.msk.f32.mxu0 %vm51_vm1, %v21850_v47  ;;  %v22335_v22 = vld [vmem:[%s27167_s1 + $0x50] sm:$0xff] }
  0x76   :  { %19671 = vmatpush3.msra.mxu1 %v21911_v54  ;;  %19672 = vmatprep.mubr.msk.f32.mxu1 %vm51_vm1, %v21555_v10 }
  0x77   :  { %19661 = vmatmul.mubr.msk.f32.vlgmr.msra.gmra.mxu0 %vm51_vm1, %v21859_v48  ;;  %19673 = vmatmul.mubr.msk.f32.vlgmr.msra.gmra.mxu1 %vm51_vm1, %v21567_v12 }
  0x78   :  { %2611 = vperm.xlu1 %21445, %v21507_v2   ;;  %2616 = vperm.xlu0 %21444, %v21502_v1   ;;  %v22121_v1 = vld [vmem:[%s27166_s0 + $0x90] sm:$0xff] }
  0x79   :  { %19678 = vmatprep.subr.msk.mxu0 %vm64_vm0, %v16926_v3  ;;  %19690 = vmatprep.subr.msk.mxu1 %vm64_vm0, %v16938_v4  ;;  %v16953_v2 = vld [vmem:[%s27166_s0 + $0x70] sm:$0xf] }
  0x7a   :  { %19663 = vmatprep.mubr.msk.f32.mxu0 %vm51_vm1, %v21880_v51  ;;  %19675 = vmatprep.mubr.msk.f32.mxu1 %vm51_vm1, %v21598_v17 }
  0x7b   :  { %19679 = vmatpush3.msk.msra.mxu0 %vm64_vm0, %v16926_v3  ;;  %19691 = vmatpush3.msk.msra.mxu1 %vm64_vm0, %v16938_v4  ;;  %v22611_v4 = vld [vmem:[%s27166_s0 + $0xe0] sm:$0xff] }
  0x7c   :  { %19664 = vmatmul.mubr.msk.f32.gmra.mxu0 %vm51_vm1, %v21889_v52  ;;  %19676 = vmatmul.mubr.msk.f32.gmra.mxu1 %vm51_vm1, %v21612_v19 }
  0x7d   :  { %19680 = vmatprep.subr.mxu0 %v22022_v61  ;;  %19692 = vmatprep.subr.mxu1 %v22108_v5 }
  0x7e   :  { %19681 = vmatpush3.msra.mxu0 %v22022_v61  ;;  %19693 = vmatpush3.msra.mxu1 %v22108_v5 }
  0x7f   :  { %2601 = vperm.xlu1 %21445, %v21632_v21   ;;  %2606 = vperm.xlu0 %21444, %v21575_v13   ;;  %v22211_v13 = vld [vmem:[%s27165_s2 + $0x10] sm:$0xff] }
  0x80   :  { %19682 = vmatprep.subr.mxu0 %v22035_v62  ;;  %19694 = vmatprep.subr.mxu1 %v22121_v1 }
  0x81   :  { %19683 = vmatpush3.msra.mxu0 %v22035_v62  ;;  %19684 = vmatprep.mubr.msk.f32.mxu0 %vm51_vm1, %v21548_v9 }
  0x82   :  { %19695 = vmatpush3.msra.mxu1 %v22121_v1  ;;  %19696 = vmatprep.mubr.msk.f32.mxu1 %vm51_vm1, %v21646_v23 }
  0x83   :  { %19685 = vmatmul.mubr.msk.f32.vlgmr.msra.gmra.mxu0 %vm51_vm1, %v21562_v11  ;;  %19697 = vmatmul.mubr.msk.f32.vlgmr.msra.gmra.mxu1 %vm51_vm1, %v21655_v24 }
  0x84   :  { %9673 = vperm.xlu1 %21445, %v21663_v25   ;;  %9678 = vperm.xlu0 %21444, %v21668_v26  }
  0x85   :  { %19702 = vmatprep.subr.msk.mxu0 %vm64_vm0, %v16953_v2  ;;  %19714 = vmatprep.subr.msk.mxu1 %vm64_vm0, %v16946_v6 }
  0x86   :  { %19687 = vmatprep.mubr.msk.f32.mxu0 %vm51_vm1, %v21593_v16  ;;  %19699 = vmatprep.mubr.msk.f32.mxu1 %vm51_vm1, %v21686_v29 }
  0x87   :  { %19703 = vmatpush3.msk.msra.mxu0 %vm64_vm0, %v16953_v2  ;;  %19715 = vmatpush3.msk.msra.mxu1 %vm64_vm0, %v16946_v6  ;;  %v22622_v2 = vld [vmem:[%s27168_s4] sm:$0xff]  ;;  %v22627_v6 = vld [vmem:[%s27168_s4 + $0x8] sm:$0xff] }
  0x88   :  { %19688 = vmatmul.mubr.msk.f32.gmra.mxu0 %vm51_vm1, %v21607_v18  ;;  %19700 = vmatmul.mubr.msk.f32.gmra.mxu1 %vm51_vm1, %v21695_v30 }
  0x89   :  { %19704 = vmatprep.subr.mxu0 %v21898_v53  ;;  %19716 = vmatprep.subr.mxu1 %v21782_v41 }
  0x8a   :  { %19705 = vmatpush3.msra.mxu0 %v21898_v53  ;;  %19717 = vmatpush3.msra.mxu1 %v21782_v41  ;;  %v22483_v41 = vld [vmem:[%s27168_s4 + $0x38] sm:$0xff] }
  0x8b   :  { %9663 = vperm.xlu1 %21445, %v21710_v31   ;;  %9668 = vperm.xlu0 %21444, %v21715_v32  }
  0x8c   :  { %19706 = vmatprep.subr.mxu0 %v21911_v54  ;;  %19718 = vmatprep.subr.mxu1 %v21805_v44 }
  0x8d   :  { %19707 = vmatpush3.msra.mxu0 %v21911_v54  ;;  %19708 = vmatprep.mubr.msk.f32.mxu0 %vm51_vm1, %v21724_v33 }
  0x8e   :  { %19719 = vmatpush3.msra.mxu1 %v21805_v44  ;;  %19720 = vmatprep.mubr.msk.f32.mxu1 %vm51_vm1, %v21850_v47  ;;  %v22501_v44 = vld [vmem:[%s27167_s1 + $0x30] sm:$0xff] }
  0x8f   :  { %19709 = vmatmul.mubr.msk.f32.vlgmr.msra.gmra.mxu0 %vm51_vm1, %v21733_v34  ;;  %19721 = vmatmul.mubr.msk.f32.vlgmr.msra.gmra.mxu1 %vm51_vm1, %v21859_v48 }
  0x90   :  { %9653 = vperm.xlu1 %21445, %v21741_v35   ;;  %9658 = vperm.xlu0 %21444, %v21746_v36  }
  0x91   :  { %19726 = vmatprep.subr.msk.mxu0 %vm64_vm0, %v16970_v7  ;;  %19738 = vmatprep.subr.msk.mxu1 %vm64_vm0, %v16982_v8 }
  0x92   :  { %19711 = vmatprep.mubr.msk.f32.mxu0 %vm51_vm1, %v21764_v39  ;;  %19723 = vmatprep.mubr.msk.f32.mxu1 %vm51_vm1, %v21880_v51 }
  0x93   :  { %19727 = vmatpush3.msk.msra.mxu0 %vm64_vm0, %v16970_v7  ;;  %19739 = vmatpush3.msk.msra.mxu1 %vm64_vm0, %v16982_v8 }
  0x94   :  { %19712 = vmatmul.mubr.msk.f32.gmra.mxu0 %vm51_vm1, %v21773_v40  ;;  %19724 = vmatmul.mubr.msk.f32.gmra.mxu1 %vm51_vm1, %v21889_v52 }
  0x95   :  { %19728 = vmatprep.subr.mxu0 %v22022_v61  ;;  %19740 = vmatprep.subr.mxu1 %v22108_v5 }
  0x96   :  { %19729 = vmatpush3.msra.mxu0 %v22022_v61  ;;  %19741 = vmatpush3.msra.mxu1 %v22108_v5 }
  0x97   :  { %9643 = vperm.xlu1 %21445, %v21793_v42   ;;  %9648 = vperm.xlu0 %21444, %v21798_v43  }
  0x98   :  { %19730 = vmatprep.subr.mxu0 %v22035_v62  ;;  %19742 = vmatprep.subr.mxu1 %v22121_v1 }
  0x99   :  { %19731 = vmatpush3.msra.mxu0 %v22035_v62  ;;  %19732 = vmatprep.mubr.msk.f32.mxu0 %vm51_vm1, %v21555_v10  ;;  %v17009_v10 = vld [vmem:[%s27166_s0 + $0x88] sm:$0xf] }
  0x9a   :  { %19743 = vmatpush3.msra.mxu1 %v22121_v1  ;;  %19744 = vmatprep.mubr.msk.f32.mxu1 %vm51_vm1, %v21548_v9  ;;  %v22242_v9 = vld [vmem:[%s27166_s0 + $0xb0] sm:$0xff] }
  0x9b   :  { %19733 = vmatmul.mubr.msk.f32.vlgmr.msra.gmra.mxu0 %vm51_vm1, %v21567_v12  ;;  %19745 = vmatmul.mubr.msk.f32.vlgmr.msra.gmra.mxu1 %vm51_vm1, %v21562_v11  ;;  %v22253_v11 = vld [vmem:[%s27165_s2 + $0x8] sm:$0xff] }
  0x9c   :  { %3196 = vperm.xlu1 %21445, %v22211_v13   ;;  %3201 = vperm.xlu0 %21444, %v22216_v14   ;;  %v22260_v12 = vld [vmem:[%s27166_s0 + $0xa8] sm:$0xff] }
  0x9d   :  { %19750 = vmatprep.subr.msk.mxu0 %vm64_vm0, %v16994_v15  ;;  %19762 = vmatprep.subr.msk.mxu1 %vm64_vm0, %v17009_v10 }
  0x9e   :  { %19735 = vmatprep.mubr.msk.f32.mxu0 %vm51_vm1, %v21598_v17  ;;  %19747 = vmatprep.mubr.msk.f32.mxu1 %vm51_vm1, %v21593_v16  ;;  %v17002_v16 = vld [vmem:[%s27166_s0 + $0x70] sm:$0xf]  ;;  %v17026_v17 = vld [vmem:[%s27166_s0 + $0xa0] sm:$0xf] }
  0x9f   :  { %19751 = vmatpush3.msk.msra.mxu0 %vm64_vm0, %v16994_v15  ;;  %19763 = vmatpush3.msk.msra.mxu1 %vm64_vm0, %v17009_v10  ;;  %v22638_v15 = vld [vmem:[%s27166_s0 + $0xd8] sm:$0xff] }
  0xa0   :  { %19736 = vmatmul.mubr.msk.f32.gmra.mxu0 %vm51_vm1, %v21612_v19  ;;  %19748 = vmatmul.mubr.msk.f32.gmra.mxu1 %vm51_vm1, %v21607_v18  ;;  %v22307_v18 = vld [vmem:[%s27167_s1 + $0x40] sm:$0xff]  ;;  %v22314_v19 = vld [vmem:[%s27167_s1 + $0x48] sm:$0xff] }
  0xa1   :  { %19752 = vmatprep.subr.mxu0 %v22242_v9  ;;  %19764 = vmatprep.subr.mxu1 %v22022_v61 }
  0xa2   :  { %19753 = vmatpush3.msra.mxu0 %v22242_v9  ;;  %19765 = vmatpush3.msra.mxu1 %v22022_v61 }
  0xa3   :  { %3186 = vperm.xlu1 %21445, %v21632_v21   ;;  %3191 = vperm.xlu0 %21444, %v22253_v11   ;;  %v17050_v21 = vld [vmem:[%s27166_s0 + $0xd0] sm:$0xf] }
  0xa4   :  { %19754 = vmatprep.subr.mxu0 %v22260_v12  ;;  %19766 = vmatprep.subr.mxu1 %v22035_v62 }
  0xa5   :  { %19755 = vmatpush3.msra.mxu0 %v22260_v12  ;;  %19756 = vmatprep.mubr.msk.f32.mxu0 %vm51_vm1, %v21646_v23  ;;  %v22344_v23 = vld [vmem:[%s27167_s1 + $0x58] sm:$0xff] }
  0xa6   :  { %19767 = vmatpush3.msra.mxu1 %v22035_v62  ;;  %19768 = vmatprep.mubr.msk.f32.mxu1 %vm51_vm1, %v21724_v33  ;;  %v22418_v33 = vld [vmem:[%s27167_s1 + $0x90] sm:$0xff] }
  0xa7   :  { %19757 = vmatmul.mubr.msk.f32.vlgmr.msra.gmra.mxu0 %vm51_vm1, %v21655_v24  ;;  %19769 = vmatmul.mubr.msk.f32.vlgmr.msra.gmra.mxu1 %vm51_vm1, %v21733_v34  ;;  %v22353_v24 = vld [vmem:[%s27166_s0 + $0xc8] sm:$0xff]  ;;  %v22427_v34 = vld [vmem:[%s27167_s1 + $0x78] sm:$0xff] }
  0xa8   :  { %10426 = vperm.xlu1 %21445, %v21663_v25   ;;  %10431 = vperm.xlu0 %21444, %v21668_v26   ;;  %v22366_v25 = vld [vmem:[%s27166_s0 + $0xc0] sm:$0xff] }
  0xa9   :  { %19774 = vmatprep.subr.msk.mxu0 %vm64_vm0, %v17002_v16  ;;  %19786 = vmatprep.subr.msk.mxu1 %vm64_vm0, %v17026_v17  ;;  %v22373_v26 = vld [vmem:[%s27167_s1 + $0x60] sm:$0xff] }
  0xaa   :  { %19759 = vmatprep.mubr.msk.f32.mxu0 %vm51_vm1, %v21686_v29  ;;  %19771 = vmatprep.mubr.msk.f32.mxu1 %vm51_vm1, %v21764_v39  ;;  %v22392_v29 = vld [vmem:[%s27167_s1 + $0x88] sm:$0xff] }
  0xab   :  { %19775 = vmatpush3.msk.msra.mxu0 %vm64_vm0, %v17002_v16  ;;  %19787 = vmatpush3.msk.msra.mxu1 %vm64_vm0, %v17026_v17  ;;  %v22470_v39 = vld [vmem:[%s27167_s1 + $0x28] sm:$0xff]  ;;  %v17114_v17 = vld [vmem:[%s27166_s0 + $0xa0] sm:$0xf] }
  0xac   :  { %19760 = vmatmul.mubr.msk.f32.gmra.mxu0 %vm51_vm1, %v21695_v30  ;;  %19772 = vmatmul.mubr.msk.f32.gmra.mxu1 %vm51_vm1, %v21773_v40  ;;  %v17065_v30 = vld [vmem:[%s27166_s0 + $0xa0] sm:$0xf]  ;;  %v22478_v40 = vld [vmem:[%s27168_s4 + $0x30] sm:$0xff] }
  0xad   :  { %19776 = vmatprep.subr.mxu0 %v21898_v53  ;;  %19788 = vmatprep.subr.mxu1 %v22108_v5 }
  0xae   :  { %19777 = vmatpush3.msra.mxu0 %v21898_v53  ;;  %19789 = vmatpush3.msra.mxu1 %v22108_v5  ;;  %v22548_v53 = vld [vmem:[%s27168_s4 + $0x28] sm:$0xff] }
  0xaf   :  { %10416 = vperm.xlu1 %21445, %v21710_v31   ;;  %10421 = vperm.xlu0 %21444, %v21715_v32   ;;  %v17058_v31 = vld [vmem:[%s27166_s0 + $0x88] sm:$0xf]  ;;  %v22413_v32 = vld [vmem:[%s27167_s1 + $0x70] sm:$0xff] }
  0xb0   :  { %19778 = vmatprep.subr.mxu0 %v21911_v54  ;;  %19790 = vmatprep.subr.mxu1 %v22121_v1 }
  0xb1   :  { %19779 = vmatpush3.msra.mxu0 %v21911_v54  ;;  %19780 = vmatprep.mubr.msk.f32.mxu0 %vm51_vm1, %v21850_v47 }
  0xb2   :  { %19791 = vmatpush3.msra.mxu1 %v22121_v1  ;;  %19792 = vmatprep.mubr.msk.f32.mxu1 %vm51_vm1, %v22307_v18 }
  0xb3   :  { %19781 = vmatmul.mubr.msk.f32.vlgmr.msra.gmra.mxu0 %vm51_vm1, %v21859_v48  ;;  %19793 = vmatmul.mubr.msk.f32.vlgmr.msra.gmra.mxu1 %vm51_vm1, %v22314_v19 }
  0xb4   :  { %10406 = vperm.xlu1 %21445, %v21741_v35   ;;  %10411 = vperm.xlu0 %21444, %v21746_v36   ;;  %v22432_v35 = vld [vmem:[%s27167_s1 + $0x98] sm:$0xff]  ;;  %v22447_v36 = vld [vmem:[%s27165_s2] sm:$0xff] }
  0xb5   :  { %19798 = vmatprep.subr.msk.mxu0 %vm64_vm0, %v17038_v20  ;;  %19810 = vmatprep.subr.msk.mxu1 %vm64_vm0, %v17050_v21 }
  0xb6   :  { %19783 = vmatprep.mubr.msk.f32.mxu0 %vm51_vm1, %v21880_v51  ;;  %19795 = vmatprep.mubr.msk.f32.mxu1 %vm51_vm1, %v22335_v22 }
  0xb7   :  { %19799 = vmatpush3.msk.msra.mxu0 %vm64_vm0, %v17038_v20  ;;  %19811 = vmatpush3.msk.msra.mxu1 %vm64_vm0, %v17050_v21  ;;  %v17138_v20 = vld [vmem:[%s27166_s0 + $0xd0] sm:$0xf] }
  0xb8   :  { %19784 = vmatmul.mubr.msk.f32.gmra.mxu0 %vm51_vm1, %v21889_v52  ;;  %19796 = vmatmul.mubr.msk.f32.gmra.mxu1 %vm51_vm1, %v22344_v23  ;;  %v22543_v52 = vld [vmem:[%s27168_s4 + $0x20] sm:$0xff] }
  0xb9   :  { %19800 = vmatprep.subr.mxu0 %v22242_v9  ;;  %19812 = vmatprep.subr.mxu1 %v22353_v24 }
  0xba   :  { %19801 = vmatpush3.msra.mxu0 %v22242_v9  ;;  %19813 = vmatpush3.msra.mxu1 %v22353_v24 }
  0xbb   :  { %10396 = vperm.xlu1 %21445, %v21793_v42   ;;  %10401 = vperm.xlu0 %21444, %v21798_v43   ;;  %v17082_v42 = vld [vmem:[%s27166_s0 + $0xb8] sm:$0xf]  ;;  %v17094_v43 = vld [vmem:[%s27166_s0 + $0xd0] sm:$0xf] }
  0xbc   :  { %19802 = vmatprep.subr.mxu0 %v22260_v12  ;;  %19814 = vmatprep.subr.mxu1 %v22366_v25 }
  0xbd   :  { %19803 = vmatpush3.msra.mxu0 %v22260_v12  ;;  %19804 = vmatprep.mubr.msk.f32.mxu0 %vm51_vm1, %v22373_v26 }
  0xbe   :  { %19815 = vmatpush3.msra.mxu1 %v22366_v25  ;;  %19816 = vmatprep.mubr.msk.f32.mxu1 %vm51_vm1, %v22380_v27 }
  0xbf   :  { %19805 = vmatmul.mubr.msk.f32.vlgmr.msra.gmra.mxu0 %vm51_vm1, %v22387_v28  ;;  %19817 = vmatmul.mubr.msk.f32.vlgmr.msra.gmra.mxu1 %vm51_vm1, %v22392_v29 }
  0xc0   :  { %3781 = vperm.xlu1 %21445, %v22211_v13   ;;  %3786 = vperm.xlu0 %21444, %v22216_v14  }
  0xc1   :  { %19822 = vmatprep.subr.msk.mxu0 %vm64_vm0, %v17065_v30  ;;  %19834 = vmatprep.subr.msk.mxu1 %vm64_vm0, %v17058_v31 }
  0xc2   :  { %19807 = vmatprep.mubr.msk.f32.mxu0 %vm51_vm1, %v22413_v32  ;;  %19819 = vmatprep.mubr.msk.f32.mxu1 %vm51_vm1, %v22418_v33 }
  0xc3   :  { %19823 = vmatpush3.msk.msra.mxu0 %vm64_vm0, %v17065_v30  ;;  %19835 = vmatpush3.msk.msra.mxu1 %vm64_vm0, %v17058_v31 }
  0xc4   :  { %19808 = vmatmul.mubr.msk.f32.gmra.mxu0 %vm51_vm1, %v22427_v34  ;;  %19820 = vmatmul.mubr.msk.f32.gmra.mxu1 %vm51_vm1, %v22432_v35 }
  0xc5   :  { %19824 = vmatprep.subr.mxu0 %v22108_v5  ;;  %19836 = vmatprep.subr.mxu1 %v22022_v61 }
  0xc6   :  { %19825 = vmatpush3.msra.mxu0 %v22108_v5  ;;  %19837 = vmatpush3.msra.mxu1 %v22022_v61  ;;  %v17121_v61 = vld [vmem:[%s27166_s0 + $0xb8] sm:$0xf] }
  0xc7   :  { %3771 = vperm.xlu1 %21445, %v22447_v36   ;;  %3776 = vperm.xlu0 %21444, %v22253_v11  }
  0xc8   :  { %19826 = vmatprep.subr.mxu0 %v22121_v1  ;;  %19838 = vmatprep.subr.mxu1 %v22035_v62 }
  0xc9   :  { %19827 = vmatpush3.msra.mxu0 %v22121_v1  ;;  %19828 = vmatprep.mubr.msk.f32.mxu0 %vm51_vm1, %v22456_v37 }
  0xca   :  { %19839 = vmatpush3.msra.mxu1 %v22035_v62  ;;  %19840 = vmatprep.mubr.msk.f32.mxu1 %vm51_vm1, %v22463_v38 }
  0xcb   :  { %19829 = vmatmul.mubr.msk.f32.vlgmr.msra.gmra.mxu0 %vm51_vm1, %v22470_v39  ;;  %19841 = vmatmul.mubr.msk.f32.vlgmr.msra.gmra.mxu1 %vm51_vm1, %v21859_v48  ;;  %v22508_v46 = vpop.f32.mrf.mxu0  ;;  %v22510_v47 = vpop.f32.mrf.mxu1  ;;  %v22519_v48 = vld [vmem:[%s27167_s1 + $0x38] sm:$0xff] }
  0xcc   :  { %27207 = vst [vmem:[#allocation5_spill] sm:$0xff] %v22508_v46  ;;  %27208 = vst [vmem:[#allocation6_spill] sm:$0xff] %v22510_v47  ;;  %11179 = vperm.xlu1 %21445, %v22478_v40   ;;  %11184 = vperm.xlu0 %21444, %v22483_v41   ;;  %v22742_v47 = vld [vmem:[%s27166_s0 + $0xf8] sm:$0xff] }
  0xcd   :  { %19846 = vmatprep.subr.msk.mxu0 %vm64_vm0, %v17082_v42  ;;  %19858 = vmatprep.subr.msk.mxu1 %vm64_vm0, %v17094_v43  ;;  %v22526_v50 = vpop.f32.mrf.mxu0  ;;  %v22528_v51 = vpop.f32.mrf.mxu1 }
  0xce   :  { %27209 = vst [vmem:[#allocation7_spill] sm:$0xff] %v22526_v50  ;;  %27210 = vst [vmem:[#allocation8_spill] sm:$0xff] %v22528_v51  ;;  %19831 = vmatprep.mubr.msk.f32.mxu0 %vm51_vm1, %v22501_v44  ;;  %19843 = vmatprep.mubr.msk.f32.mxu1 %vm51_vm1, %v22506_v45 }
  0xcf   :  { %19847 = vmatpush3.msk.msra.mxu0 %vm64_vm0, %v17082_v42  ;;  %19859 = vmatpush3.msk.msra.mxu1 %vm64_vm0, %v17094_v43 }
  0xd0   :  { %19832 = vmatmul.mubr.msk.f32.gmra.mxu0 %vm51_vm1, %v22519_v48  ;;  %19844 = vmatmul.mubr.msk.f32.gmra.mxu1 %vm51_vm1, %v22524_v49  ;;  %v22550_v54 = vpop.f32.mrf.mxu0  ;;  %v22552_v55 = vpop.f32.mrf.mxu1 }
  0xd1   :  { %19848 = vmatprep.subr.mxu0 %v22242_v9  ;;  %19860 = vmatprep.subr.mxu1 %v22353_v24 }
  0xd2   :  { %19849 = vmatpush3.msra.mxu0 %v22242_v9  ;;  %19861 = vmatpush3.msra.mxu1 %v22353_v24  ;;  %v22560_v56 = vpop.f32.mrf.mxu0  ;;  %v22562_v57 = vpop.f32.mrf.mxu1 }
  0xd3   :  { %11169 = vperm.xlu1 %21445, %v22543_v52   ;;  %11174 = vperm.xlu0 %21444, %v22548_v53   ;;  %27211 = vst [vmem:[#allocation9_spill] sm:$0xff] %v22560_v56  ;;  %27212 = vst [vmem:[#allocation10_spill] sm:$0xff] %v22562_v57 }
  0xd4   :  { %19850 = vmatprep.subr.mxu0 %v22260_v12  ;;  %19862 = vmatprep.subr.mxu1 %v22366_v25 }
  0xd5   :  { %19851 = vmatpush3.msra.mxu0 %v22260_v12  ;;  %19852 = vmatprep.mubr.msk.f32.mxu0 %vm51_vm1, %v22307_v18 }
  0xd6   :  { %19863 = vmatpush3.msra.mxu1 %v22366_v25  ;;  %19864 = vmatprep.mubr.msk.f32.mxu1 %vm51_vm1, %v22373_v26 }
  0xd7   :  { %19853 = vmatmul.mubr.msk.f32.vlgmr.msra.gmra.mxu0 %vm51_vm1, %v22314_v19  ;;  %19865 = vmatmul.mubr.msk.f32.vlgmr.msra.gmra.mxu1 %vm51_vm1, %v22387_v28  ;;  %v22592_v62 = vpop.f32.mrf.mxu0  ;;  %v22594_v63 = vpop.f32.mrf.mxu1 }
  0xd8   :  { %27213 = vst [vmem:[#allocation11_spill] sm:$0xff] %v22592_v62  ;;  %11159 = vperm.xlu1 %21445, %v22572_v58   ;;  %11164 = vperm.xlu0 %21444, %v22577_v59  }
  0xd9   :  { %19870 = vmatprep.subr.msk.mxu0 %vm64_vm0, %v17106_v60  ;;  %19882 = vmatprep.subr.msk.mxu1 %vm64_vm0, %v17121_v61  ;;  %v22600_v0 = vpop.f32.mrf.mxu0  ;;  %v22602_v3 = vpop.f32.mrf.mxu1 }
  0xda   :  { %27214 = vst [vmem:[#allocation12_spill] sm:$0xff] %v22600_v0  ;;  %19855 = vmatprep.mubr.msk.f32.mxu0 %vm51_vm1, %v22335_v22  ;;  %19867 = vmatprep.mubr.msk.f32.mxu1 %vm51_vm1, %v22413_v32  ;;  %v17162_v0 = vld [vmem:[%s27166_s0 + $0x100] sm:$0xf] }
  0xdb   :  { %19871 = vmatpush3.msk.msra.mxu0 %vm64_vm0, %v17106_v60  ;;  %19883 = vmatpush3.msk.msra.mxu1 %vm64_vm0, %v17121_v61 }
  0xdc   :  { %19856 = vmatmul.mubr.msk.f32.gmra.mxu0 %vm51_vm1, %v22344_v23  ;;  %19868 = vmatmul.mubr.msk.f32.gmra.mxu1 %vm51_vm1, %v22427_v34  ;;  %v22629_v7 = vpop.f32.mrf.mxu0  ;;  %v22631_v8 = vpop.f32.mrf.mxu1 }
  0xdd   :  { %27215 = vst [vmem:[#allocation13_spill] sm:$0xff] %v22629_v7  ;;  %19872 = vmatprep.subr.mxu0 %v22611_v4  ;;  %19884 = vmatprep.subr.mxu1 %v22242_v9 }
  0xde   :  { %19873 = vmatpush3.msra.mxu0 %v22611_v4  ;;  %19885 = vmatpush3.msra.mxu1 %v22242_v9  ;;  %v22644_v10 = vpop.f32.mrf.mxu0  ;;  %v22646_v16 = vpop.f32.mrf.mxu1 }
  0xdf   :  { %11149 = vperm.xlu1 %21445, %v22622_v2   ;;  %11154 = vperm.xlu0 %21444, %v22627_v6   ;;  %27216 = vst [vmem:[#allocation14_spill] sm:$0xff] %v22644_v10 }
  0xe0   :  { %19874 = vmatprep.subr.mxu0 %v22638_v15  ;;  %19886 = vmatprep.subr.mxu1 %v22260_v12 }
  0xe1   :  { %19875 = vmatpush3.msra.mxu0 %v22638_v15  ;;  %19876 = vmatprep.mubr.msk.f32.mxu0 %vm51_vm1, %v22380_v27 }
  0xe2   :  { %19887 = vmatpush3.msra.mxu1 %v22260_v12  ;;  %19888 = vmatprep.mubr.msk.f32.mxu1 %vm51_vm1, %v22456_v37 }
  0xe3   :  { %19877 = vmatmul.mubr.msk.f32.vlgmr.msra.gmra.mxu0 %vm51_vm1, %v22392_v29  ;;  %19889 = vmatmul.mubr.msk.f32.vlgmr.msra.gmra.mxu1 %vm51_vm1, %v22470_v39  ;;  %v22666_v21 = vpop.f32.mrf.mxu0  ;;  %v22668_v30 = vpop.f32.mrf.mxu1 }
  0xe4   :  { %27217 = vst [vmem:[#allocation15_spill] sm:$0xff] %v22668_v30  ;;  %4366 = vperm.xlu1 %21445, %v22211_v13   ;;  %4371 = vperm.xlu0 %21444, %v22216_v14  }
  0xe5   :  { %19894 = vmatprep.subr.msk.mxu0 %vm64_vm0, %v17114_v17  ;;  %19906 = vmatprep.subr.msk.mxu1 %vm64_vm0, %v17138_v20  ;;  %v22674_v31 = vpop.f32.mrf.mxu0  ;;  %v22676_v42 = vpop.f32.mrf.mxu1 }
  0xe6   :  { %27218 = vst [vmem:[#allocation16_spill] sm:$0xff] %v22674_v31  ;;  %27219 = vst [vmem:[#allocation17_spill] sm:$0xff] %v22676_v42  ;;  %19879 = vmatprep.mubr.msk.f32.mxu0 %vm51_vm1, %v22418_v33  ;;  %19891 = vmatprep.mubr.msk.f32.mxu1 %vm51_vm1, %v22501_v44 }
  0xe7   :  { %19895 = vmatpush3.msk.msra.mxu0 %vm64_vm0, %v17114_v17  ;;  %19907 = vmatpush3.msk.msra.mxu1 %vm64_vm0, %v17138_v20  ;;  %v22707_v20 = vld [vmem:[%s27167_s1 + $0x8] sm:$0xff] }
  0xe8   :  { %19880 = vmatmul.mubr.msk.f32.gmra.mxu0 %vm51_vm1, %v22432_v35  ;;  %19892 = vmatmul.mubr.msk.f32.gmra.mxu1 %vm51_vm1, %v22519_v48  ;;  %v22688_v43 = vpop.f32.mrf.mxu0  ;;  %v22690_v60 = vpop.f32.mrf.mxu1 }
  0xe9   :  { %19896 = vmatprep.subr.mxu0 %v22108_v5  ;;  %19908 = vmatprep.subr.mxu1 %v22353_v24 }
  0xea   :  { %19897 = vmatpush3.msra.mxu0 %v22108_v5  ;;  %19909 = vmatpush3.msra.mxu1 %v22353_v24  ;;  %v22698_v61 = vpop.f32.mrf.mxu0  ;;  %v22700_v17 = vpop.f32.mrf.mxu1  ;;  %v17150_v5 = vld [vmem:[%s27166_s0 + $0xe8] sm:$0xf] }
  0xeb   :  { %4356 = vperm.xlu1 %21445, %v22447_v36   ;;  %4361 = vperm.xlu0 %21444, %v22253_v11  }
  0xec   :  { %19898 = vmatprep.subr.mxu0 %v22121_v1  ;;  %19910 = vmatprep.subr.mxu1 %v22366_v25 }
  0xed   :  { %19899 = vmatpush3.msra.mxu0 %v22121_v1  ;;  %19900 = vmatprep.mubr.msk.f32.mxu0 %vm51_vm1, %v22463_v38 }
  0xee   :  { %19911 = vmatpush3.msra.mxu1 %v22366_v25  ;;  %19912 = vmatprep.mubr.msk.f32.mxu1 %vm51_vm1, %v22307_v18 }
  0xef   :  { %19901 = vmatmul.mubr.msk.f32.vlgmr.msra.gmra.mxu0 %vm51_vm1, %v22707_v20  ;;  %19913 = vmatmul.mubr.msk.f32.vlgmr.msra.gmra.mxu1 %vm51_vm1, %v22314_v19  ;;  %v22725_v1 = vpop.f32.mrf.mxu0  ;;  %v19530_v51 = vpop.f32.mrf.mxu1 }
  0xf0   :  { %27220 = vst [vmem:[#allocation18_spill] sm:$0xff] %v22725_v1  ;;  %11932 = vperm.xlu1 %21445, %v22478_v40   ;;  %11937 = vperm.xlu0 %21444, %v22483_v41   ;;  %v22769_v1 = vpop.permute.xlu1 %382 }
  0xf1   :  { %19918 = vmatprep.subr.msk.mxu0 %vm64_vm0, %v17150_v5  ;;  %19930 = vmatprep.subr.msk.mxu1 %vm64_vm0, %v17162_v0  ;;  %v22731_v50 = vpop.f32.mrf.mxu0  ;;  %v22733_v62 = vpop.f32.mrf.mxu1  ;;  %27225 = vst [vmem:[#allocation23_spill] sm:$0xff] %v22769_v1  ;;  %v17170_v1 = vld [vmem:[%s27166_s0 + $0xb8] sm:$0xf] }
  0xf2   :  { %27221 = vst [vmem:[#allocation19_spill] sm:$0xff] %v22731_v50  ;;  %27222 = vst [vmem:[#allocation20_spill] sm:$0xff] %v22733_v62  ;;  %19903 = vmatprep.mubr.msk.f32.mxu0 %vm51_vm1, %v22506_v45  ;;  %19915 = vmatprep.mubr.msk.f32.mxu1 %vm51_vm1, %v22335_v22  ;;  %v22757_v50 = vld [vmem:[%s27166_s0 + $0xf0] sm:$0xff] }
  0xf3   :  { %19919 = vmatpush3.msk.msra.mxu0 %vm64_vm0, %v17150_v5  ;;  %19931 = vmatpush3.msk.msra.mxu1 %vm64_vm0, %v17162_v0  ;;  %v22759_v5 = vpop.permute.xlu0 %387 }
  0xf4   :  { %19904 = vmatmul.mubr.msk.f32.gmra.mxu0 %vm51_vm1, %v22524_v49  ;;  %19916 = vmatmul.mubr.msk.f32.gmra.mxu1 %vm51_vm1, %v22344_v23  ;;  %v22750_v62 = vpop.f32.mrf.mxu0  ;;  %v19533_v46 = vpop.f32.mrf.mxu1  ;;  %27223 = vst [vmem:[#allocation21_spill] sm:$0xff] %v22759_v5 }
  0xf5   :  { %19920 = vmatprep.subr.mxu0 %v22611_v4  ;;  %19932 = vmatprep.subr.mxu1 %v22742_v47  ;;  %v22799_v31 = vpop.permute.xlu1 %856 }
  0xf6   :  { %19921 = vmatpush3.msra.mxu0 %v22611_v4  ;;  %19933 = vmatpush3.msra.mxu1 %v22742_v47  ;;  %v22765_v0 = vpop.f32.mrf.mxu0  ;;  %v22767_v10 = vpop.f32.mrf.mxu1 }
  0xf7   :  { %11922 = vperm.xlu1 %21445, %v22543_v52   ;;  %11927 = vperm.xlu0 %21444, %v22548_v53   ;;  %27224 = vst [vmem:[#allocation22_spill] sm:$0xff] %v22767_v10  ;;  %v17177_v10 = vld [vmem:[%s27166_s0 + $0xd0] sm:$0xf]  ;;  %v22789_v57 = vpop.permute.xlu0 %861 }
  0xf8   :  { %19922 = vmatprep.subr.mxu0 %v22638_v15  ;;  %19934 = vmatprep.subr.mxu1 %v22757_v50  ;;  %27226 = vst [vmem:[#allocation24_spill] sm:$0xff] %v22789_v57 }
  0xf9   :  { %19923 = vmatpush3.msra.mxu0 %v22638_v15  ;;  %19924 = vmatprep.mubr.msk.f32.mxu0 %vm51_vm1, %v22373_v26 }
  0xfa   :  { %19935 = vmatpush3.msra.mxu1 %v22757_v50  ;;  %19936 = vmatprep.mubr.msk.f32.mxu1 %vm51_vm1, %v22380_v27 }
  0xfb   :  { %19925 = vmatmul.mubr.msk.f32.vlgmr.msra.gmra.mxu0 %vm51_vm1, %v22387_v28  ;;  %19937 = vmatmul.mubr.msk.f32.vlgmr.msra.gmra.mxu1 %vm51_vm1, %v22392_v29  ;;  %v19542_v5 = vpop.f32.mrf.mxu0  ;;  %v19554_v42 = vpop.f32.mrf.mxu1 }
  0xfc   :  { %11912 = vperm.xlu1 %21445, %v22572_v58   ;;  %11917 = vperm.xlu0 %21444, %v22577_v59   ;;  %v1078_v56 = vadd.f32 %v19542_v5, %v19530_v51 }
  0xfd   :  { %19942 = vmatprep.subr.msk.mxu0 %vm64_vm0, %v17177_v10  ;;  %19954 = vmatprep.subr.msk.mxu1 %vm64_vm0, %v17170_v1  ;;  %v22795_v30 = vpop.f32.mrf.mxu0  ;;  %v22797_v7 = vpop.f32.mrf.mxu1 }
  0xfe   :  { %27227 = vst [vmem:[#allocation25_spill] sm:$0xff] %v22795_v30  ;;  %27228 = vst [vmem:[#allocation26_spill] sm:$0xff] %v22797_v7  ;;  %19927 = vmatprep.mubr.msk.f32.mxu0 %vm51_vm1, %v22413_v32  ;;  %19939 = vmatprep.mubr.msk.f32.mxu1 %vm51_vm1, %v22418_v33  ;;  %v1199_v57 = vadd.f32 %v19554_v42, %v1078_v56  ;;  %v22813_v30 = vpop.permute.xlu0 %377 }
  0xff   :  { %19943 = vmatpush3.msk.msra.mxu0 %vm64_vm0, %v17177_v10  ;;  %19955 = vmatpush3.msk.msra.mxu1 %vm64_vm0, %v17170_v1  ;;  %27229 = vst [vmem:[#allocation27_spill] sm:$0xff] %v22813_v30  ;;  %v22823_v1 = vpop.permute.xlu1 %851 }
 0x100   :  { %19928 = vmatmul.mubr.msk.f32.gmra.mxu0 %vm51_vm1, %v22427_v34  ;;  %19940 = vmatmul.mubr.msk.f32.gmra.mxu1 %vm51_vm1, %v22432_v35  ;;  %v19545_v51 = vpop.f32.mrf.mxu0  ;;  %v19557_v5 = vpop.f32.mrf.mxu1 }
 0x101   :  { %19944 = vmatprep.subr.mxu0 %v22353_v24  ;;  %19956 = vmatprep.subr.mxu1 %v22242_v9  ;;  %v1088_v7 = vadd.f32 %v19545_v51, %v19533_v46  ;;  %v17206_v46 = vld [vmem:[%s27166_s0 + $0x100] sm:$0xf] }
 0x102   :  { %19945 = vmatpush3.msra.mxu0 %v22353_v24  ;;  %19957 = vmatpush3.msra.mxu1 %v22242_v9  ;;  %v22819_v10 = vpop.f32.mrf.mxu0  ;;  %v22821_v42 = vpop.f32.mrf.mxu1  ;;  %v17194_v9 = vld [vmem:[%s27166_s0 + $0xe8] sm:$0xf] }
 0x103   :  { %11902 = vperm.xlu1 %21445, %v22622_v2   ;;  %11907 = vperm.xlu0 %21444, %v22627_v6   ;;  %v1201_v56 = vadd.f32 %v19557_v5, %v1088_v7  ;;  %27230 = vst [vmem:[#allocation28_spill] sm:$0xff] %v22819_v10  ;;  %27231 = vst [vmem:[#allocation29_spill] sm:$0xff] %v22821_v42  ;;  %v22853_v30 = vpop.permute.xlu1 %846 }
 0x104   :  { %19946 = vmatprep.subr.mxu0 %v22366_v25  ;;  %19958 = vmatprep.subr.mxu1 %v22260_v12 }
 0x105   :  { %19947 = vmatpush3.msra.mxu0 %v22366_v25  ;;  %19948 = vmatprep.mubr.msk.f32.mxu0 %vm51_vm1, %v22456_v37 }
 0x106   :  { %19959 = vmatpush3.msra.mxu1 %v22260_v12  ;;  %19960 = vmatprep.mubr.msk.f32.mxu1 %vm51_vm1, %v22463_v38  ;;  %v22843_v12 = vpop.permute.xlu0 %372 }
 0x107   :  { %19949 = vmatmul.mubr.msk.f32.vlgmr.msra.gmra.mxu0 %vm51_vm1, %v22470_v39  ;;  %19961 = vmatmul.mubr.msk.f32.vlgmr.msra.gmra.mxu1 %vm51_vm1, %v22707_v20  ;;  %v19566_v7 = vpop.f32.mrf.mxu0  ;;  %v19578_v51 = vpop.f32.mrf.mxu1  ;;  %27232 = vst [vmem:[#allocation30_spill] sm:$0xff] %v22843_v12 }
 0x108   :  { %4951 = vperm.xlu1 %21445, %v22211_v13   ;;  %4956 = vperm.xlu0 %21444, %v22216_v14   ;;  %v1310_v5 = vadd.f32 %v19566_v7, %v1199_v57 }
 0x109   :  { %19966 = vmatprep.subr.msk.mxu0 %vm64_vm0, %v17194_v9  ;;  %19978 = vmatprep.subr.msk.mxu1 %vm64_vm0, %v17206_v46  ;;  %v22849_v42 = vpop.f32.mrf.mxu0  ;;  %v22851_v10 = vpop.f32.mrf.mxu1 }
 0x10a   :  { %27233 = vst [vmem:[#allocation31_spill] sm:$0xff] %v22849_v42  ;;  %27234 = vst [vmem:[#allocation32_spill] sm:$0xff] %v22851_v10  ;;  %19951 = vmatprep.mubr.msk.f32.mxu0 %vm51_vm1, %v22501_v44  ;;  %19963 = vmatprep.mubr.msk.f32.mxu1 %vm51_vm1, %v22506_v45  ;;  %v22859_v13 = vadd.f32 %v19578_v51, %v1310_v5  ;;  %v22869_v10 = vpop.permute.xlu0 %7419  ;;  %v22881_v5 = vpop.permute.xlu1 %7414 }
 0x10b   :  { %19967 = vmatpush3.msk.msra.mxu0 %vm64_vm0, %v17194_v9  ;;  %19979 = vmatpush3.msk.msra.mxu1 %vm64_vm0, %v17206_v46  ;;  %27236 = vst [vmem:[#allocation34_spill] sm:$0xff] %v22869_v10  ;;  %27240 = vst [vmem:[#allocation38_spill] sm:$0xff] %v22881_v5 }
 0x10c   :  { %27235 = vst [vmem:[#allocation33_spill] sm:$0xff] %v22859_v13  ;;  %19952 = vmatmul.mubr.msk.f32.gmra.mxu0 %vm51_vm1, %v22519_v48  ;;  %19964 = vmatmul.mubr.msk.f32.gmra.mxu1 %vm51_vm1, %v22524_v49  ;;  %v19569_v14 = vpop.f32.mrf.mxu0  ;;  %v19581_v57 = vpop.f32.mrf.mxu1 }
 0x10d   :  { %19968 = vmatprep.subr.mxu0 %v22611_v4  ;;  %19980 = vmatprep.subr.mxu1 %v22742_v47  ;;  %v1312_v7 = vadd.f32 %v19569_v14, %v1201_v56  ;;  %v17233_v56 = vld [vmem:[%s27166_s0 + $0xe8] sm:$0xf] }
 0x10e   :  { %19969 = vmatpush3.msra.mxu0 %v22611_v4  ;;  %19981 = vmatpush3.msra.mxu1 %v22742_v47  ;;  %v22877_v46 = vpop.f32.mrf.mxu0  ;;  %v22879_v51 = vpop.f32.mrf.mxu1 }
 0x10f   :  { %4941 = vperm.xlu1 %21445, %v22447_v36   ;;  %4946 = vperm.xlu0 %21444, %v22253_v11   ;;  %v22875_v9 = vadd.f32 %v19581_v57, %v1312_v7  ;;  %27238 = vst [vmem:[#allocation36_spill] sm:$0xff] %v22877_v46  ;;  %27239 = vst [vmem:[#allocation37_spill] sm:$0xff] %v22879_v51  ;;  %v17218_v11 = vld [vmem:[%s27166_s0 + $0x118] sm:$0xf]  ;;  %v22901_v7 = vpop.permute.xlu0 %7409  ;;  %v22911_v42 = vpop.permute.xlu1 %7404 }
 0x110   :  { %19970 = vmatprep.subr.mxu0 %v22638_v15  ;;  %19982 = vmatprep.subr.mxu1 %v22757_v50  ;;  %27241 = vst [vmem:[#allocation39_spill] sm:$0xff] %v22901_v7  ;;  %27244 = vst [vmem:[#allocation42_spill] sm:$0xff] %v22911_v42 }
 0x111   :  { %27237 = vst [vmem:[#allocation35_spill] sm:$0xff] %v22875_v9  ;;  %19971 = vmatpush3.msra.mxu0 %v22638_v15  ;;  %19972 = vmatprep.mubr.msk.f32.mxu0 %vm51_vm1, %v22307_v18 }
 0x112   :  { %19983 = vmatpush3.msra.mxu1 %v22757_v50  ;;  %19984 = vmatprep.mubr.msk.f32.mxu1 %vm51_vm1, %v22373_v26 }
 0x113   :  { %19973 = vmatmul.mubr.msk.f32.vlgmr.msra.gmra.mxu0 %vm51_vm1, %v22314_v19  ;;  %19985 = vmatmul.mubr.msk.f32.vlgmr.msra.gmra.mxu1 %vm51_vm1, %v22387_v28  ;;  %v19590_v14 = vpop.f32.mrf.mxu0  ;;  %v19602_v57 = vpop.f32.mrf.mxu1 }
 0x114   :  { %12685 = vperm.xlu1 %21445, %v22478_v40   ;;  %12690 = vperm.xlu0 %21444, %v22483_v41   ;;  %v1663_v13 = vadd.f32 %v19602_v57, %v19590_v14  ;;  %v22920_v14 = vld [vmem:[%s27166_s0 + $0x110] sm:$0xff]  ;;  %v22935_v46 = vpop.permute.xlu0 %7399  ;;  %v22945_v5 = vpop.permute.xlu1 %7394 }
 0x115   :  { %19990 = vmatprep.subr.msk.mxu0 %vm64_vm0, %v17218_v11  ;;  %20002 = vmatprep.subr.msk.mxu1 %vm64_vm0, %v17233_v56  ;;  %v22907_v9 = vpop.f32.mrf.mxu0  ;;  %v22909_v51 = vpop.f32.mrf.mxu1  ;;  %27245 = vst [vmem:[#allocation43_spill] sm:$0xff] %v22935_v46  ;;  %27248 = vst [vmem:[#allocation46_spill] sm:$0xff] %v22945_v5 }
 0x116   :  { %27242 = vst [vmem:[#allocation40_spill] sm:$0xff] %v22907_v9  ;;  %27243 = vst [vmem:[#allocation41_spill] sm:$0xff] %v22909_v51  ;;  %19975 = vmatprep.mubr.msk.f32.mxu0 %vm51_vm1, %v22335_v22  ;;  %19987 = vmatprep.mubr.msk.f32.mxu1 %vm51_vm1, %v22413_v32  ;;  %v22933_v9 = vld [vmem:[%s27166_s0 + $0x108] sm:$0xff] }
 0x117   :  { %19991 = vmatpush3.msk.msra.mxu0 %vm64_vm0, %v17218_v11  ;;  %20003 = vmatpush3.msk.msra.mxu1 %vm64_vm0, %v17233_v56 }
 0x118   :  { %19976 = vmatmul.mubr.msk.f32.gmra.mxu0 %vm51_vm1, %v22344_v23  ;;  %19988 = vmatmul.mubr.msk.f32.gmra.mxu1 %vm51_vm1, %v22427_v34  ;;  %v19593_v57 = vpop.f32.mrf.mxu0  ;;  %v19605_v51 = vpop.f32.mrf.mxu1 }
 0x119   :  { %19992 = vmatprep.subr.mxu0 %v22920_v14  ;;  %20004 = vmatprep.subr.mxu1 %v22611_v4  ;;  %v1673_v11 = vadd.f32 %v19605_v51, %v19593_v57  ;;  %v17226_v51 = vld [vmem:[%s27166_s0 + $0xd0] sm:$0xf]  ;;  %v17250_v57 = vld [vmem:[%s27166_s0 + $0x100] sm:$0xf]  ;;  %v22965_v5 = vpop.permute.xlu0 %7389  ;;  %v22975_v12 = vpop.permute.xlu1 %7384 }
 0x11a   :  { %19993 = vmatpush3.msra.mxu0 %v22920_v14  ;;  %20005 = vmatpush3.msra.mxu1 %v22611_v4  ;;  %v22941_v56 = vpop.f32.mrf.mxu0  ;;  %v22943_v42 = vpop.f32.mrf.mxu1  ;;  %27249 = vst [vmem:[#allocation47_spill] sm:$0xff] %v22965_v5 }
 0x11b   :  { %12675 = vperm.xlu1 %21445, %v22543_v52   ;;  %12680 = vperm.xlu0 %21444, %v22548_v53   ;;  %27246 = vst [vmem:[#allocation44_spill] sm:$0xff] %v22941_v56  ;;  %27247 = vst [vmem:[#allocation45_spill] sm:$0xff] %v22943_v42 }
 0x11c   :  { %19994 = vmatprep.subr.mxu0 %v22933_v9  ;;  %20006 = vmatprep.subr.mxu1 %v22638_v15 }
 0x11d   :  { %19995 = vmatpush3.msra.mxu0 %v22933_v9  ;;  %19996 = vmatprep.mubr.msk.f32.mxu0 %vm51_vm1, %v22380_v27 }
 0x11e   :  { %20007 = vmatpush3.msra.mxu1 %v22638_v15  ;;  %20008 = vmatprep.mubr.msk.f32.mxu1 %vm51_vm1, %v22456_v37 }
 0x11f   :  { %19997 = vmatmul.mubr.msk.f32.vlgmr.msra.gmra.mxu0 %vm51_vm1, %v22392_v29  ;;  %20009 = vmatmul.mubr.msk.f32.vlgmr.msra.gmra.mxu1 %vm51_vm1, %v22470_v39  ;;  %v19614_v42 = vpop.f32.mrf.mxu0  ;;  %v19626_v56 = vpop.f32.mrf.mxu1 }
 0x120   :  { %12665 = vperm.xlu1 %21445, %v22572_v58   ;;  %12670 = vperm.xlu0 %21444, %v22577_v59   ;;  %v1784_v46 = vadd.f32 %v19614_v42, %v1663_v13 }
 0x121   :  { %20014 = vmatprep.subr.msk.mxu0 %vm64_vm0, %v17226_v51  ;;  %20026 = vmatprep.subr.msk.mxu1 %vm64_vm0, %v17250_v57  ;;  %v22971_v7 = vpop.f32.mrf.mxu0  ;;  %v22973_v10 = vpop.f32.mrf.mxu1 }
 0x122   :  { %27250 = vst [vmem:[#allocation48_spill] sm:$0xff] %v22971_v7  ;;  %27251 = vst [vmem:[#allocation49_spill] sm:$0xff] %v22973_v10  ;;  %19999 = vmatprep.mubr.msk.f32.mxu0 %vm51_vm1, %v22418_v33  ;;  %20011 = vmatprep.mubr.msk.f32.mxu1 %vm51_vm1, %v22501_v44  ;;  %v1895_v5 = vadd.f32 %v19626_v56, %v1784_v46  ;;  %v22989_v7 = vpop.permute.xlu0 %1446 }
 0x123   :  { %20015 = vmatpush3.msk.msra.mxu0 %vm64_vm0, %v17226_v51  ;;  %20027 = vmatpush3.msk.msra.mxu1 %vm64_vm0, %v17250_v57  ;;  %27252 = vst [vmem:[#allocation50_spill] sm:$0xff] %v22989_v7  ;;  %v22999_v57 = vpop.permute.xlu1 %1441 }
 0x124   :  { %20000 = vmatmul.mubr.msk.f32.gmra.mxu0 %vm51_vm1, %v22432_v35  ;;  %20012 = vmatmul.mubr.msk.f32.gmra.mxu1 %vm51_vm1, %v22519_v48  ;;  %v19617_v42 = vpop.f32.mrf.mxu0  ;;  %v19629_v13 = vpop.f32.mrf.mxu1  ;;  %27255 = vst [vmem:[#allocation53_spill] sm:$0xff] %v22999_v57 }
 0x125   :  { %20016 = vmatprep.subr.mxu0 %v22353_v24  ;;  %20028 = vmatprep.subr.mxu1 %v22742_v47  ;;  %v1786_v10 = vadd.f32 %v19617_v42, %v1673_v11  ;;  %v17274_v11 = vld [vmem:[%s27166_s0 + $0x130] sm:$0xf] }
 0x126   :  { %20017 = vmatpush3.msra.mxu0 %v22353_v24  ;;  %20029 = vmatpush3.msra.mxu1 %v22742_v47  ;;  %v22995_v56 = vpop.f32.mrf.mxu0  ;;  %v22997_v51 = vpop.f32.mrf.mxu1  ;;  %v23009_v24 = vld [vmem:[%s27165_s2 + $0x10] sm:$0xff] }
 0x127   :  { %12655 = vperm.xlu1 %21445, %v22622_v2   ;;  %12660 = vperm.xlu0 %21444, %v22627_v6   ;;  %v1897_v46 = vadd.f32 %v19629_v13, %v1786_v10  ;;  %27253 = vst [vmem:[#allocation51_spill] sm:$0xff] %v22995_v56  ;;  %27254 = vst [vmem:[#allocation52_spill] sm:$0xff] %v22997_v51  ;;  %v23014_v10 = vld [vmem:[%s27165_s2 + $0x18] sm:$0xff]  ;;  %v23029_v51 = vpop.permute.xlu0 %1436  ;;  %v23041_v7 = vpop.permute.xlu1 %1431 }
 0x128   :  { %20018 = vmatprep.subr.mxu0 %v22366_v25  ;;  %20030 = vmatprep.subr.mxu1 %v22757_v50 }
 0x129   :  { %20019 = vmatpush3.msra.mxu0 %v22366_v25  ;;  %20020 = vmatprep.mubr.msk.f32.mxu0 %vm51_vm1, %v22463_v38  ;;  %v17262_v25 = vld [vmem:[%s27166_s0 + $0x118] sm:$0xf] }
 0x12a   :  { %20031 = vmatpush3.msra.mxu1 %v22757_v50  ;;  %20032 = vmatprep.mubr.msk.f32.mxu1 %vm51_vm1, %v22307_v18 }
 0x12b   :  { %20021 = vmatmul.mubr.msk.f32.vlgmr.msra.gmra.mxu0 %vm51_vm1, %v22707_v20  ;;  %20033 = vmatmul.mubr.msk.f32.vlgmr.msra.gmra.mxu1 %vm51_vm1, %v22314_v19  ;;  %v19638_v42 = vpop.f32.mrf.mxu0  ;;  %v19650_v13 = vpop.f32.mrf.mxu1  ;;  %v23050_v19 = vld [vmem:[%s27166_s0 + $0x128] sm:$0xff] }
 0x12c   :  { %5536 = vperm.xlu1 %21445, %v23009_v24   ;;  %5541 = vperm.xlu0 %21444, %v23014_v10   ;;  %v23033_v18 = vadd.f32 %v19638_v42, %v1895_v5  ;;  %v23061_v5 = vld [vmem:[%s27165_s2 + $0x8] sm:$0xff] }
 0x12d   :  { %20038 = vmatprep.subr.msk.mxu0 %vm64_vm0, %v17262_v25  ;;  %20050 = vmatprep.subr.msk.mxu1 %vm64_vm0, %v17274_v11  ;;  %v23037_v56 = vpop.f32.mrf.mxu0  ;;  %v23039_v57 = vpop.f32.mrf.mxu1 }
 0x12e   :  { %27256 = vst [vmem:[#allocation54_spill] sm:$0xff] %v23033_v18  ;;  %27257 = vst [vmem:[#allocation55_spill] sm:$0xff] %v23037_v56  ;;  %20023 = vmatprep.mubr.msk.f32.mxu0 %vm51_vm1, %v22506_v45  ;;  %20035 = vmatprep.mubr.msk.f32.mxu1 %vm51_vm1, %v22335_v22  ;;  %v23082_v56 = vpop.permute.xlu1 %8167 }
 0x12f   :  { %27258 = vst [vmem:[#allocation56_spill] sm:$0xff] %v23039_v57  ;;  %20039 = vmatpush3.msk.msra.mxu0 %vm64_vm0, %v17262_v25  ;;  %20051 = vmatpush3.msk.msra.mxu1 %vm64_vm0, %v17274_v11  ;;  %v23068_v25 = vld [vmem:[%s27166_s0 + $0x120] sm:$0xff]  ;;  %v23072_v57 = vpop.permute.xlu0 %8172 }
 0x130   :  { %20024 = vmatmul.mubr.msk.f32.gmra.mxu0 %vm51_vm1, %v22524_v49  ;;  %20036 = vmatmul.mubr.msk.f32.gmra.mxu1 %vm51_vm1, %v22344_v23  ;;  %v19641_v22 = vpop.f32.mrf.mxu0  ;;  %v19653_v42 = vpop.f32.mrf.mxu1 }
 0x131   :  { %20040 = vmatprep.subr.mxu0 %v22920_v14  ;;  %20052 = vmatprep.subr.mxu1 %v23050_v19  ;;  %v23070_v11 = vadd.f32 %v19641_v22, %v1897_v46  ;;  %v17282_v46 = vld [vmem:[%s27166_s0 + $0xe8] sm:$0xf] }
 0x132   :  { %20041 = vmatpush3.msra.mxu0 %v22920_v14  ;;  %20053 = vmatpush3.msra.mxu1 %v23050_v19  ;;  %v23078_v23 = vpop.f32.mrf.mxu0  ;;  %v23080_v18 = vpop.f32.mrf.mxu1 }
 0x133   :  { %27259 = vst [vmem:[#allocation57_spill] sm:$0xff] %v23070_v11  ;;  %5526 = vperm.xlu1 %21445, %v22447_v36   ;;  %5531 = vperm.xlu0 %21444, %v23061_v5   ;;  %27260 = vst [vmem:[#allocation58_spill] sm:$0xff] %v23078_v23  ;;  %v17289_v36 = vld [vmem:[%s27166_s0 + $0x100] sm:$0xf] }
 0x134   :  { %27261 = vst [vmem:[#allocation59_spill] sm:$0xff] %v23080_v18  ;;  %20042 = vmatprep.subr.mxu0 %v22933_v9  ;;  %20054 = vmatprep.subr.mxu1 %v23068_v25  ;;  %v23102_v18 = vpop.permute.xlu0 %8162 }
 0x135   :  { %20043 = vmatpush3.msra.mxu0 %v22933_v9  ;;  %20044 = vmatprep.mubr.msk.f32.mxu0 %vm51_vm1, %v22373_v26 }
 0x136   :  { %20055 = vmatpush3.msra.mxu1 %v23068_v25  ;;  %20056 = vmatprep.mubr.msk.f32.mxu1 %vm51_vm1, %v22380_v27 }
 0x137   :  { %20045 = vmatmul.mubr.msk.f32.vlgmr.msra.gmra.mxu0 %vm51_vm1, %v22387_v28  ;;  %20057 = vmatmul.mubr.msk.f32.vlgmr.msra.gmra.mxu1 %vm51_vm1, %v22392_v29  ;;  %v19662_v26 = vpop.f32.mrf.mxu0  ;;  %v19674_v22 = vpop.f32.mrf.mxu1 }
 0x138   :  { %13438 = vperm.xlu1 %21445, %v22478_v40   ;;  %13443 = vperm.xlu0 %21444, %v22483_v41   ;;  %v2248_v27 = vadd.f32 %v19662_v26, %v19650_v13  ;;  %v23112_v28 = vpop.permute.xlu1 %8157  ;;  %v23126_v13 = vpop.permute.xlu0 %8152 }
 0x139   :  { %20062 = vmatprep.subr.msk.mxu0 %vm64_vm0, %v17289_v36  ;;  %20074 = vmatprep.subr.msk.mxu1 %vm64_vm0, %v17282_v46  ;;  %v23108_v11 = vpop.f32.mrf.mxu0  ;;  %v23110_v23 = vpop.f32.mrf.mxu1 }
 0x13a   :  { %27262 = vst [vmem:[#allocation60_spill] sm:$0xff] %v23108_v11  ;;  %27263 = vst [vmem:[#allocation61_spill] sm:$0xff] %v23110_v23  ;;  %20047 = vmatprep.mubr.msk.f32.mxu0 %vm51_vm1, %v22413_v32  ;;  %20059 = vmatprep.mubr.msk.f32.mxu1 %vm51_vm1, %v22418_v33  ;;  %v2369_v29 = vadd.f32 %v19674_v22, %v2248_v27 }
 0x13b   :  { %20063 = vmatpush3.msk.msra.mxu0 %vm64_vm0, %v17289_v36  ;;  %20075 = vmatpush3.msk.msra.mxu1 %vm64_vm0, %v17282_v46 }
 0x13c   :  { %20048 = vmatmul.mubr.msk.f32.gmra.mxu0 %vm51_vm1, %v22427_v34  ;;  %20060 = vmatmul.mubr.msk.f32.gmra.mxu1 %vm51_vm1, %v22432_v35  ;;  %v19665_v40 = vpop.f32.mrf.mxu0  ;;  %v19677_v41 = vpop.f32.mrf.mxu1 }
 0x13d   :  { %20064 = vmatprep.subr.mxu0 %v22742_v47  ;;  %20076 = vmatprep.subr.mxu1 %v22611_v4  ;;  %v2258_v32 = vadd.f32 %v19665_v40, %v19653_v42  ;;  %v23136_v36 = vpop.permute.xlu1 %8147 }
 0x13e   :  { %20065 = vmatpush3.msra.mxu0 %v22742_v47  ;;  %20077 = vmatpush3.msra.mxu1 %v22611_v4  ;;  %v23132_v34 = vpop.f32.mrf.mxu0  ;;  %v23134_v35 = vpop.f32.mrf.mxu1 }
 0x13f   :  { %13428 = vperm.xlu1 %21445, %v22543_v52   ;;  %13433 = vperm.xlu0 %21444, %v22548_v53   ;;  %v2371_v33 = vadd.f32 %v19677_v41, %v2258_v32  ;;  %27264 = vst [vmem:[#allocation62_spill] sm:$0xff] %v23132_v34  ;;  %27265 = vst [vmem:[#allocation63_spill] sm:$0xff] %v23134_v35  ;;  %v17306_v52 = vld [vmem:[%s27166_s0 + $0x118] sm:$0xf]  ;;  %v17318_v53 = vld [vmem:[%s27166_s0 + $0x130] sm:$0xf]  ;;  %v14_v32 = vstv %s27169_s8 }
 0x140   :  { %20066 = vmatprep.subr.mxu0 %v22757_v50  ;;  %20078 = vmatprep.subr.mxu1 %v22638_v15  ;;  %v17333_v41 = vld [vmem:[%s27166_s0 + $0x118] sm:$0xf]  ;;  %15 = vst [vmem:[#allocation4] sm:$0x1] %v14_v32  ;;  %v27443_v34 = vld [vmem:[#allocation38_spill] sm:$0xff] }
 0x141   :  { %20067 = vmatpush3.msra.mxu0 %v22757_v50  ;;  %20068 = vmatprep.mubr.msk.f32.mxu0 %vm51_vm1, %v22456_v37 }
 0x142   :  { %20079 = vmatpush3.msra.mxu1 %v22638_v15  ;;  %20080 = vmatprep.mubr.msk.f32.mxu1 %vm51_vm1, %v22463_v38  ;;  %v23156_v15 = vpop.permute.xlu0 %8142 }
 0x143   :  { %20069 = vmatmul.mubr.msk.f32.vlgmr.msra.gmra.mxu0 %vm51_vm1, %v22470_v39  ;;  %20081 = vmatmul.mubr.msk.f32.vlgmr.msra.gmra.mxu1 %vm51_vm1, %v22707_v20  ;;  %v19686_v37 = vpop.f32.mrf.mxu0  ;;  %v19698_v4 = vpop.f32.mrf.mxu1 }
 0x144   :  { %13418 = vperm.xlu1 %21445, %v22572_v58   ;;  %13423 = vperm.xlu0 %21444, %v22577_v59   ;;  %v2480_v38 = vadd.f32 %v19686_v37, %v2369_v29  ;;  %v23166_v39 = vpop.permute.xlu1 %8137 }
 0x145   :  { %20086 = vmatprep.subr.msk.mxu0 %vm64_vm0, %v17306_v52  ;;  %20098 = vmatprep.subr.msk.mxu1 %vm64_vm0, %v17318_v53  ;;  %v23162_v42 = vpop.f32.mrf.mxu0  ;;  %v23164_v46 = vpop.f32.mrf.mxu1 }
 0x146   :  { %27266 = vst [vmem:[#allocation64_spill] sm:$0xff] %v23162_v42  ;;  %27267 = vst [vmem:[#allocation65_spill] sm:$0xff] %v23164_v46  ;;  %20071 = vmatprep.mubr.msk.f32.mxu0 %vm51_vm1, %v22501_v44  ;;  %20083 = vmatprep.mubr.msk.f32.mxu1 %vm51_vm1, %v22506_v45  ;;  %v23172_v58 = vadd.f32 %v19698_v4, %v2480_v38  ;;  %v23182_v45 = vpop.permute.xlu0 %2031  ;;  %v17314_v4 = vld [vmem:[%s27167_s1 + $0x70] sm:$0xff] }
 0x147   :  { %20087 = vmatpush3.msk.msra.mxu0 %vm64_vm0, %v17306_v52  ;;  %20099 = vmatpush3.msk.msra.mxu1 %vm64_vm0, %v17318_v53  ;;  %v17326_v52 = vld [vmem:[%s27166_s0 + $0x100] sm:$0xf]  ;;  %v23236_v53 = vld [vmem:[%s27167_s1 + $0x50] sm:$0xff] }
 0x148   :  { %27268 = vst [vmem:[#allocation66_spill] sm:$0xff] %v23172_v58  ;;  %20072 = vmatmul.mubr.msk.f32.gmra.mxu0 %vm51_vm1, %v22519_v48  ;;  %20084 = vmatmul.mubr.msk.f32.gmra.mxu1 %vm51_vm1, %v22524_v49  ;;  %v19689_v59 = vpop.f32.mrf.mxu0  ;;  %v19701_v26 = vpop.f32.mrf.mxu1  ;;  %v23189_v48 = vld [vmem:[%s27167_s1 + $0x40] sm:$0xff] }
 0x149   :  { %20088 = vmatprep.subr.mxu0 %v22920_v14  ;;  %20100 = vmatprep.subr.mxu1 %v23050_v19  ;;  %v2482_v44 = vadd.f32 %v19689_v59, %v2371_v33  ;;  %v17312_v49 = vld [vmem:[%s27167_s1 + $0x60] sm:$0xff]  ;;  %v23202_v40 = vpop.permute.xlu1 %2026  ;;  %v614_v33 = vadd.f32 %v22688_v43, %v22631_v8  ;;  %v609_v59 = vadd.f32 %v22698_v61, %v22646_v16  ;;  %v17315_v16 = vld [vmem:[%s27167_s1 + $0x78] sm:$0xff] }
 0x14a   :  { %20089 = vmatpush3.msra.mxu0 %v22920_v14  ;;  %20101 = vmatpush3.msra.mxu1 %v23050_v19  ;;  %v23198_v27 = vpop.f32.mrf.mxu0  ;;  %v23200_v29 = vpop.f32.mrf.mxu1  ;;  %27272 = vst [vmem:[#allocation70_spill] sm:$0xff] %v23202_v40 }
 0x14b   :  { %13408 = vperm.xlu1 %21445, %v22622_v2   ;;  %13413 = vperm.xlu0 %21444, %v22627_v6   ;;  %v23196_v22 = vadd.f32 %v19701_v26, %v2482_v44  ;;  %27270 = vst [vmem:[#allocation68_spill] sm:$0xff] %v23198_v27  ;;  %27271 = vst [vmem:[#allocation69_spill] sm:$0xff] %v23200_v29  ;;  %v23209_v2 = vld [vmem:[%s27167_s1 + $0x48] sm:$0xff]  ;;  %v23238_v37 = vpop.permute.xlu0 %2021  ;;  %v23254_v26 = vld [vmem:[%s27167_s1 + $0x58] sm:$0xff]  ;;  %v727_v32 = vadd.f32 %v22690_v60, %v614_v33 }
 0x14c   :  { %20090 = vmatprep.subr.mxu0 %v22933_v9  ;;  %20102 = vmatprep.subr.mxu1 %v23068_v25  ;;  %v17313_v6 = vld [vmem:[%s27167_s1 + $0x68] sm:$0xff]  ;;  %27273 = vst [vmem:[#allocation71_spill] sm:$0xff] %v23238_v37  ;;  %v23278_v60 = vld [vmem:[%s27165_s2] sm:$0xff] }
 0x14d   :  { %27269 = vst [vmem:[#allocation67_spill] sm:$0xff] %v23196_v22  ;;  %20091 = vmatpush3.msra.mxu0 %v22933_v9  ;;  %20092 = vmatprep.mubr.msk.f32.mxu0 %vm51_vm1, %v23189_v48  ;;  %v839_v61 = vadd.f32 %v22750_v62, %v727_v32  ;;  %v604_v62 = vadd.f32 %v22666_v21, %v22594_v63  ;;  %v6615_v63 = vld [vmem:[%s27167_s1] sm:$0xff]  ;;  %v27440_v27 = vld [vmem:[#allocation22_spill] sm:$0xff] }
 0x14e   :  { %20103 = vmatpush3.msra.mxu1 %v23068_v25  ;;  %20104 = vmatprep.mubr.msk.f32.mxu1 %vm51_vm1, %v17312_v49  ;;  %v27444_v37 = vld [vmem:[#allocation42_spill] sm:$0xff] }
 0x14f   :  { %20093 = vmatmul.mubr.msk.f32.vlgmr.msra.gmra.mxu0 %vm51_vm1, %v23209_v2  ;;  %20105 = vmatmul.mubr.msk.f32.vlgmr.msra.gmra.mxu1 %vm51_vm1, %v17313_v6  ;;  %v19710_v8 = vpop.f32.mrf.mxu0  ;;  %v19722_v43 = vpop.f32.mrf.mxu1 }
 0x150   :  { %20110 = vmatprep.subr.msk.mxu0 %vm64_vm0, %v17333_v41  ;;  %6121 = vperm.xlu1 %21445, %v23009_v24   ;;  %v23245_v38 = vadd.f32 %v19722_v43, %v19710_v8  ;;  %v23260_v6 = vpop.permute.xlu1 %2016  ;;  %v726_v8 = vadd.f32 %v22700_v17, %v609_v59  ;;  %v250_v17 = vadd.f32 %v22552_v55, %v22550_v54  ;;  %v27282_v54 = vld [vmem:[#allocation24_spill] sm:$0xff] }
 0x151   :  { %6126 = vperm.xlu0 %21444, %v23014_v10   ;;  %20111 = vmatpush3.msk.msra.mxu0 %vm64_vm0, %v17333_v41  ;;  %v23256_v44 = vpop.f32.mrf.mxu0  ;;  %v23258_v49 = vpop.f32.mrf.mxu1  ;;  %27276 = vst [vmem:[#allocation74_spill] sm:$0xff] %v23260_v6  ;;  %v867_v55 = vadd.f32 %v27282_v54, %v839_v61  ;;  %v27286_v54 = vld [vmem:[#allocation10_spill] sm:$0xff] }
 0x152   :  { %27274 = vst [vmem:[#allocation72_spill] sm:$0xff] %v23256_v44  ;;  %27275 = vst [vmem:[#allocation73_spill] sm:$0xff] %v23258_v49  ;;  %20122 = vmatprep.subr.msk.mxu1 %vm64_vm0, %v17326_v52  ;;  %20095 = vmatprep.mubr.msk.f32.mxu0 %vm51_vm1, %v23236_v53  ;;  %v27289_v44 = vld [vmem:[#allocation18_spill] sm:$0xff] }
 0x153   :  { %20107 = vmatprep.mubr.msk.f32.mxu1 %vm51_vm1, %v17314_v4  ;;  %20112 = vmatprep.subr.mxu0 %v22920_v14  ;;  %v17327_v4 = vld [vmem:[%s27167_s1 + $0x20] sm:$0xff] }
 0x154   :  { %20123 = vmatpush3.msk.msra.mxu1 %vm64_vm0, %v17326_v52  ;;  %20096 = vmatmul.mubr.msk.f32.gmra.mxu0 %vm51_vm1, %v23254_v26  ;;  %v19713_v41 = vpop.f32.mrf.mxu0  ;;  %v19725_v33 = vpop.f32.mrf.mxu1 }
 0x155   :  { %20108 = vmatmul.mubr.msk.f32.gmra.mxu1 %vm51_vm1, %v17315_v16  ;;  %20113 = vmatpush3.msra.mxu0 %v22920_v14  ;;  %v23283_v43 = vadd.f32 %v19725_v33, %v19713_v41  ;;  %v23285_v52 = vpop.permute.xlu0 %8925  ;;  %v838_v14 = vadd.f32 %v22765_v0, %v726_v8  ;;  %v23306_v32 = vpop.permute.xlu1 %8920  ;;  %v27281_v16 = vld [vmem:[#allocation16_spill] sm:$0xff]  ;;  %v17328_v0 = vld [vmem:[%s27167_s1 + $0x28] sm:$0xff] }
 0x156   :  { %27277 = vst [vmem:[#allocation75_spill] sm:$0xff] %v23285_v52  ;;  %20124 = vmatprep.subr.mxu1 %v22742_v47  ;;  %20114 = vmatprep.subr.mxu0 %v22933_v9  ;;  %v23302_v21 = vpop.f32.mrf.mxu0  ;;  %v23304_v59 = vpop.f32.mrf.mxu1  ;;  %27280 = vst [vmem:[#allocation78_spill] sm:$0xff] %v23306_v32  ;;  %v599_v41 = vadd.f32 %v27281_v16, %v22602_v3  ;;  %v27283_v33 = vld [vmem:[#allocation13_spill] sm:$0xff]  ;;  %v27284_v3 = vld [vmem:[#allocation15_spill] sm:$0xff] }
 0x157   :  { %20125 = vmatpush3.msra.mxu1 %v22742_v47  ;;  %6111 = vperm.xlu1 %21445, %v23278_v60   ;;  %27278 = vst [vmem:[#allocation76_spill] sm:$0xff] %v23302_v21  ;;  %27279 = vst [vmem:[#allocation77_spill] sm:$0xff] %v23304_v59  ;;  %v17350_v47 = vld [vmem:[%s27166_s0 + $0x130] sm:$0xf]  ;;  %v365_v8 = vadd.f32 %v27283_v33, %v250_v17  ;;  %v725_v61 = vadd.f32 %v27284_v3, %v604_v62  ;;  %v27285_v16 = vld [vmem:[#allocation9_spill] sm:$0xff] }
 0x158   :  { %6116 = vperm.xlu0 %21444, %v23061_v5   ;;  %20115 = vmatpush3.msra.mxu0 %v22933_v9  ;;  %v23328_v9 = vld [vmem:[%s27168_s4 + $0x30] sm:$0xff]  ;;  %v245_v49 = vadd.f32 %v27286_v54, %v27285_v16  ;;  %v866_v17 = vadd.f32 %v22799_v31, %v838_v14  ;;  %v27288_v33 = vld [vmem:[#allocation17_spill] sm:$0xff]  ;;  %v23344_v16 = vmax.f32 %v867_v55, 0.0 }
 0x159   :  { %20126 = vmatprep.subr.mxu1 %v22757_v50  ;;  %20116 = vmatprep.mubr.msk.f32.mxu0 %vm51_vm1, %v17327_v4  ;;  %v724_v3 = vadd.f32 %v27288_v33, %v599_v41  ;;  %v837_v59 = vadd.f32 %v27289_v44, %v725_v61  ;;  %v17329_v31 = vld [vmem:[%s27167_s1 + $0x30] sm:$0xff]  ;;  %v27290_v41 = vld [vmem:[#allocation21_spill] sm:$0xff]  ;;  %v23363_v55 = vpop.permute.xlu1 %8910 }
 0x15a   :  { %20127 = vmatpush3.msra.mxu1 %v22757_v50  ;;  %20128 = vmatprep.mubr.msk.f32.mxu1 %vm51_vm1, %v6615_v63  ;;  %v23338_v50 = vld [vmem:[%s27168_s4 + $0x38] sm:$0xff]  ;;  %v23340_v63 = vpop.permute.xlu0 %8915  ;;  %v6617_v14 = vld [vmem:[%s27167_s1 + $0x10] sm:$0xff]  ;;  %v393_v54 = vadd.f32 %v27290_v41, %v365_v8  ;;  %27293 = vst [vmem:[#allocation15_spill] sm:$0xff] %v23363_v55  ;;  %v27296_v41 = vld [vmem:[#allocation5_spill] sm:$0xff]  ;;  %v23377_v58 = vmax.f32 %v866_v17, 0.0 }
 0x15b   :  { %20134 = vmatprep.subr.msk.mxu0 %vm64_vm0, %v17350_v47  ;;  %20117 = vmatmul.mubr.msk.f32.vlgmr.msra.gmra.mxu0 %vm51_vm1, %v17328_v0  ;;  %v19734_v62 = vpop.f32.mrf.mxu0  ;;  %v19746_v4 = vpop.f32.mrf.mxu1  ;;  %27287 = vst [vmem:[#allocation16_spill] sm:$0xff] %v23340_v63  ;;  %v27295_v33 = vld [vmem:[#allocation19_spill] sm:$0xff]  ;;  %v23392_v17 = vld [vmem:[%s27168_s4 + $0x20] sm:$0xff] }
 0x15c   :  { %20129 = vmatmul.mubr.msk.f32.vlgmr.msra.gmra.mxu1 %vm51_vm1, %v22707_v20  ;;  %20135 = vmatpush3.msk.msra.mxu0 %vm64_vm0, %v17350_v47  ;;  %v2954_v0 = vadd.f32 %v19734_v62, %v23245_v38  ;;  %v27294_v47 = vld [vmem:[#allocation14_spill] sm:$0xff]  ;;  %v836_v21 = vadd.f32 %v27295_v33, %v724_v3  ;;  %v17330_v38 = vld [vmem:[%s27167_s1 + $0x38] sm:$0xff] }
 0x15d   :  { %20136 = vmatprep.subr.mxu0 %v23050_v19  ;;  %14191 = vperm.xlu1 %21445, %v23328_v9   ;;  %v23359_v44 = vpop.f32.mrf.mxu0  ;;  %v23361_v20 = vpop.f32.mrf.mxu1  ;;  %v364_v61 = vadd.f32 %v27294_v47, %v245_v49  ;;  %v6618_v8 = vld [vmem:[%s27167_s1 + $0x18] sm:$0xff] }
 0x15e   :  { %27291 = vst [vmem:[#allocation24_spill] sm:$0xff] %v23359_v44  ;;  %27292 = vst [vmem:[#allocation13_spill] sm:$0xff] %v23361_v20  ;;  %14196 = vperm.xlu0 %21444, %v23338_v50   ;;  %20137 = vmatpush3.msra.mxu0 %v23050_v19  ;;  %v3065_v62 = vadd.f32 %v19746_v4, %v2954_v0  ;;  %v27297_v20 = vld [vmem:[#allocation6_spill] sm:$0xff]  ;;  %v865_v19 = vadd.f32 %v22823_v1, %v837_v59  ;;  %v27298_v47 = vld [vmem:[#allocation11_spill] sm:$0xff]  ;;  %v23385_v4 = vmax.f32 %v393_v54, 0.0 }
 0x15f   :  { %v240_v44 = vadd.f32 %v27297_v20, %v27296_v41  ;;  %20119 = vmatprep.mubr.msk.f32.mxu0 %vm51_vm1, %v17329_v31  ;;  %20131 = vmatprep.mubr.msk.f32.mxu1 %vm51_vm1, %v6617_v14  ;;  %v23397_v1 = vld [vmem:[%s27168_s4 + $0x28] sm:$0xff]  ;;  %v23400_v31 = vpop.permute.xlu0 %8905  ;;  %v27300_v14 = vld [vmem:[#allocation7_spill] sm:$0xff]  ;;  %v27301_v0 = vld [vmem:[#allocation8_spill] sm:$0xff] }
 0x160   :  { %20138 = vmatprep.subr.mxu0 %v23068_v25  ;;  %20146 = vmatprep.subr.mxu1 %v23344_v16  ;;  %v19737_v49 = vpop.f32.mrf.mxu0  ;;  %v19749_v3 = vpop.f32.mrf.mxu1  ;;  %27299 = vst [vmem:[#allocation9_spill] sm:$0xff] %v23400_v31  ;;  %v235_v54 = vadd.f32 %v27301_v0, %v27300_v14  ;;  %v27441_v31 = vld [vmem:[#allocation28_spill] sm:$0xff]  ;;  %v27442_v55 = vld [vmem:[#allocation39_spill] sm:$0xff] }
 0x161   :  { %v363_v33 = vadd.f32 %v27298_v47, %v240_v44  ;;  %20120 = vmatmul.mubr.msk.f32.gmra.mxu0 %vm51_vm1, %v17330_v38  ;;  %20132 = vmatmul.mubr.msk.f32.gmra.mxu1 %vm51_vm1, %v6618_v8  ;;  %v2956_v59 = vadd.f32 %v19737_v49, %v23283_v43  ;;  %v27302_v44 = vld [vmem:[#allocation23_spill] sm:$0xff]  ;;  %v864_v38 = vadd.f32 %v22853_v30, %v836_v21  ;;  %v23414_v49 = vpop.permute.xlu1 %8900  ;;  %v27306_v47 = vld [vmem:[#allocation12_spill] sm:$0xff] }
 0x162   :  { %v392_v20 = vadd.f32 %v27302_v44, %v364_v61  ;;  %20139 = vmatpush3.msra.mxu0 %v23068_v25  ;;  %20147 = vmatpush3.msra.mxu1 %v23344_v16  ;;  %v23410_v41 = vpop.f32.mrf.mxu0  ;;  %v23412_v43 = vpop.f32.mrf.mxu1  ;;  %27305 = vst [vmem:[#allocation18_spill] sm:$0xff] %v23414_v49  ;;  %v362_v14 = vadd.f32 %v27306_v47, %v235_v54  ;;  %v23417_v61 = vmax.f32 %v865_v19, 0.0  ;;  %v27307_v30 = vld [vmem:[#allocation27_spill] sm:$0xff]  ;;  %v27309_v54 = vld [vmem:[#allocation30_spill] sm:$0xff] }
 0x163   :  { %20148 = vmatprep.subr.mxu1 %v23377_v58  ;;  %20166 = vmatprep.subr.mxu0 %v23385_v4  ;;  %v3067_v8 = vadd.f32 %v19749_v3, %v2956_v59  ;;  %27303 = vst [vmem:[#allocation10_spill] sm:$0xff] %v23410_v41  ;;  %27304 = vst [vmem:[#allocation17_spill] sm:$0xff] %v23412_v43  ;;  %v391_v25 = vadd.f32 %v27307_v30, %v363_v33  ;;  %v23427_v3 = vmax.f32 %v864_v38, 0.0  ;;  %v23435_v19 = vld [vmem:[%s27168_s4 + $0x10] sm:$0xff]  ;;  %v23440_v33 = vld [vmem:[%s27168_s4 + $0x18] sm:$0xff]  ;;  %v23444_v0 = vpop.permute.xlu0 %8895 }
 0x164   :  { %14181 = vperm.xlu1 %21445, %v23392_v17   ;;  %14186 = vperm.xlu0 %21444, %v23397_v1   ;;  %v23425_v21 = vmax.f32 %v392_v20, 0.0  ;;  %27308 = vst [vmem:[#allocation21_spill] sm:$0xff] %v23444_v0  ;;  %v17364_v38 = vld [vmem:[%s27170_s3 + $0x80] sm:$0xff]  ;;  %v1083_v35 = vadd.f32 %v27441_v31, %v27440_v27 }
 0x165   :  { %20149 = vmatpush3.msra.mxu1 %v23377_v58  ;;  %20140 = vmatprep.mubr.msk.f32.mxu0 %vm51_vm1, %v23189_v48  ;;  %v23451_v20 = vmax.f32 %v391_v25, 0.0  ;;  %v23462_v30 = vpop.permute.xlu1 %8890  ;;  %v23477_v25 = vld [vmem:[%s27168_s4 + $0x8] sm:$0xff] }
 0x166   :  { %20150 = vmatprep.subr.mxu1 %v23417_v61  ;;  %20141 = vmatmul.mubr.msk.f32.vlgmr.msra.gmra.mxu0 %vm51_vm1, %v23209_v2  ;;  %v390_v2 = vadd.f32 %v27309_v54, %v362_v14  ;;  %27313 = vst [vmem:[#allocation6_spill] sm:$0xff] %v23462_v30  ;;  %v17365_v54 = vld [vmem:[%s27170_s3 + $0x88] sm:$0xff] }
 0x167   :  { %20151 = vmatpush3.msra.mxu1 %v23417_v61  ;;  %20167 = vmatpush3.msra.mxu0 %v23385_v4  ;;  %v19758_v48 = vpop.f32.mrf.mxu0  ;;  %v19770_v59 = vpop.f32.mrf.mxu1 }
 0x168   :  { %20152 = vmatprep.subr.mxu1 %v23427_v3  ;;  %20168 = vmatprep.subr.mxu0 %v23425_v21  ;;  %v23449_v44 = vadd.f32 %v19758_v48, %v3065_v62  ;;  %v23469_v62 = vld [vmem:[%s27168_s4] sm:$0xff]  ;;  %v23479_v48 = vmax.f32 %v390_v2, 0.0 }
 0x169   :  { %14171 = vperm.xlu1 %21445, %v23435_v19   ;;  %14176 = vperm.xlu0 %21444, %v23440_v33   ;;  %v23458_v47 = vpop.f32.mrf.mxu0  ;;  %v23460_v14 = vpop.f32.mrf.mxu1  ;;  %v23492_v2 = vld [vmem:[%s27170_s3 + $0x40] sm:$0xff] }
 0x16a   :  { %27310 = vst [vmem:[#allocation14_spill] sm:$0xff] %v23449_v44  ;;  %27311 = vst [vmem:[#allocation19_spill] sm:$0xff] %v23458_v47  ;;  %20153 = vmatpush3.msra.mxu1 %v23427_v3  ;;  %20169 = vmatpush3.msra.mxu0 %v23425_v21  ;;  %v17366_v47 = vld [vmem:[%s27170_s3 + $0x90] sm:$0xff] }
 0x16b   :  { %27312 = vst [vmem:[#allocation5_spill] sm:$0xff] %v23460_v14  ;;  %20143 = vmatprep.mubr.msk.f32.mxu0 %vm51_vm1, %v23236_v53  ;;  %20170 = vmatprep.subr.mxu0 %v23451_v20 }
 0x16c   :  { %20144 = vmatmul.mubr.msk.f32.gmra.mxu0 %vm51_vm1, %v23254_v26  ;;  %20154 = vmatprep.mubr.msk.f32.mxu1 %vm7115_vm2, %v17364_v38  ;;  %v19761_v14 = vpop.f32.mrf.mxu0  ;;  %v19773_v53 = vpop.f32.mrf.mxu1  ;;  %v23503_v38 = vld [vmem:[%s27170_s3 + $0x48] sm:$0xff] }
 0x16d   :  { %20171 = vmatpush3.msra.mxu0 %v23451_v20  ;;  %14161 = vperm.xlu1 %21445, %v23469_v62   ;;  %v23494_v44 = vadd.f32 %v19761_v14, %v3067_v8  ;;  %v23496_v26 = vpop.permute.xlu0 %2616 }
 0x16e   :  { %27315 = vst [vmem:[#allocation7_spill] sm:$0xff] %v23496_v26  ;;  %20172 = vmatprep.subr.mxu0 %v23479_v48  ;;  %14166 = vperm.xlu0 %21444, %v23477_v25   ;;  %v23510_v8 = vpop.f32.mrf.mxu0  ;;  %v23512_v14 = vpop.f32.mrf.mxu1 }
 0x16f   :  { %27314 = vst [vmem:[#allocation11_spill] sm:$0xff] %v23494_v44  ;;  %20155 = vmatmul.mubr.msk.f32.vlgmr.msra.gmra.mxu1 %vm7115_vm2, %v17365_v54  ;;  %20173 = vmatpush3.msra.mxu0 %v23479_v48  ;;  %27316 = vst [vmem:[#allocation8_spill] sm:$0xff] %v23510_v8  ;;  %v23514_v44 = vpop.permute.xlu1 %2611  ;;  %v17367_v54 = vld [vmem:[%s27170_s3 + $0x98] sm:$0xff]  ;;  %v17368_v8 = vld [vmem:[%s27170_s3 + $0xa0] sm:$0xff] }
 0x170   :  { %27317 = vst [vmem:[#allocation23_spill] sm:$0xff] %v23512_v14  ;;  %27318 = vst [vmem:[#allocation12_spill] sm:$0xff] %v23514_v44  ;;  %20174 = vmatprep.mubr.msk.f32.mxu0 %vm7115_vm2, %v23492_v2  ;;  %20226 = vmatprep.subr.mxu0 %v23344_v16  ;;  %v17358_v14 = vld [vmem:[%s27170_s3 + $0x50] sm:$0xff] }
 0x171   :  { %20175 = vmatmul.mubr.msk.f32.vlgmr.msra.gmra.mxu0 %vm7115_vm2, %v23503_v38  ;;  %20157 = vmatprep.mubr.msk.f32.mxu1 %vm7115_vm2, %v17366_v47  ;;  %v17359_v47 = vld [vmem:[%s27170_s3 + $0x58] sm:$0xff]  ;;  %v23538_v44 = vpop.permute.xlu0 %2606 }
 0x172   :  { %20227 = vmatpush3.msra.mxu0 %v23344_v16  ;;  %6594 = vperm.xlu1 %21445, %v23009_v24   ;;  %27319 = vst [vmem:[#allocation27_spill] sm:$0xff] %v23538_v44 }
 0x173   :  { %20228 = vmatprep.subr.mxu0 %v23377_v58  ;;  %6599 = vperm.xlu0 %21444, %v23014_v10   ;;  %v19782_v43 = vpop.f32.mrf.mxu0  ;;  %v19794_v41 = vpop.f32.mrf.mxu1 }
 0x174   :  { %20158 = vmatmul.mubr.msk.f32.gmra.mxu1 %vm7115_vm2, %v17367_v54  ;;  %20229 = vmatpush3.msra.mxu0 %v23377_v58  ;;  %v3418_v46 = vadd.f32 %v19782_v43, %v19770_v59  ;;  %v23548_v30 = vpop.permute.xlu1 %2601  ;;  %v17369_v54 = vld [vmem:[%s27170_s3 + $0xa8] sm:$0xff]  ;;  %v17360_v43 = vld [vmem:[%s27170_s3 + $0x60] sm:$0xff] }
 0x175   :  { %20177 = vmatprep.mubr.msk.f32.mxu0 %vm7115_vm2, %v17358_v14  ;;  %20230 = vmatprep.subr.mxu0 %v23417_v61  ;;  %v23544_v26 = vpop.f32.mrf.mxu0  ;;  %v23546_v22 = vpop.f32.mrf.mxu1  ;;  %27322 = vst [vmem:[#allocation80_spill] sm:$0xff] %v23548_v30  ;;  %v17361_v59 = vld [vmem:[%s27170_s3 + $0x68] sm:$0xff] }
 0x176   :  { %27320 = vst [vmem:[#allocation30_spill] sm:$0xff] %v23544_v26  ;;  %27321 = vst [vmem:[#allocation79_spill] sm:$0xff] %v23546_v22  ;;  %20178 = vmatmul.mubr.msk.f32.gmra.mxu0 %vm7115_vm2, %v17359_v47  ;;  %20160 = vmatprep.mubr.msk.f32.mxu1 %vm7115_vm2, %v17368_v8  ;;  %v3539_v44 = vadd.f32 %v19794_v41, %v3418_v46  ;;  %v17370_v46 = vld [vmem:[%s27170_s3 + $0xb0] sm:$0xff]  ;;  %v23570_v47 = vpop.permute.xlu0 %9678  ;;  %v17371_v22 = vld [vmem:[%s27170_s3 + $0xb8] sm:$0xff] }
 0x177   :  { %20231 = vmatpush3.msra.mxu0 %v23417_v61  ;;  %6584 = vperm.xlu1 %21445, %v23278_v60   ;;  %27323 = vst [vmem:[#allocation81_spill] sm:$0xff] %v23570_v47  ;;  %v17362_v26 = vld [vmem:[%s27170_s3 + $0x70] sm:$0xff]  ;;  %v17363_v47 = vld [vmem:[%s27170_s3 + $0x78] sm:$0xff] }
 0x178   :  { %20232 = vmatprep.subr.mxu0 %v23427_v3  ;;  %6589 = vperm.xlu0 %21444, %v23061_v5   ;;  %v19785_v41 = vpop.f32.mrf.mxu0  ;;  %v19797_v8 = vpop.f32.mrf.mxu1 }
 0x179   :  { %20161 = vmatmul.mubr.msk.f32.gmra.mxu1 %vm7115_vm2, %v17369_v54  ;;  %20233 = vmatpush3.msra.mxu0 %v23427_v3  ;;  %v3428_v14 = vadd.f32 %v19785_v41, %v19773_v53 }
 0x17a   :  { %20180 = vmatprep.mubr.msk.f32.mxu0 %vm7115_vm2, %v17360_v43  ;;  %20246 = vmatprep.subr.mxu0 %v23385_v4  ;;  %v23582_v53 = vpop.f32.mrf.mxu0  ;;  %v23584_v41 = vpop.f32.mrf.mxu1 }
 0x17b   :  { %20181 = vmatmul.mubr.msk.f32.gmra.mxu0 %vm7115_vm2, %v17361_v59  ;;  %20163 = vmatprep.mubr.msk.f32.mxu1 %vm7115_vm2, %v17370_v46  ;;  %v3541_v54 = vadd.f32 %v19797_v8, %v3428_v14  ;;  %27324 = vst [vmem:[#allocation82_spill] sm:$0xff] %v23582_v53  ;;  %27325 = vst [vmem:[#allocation83_spill] sm:$0xff] %v23584_v41  ;;  %v23586_v43 = vpop.permute.xlu1 %9673  ;;  %v23596_v8 = vpop.permute.xlu0 %9668 }
 0x17c   :  { %27326 = vst [vmem:[#allocation84_spill] sm:$0xff] %v23586_v43  ;;  %14944 = vperm.xlu1 %21445, %v23328_v9   ;;  %14949 = vperm.xlu0 %21444, %v23338_v50   ;;  %27327 = vst [vmem:[#allocation85_spill] sm:$0xff] %v23596_v8 }
 0x17d   :  { %20164 = vmatmul.mubr.msk.f32.gmra.mxu1 %vm7115_vm2, %v17371_v22  ;;  %20183 = vmatprep.mubr.msk.f32.mxu0 %vm7115_vm2, %v17362_v26 }
 0x17f   :  { %20184 = vmatmul.mubr.msk.f32.gmra.mxu0 %vm7115_vm2, %v17363_v47  ;;  %v19806_v59 = vpop.f32.mrf.mxu0  ;;  %v19818_v46 = vpop.f32.mrf.mxu1 }
 0x180   :  { %14934 = vperm.xlu1 %21445, %v23392_v17   ;;  %14939 = vperm.xlu0 %21444, %v23397_v1   ;;  %v3650_v14 = vadd.f32 %v19806_v59, %v3539_v44  ;;  %v23606_v22 = vpop.permute.xlu1 %9663  ;;  %v23616_v59 = vpop.permute.xlu0 %9658 }
 0x181   :  { %20234 = vmatprep.mubr.msk.f32.mxu0 %vm7115_vm2, %v23492_v2  ;;  %v23602_v41 = vpop.f32.mrf.mxu0  ;;  %v23604_v53 = vpop.f32.mrf.mxu1  ;;  %27330 = vst [vmem:[#allocation88_spill] sm:$0xff] %v23606_v22  ;;  %27332 = vst [vmem:[#allocation90_spill] sm:$0xff] %v23616_v59 }
 0x182   :  { %27328 = vst [vmem:[#allocation86_spill] sm:$0xff] %v23602_v41  ;;  %27329 = vst [vmem:[#allocation87_spill] sm:$0xff] %v23604_v53  ;;  %v23608_v26 = vadd.f32 %v19818_v46, %v3650_v14 }
 0x183   :  { %20235 = vmatmul.mubr.msk.f32.vlgmr.msra.gmra.mxu0 %vm7115_vm2, %v23503_v38 }
 0x184   :  { %27331 = vst [vmem:[#allocation89_spill] sm:$0xff] %v23608_v26  ;;  %20247 = vmatpush3.msra.mxu0 %v23385_v4  ;;  %14924 = vperm.xlu1 %21445, %v23435_v19   ;;  %v19809_v47 = vpop.f32.mrf.mxu0  ;;  %v19821_v44 = vpop.f32.mrf.mxu1 }
 0x185   :  { %20248 = vmatprep.subr.mxu0 %v23425_v21  ;;  %14929 = vperm.xlu0 %21444, %v23440_v33   ;;  %v3652_v2 = vadd.f32 %v19809_v47, %v3541_v54  ;;  %v23626_v14 = vpop.permute.xlu1 %9653  ;;  %v23633_v47 = vpop.permute.xlu0 %9648 }
 0x186   :  { %20249 = vmatpush3.msra.mxu0 %v23425_v21  ;;  %v23622_v38 = vpop.f32.mrf.mxu0  ;;  %v23624_v4 = vpop.f32.mrf.mxu1  ;;  %27336 = vst [vmem:[#allocation94_spill] sm:$0xff] %v23626_v14  ;;  %27337 = vst [vmem:[#allocation95_spill] sm:$0xff] %v23633_v47 }
 0x187   :  { %20250 = vmatprep.subr.mxu0 %v23451_v20  ;;  %v23620_v46 = vadd.f32 %v19821_v44, %v3652_v2  ;;  %27334 = vst [vmem:[#allocation92_spill] sm:$0xff] %v23622_v38  ;;  %27335 = vst [vmem:[#allocation93_spill] sm:$0xff] %v23624_v4 }
 0x188   :  { %20251 = vmatpush3.msra.mxu0 %v23451_v20  ;;  %14914 = vperm.xlu1 %21445, %v23469_v62  }
 0x189   :  { %27333 = vst [vmem:[#allocation91_spill] sm:$0xff] %v23620_v46  ;;  %20252 = vmatprep.subr.mxu0 %v23479_v48  ;;  %14919 = vperm.xlu0 %21444, %v23477_v25   ;;  %v23641_v26 = vpop.permute.xlu1 %9643  ;;  %v23645_v4 = vpop.permute.xlu0 %3201 }
 0x18a   :  { %20253 = vmatpush3.msra.mxu0 %v23479_v48  ;;  %27340 = vst [vmem:[#allocation98_spill] sm:$0xff] %v23641_v26  ;;  %27341 = vst [vmem:[#allocation99_spill] sm:$0xff] %v23645_v4 }
 0x18b   :  { %v19830_v21 = vpop.f32.mrf.mxu0  ;;  %v19842_v54 = vpop.f32.mrf.mxu1 }
 0x18c   :  { %6956 = vperm.xlu1 %21445, %v23009_v24   ;;  %v4003_v44 = vadd.f32 %v19842_v54, %v19830_v21 }
 0x18d   :  { %6961 = vperm.xlu0 %21444, %v23014_v10   ;;  %v23637_v2 = vpop.f32.mrf.mxu0  ;;  %v23639_v20 = vpop.f32.mrf.mxu1 }
 0x18e   :  { %27338 = vst [vmem:[#allocation96_spill] sm:$0xff] %v23637_v2  ;;  %27339 = vst [vmem:[#allocation97_spill] sm:$0xff] %v23639_v20  ;;  %v23651_v10 = vpop.permute.xlu1 %3196 }
 0x18f   :  { %27344 = vst [vmem:[#allocation102_spill] sm:$0xff] %v23651_v10 }
 0x190   :  { %6946 = vperm.xlu1 %21445, %v23278_v60   ;;  %v19833_v53 = vpop.f32.mrf.mxu0  ;;  %v19845_v46 = vpop.f32.mrf.mxu1 }
 0x191   :  { %6951 = vperm.xlu0 %21444, %v23061_v5   ;;  %v4013_v48 = vadd.f32 %v19845_v46, %v19833_v53  ;;  %v23655_v60 = vpop.permute.xlu0 %3191 }
 0x192   :  { %v23647_v41 = vpop.f32.mrf.mxu0  ;;  %v23649_v24 = vpop.f32.mrf.mxu1  ;;  %27345 = vst [vmem:[#allocation103_spill] sm:$0xff] %v23655_v60 }
 0x193   :  { %27342 = vst [vmem:[#allocation100_spill] sm:$0xff] %v23647_v41  ;;  %27343 = vst [vmem:[#allocation101_spill] sm:$0xff] %v23649_v24  ;;  %v23663_v20 = vpop.permute.xlu1 %3186 }
 0x194   :  { %15697 = vperm.xlu1 %21445, %v23328_v9   ;;  %27348 = vst [vmem:[#allocation106_spill] sm:$0xff] %v23663_v20  ;;  %v23929_v20 = vld [vmem:[%s27170_s3 + $0x38] sm:$0xff] }
 0x195   :  { %15702 = vperm.xlu0 %21444, %v23338_v50   ;;  %v23667_v60 = vpop.permute.xlu0 %10431  ;;  %27412 = vst [vmem:[#allocation170_spill] sm:$0xff] %v23929_v20 }
 0x196   :  { %27349 = vst [vmem:[#allocation107_spill] sm:$0xff] %v23667_v60 }
 0x197   :  { %v19854_v21 = vpop.f32.mrf.mxu0  ;;  %v19866_v54 = vpop.f32.mrf.mxu1 }
 0x198   :  { %15687 = vperm.xlu1 %21445, %v23392_v17   ;;  %v4124_v5 = vadd.f32 %v19854_v21, %v4003_v44 }
 0x199   :  { %15692 = vperm.xlu0 %21444, %v23397_v1   ;;  %v23659_v53 = vpop.f32.mrf.mxu0  ;;  %v23661_v46 = vpop.f32.mrf.mxu1 }
 0x19a   :  { %27346 = vst [vmem:[#allocation104_spill] sm:$0xff] %v23659_v53  ;;  %27347 = vst [vmem:[#allocation105_spill] sm:$0xff] %v23661_v46  ;;  %v4235_v2 = vadd.f32 %v19866_v54, %v4124_v5  ;;  %v23673_v53 = vpop.permute.xlu1 %10426  ;;  %v23677_v46 = vpop.permute.xlu0 %10421 }
 0x19b   :  { %27352 = vst [vmem:[#allocation110_spill] sm:$0xff] %v23673_v53  ;;  %27353 = vst [vmem:[#allocation111_spill] sm:$0xff] %v23677_v46 }
 0x19c   :  { %15677 = vperm.xlu1 %21445, %v23435_v19   ;;  %v19857_v24 = vpop.f32.mrf.mxu0  ;;  %v19869_v41 = vpop.f32.mrf.mxu1 }
 0x19d   :  { %15682 = vperm.xlu0 %21444, %v23440_v33   ;;  %v4126_v38 = vadd.f32 %v19857_v24, %v4013_v48 }
 0x19e   :  { %v23669_v44 = vpop.f32.mrf.mxu0  ;;  %v23671_v21 = vpop.f32.mrf.mxu1 }
 0x19f   :  { %v4237_v10 = vadd.f32 %v19869_v41, %v4126_v38  ;;  %27350 = vst [vmem:[#allocation108_spill] sm:$0xff] %v23669_v44  ;;  %27351 = vst [vmem:[#allocation109_spill] sm:$0xff] %v23671_v21  ;;  %v23687_v24 = vpop.permute.xlu1 %10416  ;;  %v23693_v46 = vpop.permute.xlu0 %10411 }
 0x1a0   :  { %15667 = vperm.xlu1 %21445, %v23469_v62   ;;  %27357 = vst [vmem:[#allocation115_spill] sm:$0xff] %v23687_v24  ;;  %27359 = vst [vmem:[#allocation117_spill] sm:$0xff] %v23693_v46 }
 0x1a1   :  { %15672 = vperm.xlu0 %21444, %v23477_v25  }
 0x1a3   :  { %v19878_v54 = vpop.f32.mrf.mxu0  ;;  %v19890_v5 = vpop.f32.mrf.mxu1 }
 0x1a4   :  { %16301 = vperm.xlu1 %21445, %v23328_v9   ;;  %v23680_v48 = vadd.f32 %v19878_v54, %v4235_v2 }
 0x1a5   :  { %16306 = vperm.xlu0 %21444, %v23338_v50   ;;  %v23683_v41 = vpop.f32.mrf.mxu0  ;;  %v23685_v38 = vpop.f32.mrf.mxu1 }
 0x1a6   :  { %27354 = vst [vmem:[#allocation112_spill] sm:$0xff] %v23680_v48  ;;  %27355 = vst [vmem:[#allocation113_spill] sm:$0xff] %v23683_v41  ;;  %v23699_v50 = vpop.permute.xlu1 %10406 }
 0x1a7   :  { %27356 = vst [vmem:[#allocation114_spill] sm:$0xff] %v23685_v38  ;;  %27362 = vst [vmem:[#allocation120_spill] sm:$0xff] %v23699_v50  ;;  %v23703_v38 = vpop.permute.xlu0 %10401  ;;  %v23904_v50 = vld [vmem:[%s27170_s3 + $0x20] sm:$0xff] }
 0x1a8   :  { %16291 = vperm.xlu1 %21445, %v23392_v17   ;;  %v19881_v21 = vpop.f32.mrf.mxu0  ;;  %v19893_v44 = vpop.f32.mrf.mxu1  ;;  %27363 = vst [vmem:[#allocation121_spill] sm:$0xff] %v23703_v38  ;;  %27407 = vst [vmem:[#allocation165_spill] sm:$0xff] %v23904_v50 }
 0x1a9   :  { %16296 = vperm.xlu0 %21444, %v23397_v1   ;;  %v23691_v53 = vadd.f32 %v19881_v21, %v4237_v10  ;;  %v6991_v10 = vld [vmem:[%s27171_s6 + $0x70] sm:$0xff] }
 0x1aa   :  { %v23695_v9 = vpop.f32.mrf.mxu0  ;;  %v23697_v2 = vpop.f32.mrf.mxu1 }
 0x1ab   :  { %27358 = vst [vmem:[#allocation116_spill] sm:$0xff] %v23691_v53  ;;  %27360 = vst [vmem:[#allocation118_spill] sm:$0xff] %v23695_v9  ;;  %v23722_v41 = vpop.permute.xlu0 %3786 }
 0x1ac   :  { %27361 = vst [vmem:[#allocation119_spill] sm:$0xff] %v23697_v2  ;;  %16281 = vperm.xlu1 %21445, %v23435_v19   ;;  %v23714_v19 = vpop.permute.xlu1 %10396  ;;  %27367 = vst [vmem:[#allocation125_spill] sm:$0xff] %v23722_v41 }
 0x1ad   :  { %16286 = vperm.xlu0 %21444, %v23440_v33   ;;  %27366 = vst [vmem:[#allocation124_spill] sm:$0xff] %v23714_v19  ;;  %v6992_v33 = vld [vmem:[%s27171_s6 + $0x78] sm:$0xff] }
 0x1af   :  { %v19902_v54 = vpop.f32.mrf.mxu0  ;;  %v19914_v17 = vpop.f32.mrf.mxu1 }
 0x1b0   :  { %16271 = vperm.xlu1 %21445, %v23469_v62   ;;  %v4588_v1 = vadd.f32 %v19902_v54, %v19890_v5 }
 0x1b1   :  { %16276 = vperm.xlu0 %21444, %v23477_v25   ;;  %v23710_v21 = vpop.f32.mrf.mxu0  ;;  %v23712_v2 = vpop.f32.mrf.mxu1  ;;  %v6989_v25 = vld [vmem:[%s27171_s6 + $0x60] sm:$0xff] }
 0x1b2   :  { %27364 = vst [vmem:[#allocation122_spill] sm:$0xff] %v23710_v21  ;;  %27365 = vst [vmem:[#allocation123_spill] sm:$0xff] %v23712_v2  ;;  %v4709_v48 = vadd.f32 %v19914_v17, %v4588_v1  ;;  %v6990_v2 = vld [vmem:[%s27171_s6 + $0x68] sm:$0xff]  ;;  %v23731_v17 = vpop.permute.xlu1 %3781  ;;  %v6987_v1 = vld [vmem:[%s27171_s6 + $0x50] sm:$0xff] }
 0x1b3   :  { %27370 = vst [vmem:[#allocation128_spill] sm:$0xff] %v23731_v17 }
 0x1b4   :  { %7065 = vperm.xlu1 %21445, %v6991_v10   ;;  %v19905_v62 = vpop.f32.mrf.mxu0  ;;  %v19917_v5 = vpop.f32.mrf.mxu1 }
 0x1b5   :  { %7070 = vperm.xlu0 %21444, %v6992_v33   ;;  %v4598_v54 = vadd.f32 %v19905_v62, %v19893_v44  ;;  %v6988_v44 = vld [vmem:[%s27171_s6 + $0x58] sm:$0xff]  ;;  %v23739_v62 = vpop.permute.xlu0 %3776 }
 0x1b6   :  { %v23727_v53 = vpop.f32.mrf.mxu0  ;;  %v23729_v9 = vpop.f32.mrf.mxu1  ;;  %27371 = vst [vmem:[#allocation129_spill] sm:$0xff] %v23739_v62 }
 0x1b7   :  { %v4711_v21 = vadd.f32 %v19917_v5, %v4598_v54  ;;  %27368 = vst [vmem:[#allocation126_spill] sm:$0xff] %v23727_v53  ;;  %27369 = vst [vmem:[#allocation127_spill] sm:$0xff] %v23729_v9  ;;  %v23748_v9 = vpop.permute.xlu1 %3771  ;;  %v6986_v53 = vld [vmem:[%s27171_s6 + $0x48] sm:$0xff] }
 0x1b8   :  { %7055 = vperm.xlu1 %21445, %v6989_v25   ;;  %v6985_v25 = vld [vmem:[%s27171_s6 + $0x40] sm:$0xff]  ;;  %27374 = vst [vmem:[#allocation132_spill] sm:$0xff] %v23748_v9 }
 0x1b9   :  { %7060 = vperm.xlu0 %21444, %v6990_v2  }
 0x1bb   :  { %v19926_v10 = vpop.f32.mrf.mxu0  ;;  %v19938_v33 = vpop.f32.mrf.mxu1 }
 0x1bc   :  { %7045 = vperm.xlu1 %21445, %v6987_v1   ;;  %v4820_v5 = vadd.f32 %v19926_v10, %v4709_v48 }
 0x1bd   :  { %7050 = vperm.xlu0 %21444, %v6988_v44   ;;  %v23744_v2 = vpop.f32.mrf.mxu0  ;;  %v23746_v54 = vpop.f32.mrf.mxu1  ;;  %v6983_v44 = vld [vmem:[%s27171_s6 + $0x30] sm:$0xff] }
 0x1be   :  { %27372 = vst [vmem:[#allocation130_spill] sm:$0xff] %v23744_v2  ;;  %27373 = vst [vmem:[#allocation131_spill] sm:$0xff] %v23746_v54  ;;  %v23753_v17 = vadd.f32 %v19938_v33, %v4820_v5  ;;  %v23758_v2 = vpop.permute.xlu0 %11184  ;;  %v6984_v54 = vld [vmem:[%s27171_s6 + $0x38] sm:$0xff]  ;;  %v23769_v5 = vpop.permute.xlu1 %11179 }
 0x1bf   :  { %27376 = vst [vmem:[#allocation134_spill] sm:$0xff] %v23758_v2  ;;  %27380 = vst [vmem:[#allocation138_spill] sm:$0xff] %v23769_v5 }
 0x1c0   :  { %27375 = vst [vmem:[#allocation133_spill] sm:$0xff] %v23753_v17  ;;  %7035 = vperm.xlu1 %21445, %v6985_v25   ;;  %v19929_v1 = vpop.f32.mrf.mxu0  ;;  %v19941_v48 = vpop.f32.mrf.mxu1 }
 0x1c1   :  { %7040 = vperm.xlu0 %21444, %v6986_v53   ;;  %v4822_v10 = vadd.f32 %v19929_v1, %v4711_v21  ;;  %v6981_v53 = vld [vmem:[%s27171_s6 + $0x20] sm:$0xff]  ;;  %v6982_v21 = vld [vmem:[%s27171_s6 + $0x28] sm:$0xff] }
 0x1c2   :  { %v23765_v62 = vpop.f32.mrf.mxu0  ;;  %v23767_v33 = vpop.f32.mrf.mxu1 }
 0x1c3   :  { %v23763_v9 = vadd.f32 %v19941_v48, %v4822_v10  ;;  %27378 = vst [vmem:[#allocation136_spill] sm:$0xff] %v23765_v62  ;;  %27379 = vst [vmem:[#allocation137_spill] sm:$0xff] %v23767_v33  ;;  %v23777_v48 = vpop.permute.xlu0 %11174  ;;  %v6980_v33 = vld [vmem:[%s27171_s6 + $0x18] sm:$0xff] }
 0x1c4   :  { %7025 = vperm.xlu1 %21445, %v6983_v44   ;;  %27381 = vst [vmem:[#allocation139_spill] sm:$0xff] %v23777_v48  ;;  %v6979_v44 = vld [vmem:[%s27171_s6 + $0x10] sm:$0xff] }
 0x1c5   :  { %27377 = vst [vmem:[#allocation135_spill] sm:$0xff] %v23763_v9  ;;  %7030 = vperm.xlu0 %21444, %v6984_v54   ;;  %v23786_v9 = vpop.permute.xlu1 %11169 }
 0x1c6   :  { %27384 = vst [vmem:[#allocation142_spill] sm:$0xff] %v23786_v9 }
 0x1c7   :  { %v19950_v25 = vpop.f32.mrf.mxu0  ;;  %v19962_v1 = vpop.f32.mrf.mxu1 }
 0x1c8   :  { %7015 = vperm.xlu1 %21445, %v6981_v53   ;;  %v5173_v10 = vadd.f32 %v19962_v1, %v19950_v25  ;;  %v6977_v53 = vld [vmem:[%s27171_s6] sm:$0xff]  ;;  %v6978_v25 = vld [vmem:[%s27171_s6 + $0x8] sm:$0xff] }
 0x1c9   :  { %7020 = vperm.xlu0 %21444, %v6982_v21   ;;  %v23782_v54 = vpop.f32.mrf.mxu0  ;;  %v23784_v17 = vpop.f32.mrf.mxu1 }
 0x1ca   :  { %27382 = vst [vmem:[#allocation140_spill] sm:$0xff] %v23782_v54  ;;  %27383 = vst [vmem:[#allocation141_spill] sm:$0xff] %v23784_v17  ;;  %v23797_v17 = vpop.permute.xlu0 %11164  ;;  %v23801_v9 = vpop.permute.xlu1 %11159 }
 0x1cb   :  { %27385 = vst [vmem:[#allocation143_spill] sm:$0xff] %v23797_v17  ;;  %27387 = vst [vmem:[#allocation145_spill] sm:$0xff] %v23801_v9  ;;  %v23877_v9 = vld [vmem:[%s27170_s3 + $0x8] sm:$0xff]  ;;  %v23884_v17 = vld [vmem:[%s27170_s3 + $0x10] sm:$0xff] }
 0x1cc   :  { %7005 = vperm.xlu1 %21445, %v6979_v44   ;;  %v19953_v62 = vpop.f32.mrf.mxu0  ;;  %v19965_v21 = vpop.f32.mrf.mxu1  ;;  %27401 = vst [vmem:[#allocation159_spill] sm:$0xff] %v23877_v9  ;;  %27402 = vst [vmem:[#allocation160_spill] sm:$0xff] %v23884_v17 }
 0x1cd   :  { %7010 = vperm.xlu0 %21444, %v6980_v33   ;;  %v5183_v1 = vadd.f32 %v19965_v21, %v19953_v62  ;;  %v16616_v33 = vld [vmem:[#allocation4] sm:$0x1] }
 0x1ce   :  { %v23799_v54 = vpop.f32.mrf.mxu0  ;;  %v23803_v44 = vpop.f32.mrf.mxu1  ;;  %v7454_v62 = vld [vmem:[%s27172_s5] sm:$0xff] }
 0x1cf   :  { %27386 = vst [vmem:[#allocation144_spill] sm:$0xff] %v23799_v54  ;;  %27388 = vst [vmem:[#allocation146_spill] sm:$0xff] %v23803_v44  ;;  %v23805_v41 = vpop.permute.xlu0 %11154  ;;  %20202 = vmatprep.mubr.msk.f32.mxu1 %vm7470_vm3, %v7454_v62  ;;  %v23839_v62 = vld [vmem:[%s27170_s3 + $0x68] sm:$0xff] }
 0x1d0   :  { %6995 = vperm.xlu1 %21445, %v6977_v53   ;;  %27389 = vst [vmem:[#allocation147_spill] sm:$0xff] %v23805_v41  ;;  %v23815_v53 = vld [vmem:[%s27170_s3 + $0x50] sm:$0xff]  ;;  %27392 = vst [vmem:[#allocation150_spill] sm:$0xff] %v23839_v62 }
 0x1d1   :  { %7000 = vperm.xlu0 %21444, %v6978_v25   ;;  %20237 = vmatprep.mubr.msk.f32.mxu0 %vm7115_vm2, %v23815_v53 }
 0x1d3   :  { %v19974_v5 = vpop.f32.mrf.mxu0  ;;  %v19986_v2 = vpop.f32.mrf.mxu1 }
 0x1d4   :  { %v5294_v48 = vadd.f32 %v19974_v5, %v5173_v10  ;;  %v23825_v5 = vld [vmem:[%s27170_s3 + $0x58] sm:$0xff] }
 0x1d5   :  { %16619 = vperm.xlu0 %21444, %v16616_v33   ;;  %v23807_v19 = vpop.f32.mrf.mxu0  ;;  %v23817_v25 = vpop.f32.mrf.mxu1  ;;  %20238 = vmatmul.mubr.msk.f32.gmra.mxu0 %vm7115_vm2, %v23825_v5 }
 0x1d6   :  { %27390 = vst [vmem:[#allocation148_spill] sm:$0xff] %v23807_v19  ;;  %v5405_v21 = vadd.f32 %v19986_v2, %v5294_v48  ;;  %27391 = vst [vmem:[#allocation149_spill] sm:$0xff] %v23817_v25  ;;  %v23832_v2 = vld [vmem:[%s27170_s3 + $0x60] sm:$0xff] }
 0x1d7   :  { %20240 = vmatprep.mubr.msk.f32.mxu0 %vm7115_vm2, %v23832_v2 }
 0x1d8   :  { %v19977_v10 = vpop.f32.mrf.mxu0  ;;  %v19989_v33 = vpop.f32.mrf.mxu1 }
 0x1d9   :  { %v5296_v48 = vadd.f32 %v19977_v10, %v5183_v1  ;;  %20241 = vmatmul.mubr.msk.f32.gmra.mxu0 %vm7115_vm2, %v23839_v62  ;;  %v23850_v1 = vld [vmem:[%s27170_s3 + $0x70] sm:$0xff]  ;;  %v23857_v10 = vld [vmem:[%s27170_s3 + $0x78] sm:$0xff] }
 0x1da   :  { %v23843_v19 = vpop.f32.mrf.mxu0  ;;  %v23845_v44 = vpop.f32.mrf.mxu1  ;;  %27395 = vst [vmem:[#allocation153_spill] sm:$0xff] %v23850_v1  ;;  %20243 = vmatprep.mubr.msk.f32.mxu0 %vm7115_vm2, %v23850_v1  ;;  %27396 = vst [vmem:[#allocation154_spill] sm:$0xff] %v23857_v10 }
 0x1db   :  { %v5407_v25 = vadd.f32 %v19989_v33, %v5296_v48  ;;  %27393 = vst [vmem:[#allocation151_spill] sm:$0xff] %v23843_v19  ;;  %27394 = vst [vmem:[#allocation152_spill] sm:$0xff] %v23845_v44  ;;  %v23864_v48 = vld [vmem:[%s27170_s3] sm:$0xff] }
 0x1dc   :  { %27397 = vst [vmem:[#allocation155_spill] sm:$0xff] %v23864_v48 }
 0x1dd   :  { %20244 = vmatmul.mubr.msk.f32.gmra.mxu0 %vm7115_vm2, %v23857_v10 }
 0x1de   :  { %20254 = vmatprep.mubr.msk.f32.mxu0 %vm7115_vm2, %v23864_v48 }
 0x1df   :  { %v19998_v33 = vpop.f32.mrf.mxu0  ;;  %v20010_v44 = vpop.f32.mrf.mxu1 }
 0x1e0   :  { %v23868_v19 = vadd.f32 %v19998_v33, %v5405_v21 }
 0x1e1   :  { %v23870_v54 = vpop.f32.mrf.mxu0  ;;  %v23872_v41 = vpop.f32.mrf.mxu1  ;;  %20255 = vmatmul.mubr.msk.f32.vlgmr.msra.gmra.mxu0 %vm7115_vm2, %v23877_v9 }
 0x1e2   :  { %27398 = vst [vmem:[#allocation156_spill] sm:$0xff] %v23868_v19  ;;  %27399 = vst [vmem:[#allocation157_spill] sm:$0xff] %v23870_v54  ;;  %20257 = vmatprep.mubr.msk.f32.mxu0 %vm7115_vm2, %v23884_v17 }
 0x1e3   :  { %27400 = vst [vmem:[#allocation158_spill] sm:$0xff] %v23872_v41  ;;  %v23893_v41 = vld [vmem:[%s27170_s3 + $0x18] sm:$0xff] }
 0x1e4   :  { %v20001_v21 = vpop.f32.mrf.mxu0  ;;  %v20013_v33 = vpop.f32.mrf.mxu1  ;;  %27404 = vst [vmem:[#allocation162_spill] sm:$0xff] %v23893_v41 }
 0x1e5   :  { %v23888_v19 = vadd.f32 %v20001_v21, %v5407_v25  ;;  %20258 = vmatmul.mubr.msk.f32.gmra.mxu0 %vm7115_vm2, %v23893_v41  ;;  %v23911_v25 = vld [vmem:[%s27170_s3 + $0x28] sm:$0xff] }
 0x1e6   :  { %v23895_v54 = vpop.f32.mrf.mxu0  ;;  %v23897_v38 = vpop.f32.mrf.mxu1  ;;  %20260 = vmatprep.mubr.msk.f32.mxu0 %vm7115_vm2, %v23904_v50  ;;  %27408 = vst [vmem:[#allocation166_spill] sm:$0xff] %v23911_v25 }
 0x1e7   :  { %27403 = vst [vmem:[#allocation161_spill] sm:$0xff] %v23888_v19  ;;  %27405 = vst [vmem:[#allocation163_spill] sm:$0xff] %v23895_v54 }
 0x1e8   :  { %27406 = vst [vmem:[#allocation164_spill] sm:$0xff] %v23897_v38  ;;  %v23918_v38 = vld [vmem:[%s27170_s3 + $0x30] sm:$0xff] }
 0x1e9   :  { %20261 = vmatmul.mubr.msk.f32.gmra.mxu0 %vm7115_vm2, %v23911_v25  ;;  %27409 = vst [vmem:[#allocation167_spill] sm:$0xff] %v23918_v38 }
 0x1ea   :  { %20263 = vmatprep.mubr.msk.f32.mxu0 %vm7115_vm2, %v23918_v38 }
 0x1eb   :  { %v20022_v21 = vpop.f32.mrf.mxu0  ;;  %v20034_v19 = vpop.f32.mrf.mxu1 }
 0x1ec   :  { %v5758_v54 = vadd.f32 %v20022_v21, %v20010_v44 }
 0x1ed   :  { %v23922_v46 = vpop.f32.mrf.mxu0  ;;  %v23924_v60 = vpop.f32.mrf.mxu1  ;;  %20264 = vmatmul.mubr.msk.f32.gmra.mxu0 %vm7115_vm2, %v23929_v20 }
 0x1ee   :  { %27410 = vst [vmem:[#allocation168_spill] sm:$0xff] %v23922_v46  ;;  %v5879_v24 = vadd.f32 %v20034_v19, %v5758_v54  ;;  %27411 = vst [vmem:[#allocation169_spill] sm:$0xff] %v23924_v60 }
 0x1f0   :  { %v20025_v4 = vpop.f32.mrf.mxu0  ;;  %v20037_v26 = vpop.f32.mrf.mxu1 }
 0x1f1   :  { %v5768_v47 = vadd.f32 %v20025_v4, %v20013_v33 }
 0x1f2   :  { %v23933_v21 = vpop.f32.mrf.mxu0  ;;  %v23935_v14 = vpop.f32.mrf.mxu1 }
 0x1f3   :  { %v5881_v44 = vadd.f32 %v20037_v26, %v5768_v47  ;;  %27413 = vst [vmem:[#allocation171_spill] sm:$0xff] %v23933_v21  ;;  %27414 = vst [vmem:[#allocation172_spill] sm:$0xff] %v23935_v14 }
 0x1f7   :  { %v20046_v46 = vpop.f32.mrf.mxu0  ;;  %v20058_v19 = vpop.f32.mrf.mxu1 }
 0x1f8   :  { %v5990_v54 = vadd.f32 %v20046_v46, %v5879_v24 }
 0x1f9   :  { %v23937_v60 = vpop.f32.mrf.mxu0  ;;  %v23939_v59 = vpop.f32.mrf.mxu1 }
 0x1fa   :  { %27415 = vst [vmem:[#allocation173_spill] sm:$0xff] %v23937_v60  ;;  %27416 = vst [vmem:[#allocation174_spill] sm:$0xff] %v23939_v59  ;;  %v23941_v22 = vadd.f32 %v20058_v19, %v5990_v54 }
 0x1fc   :  { %27417 = vst [vmem:[#allocation175_spill] sm:$0xff] %v23941_v22  ;;  %v20049_v43 = vpop.f32.mrf.mxu0  ;;  %v20061_v8 = vpop.f32.mrf.mxu1 }
 0x1fd   :  { %v5992_v30 = vadd.f32 %v20049_v43, %v5881_v44 }
 0x1fe   :  { %v23945_v4 = vpop.f32.mrf.mxu0  ;;  %v23947_v26 = vpop.f32.mrf.mxu1 }
 0x1ff   :  { %v23943_v29 = vadd.f32 %v20061_v8, %v5992_v30  ;;  %27419 = vst [vmem:[#allocation177_spill] sm:$0xff] %v23945_v4  ;;  %27420 = vst [vmem:[#allocation178_spill] sm:$0xff] %v23947_v26 }
 0x201   :  { %27418 = vst [vmem:[#allocation176_spill] sm:$0xff] %v23943_v29 }
 0x203   :  { %v20070_v47 = vpop.f32.mrf.mxu0  ;;  %v20082_v33 = vpop.f32.mrf.mxu1 }
 0x204   :  { %v6343_v14 = vadd.f32 %v20082_v33, %v20070_v47 }
 0x205   :  { %v23949_v21 = vpop.f32.mrf.mxu0  ;;  %v23951_v46 = vpop.f32.mrf.mxu1 }
 0x206   :  { %27421 = vst [vmem:[#allocation179_spill] sm:$0xff] %v23949_v21  ;;  %27422 = vst [vmem:[#allocation180_spill] sm:$0xff] %v23951_v46 }
 0x208   :  { %v20073_v24 = vpop.f32.mrf.mxu0  ;;  %v20085_v59 = vpop.f32.mrf.mxu1 }
 0x209   :  { %v6353_v19 = vadd.f32 %v20085_v59, %v20073_v24 }
 0x20a   :  { %v23953_v54 = vpop.f32.mrf.mxu0  ;;  %v23955_v22 = vpop.f32.mrf.mxu1 }
 0x20b   :  { %27423 = vst [vmem:[#allocation181_spill] sm:$0xff] %v23953_v54  ;;  %27424 = vst [vmem:[#allocation182_spill] sm:$0xff] %v23955_v22 }
 0x20f   :  { %v20094_v30 = vpop.f32.mrf.mxu0  ;;  %v20106_v8 = vpop.f32.mrf.mxu1 }
 0x210   :  { %v6464_v43 = vadd.f32 %v20094_v30, %v6343_v14 }
 0x211   :  { %v23957_v44 = vpop.f32.mrf.mxu0  ;;  %v23961_v26 = vpop.f32.mrf.mxu1 }
 0x212   :  { %27425 = vst [vmem:[#allocation183_spill] sm:$0xff] %v23957_v44  ;;  %v23959_v29 = vadd.f32 %v20106_v8, %v6464_v43  ;;  %27427 = vst [vmem:[#allocation185_spill] sm:$0xff] %v23961_v26 }
 0x214   :  { %27426 = vst [vmem:[#allocation184_spill] sm:$0xff] %v23959_v29  ;;  %v20097_v47 = vpop.f32.mrf.mxu0 }
 0x215   :  { %v6466_v33 = vadd.f32 %v20097_v47, %v6353_v19  ;;  %v20109_v21 = vpop.f32.mrf.mxu1 }
 0x216   :  { %v23965_v60 = vpop.f32.mrf.mxu0 }
 0x217   :  { %v23963_v46 = vadd.f32 %v20109_v21, %v6466_v33  ;;  %27429 = vst [vmem:[#allocation187_spill] sm:$0xff] %v23965_v60  ;;  %v23967_v59 = vpop.f32.mrf.mxu1 }
 0x218   :  { %27430 = vst [vmem:[#allocation188_spill] sm:$0xff] %v23967_v59 }
 0x219   :  { %27428 = vst [vmem:[#allocation186_spill] sm:$0xff] %v23963_v46 }
 0x21b   :  { %v20118_v24 = vpop.f32.mrf.mxu0 }
 0x21c   :  { %v20130_v22 = vpop.f32.mrf.mxu1 }
 0x21d   :  { %v6816_v54 = vadd.f32 %v20130_v22, %v20118_v24  ;;  %v23969_v14 = vpop.f32.mrf.mxu0 }
 0x21e   :  { %27431 = vst [vmem:[#allocation189_spill] sm:$0xff] %v23969_v14  ;;  %v23971_v30 = vpop.f32.mrf.mxu1 }
 0x21f   :  { %27432 = vst [vmem:[#allocation190_spill] sm:$0xff] %v23971_v30 }
 0x221   :  { %v20121_v43 = vpop.f32.mrf.mxu0  ;;  %v20133_v8 = vpop.f32.mrf.mxu1 }
 0x222   :  { %v6826_v29 = vadd.f32 %v20133_v8, %v20121_v43 }
 0x223   :  { %v23973_v26 = vpop.f32.mrf.mxu0  ;;  %v23979_v46 = vpop.f32.mrf.mxu1 }
 0x224   :  { %27433 = vst [vmem:[#allocation191_spill] sm:$0xff] %v23973_v26  ;;  %27436 = vst [vmem:[#allocation194_spill] sm:$0xff] %v23979_v46 }
 0x226   :  { %v20142_v19 = vpop.f32.mrf.mxu0 }
 0x227   :  { %v23975_v47 = vadd.f32 %v20142_v19, %v6816_v54 }
 0x228   :  { %v23977_v21 = vpop.f32.mrf.mxu0 }
 0x229   :  { %27434 = vst [vmem:[#allocation192_spill] sm:$0xff] %v23975_v47  ;;  %27435 = vst [vmem:[#allocation193_spill] sm:$0xff] %v23977_v21 }
 0x22c   :  { %v20145_v33 = vpop.f32.mrf.mxu0 }
 0x22d   :  { %v23981_v59 = vadd.f32 %v20145_v33, %v6826_v29 }
 0x22e   :  { %v23983_v22 = vpop.f32.mrf.mxu0 }
 0x22f   :  { %27437 = vst [vmem:[#allocation195_spill] sm:$0xff] %v23981_v59  ;;  %27438 = vst [vmem:[#allocation196_spill] sm:$0xff] %v23983_v22  ;;  %v20156_v24 = vpop.f32.mrf.mxu1  ;;  %v27439_v22 = vld [vmem:[#allocation34_spill] sm:$0xff] }
 0x231   :  { %v7206_v14 = vpop.f32.mrf.mxu1  ;;  %v20176_v30 = vpop.f32.mrf.mxu0 }
 0x233   :  { %v7335_v44 = vpop.f32.mrf.mxu0 }
 0x234   :  { %v20159_v60 = vpop.f32.mrf.mxu1 }
 0x236   :  { %v7216_v43 = vpop.f32.mrf.mxu1  ;;  %v20179_v8 = vpop.f32.mrf.mxu0 }
 0x237   :  { %v7351_v11 = vadd.f32 %v20179_v8, %v20159_v60  ;;  %v27457_v8 = vld [vmem:[#allocation32_spill] sm:$0xff] }
 0x238   :  { %v7345_v26 = vpop.f32.mrf.mxu0 }
 0x239   :  { %v20162_v4 = vpop.f32.mrf.mxu1  ;;  %v7346_v6 = vadd.f32 %v7345_v26, %v7216_v43  ;;  %v27452_v26 = vld [vmem:[#allocation47_spill] sm:$0xff] }
 0x23b   :  { %v7226_v54 = vpop.f32.mrf.mxu1  ;;  %v20182_v19 = vpop.f32.mrf.mxu0 }
 0x23c   :  { %v7361_v0 = vadd.f32 %v20182_v19, %v20162_v4  ;;  %v27445_v4 = vld [vmem:[#allocation20_spill] sm:$0xff]  ;;  %v27448_v19 = vld [vmem:[#allocation43_spill] sm:$0xff] }
 0x23d   :  { %v20165_v47 = vpop.f32.mrf.mxu1  ;;  %v7355_v21 = vpop.f32.mrf.mxu0  ;;  %v7425_v27 = vadd.f32 %v27448_v19, %v7351_v11 }
 0x23e   :  { %v7356_v59 = vadd.f32 %v7355_v21, %v7226_v54  ;;  %v7427_v32 = vadd.f32 %v27442_v55, %v7361_v0  ;;  %v7341_v54 = vadd.f32 %v20176_v30, %v20156_v24 }
 0x23f   :  { %v20185_v42 = vpop.f32.mrf.mxu0  ;;  %v7236_v29 = vpop.f32.mrf.mxu1 }
 0x240   :  { %v7371_v46 = vadd.f32 %v20185_v42, %v20165_v47  ;;  %v7426_v40 = vadd.f32 %v27444_v37, %v7356_v59  ;;  %v27446_v47 = vld [vmem:[#allocation25_spill] sm:$0xff]  ;;  %v7435_v31 = vmax.f32 %v7427_v32, 0.0  ;;  %v7433_v59 = vmax.f32 %v7425_v27, 0.0 }
 0x241   :  { %v7365_v33 = vpop.f32.mrf.mxu0  ;;  %v1073_v21 = vadd.f32 %v27446_v47, %v27445_v4  ;;  %v27454_v32 = vld [vmem:[#allocation37_spill] sm:$0xff] }
 0x242   :  { %v7429_v23 = vadd.f32 %v27439_v22, %v7371_v46  ;;  %v7366_v49 = vadd.f32 %v7365_v33, %v7236_v29  ;;  %v27447_v46 = vld [vmem:[#allocation29_spill] sm:$0xff]  ;;  %v7434_v37 = vmax.f32 %v7426_v40, 0.0 }
 0x243   :  { %v1200_v22 = vadd.f32 %v27447_v46, %v1083_v35  ;;  %v27453_v35 = vld [vmem:[#allocation31_spill] sm:$0xff]  ;;  %v27458_v33 = vld [vmem:[#allocation53_spill] sm:$0xff] }
 0x244   :  { %v7437_v63 = vmax.f32 %v7429_v23, 0.0  ;;  %v7428_v52 = vadd.f32 %v27443_v34, %v7366_v49  ;;  %v27449_v23 = vld [vmem:[#allocation36_spill] sm:$0xff]  ;;  %v7336_v34 = vadd.f32 %v7335_v44, %v7206_v14  ;;  %v27450_v49 = vld [vmem:[#allocation46_spill] sm:$0xff]  ;;  %v27459_v47 = vld [vmem:[#allocation33_spill] sm:$0xff] }
 0x245   :  { %v1311_v55 = vadd.f32 %v27449_v23, %v1200_v22  ;;  %v7424_v0 = vadd.f32 %v27450_v49, %v7346_v6  ;;  %v27455_v6 = vld [vmem:[#allocation35_spill] sm:$0xff]  ;;  %v27456_v14 = vld [vmem:[#allocation50_spill] sm:$0xff]  ;;  %v7462_v49 = vld [vmem:[%s27172_s5 + $0x40] sm:$0xff] }
 0x246   :  { %20186 = vmatprep.subr.mxu1 %v7437_v63  ;;  %v7436_v42 = vmax.f32 %v7428_v52, 0.0  ;;  %v27451_v52 = vld [vmem:[#allocation26_spill] sm:$0xff]  ;;  %v7422_v24 = vadd.f32 %v22975_v12, %v7336_v34  ;;  %v1452_v40 = vadd.f32 %v27456_v14, %v27455_v6  ;;  %v7461_v34 = vld [vmem:[%s27172_s5 + $0x38] sm:$0xff] }
 0x247   :  { %20187 = vmatpush3.msra.mxu1 %v7437_v63  ;;  %v1198_v60 = vadd.f32 %v27451_v52, %v1073_v21  ;;  %v7423_v63 = vadd.f32 %v27452_v26, %v7341_v54  ;;  %v1423_v30 = vadd.f32 %v27454_v32, %v1311_v55  ;;  %v7432_v44 = vmax.f32 %v7424_v0, 0.0  ;;  %v7455_v12 = vld [vmem:[%s27172_s5 + $0x8] sm:$0xff]  ;;  %v7456_v22 = vld [vmem:[%s27172_s5 + $0x10] sm:$0xff]  ;;  %v7465_v52 = vld [vmem:[%s27172_s5 + $0x58] sm:$0xff] }
 0x248   :  { %20188 = vmatprep.subr.mxu1 %v7436_v42  ;;  %v7430_v4 = vmax.f32 %v7422_v24, 0.0  ;;  %v1450_v21 = vadd.f32 %v23029_v51, %v27459_v47  ;;  %v24011_v46 = vmax.f32 %v1452_v40, 0.0  ;;  %v7457_v51 = vld [vmem:[%s27172_s5 + $0x18] sm:$0xff]  ;;  %v7459_v23 = vld [vmem:[%s27172_s5 + $0x28] sm:$0xff]  ;;  %v7460_v55 = vld [vmem:[%s27172_s5 + $0x30] sm:$0xff] }
 0x249   :  { %20189 = vmatpush3.msra.mxu1 %v7436_v42  ;;  %v1309_v11 = vadd.f32 %v27453_v35, %v1198_v60  ;;  %v7431_v43 = vmax.f32 %v7423_v63, 0.0  ;;  %v1451_v42 = vadd.f32 %v27458_v33, %v1423_v30  ;;  %v7463_v0 = vld [vmem:[%s27172_s5 + $0x48] sm:$0xff]  ;;  %v7466_v60 = vld [vmem:[%s27172_s5 + $0x60] sm:$0xff]  ;;  %v7468_v63 = vld [vmem:[%s27172_s5 + $0x70] sm:$0xff] }
 0x24a   :  { %20190 = vmatprep.subr.mxu1 %v7435_v31  ;;  %v24026_v27 = vmax.f32 %v1450_v21, 0.0  ;;  %v7467_v26 = vld [vmem:[%s27172_s5 + $0x68] sm:$0xff]  ;;  %v24088_v35 = vld [vmem:[%s27170_s3 + $0x80] sm:$0xff]  ;;  %v24101_v32 = vld [vmem:[%s27170_s3 + $0x90] sm:$0xff] }
 0x24b   :  { %20191 = vmatpush3.msra.mxu1 %v7435_v31  ;;  %v1421_v29 = vadd.f32 %v27457_v8, %v1309_v11  ;;  %v24017_v19 = vmax.f32 %v1451_v42, 0.0  ;;  %v24096_v11 = vld [vmem:[%s27170_s3 + $0x88] sm:$0xff]  ;;  %v24111_v30 = vld [vmem:[%s27170_s3 + $0x98] sm:$0xff]  ;;  %v24117_v24 = vld [vmem:[%s27170_s3 + $0xa0] sm:$0xff] }
 0x24c   :  { %20192 = vmatprep.subr.mxu1 %v7434_v37  ;;  %v24135_v6 = vld [vmem:[%s27170_s3 + $0xb0] sm:$0xff]  ;;  %v24146_v14 = vld [vmem:[%s27170_s3 + $0xb8] sm:$0xff]  ;;  %v24151_v40 = vld [vmem:[%s27170_s3 + $0x40] sm:$0xff] }
 0x24d   :  { %20193 = vmatpush3.msra.mxu1 %v7434_v37  ;;  %v1449_v54 = vadd.f32 %v23041_v7, %v1421_v29  ;;  %v7458_v7 = vld [vmem:[%s27172_s5 + $0x20] sm:$0xff]  ;;  %v7464_v37 = vld [vmem:[%s27172_s5 + $0x50] sm:$0xff] }
 0x24e   :  { %20194 = vmatprep.subr.mxu1 %v7433_v59 }
 0x24f   :  { %20195 = vmatpush3.msra.mxu1 %v7433_v59  ;;  %v24033_v31 = vmax.f32 %v1449_v54, 0.0  ;;  %v7469_v59 = vld [vmem:[%s27172_s5 + $0x78] sm:$0xff] }
 0x250   :  { %20196 = vmatprep.subr.mxu1 %v7432_v44 }
 0x251   :  { %20197 = vmatpush3.msra.mxu1 %v7432_v44  ;;  %27460 = vst [vmem:[#allocation34_spill] sm:$0xff] %v24033_v31  ;;  %v24129_v44 = vld [vmem:[%s27170_s3 + $0xa8] sm:$0xff] }
 0x252   :  { %20198 = vmatprep.subr.mxu1 %v7431_v43 }
 0x253   :  { %20199 = vmatpush3.msra.mxu1 %v7431_v43  ;;  %v24160_v43 = vld [vmem:[%s27170_s3 + $0x48] sm:$0xff] }
 0x254   :  { %20200 = vmatprep.subr.mxu1 %v7430_v4 }
 0x255   :  { %20201 = vmatpush3.msra.mxu1 %v7430_v4 }
 0x256   :  { %20203 = vmatmul.mubr.msk.f32.vlgmr.msra.gmra.mxu1 %vm7470_vm3, %v7455_v12  ;;  %20266 = vmatprep.subr.mxu1 %v24011_v46 }
 0x257   :  { %20267 = vmatpush3.msra.mxu1 %v24011_v46  ;;  %20205 = vmatprep.mubr.msk.f32.mxu1 %vm7470_vm3, %v7456_v22 }
 0x258   :  { %20268 = vmatprep.subr.mxu1 %v24017_v19 }
 0x259   :  { %20269 = vmatpush3.msra.mxu1 %v24017_v19 }
 0x25a   :  { %20206 = vmatmul.mubr.msk.f32.gmra.mxu1 %vm7470_vm3, %v7457_v51  ;;  %20270 = vmatprep.subr.mxu1 %v24026_v27 }
 0x25b   :  { %20271 = vmatpush3.msra.mxu1 %v24026_v27  ;;  %20208 = vmatprep.mubr.msk.f32.mxu1 %vm7470_vm3, %v7458_v7 }
 0x25c   :  { %20272 = vmatprep.subr.mxu1 %v24033_v31 }
 0x25d   :  { %20273 = vmatpush3.msra.mxu1 %v24033_v31 }
 0x25e   :  { %20209 = vmatmul.mubr.msk.f32.gmra.mxu1 %vm7470_vm3, %v7459_v23  ;;  %20326 = vmatprep.subr.mxu1 %v24011_v46 }
 0x25f   :  { %20211 = vmatprep.mubr.msk.f32.mxu1 %vm7470_vm3, %v7460_v55 }
 0x262   :  { %20212 = vmatmul.mubr.msk.f32.gmra.mxu1 %vm7470_vm3, %v7461_v34 }
 0x263   :  { %20214 = vmatprep.mubr.msk.f32.mxu1 %vm7470_vm3, %v7462_v49 }
 0x266   :  { %20215 = vmatmul.mubr.msk.f32.gmra.mxu1 %vm7470_vm3, %v7463_v0 }
 0x267   :  { %20217 = vmatprep.mubr.msk.f32.mxu1 %vm7470_vm3, %v7464_v37 }
 0x26a   :  { %20218 = vmatmul.mubr.msk.f32.gmra.mxu1 %vm7470_vm3, %v7465_v52 }
 0x26b   :  { %20220 = vmatprep.mubr.msk.f32.mxu1 %vm7470_vm3, %v7466_v60 }
 0x26e   :  { %20221 = vmatmul.mubr.msk.f32.gmra.mxu1 %vm7470_vm3, %v7467_v26 }
 0x26f   :  { %20223 = vmatprep.mubr.msk.f32.mxu1 %vm7470_vm3, %v7468_v63 }
 0x272   :  { %20224 = vmatmul.mubr.msk.f32.gmra.mxu1 %vm7470_vm3, %v7469_v59 }
 0x273   :  { %20274 = vmatprep.mubr.msk.f32.mxu1 %vm7115_vm2, %v24088_v35 }
 0x276   :  { %20275 = vmatmul.mubr.msk.f32.vlgmr.msra.gmra.mxu1 %vm7115_vm2, %v24096_v11 }
 0x277   :  { %20327 = vmatpush3.msra.mxu1 %v24011_v46  ;;  %20277 = vmatprep.mubr.msk.f32.mxu1 %vm7115_vm2, %v24101_v32 }
 0x278   :  { %20328 = vmatprep.subr.mxu1 %v24017_v19 }
 0x279   :  { %20329 = vmatpush3.msra.mxu1 %v24017_v19 }
 0x27a   :  { %20330 = vmatprep.subr.mxu1 %v24026_v27  ;;  %20278 = vmatmul.mubr.msk.f32.gmra.mxu1 %vm7115_vm2, %v24111_v30 }
 0x27b   :  { %20331 = vmatpush3.msra.mxu1 %v24026_v27  ;;  %20280 = vmatprep.mubr.msk.f32.mxu1 %vm7115_vm2, %v24117_v24 }
 0x27c   :  { %20332 = vmatprep.subr.mxu1 %v24033_v31 }
 0x27d   :  { %20333 = vmatpush3.msra.mxu1 %v24033_v31 }
 0x27e   :  { %20346 = vmatprep.subr.mxu1 %v23344_v16  ;;  %20281 = vmatmul.mubr.msk.f32.gmra.mxu1 %vm7115_vm2, %v24129_v44 }
 0x27f   :  { %20283 = vmatprep.mubr.msk.f32.mxu1 %vm7115_vm2, %v24135_v6 }
 0x282   :  { %20284 = vmatmul.mubr.msk.f32.gmra.mxu1 %vm7115_vm2, %v24146_v14 }
 0x283   :  { %20334 = vmatprep.mubr.msk.f32.mxu1 %vm7115_vm2, %v24151_v40 }
 0x286   :  { %20335 = vmatmul.mubr.msk.f32.vlgmr.msra.gmra.mxu1 %vm7115_vm2, %v24160_v43 }
 0x287   :  { %20347 = vmatpush3.msra.mxu1 %v23344_v16  ;;  %20337 = vmatprep.mubr.msk.f32.mxu1 %vm7115_vm2, %v23815_v53  ;;  %v24203_v16 = vpop.permute.xlu0 %4371 }
 0x288   :  { %20348 = vmatprep.subr.mxu1 %v23377_v58  ;;  %27461 = vst [vmem:[#allocation22_spill] sm:$0xff] %v24203_v16 }
 0x289   :  { %20349 = vmatpush3.msra.mxu1 %v23377_v58  ;;  %v17444_v58 = vld [vmem:[%s27172_s5 + $0x80] sm:$0xff] }
 0x28a   :  { %20350 = vmatprep.subr.mxu1 %v23417_v61  ;;  %20338 = vmatmul.mubr.msk.f32.gmra.mxu1 %vm7115_vm2, %v23825_v5 }
 0x28b   :  { %20351 = vmatpush3.msra.mxu1 %v23417_v61  ;;  %20340 = vmatprep.mubr.msk.f32.mxu1 %vm7115_vm2, %v23832_v2  ;;  %v24205_v61 = vpop.permute.xlu0 %4361 }
 0x28c   :  { %20352 = vmatprep.subr.mxu1 %v23427_v3  ;;  %20302 = vmatprep.mubr.msk.f32.mxu0 %vm7470_vm3, %v17444_v58  ;;  %27462 = vst [vmem:[#allocation28_spill] sm:$0xff] %v24205_v61 }
 0x28d   :  { %20353 = vmatpush3.msra.mxu1 %v23427_v3  ;;  %v24207_v3 = vpop.f32.mrf.mxu0 }
 0x28e   :  { %20341 = vmatmul.mubr.msk.f32.gmra.mxu1 %vm7115_vm2, %v23839_v62 }
 0x28f   :  { %20343 = vmatprep.mubr.msk.f32.mxu1 %vm7115_vm2, %v23850_v1  ;;  %v24209_v8 = vpop.f32.mrf.mxu0  ;;  %v24211_v29 = vpop.permute.xlu0 %11937 }
 0x290   :  { %27463 = vst [vmem:[#allocation39_spill] sm:$0xff] %v24211_v29 }
 0x292   :  { %20344 = vmatmul.mubr.msk.f32.gmra.mxu1 %vm7115_vm2, %v23857_v10 }
 0x293   :  { %20354 = vmatprep.mubr.msk.f32.mxu1 %vm7115_vm2, %v23864_v48  ;;  %v24213_v42 = vpop.permute.xlu0 %11927 }
 0x294   :  { %27464 = vst [vmem:[#allocation38_spill] sm:$0xff] %v24213_v42 }
 0x295   :  { %v20239_v33 = vpop.f32.mrf.mxu0 }
 0x296   :  { %20355 = vmatmul.mubr.msk.f32.vlgmr.msra.gmra.mxu1 %vm7115_vm2, %v23877_v9 }
 0x297   :  { %20357 = vmatprep.mubr.msk.f32.mxu1 %vm7115_vm2, %v23884_v17  ;;  %v7820_v4 = vpop.f32.mrf.mxu0  ;;  %v24215_v47 = vpop.permute.xlu0 %11917 }
 0x298   :  { %27465 = vst [vmem:[#allocation42_spill] sm:$0xff] %v24215_v47 }
 0x299   :  { %v20242_v12 = vpop.f32.mrf.mxu0 }
 0x29a   :  { %20358 = vmatmul.mubr.msk.f32.gmra.mxu1 %vm7115_vm2, %v23893_v41 }
 0x29b   :  { %20360 = vmatprep.mubr.msk.f32.mxu1 %vm7115_vm2, %v23904_v50  ;;  %v7830_v54 = vpop.f32.mrf.mxu0  ;;  %v24223_v7 = vpop.permute.xlu0 %11907 }
 0x29c   :  { %27469 = vst [vmem:[#allocation43_spill] sm:$0xff] %v24223_v7 }
 0x29d   :  { %v20245_v55 = vpop.f32.mrf.mxu0 }
 0x29e   :  { %20361 = vmatmul.mubr.msk.f32.gmra.mxu1 %vm7115_vm2, %v23911_v25 }
 0x29f   :  { %20363 = vmatprep.mubr.msk.f32.mxu1 %vm7115_vm2, %v23918_v38  ;;  %v7840_v0 = vpop.f32.mrf.mxu0  ;;  %v24231_v37 = vpop.permute.xlu0 %4956 }
 0x2a0   :  { %27473 = vst [vmem:[#allocation47_spill] sm:$0xff] %v24231_v37 }
 0x2a1   :  { %v20256_v60 = vpop.f32.mrf.mxu0 }
 0x2a2   :  { %20364 = vmatmul.mubr.msk.f32.gmra.mxu1 %vm7115_vm2, %v23929_v20 }
 0x2a3   :  { %v24239_v59 = vpop.permute.xlu0 %4946  ;;  %v7939_v58 = vpop.f32.mrf.mxu0 }
 0x2a4   :  { %27477 = vst [vmem:[#allocation50_spill] sm:$0xff] %v24239_v59 }
 0x2a5   :  { %v20259_v7 = vpop.f32.mrf.mxu0 }
 0x2a6   :  { %v7955_v9 = vadd.f32 %v20259_v7, %v20239_v33  ;;  %v27497_v33 = vld [vmem:[#allocation52_spill] sm:$0xff]  ;;  %v27500_v7 = vld [vmem:[#allocation49_spill] sm:$0xff] }
 0x2a7   :  { %v7949_v42 = vpop.f32.mrf.mxu0 }
 0x2a8   :  { %v7950_v1 = vadd.f32 %v7949_v42, %v7820_v4 }
 0x2a9   :  { %v20262_v59 = vpop.f32.mrf.mxu0 }
 0x2aa   :  { %v7965_v20 = vadd.f32 %v20262_v59, %v20242_v12  ;;  %v27505_v59 = vld [vmem:[#allocation71_spill] sm:$0xff] }
 0x316   :  { %v24217_v21 = vpop.f32.mrf.mxu1 }
 0x317   :  { %27466 = vst [vmem:[#allocation20_spill] sm:$0xff] %v24217_v21 }
 0x318   :  { %v24219_v22 = vpop.f32.mrf.mxu1 }
 0x319   :  { %27467 = vst [vmem:[#allocation25_spill] sm:$0xff] %v24219_v22 }
 0x31a   :  { %v24221_v51 = vpop.f32.mrf.mxu1 }
 0x31b   :  { %27468 = vst [vmem:[#allocation29_spill] sm:$0xff] %v24221_v51 }
 0x31c   :  { %v24225_v23 = vpop.f32.mrf.mxu1 }
 0x31d   :  { %27470 = vst [vmem:[#allocation36_spill] sm:$0xff] %v24225_v23 }
 0x31e   :  { %v24227_v34 = vpop.f32.mrf.mxu1 }
 0x31f   :  { %27471 = vst [vmem:[#allocation46_spill] sm:$0xff] %v24227_v34 }
 0x320   :  { %v24229_v49 = vpop.f32.mrf.mxu1 }
 0x321   :  { %27472 = vst [vmem:[#allocation26_spill] sm:$0xff] %v24229_v49  ;;  %v24247_v49 = vpop.permute.xlu0 %12690 }
 0x322   :  { %v24233_v52 = vpop.f32.mrf.mxu1  ;;  %27481 = vst [vmem:[#allocation197_spill] sm:$0xff] %v24247_v49 }
 0x323   :  { %27474 = vst [vmem:[#allocation31_spill] sm:$0xff] %v24233_v52 }
 0x324   :  { %v24235_v26 = vpop.f32.mrf.mxu1 }
 0x325   :  { %27475 = vst [vmem:[#allocation37_spill] sm:$0xff] %v24235_v26  ;;  %v24255_v61 = vpop.permute.xlu0 %12680 }
 0x326   :  { %v24237_v63 = vpop.f32.mrf.mxu1  ;;  %27485 = vst [vmem:[#allocation201_spill] sm:$0xff] %v24255_v61 }
 0x327   :  { %27476 = vst [vmem:[#allocation35_spill] sm:$0xff] %v24237_v63  ;;  %v7959_v63 = vpop.f32.mrf.mxu0 }
 0x328   :  { %v24241_v22 = vpop.f32.mrf.mxu1  ;;  %v7960_v61 = vadd.f32 %v7959_v63, %v7830_v54  ;;  %v27491_v54 = vld [vmem:[#allocation45_spill] sm:$0xff]  ;;  %v27504_v63 = vld [vmem:[#allocation54_spill] sm:$0xff] }
 0x329   :  { %27478 = vst [vmem:[#allocation32_spill] sm:$0xff] %v24241_v22  ;;  %v24259_v52 = vpop.permute.xlu0 %12670  ;;  %v20265_v34 = vpop.f32.mrf.mxu0 }
 0x32a   :  { %v24243_v23 = vpop.f32.mrf.mxu1  ;;  %27487 = vst [vmem:[#allocation203_spill] sm:$0xff] %v24259_v52 }
 0x32b   :  { %27479 = vst [vmem:[#allocation53_spill] sm:$0xff] %v24243_v23  ;;  %v7969_v21 = vpop.f32.mrf.mxu0 }
 0x32c   :  { %v24245_v47 = vpop.f32.mrf.mxu1  ;;  %v7970_v25 = vadd.f32 %v7969_v21, %v7840_v0 }
 0x32d   :  { %27480 = vst [vmem:[#allocation33_spill] sm:$0xff] %v24245_v47 }
 0x32e   :  { %v24249_v37 = vpop.f32.mrf.mxu1 }
 0x32f   :  { %27482 = vst [vmem:[#allocation198_spill] sm:$0xff] %v24249_v37  ;;  %v24261_v37 = vpop.permute.xlu0 %12660 }
 0x330   :  { %v24251_v29 = vpop.f32.mrf.mxu1  ;;  %27488 = vst [vmem:[#allocation204_spill] sm:$0xff] %v24261_v37 }
 0x331   :  { %27483 = vst [vmem:[#allocation199_spill] sm:$0xff] %v24251_v29 }
 0x332   :  { %v24253_v26 = vpop.f32.mrf.mxu1 }
 0x333   :  { %27484 = vst [vmem:[#allocation200_spill] sm:$0xff] %v24253_v26  ;;  %v7975_v26 = vadd.f32 %v20265_v34, %v20245_v55  ;;  %v24263_v17 = vpop.permute.xlu0 %5541  ;;  %v27490_v55 = vld [vmem:[#allocation44_spill] sm:$0xff]  ;;  %v27501_v34 = vld [vmem:[#allocation57_spill] sm:$0xff] }
 0x334   :  { %v24257_v16 = vpop.f32.mrf.mxu1  ;;  %27489 = vst [vmem:[#allocation205_spill] sm:$0xff] %v24263_v17  ;;  %v1668_v21 = vadd.f32 %v27491_v54, %v27490_v55  ;;  %v17446_v55 = vld [vmem:[%s27172_s5 + $0x90] sm:$0xff]  ;;  %v27603_v17 = vld [vmem:[#allocation85_spill] sm:$0xff] }
 0x335   :  { %27486 = vst [vmem:[#allocation202_spill] sm:$0xff] %v24257_v16  ;;  %v27507_v54 = vld [vmem:[#allocation74_spill] sm:$0xff] }
 0x336   :  { %v20276_v22 = vpop.f32.mrf.mxu1 }
 0x338   :  { %v8080_v23 = vpop.f32.mrf.mxu1 }
 0x33a   :  { %v20279_v47 = vpop.f32.mrf.mxu1 }
 0x33b   :  { %v8122_v62 = vadd.f32 %v20279_v47, %v7955_v9 }
 0x33c   :  { %v8090_v49 = vpop.f32.mrf.mxu1 }
 0x33e   :  { %v20282_v51 = vpop.f32.mrf.mxu1 }
 0x33f   :  { %v8124_v50 = vadd.f32 %v20282_v51, %v7965_v20  ;;  %v7945_v20 = vadd.f32 %v20256_v60, %v24207_v3 }
 0x340   :  { %v8100_v29 = vpop.f32.mrf.mxu1 }
 0x341   :  { %v8123_v52 = vadd.f32 %v8100_v29, %v7960_v61  ;;  %v8180_v37 = vadd.f32 %v23102_v18, %v8124_v50  ;;  %v27492_v29 = vld [vmem:[#allocation51_spill] sm:$0xff]  ;;  %v7940_v18 = vadd.f32 %v7939_v58, %v24209_v8  ;;  %v8120_v9 = vadd.f32 %v20276_v22, %v7945_v20 }
 0x342   :  { %v20285_v38 = vpop.f32.mrf.mxu1  ;;  %v2035_v58 = vadd.f32 %v27505_v59, %v27504_v63 }
 0x343   :  { %v8126_v16 = vadd.f32 %v20285_v38, %v7975_v26  ;;  %v8121_v38 = vadd.f32 %v8090_v49, %v7950_v1  ;;  %v8179_v51 = vadd.f32 %v23112_v28, %v8123_v52  ;;  %v8188_v50 = vmax.f32 %v8180_v37, 0.0  ;;  %v27503_v52 = vld [vmem:[#allocation70_spill] sm:$0xff] }
 0x344   :  { %v8110_v41 = vpop.f32.mrf.mxu1  ;;  %v8176_v8 = vadd.f32 %v23156_v15, %v8120_v9  ;;  %v2037_v49 = vadd.f32 %v23182_v45, %v27501_v34  ;;  %v27502_v15 = vld [vmem:[#allocation55_spill] sm:$0xff]  ;;  %v27526_v34 = vld [vmem:[#allocation162_spill] sm:$0xff] }
 0x345   :  { %v8182_v48 = vadd.f32 %v23072_v57, %v8126_v16  ;;  %v8125_v10 = vadd.f32 %v8110_v41, %v7970_v25  ;;  %v1785_v57 = vadd.f32 %v27492_v29, %v1668_v21  ;;  %v24273_v41 = vpop.permute.xlu0 %5531  ;;  %v8119_v25 = vadd.f32 %v8080_v23, %v7940_v18  ;;  %v17449_v18 = vld [vmem:[%s27172_s5 + $0xa8] sm:$0xff]  ;;  %v17450_v9 = vld [vmem:[%s27172_s5 + $0xb0] sm:$0xff] }
 0x346   :  { %27493 = vst [vmem:[#allocation44_spill] sm:$0xff] %v24273_v41  ;;  %v8177_v28 = vadd.f32 %v23136_v36, %v8121_v38  ;;  %v8187_v16 = vmax.f32 %v8179_v51, 0.0  ;;  %v8184_v0 = vmax.f32 %v8176_v8, 0.0  ;;  %v17447_v38 = vld [vmem:[%s27172_s5 + $0x98] sm:$0xff]  ;;  %v24314_v51 = vmax.f32 %v2035_v58, 0.0 }
 0x347   :  { %v8190_v31 = vmax.f32 %v8182_v48, 0.0  ;;  %v8181_v12 = vadd.f32 %v23082_v56, %v8125_v10  ;;  %v8178_v56 = vadd.f32 %v23126_v13, %v8122_v62  ;;  %v27494_v10 = vld [vmem:[#allocation40_spill] sm:$0xff]  ;;  %v27495_v48 = vld [vmem:[#allocation41_spill] sm:$0xff]  ;;  %v1896_v42 = vadd.f32 %v27497_v33, %v1785_v57  ;;  %v27498_v13 = vld [vmem:[#allocation58_spill] sm:$0xff] }
 0x348   :  { %v1658_v1 = vadd.f32 %v27495_v48, %v27494_v10  ;;  %v8175_v22 = vadd.f32 %v23166_v39, %v8119_v25  ;;  %v8185_v36 = vmax.f32 %v8177_v28, 0.0  ;;  %v17445_v39 = vld [vmem:[%s27172_s5 + $0x88] sm:$0xff]  ;;  %v17452_v10 = vld [vmem:[%s27172_s5 + $0xc0] sm:$0xff]  ;;  %v17455_v28 = vld [vmem:[%s27172_s5 + $0xd8] sm:$0xff] }
 0x349   :  { %20286 = vmatprep.subr.mxu0 %v8190_v31  ;;  %v8189_v61 = vmax.f32 %v8181_v12, 0.0  ;;  %v8186_v4 = vmax.f32 %v8178_v56, 0.0  ;;  %v2008_v62 = vadd.f32 %v27498_v13, %v1896_v42  ;;  %v24284_v47 = vpop.permute.xlu0 %13443  ;;  %v24297_v12 = vmax.f32 %v2037_v49, 0.0  ;;  %v17451_v56 = vld [vmem:[%s27172_s5 + $0xb8] sm:$0xff]  ;;  %v17453_v48 = vld [vmem:[%s27172_s5 + $0xc8] sm:$0xff]  ;;  %v17458_v33 = vld [vmem:[%s27172_s5 + $0xf0] sm:$0xff] }
 0x34a   :  { %20287 = vmatpush3.msra.mxu0 %v8190_v31  ;;  %v27496_v31 = vld [vmem:[#allocation48_spill] sm:$0xff]  ;;  %27499 = vst [vmem:[#allocation45_spill] sm:$0xff] %v24284_v47  ;;  %v8183_v26 = vmax.f32 %v8175_v22, 0.0  ;;  %v27527_v49 = vld [vmem:[#allocation165_spill] sm:$0xff]  ;;  %v27562_v47 = vld [vmem:[#allocation62_spill] sm:$0xff] }
 0x34b   :  { %20288 = vmatprep.subr.mxu0 %v8189_v61  ;;  %v1783_v3 = vadd.f32 %v27496_v31, %v1658_v1  ;;  %v2036_v60 = vadd.f32 %v27503_v52, %v2008_v62  ;;  %v17454_v1 = vld [vmem:[%s27172_s5 + $0xd0] sm:$0xff]  ;;  %v17457_v31 = vld [vmem:[%s27172_s5 + $0xe8] sm:$0xff]  ;;  %v17459_v42 = vld [vmem:[%s27172_s5 + $0xf8] sm:$0xff] }
 0x34c   :  { %20289 = vmatpush3.msra.mxu0 %v8189_v61  ;;  %v17448_v61 = vld [vmem:[%s27172_s5 + $0xa0] sm:$0xff] }
 0x34d   :  { %20290 = vmatprep.subr.mxu0 %v8188_v50  ;;  %v1894_v23 = vadd.f32 %v27500_v7, %v1783_v3  ;;  %v24299_v45 = vpop.permute.xlu0 %13433  ;;  %v24305_v20 = vmax.f32 %v2036_v60, 0.0  ;;  %v27521_v7 = vld [vmem:[#allocation154_spill] sm:$0xff]  ;;  %v27563_v41 = vld [vmem:[#allocation16_spill] sm:$0xff] }
 0x34e   :  { %20291 = vmatpush3.msra.mxu0 %v8188_v50  ;;  %27506 = vst [vmem:[#allocation51_spill] sm:$0xff] %v24299_v45  ;;  %v27532_v60 = vld [vmem:[#allocation170_spill] sm:$0xff]  ;;  %v27561_v45 = vld [vmem:[#allocation59_spill] sm:$0xff] }
 0x34f   :  { %20292 = vmatprep.subr.mxu0 %v8187_v16  ;;  %v2006_v37 = vadd.f32 %v27502_v15, %v1894_v23  ;;  %v27525_v23 = vld [vmem:[#allocation160_spill] sm:$0xff]  ;;  %v27529_v15 = vld [vmem:[#allocation166_spill] sm:$0xff] }
 0x350   :  { %20293 = vmatpush3.msra.mxu0 %v8187_v16  ;;  %v17456_v16 = vld [vmem:[%s27172_s5 + $0xe0] sm:$0xff] }
 0x351   :  { %20294 = vmatprep.subr.mxu0 %v8186_v4  ;;  %v2034_v21 = vadd.f32 %v27507_v54, %v2006_v37  ;;  %v24323_v57 = vpop.permute.xlu0 %13423  ;;  %v27530_v37 = vld [vmem:[#allocation167_spill] sm:$0xff] }
 0x352   :  { %20295 = vmatpush3.msra.mxu0 %v8186_v4  ;;  %27508 = vst [vmem:[#allocation40_spill] sm:$0xff] %v24323_v57 }
 0x353   :  { %20296 = vmatprep.subr.mxu0 %v8185_v36  ;;  %v24321_v29 = vmax.f32 %v2034_v21, 0.0 }
 0x354   :  { %20297 = vmatpush3.msra.mxu0 %v8185_v36 }
 0x355   :  { %20298 = vmatprep.subr.mxu0 %v8184_v0  ;;  %v24343_v50 = vpop.permute.xlu0 %13413 }
 0x356   :  { %20299 = vmatpush3.msra.mxu0 %v8184_v0  ;;  %27509 = vst [vmem:[#allocation41_spill] sm:$0xff] %v24343_v50 }
 0x357   :  { %20300 = vmatprep.subr.mxu0 %v8183_v26 }
 0x358   :  { %20301 = vmatpush3.msra.mxu0 %v8183_v26 }
 0x359   :  { %20303 = vmatmul.mubr.msk.f32.vlgmr.msra.gmra.mxu0 %vm7470_vm3, %v17445_v39  ;;  %20366 = vmatprep.subr.mxu0 %v24297_v12  ;;  %v24356_v25 = vpop.permute.xlu0 %6126 }
 0x35a   :  { %20367 = vmatpush3.msra.mxu0 %v24297_v12  ;;  %20305 = vmatprep.mubr.msk.f32.mxu0 %vm7470_vm3, %v17446_v55  ;;  %27510 = vst [vmem:[#allocation48_spill] sm:$0xff] %v24356_v25  ;;  %v27560_v25 = vld [vmem:[#allocation75_spill] sm:$0xff] }
 0x35b   :  { %20368 = vmatprep.subr.mxu0 %v24305_v20 }
 0x35c   :  { %20369 = vmatpush3.msra.mxu0 %v24305_v20 }
 0x35d   :  { %20306 = vmatmul.mubr.msk.f32.gmra.mxu0 %vm7470_vm3, %v17447_v38  ;;  %20370 = vmatprep.subr.mxu0 %v24314_v51  ;;  %v24371_v3 = vpop.permute.xlu0 %6116 }
 0x35e   :  { %20371 = vmatpush3.msra.mxu0 %v24314_v51  ;;  %20308 = vmatprep.mubr.msk.f32.mxu0 %vm7470_vm3, %v17448_v61  ;;  %27511 = vst [vmem:[#allocation52_spill] sm:$0xff] %v24371_v3  ;;  %v17516_v61 = vld [vmem:[%s27172_s5 + $0x100] sm:$0xff] }
 0x35f   :  { %20372 = vmatprep.subr.mxu0 %v24321_v29  ;;  %20402 = vmatprep.mubr.msk.f32.mxu1 %vm7470_vm3, %v17516_v61 }
 0x360   :  { %20373 = vmatpush3.msra.mxu0 %v24321_v29 }
 0x361   :  { %20309 = vmatmul.mubr.msk.f32.gmra.mxu0 %vm7470_vm3, %v17449_v18  ;;  %20426 = vmatprep.subr.mxu0 %v24297_v12  ;;  %v24381_v8 = vpop.permute.xlu0 %14196 }
 0x362   :  { %20311 = vmatprep.mubr.msk.f32.mxu0 %vm7470_vm3, %v17450_v9  ;;  %27512 = vst [vmem:[#allocation58_spill] sm:$0xff] %v24381_v8 }
 0x365   :  { %20312 = vmatmul.mubr.msk.f32.gmra.mxu0 %vm7470_vm3, %v17451_v56  ;;  %v24391_v4 = vpop.permute.xlu0 %14186 }
 0x366   :  { %20314 = vmatprep.mubr.msk.f32.mxu0 %vm7470_vm3, %v17452_v10  ;;  %27513 = vst [vmem:[#allocation49_spill] sm:$0xff] %v24391_v4 }
 0x369   :  { %20315 = vmatmul.mubr.msk.f32.gmra.mxu0 %vm7470_vm3, %v17453_v48  ;;  %v24403_v13 = vpop.permute.xlu0 %14176 }
 0x36a   :  { %20317 = vmatprep.mubr.msk.f32.mxu0 %vm7470_vm3, %v17454_v1  ;;  %27514 = vst [vmem:[#allocation57_spill] sm:$0xff] %v24403_v13 }
 0x36d   :  { %20318 = vmatmul.mubr.msk.f32.gmra.mxu0 %vm7470_vm3, %v17455_v28  ;;  %v24414_v62 = vpop.permute.xlu0 %14166 }
 0x36e   :  { %20320 = vmatprep.mubr.msk.f32.mxu0 %vm7470_vm3, %v17456_v16  ;;  %27515 = vst [vmem:[#allocation55_spill] sm:$0xff] %v24414_v62  ;;  %v24489_v16 = vpop.f32.mrf.mxu1 }
 0x371   :  { %20321 = vmatmul.mubr.msk.f32.gmra.mxu0 %vm7470_vm3, %v17457_v31  ;;  %v24423_v22 = vpop.permute.xlu0 %6599 }
 0x372   :  { %20323 = vmatprep.mubr.msk.f32.mxu0 %vm7470_vm3, %v17458_v33  ;;  %27516 = vst [vmem:[#allocation70_spill] sm:$0xff] %v24423_v22  ;;  %v24491_v33 = vpop.f32.mrf.mxu1 }
 0x375   :  { %20324 = vmatmul.mubr.msk.f32.gmra.mxu0 %vm7470_vm3, %v17459_v42  ;;  %v24437_v36 = vpop.permute.xlu0 %6589  ;;  %v20339_v42 = vpop.f32.mrf.mxu1 }
 0x376   :  { %20374 = vmatprep.mubr.msk.f32.mxu0 %vm7115_vm2, %v24088_v35  ;;  %27520 = vst [vmem:[#allocation54_spill] sm:$0xff] %v24437_v36 }
 0x379   :  { %20375 = vmatmul.mubr.msk.f32.vlgmr.msra.gmra.mxu0 %vm7115_vm2, %v24096_v11 }
 0x37a   :  { %20427 = vmatpush3.msra.mxu0 %v24297_v12  ;;  %20377 = vmatprep.mubr.msk.f32.mxu0 %vm7115_vm2, %v24101_v32 }
 0x37b   :  { %20428 = vmatprep.subr.mxu0 %v24305_v20 }
 0x37c   :  { %20429 = vmatpush3.msra.mxu0 %v24305_v20 }
 0x37d   :  { %20430 = vmatprep.subr.mxu0 %v24314_v51  ;;  %20378 = vmatmul.mubr.msk.f32.gmra.mxu0 %vm7115_vm2, %v24111_v30 }
 0x37e   :  { %20431 = vmatpush3.msra.mxu0 %v24314_v51  ;;  %20380 = vmatprep.mubr.msk.f32.mxu0 %vm7115_vm2, %v24117_v24 }
 0x37f   :  { %20432 = vmatprep.subr.mxu0 %v24321_v29 }
 0x380   :  { %20433 = vmatpush3.msra.mxu0 %v24321_v29 }
 0x381   :  { %20446 = vmatprep.subr.mxu0 %v24011_v46  ;;  %20381 = vmatmul.mubr.msk.f32.gmra.mxu0 %vm7115_vm2, %v24129_v44 }
 0x382   :  { %20383 = vmatprep.mubr.msk.f32.mxu0 %vm7115_vm2, %v24135_v6 }
 0x385   :  { %20384 = vmatmul.mubr.msk.f32.gmra.mxu0 %vm7115_vm2, %v24146_v14 }
 0x386   :  { %20434 = vmatprep.mubr.msk.f32.mxu0 %vm7115_vm2, %v24151_v40 }
 0x389   :  { %20435 = vmatmul.mubr.msk.f32.vlgmr.msra.gmra.mxu0 %vm7115_vm2, %v24160_v43 }
 0x38a   :  { %20447 = vmatpush3.msra.mxu0 %v24011_v46  ;;  %20437 = vmatprep.mubr.msk.f32.mxu0 %vm7115_vm2, %v23815_v53  ;;  %v27517_v46 = vld [vmem:[#allocation34_spill] sm:$0xff] }
 0x38b   :  { %20448 = vmatprep.subr.mxu0 %v24017_v19  ;;  %v27518_v53 = vld [vmem:[#allocation150_spill] sm:$0xff] }
 0x38c   :  { %20449 = vmatpush3.msra.mxu0 %v24017_v19  ;;  %v27519_v19 = vld [vmem:[#allocation153_spill] sm:$0xff] }
 0x38d   :  { %20450 = vmatprep.subr.mxu0 %v24026_v27  ;;  %20438 = vmatmul.mubr.msk.f32.gmra.mxu0 %vm7115_vm2, %v23825_v5  ;;  %v27522_v5 = vld [vmem:[#allocation155_spill] sm:$0xff] }
 0x38e   :  { %20451 = vmatpush3.msra.mxu0 %v24026_v27  ;;  %20440 = vmatprep.mubr.msk.f32.mxu0 %vm7115_vm2, %v23832_v2  ;;  %v24443_v27 = vpop.permute.xlu0 %14949  ;;  %v27524_v2 = vld [vmem:[#allocation159_spill] sm:$0xff] }
 0x38f   :  { %20452 = vmatprep.subr.mxu0 %v27517_v46  ;;  %27523 = vst [vmem:[#allocation71_spill] sm:$0xff] %v24443_v27 }
 0x390   :  { %20453 = vmatpush3.msra.mxu0 %v27517_v46 }
 0x391   :  { %20441 = vmatmul.mubr.msk.f32.gmra.mxu0 %vm7115_vm2, %v27518_v53  ;;  %v24493_v53 = vpop.f32.mrf.mxu1 }
 0x392   :  { %20443 = vmatprep.mubr.msk.f32.mxu0 %vm7115_vm2, %v27519_v19  ;;  %v24453_v0 = vpop.permute.xlu0 %14939 }
 0x393   :  { %27528 = vst [vmem:[#allocation74_spill] sm:$0xff] %v24453_v0 }
 0x395   :  { %20444 = vmatmul.mubr.msk.f32.gmra.mxu0 %vm7115_vm2, %v27521_v7  ;;  %v20342_v7 = vpop.f32.mrf.mxu1 }
 0x396   :  { %20454 = vmatprep.mubr.msk.f32.mxu0 %vm7115_vm2, %v27522_v5  ;;  %v24459_v52 = vpop.permute.xlu0 %14929  ;;  %v27544_v5 = vld [vmem:[#allocation20_spill] sm:$0xff] }
 0x397   :  { %27531 = vst [vmem:[#allocation34_spill] sm:$0xff] %v24459_v52 }
 0x399   :  { %20455 = vmatmul.mubr.msk.f32.vlgmr.msra.gmra.mxu0 %vm7115_vm2, %v27524_v2 }
 0x39a   :  { %20457 = vmatprep.mubr.msk.f32.mxu0 %vm7115_vm2, %v27525_v23  ;;  %v24463_v26 = vpop.permute.xlu0 %14919 }
 0x39b   :  { %27533 = vst [vmem:[#allocation150_spill] sm:$0xff] %v24463_v26 }
 0x39d   :  { %20458 = vmatmul.mubr.msk.f32.gmra.mxu0 %vm7115_vm2, %v27526_v34 }
 0x39e   :  { %20460 = vmatprep.mubr.msk.f32.mxu0 %vm7115_vm2, %v27527_v49  ;;  %v24465_v39 = vpop.permute.xlu0 %6961 }
 0x39f   :  { %27534 = vst [vmem:[#allocation153_spill] sm:$0xff] %v24465_v39 }
 0x3a1   :  { %20461 = vmatmul.mubr.msk.f32.gmra.mxu0 %vm7115_vm2, %v27529_v15  ;;  %v8583_v15 = vpop.f32.mrf.mxu1 }
 0x3a2   :  { %20463 = vmatprep.mubr.msk.f32.mxu0 %vm7115_vm2, %v27530_v37  ;;  %v24467_v63 = vpop.permute.xlu0 %6951  ;;  %v27546_v37 = vld [vmem:[#allocation29_spill] sm:$0xff] }
 0x3a3   :  { %27535 = vst [vmem:[#allocation154_spill] sm:$0xff] %v24467_v63 }
 0x3a5   :  { %20464 = vmatmul.mubr.msk.f32.gmra.mxu0 %vm7115_vm2, %v27532_v60 }
 0x3a6   :  { %v24469_v59 = vpop.permute.xlu0 %15702 }
 0x3a7   :  { %27536 = vst [vmem:[#allocation155_spill] sm:$0xff] %v24469_v59 }
 0x3aa   :  { %v24471_v58 = vpop.permute.xlu0 %15692 }
 0x3ab   :  { %27537 = vst [vmem:[#allocation159_spill] sm:$0xff] %v24471_v58 }
 0x3ae   :  { %v24473_v55 = vpop.permute.xlu0 %15682 }
 0x3af   :  { %27538 = vst [vmem:[#allocation160_spill] sm:$0xff] %v24473_v55 }
 0x3b2   :  { %v24475_v54 = vpop.permute.xlu0 %15672 }
 0x3b3   :  { %27539 = vst [vmem:[#allocation162_spill] sm:$0xff] %v24475_v54 }
 0x3b6   :  { %v24477_v21 = vpop.permute.xlu0 %16306 }
 0x3b7   :  { %27540 = vst [vmem:[#allocation165_spill] sm:$0xff] %v24477_v21  ;;  %v27548_v21 = vld [vmem:[#allocation46_spill] sm:$0xff] }
 0x3ba   :  { %v24479_v38 = vpop.permute.xlu0 %16296 }
 0x3bb   :  { %27541 = vst [vmem:[#allocation166_spill] sm:$0xff] %v24479_v38  ;;  %v20345_v38 = vpop.f32.mrf.mxu1 }
 0x3be   :  { %v24485_v18 = vpop.permute.xlu0 %16286 }
 0x3bf   :  { %27542 = vst [vmem:[#allocation167_spill] sm:$0xff] %v24485_v18 }
 0x3c2   :  { %v24487_v9 = vpop.permute.xlu0 %16276 }
 0x3c3   :  { %27543 = vst [vmem:[#allocation170_spill] sm:$0xff] %v24487_v9 }
 0x3c6   :  { %v7071_v56 = vpop.permute.xlu0 %7070 }
 0x3ca   :  { %v7061_v10 = vpop.permute.xlu0 %7060 }
 0x3ce   :  { %v7051_v48 = vpop.permute.xlu0 %7050 }
 0x3d2   :  { %v7041_v1 = vpop.permute.xlu0 %7040 }
 0x3d6   :  { %v7031_v28 = vpop.permute.xlu0 %7030 }
 0x3da   :  { %v7021_v31 = vpop.permute.xlu0 %7020 }
 0x3db   :  { %v7669_v54 = vadd.f32 %v27548_v21, %v7021_v31 }
 0x3de   :  { %v7011_v46 = vpop.permute.xlu0 %7010 }
 0x3df   :  { %v7667_v60 = vadd.f32 %v27546_v37, %v7011_v46 }
 0x3e2   :  { %v7001_v19 = vpop.permute.xlu0 %7000 }
 0x3e3   :  { %v7665_v2 = vadd.f32 %v27544_v5, %v7001_v19  ;;  %v8593_v5 = vpop.f32.mrf.mxu1 }
 0x3e5   :  { %v20356_v46 = vpop.f32.mrf.mxu1 }
 0x3e7   :  { %v8692_v21 = vpop.f32.mrf.mxu1 }
 0x419   :  { %v20304_v23 = vpop.f32.mrf.mxu0 }
 0x41a   :  { %v24496_v34 = vadd.f32 %v20304_v23, %v7665_v2  ;;  %v27550_v2 = vld [vmem:[#allocation31_spill] sm:$0xff] }
 0x41b   :  { %v24498_v49 = vpop.f32.mrf.mxu0  ;;  %v7671_v23 = vadd.f32 %v27550_v2, %v7031_v28  ;;  %v20359_v28 = vpop.f32.mrf.mxu1 }
 0x41c   :  { %27545 = vst [vmem:[#allocation20_spill] sm:$0xff] %v24498_v49  ;;  %v8708_v49 = vadd.f32 %v20359_v28, %v20339_v42 }
 0x41d   :  { %v20307_v61 = vpop.f32.mrf.mxu0 }
 0x41e   :  { %v24501_v9 = vadd.f32 %v20307_v61, %v7667_v60  ;;  %v27552_v60 = vld [vmem:[#allocation35_spill] sm:$0xff] }
 0x41f   :  { %v24503_v18 = vpop.f32.mrf.mxu0  ;;  %v7673_v61 = vadd.f32 %v27552_v60, %v7041_v1  ;;  %v8702_v1 = vpop.f32.mrf.mxu1 }
 0x420   :  { %27547 = vst [vmem:[#allocation29_spill] sm:$0xff] %v24503_v18 }
 0x421   :  { %v20310_v55 = vpop.f32.mrf.mxu0 }
 0x422   :  { %v24506_v58 = vadd.f32 %v20310_v55, %v7669_v54  ;;  %v27554_v55 = vld [vmem:[#allocation53_spill] sm:$0xff] }
 0x423   :  { %v24508_v19 = vpop.f32.mrf.mxu0  ;;  %v7675_v54 = vadd.f32 %v27554_v55, %v7051_v48  ;;  %v20362_v48 = vpop.f32.mrf.mxu1 }
 0x424   :  { %27549 = vst [vmem:[#allocation46_spill] sm:$0xff] %v24508_v19 }
 0x425   :  { %v20313_v59 = vpop.f32.mrf.mxu0 }
 0x426   :  { %v24511_v63 = vadd.f32 %v20313_v59, %v7671_v23  ;;  %v27556_v59 = vld [vmem:[#allocation198_spill] sm:$0xff] }
 0x427   :  { %v24513_v37 = vpop.f32.mrf.mxu0  ;;  %v7677_v23 = vadd.f32 %v27556_v59, %v7061_v10 }
 0x428   :  { %27551 = vst [vmem:[#allocation31_spill] sm:$0xff] %v24513_v37 }
 0x429   :  { %v20316_v39 = vpop.f32.mrf.mxu0 }
 0x42a   :  { %v24516_v26 = vadd.f32 %v20316_v39, %v7673_v61  ;;  %v27558_v39 = vld [vmem:[#allocation200_spill] sm:$0xff] }
 0x42b   :  { %v24518_v31 = vpop.f32.mrf.mxu0  ;;  %v7679_v61 = vadd.f32 %v27558_v39, %v7071_v56 }
 0x42c   :  { %27553 = vst [vmem:[#allocation35_spill] sm:$0xff] %v24518_v31  ;;  %v8718_v31 = vadd.f32 %v20362_v48, %v20342_v7  ;;  %v27568_v48 = vld [vmem:[#allocation63_spill] sm:$0xff] }
 0x42d   :  { %v20319_v52 = vpop.f32.mrf.mxu0 }
 0x42e   :  { %v24521_v0 = vadd.f32 %v20319_v52, %v7675_v54  ;;  %v8712_v54 = vpop.f32.mrf.mxu1 }
 0x42f   :  { %v24523_v2 = vpop.f32.mrf.mxu0  ;;  %v8713_v18 = vadd.f32 %v8712_v54, %v8583_v15 }
 0x430   :  { %27555 = vst [vmem:[#allocation53_spill] sm:$0xff] %v24523_v2  ;;  %v20365_v8 = vpop.f32.mrf.mxu1 }
 0x431   :  { %v20322_v27 = vpop.f32.mrf.mxu0  ;;  %v8728_v37 = vadd.f32 %v20365_v8, %v20345_v38  ;;  %v27564_v38 = vld [vmem:[#allocation78_spill] sm:$0xff] }
 0x432   :  { %v24526_v36 = vadd.f32 %v20322_v27, %v7677_v23  ;;  %v8722_v27 = vpop.f32.mrf.mxu1 }
 0x433   :  { %v24528_v60 = vpop.f32.mrf.mxu0  ;;  %v8723_v56 = vadd.f32 %v8722_v27, %v8593_v5  ;;  %v8698_v5 = vadd.f32 %v20356_v46, %v24489_v16  ;;  %v27576_v27 = vld [vmem:[#allocation6_spill] sm:$0xff] }
 0x434   :  { %27557 = vst [vmem:[#allocation198_spill] sm:$0xff] %v24528_v60  ;;  %v8703_v60 = vadd.f32 %v8702_v1, %v24493_v53 }
 0x435   :  { %v20325_v22 = vpop.f32.mrf.mxu0 }
 0x436   :  { %v24531_v62 = vadd.f32 %v20325_v22, %v7679_v61 }
 0x437   :  { %v24533_v55 = vpop.f32.mrf.mxu0 }
 0x438   :  { %27559 = vst [vmem:[#allocation200_spill] sm:$0xff] %v24533_v55  ;;  %v2253_v55 = vadd.f32 %v27562_v47, %v27561_v45  ;;  %v8693_v45 = vadd.f32 %v8692_v21, %v24491_v33  ;;  %v27574_v33 = vld [vmem:[#allocation64_spill] sm:$0xff] }
 0x439   :  { %v20376_v52 = vpop.f32.mrf.mxu0 }
 0x43a   :  { %v2370_v47 = vadd.f32 %v27568_v48, %v2253_v55  ;;  %v27573_v55 = vld [vmem:[#allocation21_spill] sm:$0xff] }
 0x43b   :  { %v8833_v13 = vpop.f32.mrf.mxu0 }
 0x43d   :  { %v20379_v4 = vpop.f32.mrf.mxu0 }
 0x43e   :  { %v8875_v2 = vadd.f32 %v20379_v4, %v8708_v49  ;;  %v8873_v4 = vadd.f32 %v20376_v52, %v8698_v5  ;;  %v8872_v49 = vadd.f32 %v8833_v13, %v8693_v45  ;;  %v17519_v45 = vld [vmem:[%s27172_s5 + $0x118] sm:$0xff] }
 0x43f   :  { %v8843_v10 = vpop.f32.mrf.mxu0 }
 0x441   :  { %v20382_v59 = vpop.f32.mrf.mxu0 }
 0x442   :  { %v8877_v39 = vadd.f32 %v20382_v59, %v8718_v31  ;;  %v27567_v31 = vld [vmem:[#allocation60_spill] sm:$0xff] }
 0x443   :  { %v8853_v23 = vpop.f32.mrf.mxu0 }
 0x444   :  { %v8876_v3 = vadd.f32 %v8853_v23, %v8713_v18  ;;  %v8933_v7 = vadd.f32 %v27563_v41, %v8877_v39  ;;  %v27569_v41 = vld [vmem:[#allocation9_spill] sm:$0xff]  ;;  %v8928_v23 = vadd.f32 %v27576_v27, %v8872_v49  ;;  %v27578_v39 = vld [vmem:[#allocation7_spill] sm:$0xff] }
 0x445   :  { %v20385_v19 = vpop.f32.mrf.mxu0  ;;  %v17524_v49 = vld [vmem:[%s27172_s5 + $0x140] sm:$0xff] }
 0x446   :  { %v8879_v22 = vadd.f32 %v20385_v19, %v8728_v37  ;;  %v8874_v19 = vadd.f32 %v8843_v10, %v8703_v60  ;;  %v27565_v37 = vld [vmem:[#allocation15_spill] sm:$0xff]  ;;  %v8941_v53 = vmax.f32 %v8933_v7, 0.0  ;;  %v27572_v60 = vld [vmem:[#allocation61_spill] sm:$0xff]  ;;  %v8929_v10 = vadd.f32 %v27573_v55, %v8873_v4 }
 0x447   :  { %v8863_v61 = vpop.f32.mrf.mxu0  ;;  %v8932_v42 = vadd.f32 %v27565_v37, %v8876_v3  ;;  %v27571_v3 = vld [vmem:[#allocation18_spill] sm:$0xff]  ;;  %v27579_v7 = vld [vmem:[#allocation65_spill] sm:$0xff]  ;;  %v8936_v5 = vmax.f32 %v8928_v23, 0.0 }
 0x448   :  { %v8935_v50 = vadd.f32 %v27560_v25, %v8879_v22  ;;  %v8878_v57 = vadd.f32 %v8863_v61, %v8723_v56  ;;  %v27566_v25 = vld [vmem:[#allocation56_spill] sm:$0xff]  ;;  %v8930_v46 = vadd.f32 %v27571_v3, %v8874_v19  ;;  %v27577_v56 = vld [vmem:[#allocation67_spill] sm:$0xff]  ;;  %v8937_v61 = vmax.f32 %v8929_v10, 0.0  ;;  %v17517_v19 = vld [vmem:[%s27172_s5 + $0x108] sm:$0xff] }
 0x449   :  { %v2243_v28 = vadd.f32 %v27567_v31, %v27566_v25  ;;  %v8940_v1 = vmax.f32 %v8932_v42, 0.0  ;;  %v2622_v22 = vadd.f32 %v27578_v39, %v27577_v56  ;;  %v27581_v37 = vld [vmem:[#allocation66_spill] sm:$0xff]  ;;  %v27582_v42 = vld [vmem:[#allocation27_spill] sm:$0xff] }
 0x44a   :  { %v8943_v8 = vmax.f32 %v8935_v50, 0.0  ;;  %v8934_v15 = vadd.f32 %v27564_v38, %v8878_v57  ;;  %v8931_v50 = vadd.f32 %v27569_v41, %v8875_v2  ;;  %v27570_v57 = vld [vmem:[#allocation68_spill] sm:$0xff]  ;;  %v27575_v2 = vld [vmem:[#allocation69_spill] sm:$0xff]  ;;  %v8938_v13 = vmax.f32 %v8930_v46, 0.0  ;;  %v17518_v31 = vld [vmem:[%s27172_s5 + $0x110] sm:$0xff] }
 0x44b   :  { %v2481_v16 = vadd.f32 %v27570_v57, %v2370_v47  ;;  %v2368_v54 = vadd.f32 %v27572_v60, %v2243_v28  ;;  %v27580_v38 = vld [vmem:[#allocation12_spill] sm:$0xff]  ;;  %v24564_v25 = vmax.f32 %v2622_v22, 0.0  ;;  %v17522_v57 = vld [vmem:[%s27172_s5 + $0x130] sm:$0xff]  ;;  %v17525_v3 = vld [vmem:[%s27172_s5 + $0x148] sm:$0xff] }
 0x44c   :  { %20386 = vmatprep.subr.mxu1 %v8943_v8  ;;  %v8942_v18 = vmax.f32 %v8934_v15, 0.0  ;;  %v8939_v59 = vmax.f32 %v8931_v50, 0.0  ;;  %v27583_v28 = vld [vmem:[#allocation80_spill] sm:$0xff]  ;;  %v17526_v46 = vld [vmem:[%s27172_s5 + $0x150] sm:$0xff] }
 0x44d   :  { %20387 = vmatpush3.msra.mxu1 %v8943_v8  ;;  %v2479_v21 = vadd.f32 %v27574_v33, %v2368_v54  ;;  %v2593_v52 = vadd.f32 %v27575_v2, %v2481_v16  ;;  %v17520_v41 = vld [vmem:[%s27172_s5 + $0x120] sm:$0xff]  ;;  %v17523_v16 = vld [vmem:[%s27172_s5 + $0x138] sm:$0xff]  ;;  %v17529_v54 = vld [vmem:[%s27172_s5 + $0x168] sm:$0xff]  ;;  %v24776_v33 = vpop.f32.mrf.mxu0 }
 0x44e   :  { %20388 = vmatprep.subr.mxu1 %v8942_v18  ;;  %v17528_v60 = vld [vmem:[%s27172_s5 + $0x160] sm:$0xff]  ;;  %v17530_v55 = vld [vmem:[%s27172_s5 + $0x170] sm:$0xff]  ;;  %v17531_v10 = vld [vmem:[%s27172_s5 + $0x178] sm:$0xff] }
 0x44f   :  { %20389 = vmatpush3.msra.mxu1 %v8942_v18  ;;  %v2591_v8 = vadd.f32 %v27579_v7, %v2479_v21  ;;  %v2621_v15 = vadd.f32 %v27580_v38, %v2593_v52  ;;  %v2620_v18 = vadd.f32 %v27582_v42, %v27581_v37  ;;  %v24778_v21 = vpop.f32.mrf.mxu0 }
 0x450   :  { %20390 = vmatprep.subr.mxu1 %v8941_v53 }
 0x451   :  { %20391 = vmatpush3.msra.mxu1 %v8941_v53  ;;  %v2619_v48 = vadd.f32 %v27583_v28, %v2591_v8  ;;  %v24570_v47 = vmax.f32 %v2621_v15, 0.0  ;;  %v24579_v4 = vmax.f32 %v2620_v18, 0.0  ;;  %v17521_v53 = vld [vmem:[%s27172_s5 + $0x128] sm:$0xff]  ;;  %v20439_v2 = vpop.f32.mrf.mxu0 }
 0x452   :  { %20392 = vmatprep.subr.mxu1 %v8940_v1 }
 0x453   :  { %20393 = vmatpush3.msra.mxu1 %v8940_v1  ;;  %v24586_v50 = vmax.f32 %v2619_v48, 0.0  ;;  %v17527_v1 = vld [vmem:[%s27172_s5 + $0x158] sm:$0xff]  ;;  %v9326_v52 = vpop.f32.mrf.mxu0 }
 0x454   :  { %20394 = vmatprep.subr.mxu1 %v8939_v59 }
 0x455   :  { %20395 = vmatpush3.msra.mxu1 %v8939_v59  ;;  %v24772_v59 = vld [vmem:[%s27170_s3 + $0x38] sm:$0xff]  ;;  %v20442_v27 = vpop.f32.mrf.mxu0 }
 0x456   :  { %20396 = vmatprep.subr.mxu1 %v8938_v13  ;;  %27589 = vst [vmem:[#allocation15_spill] sm:$0xff] %v24772_v59 }
 0x457   :  { %20397 = vmatpush3.msra.mxu1 %v8938_v13  ;;  %v9336_v39 = vpop.f32.mrf.mxu0 }
 0x458   :  { %20398 = vmatprep.subr.mxu1 %v8937_v61 }
 0x459   :  { %20399 = vmatpush3.msra.mxu1 %v8937_v61  ;;  %v20445_v8 = vpop.f32.mrf.mxu0 }
 0x45a   :  { %20400 = vmatprep.subr.mxu1 %v8936_v5 }
 0x45b   :  { %20401 = vmatpush3.msra.mxu1 %v8936_v5 }
 0x45c   :  { %20403 = vmatmul.mubr.msk.f32.vlgmr.msra.gmra.mxu1 %vm7470_vm3, %v17517_v19  ;;  %20466 = vmatprep.subr.mxu1 %v24564_v25  ;;  %v9346_v19 = vpop.f32.mrf.mxu0 }
 0x45d   :  { %20467 = vmatpush3.msra.mxu1 %v24564_v25  ;;  %20405 = vmatprep.mubr.msk.f32.mxu1 %vm7470_vm3, %v17518_v31 }
 0x45e   :  { %20468 = vmatprep.subr.mxu1 %v24570_v47  ;;  %v20456_v42 = vpop.f32.mrf.mxu0 }
 0x45f   :  { %20469 = vmatpush3.msra.mxu1 %v24570_v47 }
 0x460   :  { %20406 = vmatmul.mubr.msk.f32.gmra.mxu1 %vm7470_vm3, %v17519_v45  ;;  %20470 = vmatprep.subr.mxu1 %v24579_v4  ;;  %v9445_v28 = vpop.f32.mrf.mxu0 }
 0x461   :  { %20471 = vmatpush3.msra.mxu1 %v24579_v4  ;;  %20408 = vmatprep.mubr.msk.f32.mxu1 %vm7470_vm3, %v17520_v41 }
 0x462   :  { %20472 = vmatprep.subr.mxu1 %v24586_v50  ;;  %v20459_v41 = vpop.f32.mrf.mxu0 }
 0x463   :  { %20473 = vmatpush3.msra.mxu1 %v24586_v50 }
 0x464   :  { %20409 = vmatmul.mubr.msk.f32.gmra.mxu1 %vm7470_vm3, %v17521_v53  ;;  %20526 = vmatprep.subr.mxu1 %v24564_v25 }
 0x465   :  { %20411 = vmatprep.mubr.msk.f32.mxu1 %vm7470_vm3, %v17522_v57 }
 0x468   :  { %20412 = vmatmul.mubr.msk.f32.gmra.mxu1 %vm7470_vm3, %v17523_v16  ;;  %v9455_v16 = vpop.f32.mrf.mxu0 }
 0x469   :  { %20414 = vmatprep.mubr.msk.f32.mxu1 %vm7470_vm3, %v17524_v49 }
 0x46c   :  { %20415 = vmatmul.mubr.msk.f32.gmra.mxu1 %vm7470_vm3, %v17525_v3 }
 0x46d   :  { %20417 = vmatprep.mubr.msk.f32.mxu1 %vm7470_vm3, %v17526_v46  ;;  %v20462_v46 = vpop.f32.mrf.mxu0 }
 0x470   :  { %20418 = vmatmul.mubr.msk.f32.gmra.mxu1 %vm7470_vm3, %v17527_v1 }
 0x471   :  { %20420 = vmatprep.mubr.msk.f32.mxu1 %vm7470_vm3, %v17528_v60 }
 0x474   :  { %20421 = vmatmul.mubr.msk.f32.gmra.mxu1 %vm7470_vm3, %v17529_v54 }
 0x475   :  { %20423 = vmatprep.mubr.msk.f32.mxu1 %vm7470_vm3, %v17530_v55 }
 0x478   :  { %20424 = vmatmul.mubr.msk.f32.gmra.mxu1 %vm7470_vm3, %v17531_v10 }
 0x479   :  { %20474 = vmatprep.mubr.msk.f32.mxu1 %vm7115_vm2, %v24088_v35  ;;  %v17588_v35 = vld [vmem:[%s27172_s5 + $0x180] sm:$0xff] }
 0x47a   :  { %20502 = vmatprep.mubr.msk.f32.mxu0 %vm7470_vm3, %v17588_v35 }
 0x47c   :  { %20475 = vmatmul.mubr.msk.f32.vlgmr.msra.gmra.mxu1 %vm7115_vm2, %v24096_v11  ;;  %v24680_v11 = vld [vmem:[%s27170_s3 + $0x50] sm:$0xff] }
 0x47d   :  { %20527 = vmatpush3.msra.mxu1 %v24564_v25  ;;  %20477 = vmatprep.mubr.msk.f32.mxu1 %vm7115_vm2, %v24101_v32  ;;  %v24688_v32 = vld [vmem:[%s27170_s3 + $0x58] sm:$0xff] }
 0x47e   :  { %20528 = vmatprep.subr.mxu1 %v24570_v47 }
 0x47f   :  { %20529 = vmatpush3.msra.mxu1 %v24570_v47 }
 0x480   :  { %20530 = vmatprep.subr.mxu1 %v24579_v4  ;;  %20478 = vmatmul.mubr.msk.f32.gmra.mxu1 %vm7115_vm2, %v24111_v30  ;;  %v24695_v30 = vld [vmem:[%s27170_s3 + $0x60] sm:$0xff] }
 0x481   :  { %20531 = vmatpush3.msra.mxu1 %v24579_v4  ;;  %20480 = vmatprep.mubr.msk.f32.mxu1 %vm7115_vm2, %v24117_v24  ;;  %v24702_v24 = vld [vmem:[%s27170_s3 + $0x68] sm:$0xff] }
 0x482   :  { %20532 = vmatprep.subr.mxu1 %v24586_v50 }
 0x483   :  { %20533 = vmatpush3.msra.mxu1 %v24586_v50 }
 0x484   :  { %20546 = vmatprep.subr.mxu1 %v24297_v12  ;;  %20481 = vmatmul.mubr.msk.f32.gmra.mxu1 %vm7115_vm2, %v24129_v44  ;;  %v24709_v44 = vld [vmem:[%s27170_s3 + $0x70] sm:$0xff] }
 0x485   :  { %20483 = vmatprep.mubr.msk.f32.mxu1 %vm7115_vm2, %v24135_v6  ;;  %v24716_v6 = vld [vmem:[%s27170_s3 + $0x78] sm:$0xff] }
 0x488   :  { %20484 = vmatmul.mubr.msk.f32.gmra.mxu1 %vm7115_vm2, %v24146_v14  ;;  %v24723_v14 = vld [vmem:[%s27170_s3] sm:$0xff] }
 0x489   :  { %20534 = vmatprep.mubr.msk.f32.mxu1 %vm7115_vm2, %v24151_v40  ;;  %v24730_v40 = vld [vmem:[%s27170_s3 + $0x8] sm:$0xff] }
 0x48c   :  { %20535 = vmatmul.mubr.msk.f32.vlgmr.msra.gmra.mxu1 %vm7115_vm2, %v24160_v43  ;;  %v24737_v43 = vld [vmem:[%s27170_s3 + $0x10] sm:$0xff] }
 0x48d   :  { %20547 = vmatpush3.msra.mxu1 %v24297_v12  ;;  %20537 = vmatprep.mubr.msk.f32.mxu1 %vm7115_vm2, %v24680_v11  ;;  %27584 = vst [vmem:[#allocation75_spill] sm:$0xff] %v24737_v43  ;;  %v24744_v12 = vld [vmem:[%s27170_s3 + $0x18] sm:$0xff] }
 0x48e   :  { %20548 = vmatprep.subr.mxu1 %v24305_v20  ;;  %27585 = vst [vmem:[#allocation59_spill] sm:$0xff] %v24744_v12 }
 0x48f   :  { %20549 = vmatpush3.msra.mxu1 %v24305_v20  ;;  %v24751_v20 = vld [vmem:[%s27170_s3 + $0x20] sm:$0xff] }
 0x490   :  { %20550 = vmatprep.subr.mxu1 %v24314_v51  ;;  %20538 = vmatmul.mubr.msk.f32.gmra.mxu1 %vm7115_vm2, %v24688_v32  ;;  %27586 = vst [vmem:[#allocation62_spill] sm:$0xff] %v24751_v20 }
 0x491   :  { %20551 = vmatpush3.msra.mxu1 %v24314_v51  ;;  %20540 = vmatprep.mubr.msk.f32.mxu1 %vm7115_vm2, %v24695_v30  ;;  %v24758_v51 = vld [vmem:[%s27170_s3 + $0x28] sm:$0xff] }
 0x492   :  { %20552 = vmatprep.subr.mxu1 %v24321_v29  ;;  %27587 = vst [vmem:[#allocation16_spill] sm:$0xff] %v24758_v51 }
 0x493   :  { %20553 = vmatpush3.msra.mxu1 %v24321_v29  ;;  %v24765_v29 = vld [vmem:[%s27170_s3 + $0x30] sm:$0xff] }
 0x494   :  { %20541 = vmatmul.mubr.msk.f32.gmra.mxu1 %vm7115_vm2, %v24702_v24  ;;  %27588 = vst [vmem:[#allocation78_spill] sm:$0xff] %v24765_v29 }
 0x495   :  { %20543 = vmatprep.mubr.msk.f32.mxu1 %vm7115_vm2, %v24709_v44 }
 0x498   :  { %20544 = vmatmul.mubr.msk.f32.gmra.mxu1 %vm7115_vm2, %v24716_v6 }
 0x499   :  { %20554 = vmatprep.mubr.msk.f32.mxu1 %vm7115_vm2, %v24723_v14 }
 0x49c   :  { %20555 = vmatmul.mubr.msk.f32.vlgmr.msra.gmra.mxu1 %vm7115_vm2, %v24730_v40 }
 0x49d   :  { %20557 = vmatprep.mubr.msk.f32.mxu1 %vm7115_vm2, %v24737_v43 }
 0x4a0   :  { %20558 = vmatmul.mubr.msk.f32.gmra.mxu1 %vm7115_vm2, %v24744_v12 }
 0x4a1   :  { %20560 = vmatprep.mubr.msk.f32.mxu1 %vm7115_vm2, %v24751_v20 }
 0x4a4   :  { %20561 = vmatmul.mubr.msk.f32.gmra.mxu1 %vm7115_vm2, %v24758_v51 }
 0x4a5   :  { %20563 = vmatprep.mubr.msk.f32.mxu1 %vm7115_vm2, %v24765_v29 }
 0x4a8   :  { %20564 = vmatmul.mubr.msk.f32.gmra.mxu1 %vm7115_vm2, %v24772_v59 }
 0x51c   :  { %v20404_v23 = vpop.f32.mrf.mxu1 }
 0x51d   :  { %v24781_v13 = vadd.f32 %v20404_v23, %v24496_v34 }
 0x51e   :  { %v24783_v56 = vpop.f32.mrf.mxu1 }
 0x51f   :  { %27590 = vst [vmem:[#allocation56_spill] sm:$0xff] %v24783_v56 }
 0x520   :  { %v20407_v22 = vpop.f32.mrf.mxu1 }
 0x521   :  { %v24786_v61 = vadd.f32 %v20407_v22, %v24501_v9 }
 0x522   :  { %v24788_v7 = vpop.f32.mrf.mxu1 }
 0x523   :  { %27591 = vst [vmem:[#allocation60_spill] sm:$0xff] %v24788_v7  ;;  %v27602_v7 = vld [vmem:[#allocation81_spill] sm:$0xff] }
 0x524   :  { %v20410_v38 = vpop.f32.mrf.mxu1 }
 0x525   :  { %v24791_v15 = vadd.f32 %v20410_v38, %v24506_v58  ;;  %v9471_v38 = vadd.f32 %v20462_v46, %v20442_v27  ;;  %v27605_v27 = vld [vmem:[#allocation76_spill] sm:$0xff] }
 0x526   :  { %v24793_v5 = vpop.f32.mrf.mxu1 }
 0x527   :  { %27592 = vst [vmem:[#allocation63_spill] sm:$0xff] %v24793_v5 }
 0x528   :  { %v20413_v37 = vpop.f32.mrf.mxu1 }
 0x529   :  { %v24796_v34 = vadd.f32 %v20413_v37, %v24511_v63 }
 0x52a   :  { %v24798_v18 = vpop.f32.mrf.mxu1 }
 0x52b   :  { %27593 = vst [vmem:[#allocation9_spill] sm:$0xff] %v24798_v18  ;;  %v9461_v18 = vadd.f32 %v20459_v41, %v20439_v2  ;;  %v27608_v41 = vld [vmem:[#allocation10_spill] sm:$0xff] }
 0x52c   :  { %v20416_v31 = vpop.f32.mrf.mxu1 }
 0x52d   :  { %v24801_v9 = vadd.f32 %v20416_v31, %v24516_v26 }
 0x52e   :  { %v24803_v48 = vpop.f32.mrf.mxu1 }
 0x52f   :  { %27594 = vst [vmem:[#allocation68_spill] sm:$0xff] %v24801_v9  ;;  %27595 = vst [vmem:[#allocation18_spill] sm:$0xff] %v24803_v48 }
 0x530   :  { %v20419_v45 = vpop.f32.mrf.mxu1 }
 0x531   :  { %v24806_v58 = vadd.f32 %v20419_v45, %v24521_v0  ;;  %v9465_v0 = vpop.f32.mrf.mxu0 }
 0x532   :  { %v24808_v53 = vpop.f32.mrf.mxu1  ;;  %v9466_v45 = vadd.f32 %v9465_v0, %v9336_v39  ;;  %v9451_v39 = vadd.f32 %v20456_v42, %v24776_v33  ;;  %v27607_v0 = vld [vmem:[#allocation88_spill] sm:$0xff]  ;;  %v27612_v42 = vld [vmem:[#allocation94_spill] sm:$0xff] }
 0x533   :  { %27596 = vst [vmem:[#allocation61_spill] sm:$0xff] %v24806_v58  ;;  %27597 = vst [vmem:[#allocation21_spill] sm:$0xff] %v24808_v53  ;;  %v20465_v10 = vpop.f32.mrf.mxu0  ;;  %v27604_v58 = vld [vmem:[#allocation84_spill] sm:$0xff] }
 0x534   :  { %v20422_v57 = vpop.f32.mrf.mxu1  ;;  %v9481_v37 = vadd.f32 %v20465_v10, %v20445_v8  ;;  %v27606_v8 = vld [vmem:[#allocation77_spill] sm:$0xff] }
 0x535   :  { %v24811_v63 = vadd.f32 %v20422_v57, %v24526_v36  ;;  %v9475_v22 = vpop.f32.mrf.mxu0  ;;  %v2838_v46 = vadd.f32 %v27606_v8, %v27605_v27  ;;  %v27622_v27 = vld [vmem:[#allocation102_spill] sm:$0xff] }
 0x536   :  { %v24813_v49 = vpop.f32.mrf.mxu1  ;;  %v9476_v57 = vadd.f32 %v9475_v22, %v9346_v19 }
 0x537   :  { %27598 = vst [vmem:[#allocation64_spill] sm:$0xff] %v24811_v63  ;;  %27599 = vst [vmem:[#allocation69_spill] sm:$0xff] %v24813_v49  ;;  %v9456_v49 = vadd.f32 %v9455_v16, %v9326_v52  ;;  %v9446_v52 = vadd.f32 %v9445_v28, %v24778_v21  ;;  %v27611_v16 = vld [vmem:[#allocation73_spill] sm:$0xff]  ;;  %v27615_v21 = vld [vmem:[#allocation95_spill] sm:$0xff] }
 0x538   :  { %v20425_v3 = vpop.f32.mrf.mxu1 }
 0x539   :  { %v24816_v26 = vadd.f32 %v20425_v3, %v24531_v62 }
 0x53a   :  { %v24818_v1 = vpop.f32.mrf.mxu1 }
 0x53b   :  { %27600 = vst [vmem:[#allocation6_spill] sm:$0xff] %v24816_v26  ;;  %27601 = vst [vmem:[#allocation67_spill] sm:$0xff] %v24818_v1 }
 0x53c   :  { %v20476_v60 = vpop.f32.mrf.mxu1 }
 0x53e   :  { %v9586_v54 = vpop.f32.mrf.mxu1 }
 0x53f   :  { %v9625_v33 = vadd.f32 %v9586_v54, %v9446_v52 }
 0x540   :  { %v20479_v55 = vpop.f32.mrf.mxu1 }
 0x541   :  { %v9628_v53 = vadd.f32 %v20479_v55, %v9461_v18  ;;  %v9626_v18 = vadd.f32 %v20476_v60, %v9451_v39  ;;  %v17589_v39 = vld [vmem:[%s27172_s5 + $0x188] sm:$0xff] }
 0x542   :  { %v9596_v35 = vpop.f32.mrf.mxu1 }
 0x543   :  { %v9627_v19 = vadd.f32 %v9596_v35, %v9456_v49  ;;  %v9682_v28 = vadd.f32 %v27615_v21, %v9626_v18  ;;  %v17603_v21 = vld [vmem:[%s27172_s5 + $0x1f8] sm:$0xff] }
 0x544   :  { %v20482_v23 = vpop.f32.mrf.mxu1 }
 0x545   :  { %v9630_v48 = vadd.f32 %v20482_v23, %v9471_v38  ;;  %v9683_v49 = vadd.f32 %v27612_v42, %v9627_v19  ;;  %v27617_v23 = vld [vmem:[#allocation98_spill] sm:$0xff]  ;;  %v17596_v42 = vld [vmem:[%s27172_s5 + $0x1c0] sm:$0xff] }
 0x546   :  { %v9606_v36 = vpop.f32.mrf.mxu1  ;;  %v9681_v22 = vadd.f32 %v27617_v23, %v9625_v33  ;;  %v27623_v19 = vld [vmem:[#allocation14_spill] sm:$0xff]  ;;  %v17595_v33 = vld [vmem:[%s27172_s5 + $0x1b8] sm:$0xff]  ;;  %v24954_v23 = vld [vmem:[%s27170_s3 + $0xa0] sm:$0xff] }
 0x547   :  { %v9629_v5 = vadd.f32 %v9606_v36, %v9466_v45  ;;  %v9686_v26 = vadd.f32 %v27603_v17, %v9630_v48  ;;  %v27609_v17 = vld [vmem:[#allocation90_spill] sm:$0xff]  ;;  %v9691_v54 = vmax.f32 %v9683_v49, 0.0  ;;  %v27618_v36 = vld [vmem:[#allocation13_spill] sm:$0xff] }
 0x548   :  { %v20485_v31 = vpop.f32.mrf.mxu1  ;;  %v17597_v49 = vld [vmem:[%s27172_s5 + $0x1c8] sm:$0xff] }
 0x549   :  { %v9632_v62 = vadd.f32 %v20485_v31, %v9481_v37  ;;  %v9685_v10 = vadd.f32 %v27607_v0, %v9629_v5  ;;  %v9694_v48 = vmax.f32 %v9686_v26, 0.0  ;;  %v27619_v37 = vld [vmem:[#allocation11_spill] sm:$0xff] }
 0x54a   :  { %v9616_v3 = vpop.f32.mrf.mxu1  ;;  %v27620_v31 = vld [vmem:[#allocation99_spill] sm:$0xff] }
 0x54b   :  { %v9688_v56 = vadd.f32 %v27602_v7, %v9632_v62  ;;  %v9631_v1 = vadd.f32 %v9616_v3, %v9476_v57  ;;  %v2955_v7 = vadd.f32 %v27608_v41, %v2838_v46  ;;  %v9693_v5 = vmax.f32 %v9685_v10, 0.0  ;;  %v27621_v62 = vld [vmem:[#allocation19_spill] sm:$0xff] }
 0x54c   :  { %v3207_v45 = vadd.f32 %v27620_v31, %v27619_v37  ;;  %v9690_v57 = vmax.f32 %v9682_v28, 0.0  ;;  %v9689_v46 = vmax.f32 %v9681_v22, 0.0  ;;  %v27624_v0 = vld [vmem:[#allocation103_spill] sm:$0xff]  ;;  %v24925_v28 = vld [vmem:[%s27170_s3 + $0x80] sm:$0xff]  ;;  %v24966_v22 = vld [vmem:[%s27170_s3 + $0xa8] sm:$0xff] }
 0x54d   :  { %v9696_v63 = vmax.f32 %v9688_v56, 0.0  ;;  %v9687_v9 = vadd.f32 %v27604_v58, %v9631_v1  ;;  %v9684_v56 = vadd.f32 %v27609_v17, %v9628_v53  ;;  %v27610_v58 = vld [vmem:[#allocation72_spill] sm:$0xff]  ;;  %v3205_v10 = vadd.f32 %v27624_v0, %v27623_v19  ;;  %v17590_v41 = vld [vmem:[%s27172_s5 + $0x190] sm:$0xff]  ;;  %v24997_v37 = vld [vmem:[%s27170_s3 + $0x48] sm:$0xff] }
 0x54e   :  { %v2828_v1 = vadd.f32 %v27611_v16, %v27610_v58  ;;  %v27616_v53 = vld [vmem:[#allocation8_spill] sm:$0xff]  ;;  %v17593_v16 = vld [vmem:[%s27172_s5 + $0x1a8] sm:$0xff] }
 0x54f   :  { %20486 = vmatprep.subr.mxu0 %v9696_v63  ;;  %v9695_v2 = vmax.f32 %v9687_v9, 0.0  ;;  %v27613_v9 = vld [vmem:[#allocation24_spill] sm:$0xff]  ;;  %v9692_v60 = vmax.f32 %v9684_v56, 0.0  ;;  %v24863_v56 = vmax.f32 %v3205_v10, 0.0 }
 0x550   :  { %20487 = vmatpush3.msra.mxu0 %v9696_v63  ;;  %v2953_v55 = vadd.f32 %v27613_v9, %v2828_v1  ;;  %v27614_v63 = vld [vmem:[#allocation17_spill] sm:$0xff]  ;;  %v17591_v17 = vld [vmem:[%s27172_s5 + $0x198] sm:$0xff]  ;;  %v17594_v1 = vld [vmem:[%s27172_s5 + $0x1b0] sm:$0xff] }
 0x551   :  { %20488 = vmatprep.subr.mxu0 %v9695_v2  ;;  %v3066_v35 = vadd.f32 %v27614_v63, %v2955_v7  ;;  %v27625_v7 = vld [vmem:[#allocation106_spill] sm:$0xff]  ;;  %v17599_v9 = vld [vmem:[%s27172_s5 + $0x1d8] sm:$0xff] }
 0x552   :  { %20489 = vmatpush3.msra.mxu0 %v9695_v2  ;;  %v3064_v38 = vadd.f32 %v27618_v36, %v2953_v55  ;;  %v24848_v2 = vmax.f32 %v3207_v45, 0.0  ;;  %v17600_v55 = vld [vmem:[%s27172_s5 + $0x1e0] sm:$0xff]  ;;  %v17601_v63 = vld [vmem:[%s27172_s5 + $0x1e8] sm:$0xff]  ;;  %v24983_v36 = vld [vmem:[%s27170_s3 + $0xb8] sm:$0xff] }
 0x553   :  { %20490 = vmatprep.subr.mxu0 %v9694_v48  ;;  %v3178_v26 = vadd.f32 %v27616_v53, %v3066_v35  ;;  %v17602_v35 = vld [vmem:[%s27172_s5 + $0x1f0] sm:$0xff] }
 0x554   :  { %20491 = vmatpush3.msra.mxu0 %v9694_v48  ;;  %v3176_v3 = vadd.f32 %v27621_v62, %v3064_v38  ;;  %v17592_v48 = vld [vmem:[%s27172_s5 + $0x1a0] sm:$0xff]  ;;  %v24938_v53 = vld [vmem:[%s27170_s3 + $0x90] sm:$0xff] }
 0x555   :  { %20492 = vmatprep.subr.mxu0 %v9693_v5  ;;  %v3206_v8 = vadd.f32 %v27622_v27, %v3178_v26  ;;  %v24948_v26 = vld [vmem:[%s27170_s3 + $0x98] sm:$0xff]  ;;  %v24988_v38 = vld [vmem:[%s27170_s3 + $0x40] sm:$0xff] }
 0x556   :  { %20493 = vmatpush3.msra.mxu0 %v9693_v5  ;;  %v3204_v52 = vadd.f32 %v27625_v7, %v3176_v3  ;;  %v17598_v5 = vld [vmem:[%s27172_s5 + $0x1d0] sm:$0xff] }
 0x557   :  { %20494 = vmatprep.subr.mxu0 %v9692_v60  ;;  %v24854_v18 = vmax.f32 %v3206_v8, 0.0 }
 0x558   :  { %20495 = vmatpush3.msra.mxu0 %v9692_v60  ;;  %v24870_v58 = vmax.f32 %v3204_v52, 0.0  ;;  %v24933_v60 = vld [vmem:[%s27170_s3 + $0x88] sm:$0xff] }
 0x559   :  { %20496 = vmatprep.subr.mxu0 %v9691_v54 }
 0x55a   :  { %20497 = vmatpush3.msra.mxu0 %v9691_v54  ;;  %v24972_v54 = vld [vmem:[%s27170_s3 + $0xb0] sm:$0xff] }
 0x55b   :  { %20498 = vmatprep.subr.mxu0 %v9690_v57 }
 0x55c   :  { %20499 = vmatpush3.msra.mxu0 %v9690_v57 }
 0x55d   :  { %20500 = vmatprep.subr.mxu0 %v9689_v46 }
 0x55e   :  { %20501 = vmatpush3.msra.mxu0 %v9689_v46 }
 0x55f   :  { %20503 = vmatmul.mubr.msk.f32.vlgmr.msra.gmra.mxu0 %vm7470_vm3, %v17589_v39  ;;  %20566 = vmatprep.subr.mxu0 %v24848_v2 }
 0x560   :  { %20567 = vmatpush3.msra.mxu0 %v24848_v2  ;;  %20505 = vmatprep.mubr.msk.f32.mxu0 %vm7470_vm3, %v17590_v41 }
 0x561   :  { %20568 = vmatprep.subr.mxu0 %v24854_v18 }
 0x562   :  { %20569 = vmatpush3.msra.mxu0 %v24854_v18 }
 0x563   :  { %20506 = vmatmul.mubr.msk.f32.gmra.mxu0 %vm7470_vm3, %v17591_v17  ;;  %20570 = vmatprep.subr.mxu0 %v24863_v56 }
 0x564   :  { %20571 = vmatpush3.msra.mxu0 %v24863_v56  ;;  %20508 = vmatprep.mubr.msk.f32.mxu0 %vm7470_vm3, %v17592_v48 }
 0x565   :  { %20572 = vmatprep.subr.mxu0 %v24870_v58 }
 0x566   :  { %20573 = vmatpush3.msra.mxu0 %v24870_v58 }
 0x567   :  { %20509 = vmatmul.mubr.msk.f32.gmra.mxu0 %vm7470_vm3, %v17593_v16  ;;  %20626 = vmatprep.subr.mxu0 %v24848_v2 }
 0x568   :  { %20511 = vmatprep.mubr.msk.f32.mxu0 %vm7470_vm3, %v17594_v1 }
 0x56b   :  { %20512 = vmatmul.mubr.msk.f32.gmra.mxu0 %vm7470_vm3, %v17595_v33 }
 0x56c   :  { %20514 = vmatprep.mubr.msk.f32.mxu0 %vm7470_vm3, %v17596_v42 }
 0x56f   :  { %20515 = vmatmul.mubr.msk.f32.gmra.mxu0 %vm7470_vm3, %v17597_v49 }
 0x570   :  { %20517 = vmatprep.mubr.msk.f32.mxu0 %vm7470_vm3, %v17598_v5 }
 0x573   :  { %20518 = vmatmul.mubr.msk.f32.gmra.mxu0 %vm7470_vm3, %v17599_v9 }
 0x574   :  { %20520 = vmatprep.mubr.msk.f32.mxu0 %vm7470_vm3, %v17600_v55 }
 0x577   :  { %20521 = vmatmul.mubr.msk.f32.gmra.mxu0 %vm7470_vm3, %v17601_v63 }
 0x578   :  { %20523 = vmatprep.mubr.msk.f32.mxu0 %vm7470_vm3, %v17602_v35 }
 0x57b   :  { %20524 = vmatmul.mubr.msk.f32.gmra.mxu0 %vm7470_vm3, %v17603_v21 }
 0x57c   :  { %20574 = vmatprep.mubr.msk.f32.mxu0 %vm7115_vm2, %v24925_v28 }
 0x57f   :  { %20575 = vmatmul.mubr.msk.f32.vlgmr.msra.gmra.mxu0 %vm7115_vm2, %v24933_v60 }
 0x580   :  { %20627 = vmatpush3.msra.mxu0 %v24848_v2  ;;  %20577 = vmatprep.mubr.msk.f32.mxu0 %vm7115_vm2, %v24938_v53 }
 0x581   :  { %20628 = vmatprep.subr.mxu0 %v24854_v18 }
 0x582   :  { %20629 = vmatpush3.msra.mxu0 %v24854_v18 }
 0x583   :  { %20630 = vmatprep.subr.mxu0 %v24863_v56  ;;  %20578 = vmatmul.mubr.msk.f32.gmra.mxu0 %vm7115_vm2, %v24948_v26 }
 0x584   :  { %20631 = vmatpush3.msra.mxu0 %v24863_v56  ;;  %20580 = vmatprep.mubr.msk.f32.mxu0 %vm7115_vm2, %v24954_v23 }
 0x585   :  { %20632 = vmatprep.subr.mxu0 %v24870_v58 }
 0x586   :  { %20633 = vmatpush3.msra.mxu0 %v24870_v58 }
 0x587   :  { %20646 = vmatprep.subr.mxu0 %v24564_v25  ;;  %20581 = vmatmul.mubr.msk.f32.gmra.mxu0 %vm7115_vm2, %v24966_v22 }
 0x588   :  { %20583 = vmatprep.mubr.msk.f32.mxu0 %vm7115_vm2, %v24972_v54 }
 0x58b   :  { %20584 = vmatmul.mubr.msk.f32.gmra.mxu0 %vm7115_vm2, %v24983_v36 }
 0x58c   :  { %20634 = vmatprep.mubr.msk.f32.mxu0 %vm7115_vm2, %v24988_v38 }
 0x58f   :  { %20635 = vmatmul.mubr.msk.f32.vlgmr.msra.gmra.mxu0 %vm7115_vm2, %v24997_v37 }
 0x590   :  { %20647 = vmatpush3.msra.mxu0 %v24564_v25  ;;  %20637 = vmatprep.mubr.msk.f32.mxu0 %vm7115_vm2, %v24680_v11  ;;  %v17660_v25 = vld [vmem:[%s27172_s5 + $0x200] sm:$0xff] }
 0x591   :  { %20648 = vmatprep.subr.mxu0 %v24570_v47  ;;  %20602 = vmatprep.mubr.msk.f32.mxu1 %vm7470_vm3, %v17660_v25 }
 0x592   :  { %20649 = vmatpush3.msra.mxu0 %v24570_v47  ;;  %v25040_v47 = vpop.f32.mrf.mxu1 }
 0x593   :  { %20650 = vmatprep.subr.mxu0 %v24579_v4  ;;  %20638 = vmatmul.mubr.msk.f32.gmra.mxu0 %vm7115_vm2, %v24688_v32 }
 0x594   :  { %20651 = vmatpush3.msra.mxu0 %v24579_v4  ;;  %20640 = vmatprep.mubr.msk.f32.mxu0 %vm7115_vm2, %v24695_v30  ;;  %v25042_v4 = vpop.f32.mrf.mxu1 }
 0x595   :  { %20652 = vmatprep.subr.mxu0 %v24586_v50 }
 0x596   :  { %20653 = vmatpush3.msra.mxu0 %v24586_v50  ;;  %v20539_v50 = vpop.f32.mrf.mxu1 }
 0x597   :  { %20641 = vmatmul.mubr.msk.f32.gmra.mxu0 %vm7115_vm2, %v24702_v24 }
 0x598   :  { %20643 = vmatprep.mubr.msk.f32.mxu0 %vm7115_vm2, %v24709_v44  ;;  %v10079_v31 = vpop.f32.mrf.mxu1 }
 0x59a   :  { %v20542_v45 = vpop.f32.mrf.mxu1 }
 0x59b   :  { %20644 = vmatmul.mubr.msk.f32.gmra.mxu0 %vm7115_vm2, %v24716_v6 }
 0x59c   :  { %20654 = vmatprep.mubr.msk.f32.mxu0 %vm7115_vm2, %v24723_v14  ;;  %v10089_v27 = vpop.f32.mrf.mxu1 }
 0x59e   :  { %v20545_v19 = vpop.f32.mrf.mxu1 }
 0x59f   :  { %20655 = vmatmul.mubr.msk.f32.vlgmr.msra.gmra.mxu0 %vm7115_vm2, %v24730_v40 }
 0x5a0   :  { %20657 = vmatprep.mubr.msk.f32.mxu0 %vm7115_vm2, %v24737_v43  ;;  %v10099_v7 = vpop.f32.mrf.mxu1 }
 0x5a2   :  { %v20556_v17 = vpop.f32.mrf.mxu1 }
 0x5a3   :  { %20658 = vmatmul.mubr.msk.f32.gmra.mxu0 %vm7115_vm2, %v24744_v12  ;;  %v27649_v12 = vld [vmem:[#allocation111_spill] sm:$0xff] }
 0x5a4   :  { %20660 = vmatprep.mubr.msk.f32.mxu0 %vm7115_vm2, %v24751_v20  ;;  %v10198_v33 = vpop.f32.mrf.mxu1 }
 0x5a6   :  { %v20559_v9 = vpop.f32.mrf.mxu1 }
 0x5a7   :  { %20661 = vmatmul.mubr.msk.f32.gmra.mxu0 %vm7115_vm2, %v24758_v51 }
 0x5a8   :  { %20663 = vmatprep.mubr.msk.f32.mxu0 %vm7115_vm2, %v24765_v29  ;;  %v10208_v21 = vpop.f32.mrf.mxu1 }
 0x5a9   :  { %v10209_v51 = vadd.f32 %v10208_v21, %v10079_v31 }
 0x5ab   :  { %20664 = vmatmul.mubr.msk.f32.gmra.mxu0 %vm7115_vm2, %v24772_v59  ;;  %v27648_v59 = vld [vmem:[#allocation82_spill] sm:$0xff] }
 0x61f   :  { %v20504_v57 = vpop.f32.mrf.mxu0 }
 0x620   :  { %v25045_v62 = vadd.f32 %v20504_v57, %v24781_v13 }
 0x621   :  { %v25047_v3 = vpop.f32.mrf.mxu0 }
 0x622   :  { %27626 = vst [vmem:[#allocation7_spill] sm:$0xff] %v25045_v62  ;;  %27627 = vst [vmem:[#allocation65_spill] sm:$0xff] %v25047_v3  ;;  %v27647_v62 = vld [vmem:[#allocation23_spill] sm:$0xff] }
 0x623   :  { %v20507_v8 = vpop.f32.mrf.mxu0  ;;  %v3423_v29 = vadd.f32 %v27648_v59, %v27647_v62  ;;  %v10199_v59 = vadd.f32 %v10198_v33, %v25042_v4  ;;  %v27660_v4 = vld [vmem:[#allocation86_spill] sm:$0xff] }
 0x624   :  { %v25050_v46 = vadd.f32 %v20507_v8, %v24786_v61  ;;  %v27634_v61 = vld [vmem:[#allocation68_spill] sm:$0xff]  ;;  %v27643_v8 = vld [vmem:[#allocation6_spill] sm:$0xff] }
 0x625   :  { %v25052_v39 = vpop.f32.mrf.mxu0 }
 0x626   :  { %27628 = vst [vmem:[#allocation12_spill] sm:$0xff] %v25050_v46  ;;  %27629 = vst [vmem:[#allocation66_spill] sm:$0xff] %v25052_v39 }
 0x627   :  { %v20510_v0 = vpop.f32.mrf.mxu0 }
 0x628   :  { %v25055_v10 = vadd.f32 %v20510_v0, %v24791_v15  ;;  %v27637_v15 = vld [vmem:[#allocation61_spill] sm:$0xff] }
 0x629   :  { %v25057_v41 = vpop.f32.mrf.mxu0 }
 0x62a   :  { %27630 = vst [vmem:[#allocation27_spill] sm:$0xff] %v25055_v10  ;;  %27631 = vst [vmem:[#allocation80_spill] sm:$0xff] %v25057_v41 }
 0x62b   :  { %v20513_v52 = vpop.f32.mrf.mxu0 }
 0x62c   :  { %v25060_v13 = vadd.f32 %v20513_v52, %v24796_v34  ;;  %v27640_v34 = vld [vmem:[#allocation64_spill] sm:$0xff]  ;;  %v20562_v52 = vpop.f32.mrf.mxu1 }
 0x62d   :  { %v25062_v48 = vpop.f32.mrf.mxu0 }
 0x62e   :  { %27632 = vst [vmem:[#allocation81_spill] sm:$0xff] %v25060_v13  ;;  %27633 = vst [vmem:[#allocation85_spill] sm:$0xff] %v25062_v48 }
 0x62f   :  { %v20516_v16 = vpop.f32.mrf.mxu0 }
 0x630   :  { %v25065_v1 = vadd.f32 %v20516_v16, %v27634_v61 }
 0x631   :  { %v25067_v42 = vpop.f32.mrf.mxu0 }
 0x632   :  { %27635 = vst [vmem:[#allocation84_spill] sm:$0xff] %v25065_v1  ;;  %27636 = vst [vmem:[#allocation76_spill] sm:$0xff] %v25067_v42 }
 0x633   :  { %v20519_v49 = vpop.f32.mrf.mxu0 }
 0x634   :  { %v25070_v5 = vadd.f32 %v20519_v49, %v27637_v15  ;;  %v10218_v49 = vpop.f32.mrf.mxu1 }
 0x635   :  { %v25072_v55 = vpop.f32.mrf.mxu0 }
 0x636   :  { %27638 = vst [vmem:[#allocation77_spill] sm:$0xff] %v25070_v5  ;;  %27639 = vst [vmem:[#allocation88_spill] sm:$0xff] %v25072_v55  ;;  %v20565_v48 = vpop.f32.mrf.mxu1 }
 0x637   :  { %v20522_v63 = vpop.f32.mrf.mxu0  ;;  %v10234_v55 = vadd.f32 %v20565_v48, %v20545_v19  ;;  %v27650_v19 = vld [vmem:[#allocation110_spill] sm:$0xff] }
 0x638   :  { %v25075_v35 = vadd.f32 %v20522_v63, %v27640_v34  ;;  %v10228_v3 = vpop.f32.mrf.mxu1  ;;  %v10224_v34 = vadd.f32 %v20562_v52, %v20542_v45  ;;  %v27662_v52 = vld [vmem:[#allocation124_spill] sm:$0xff] }
 0x639   :  { %v25077_v25 = vpop.f32.mrf.mxu0  ;;  %v10229_v5 = vadd.f32 %v10228_v3, %v10099_v7  ;;  %v10204_v3 = vadd.f32 %v20556_v17, %v25040_v47  ;;  %v27656_v47 = vld [vmem:[#allocation92_spill] sm:$0xff] }
 0x63a   :  { %27641 = vst [vmem:[#allocation10_spill] sm:$0xff] %v25075_v35  ;;  %27642 = vst [vmem:[#allocation90_spill] sm:$0xff] %v25077_v25  ;;  %v10219_v25 = vadd.f32 %v10218_v49, %v10089_v27  ;;  %v27663_v49 = vld [vmem:[#allocation91_spill] sm:$0xff] }
 0x63b   :  { %v20525_v57 = vpop.f32.mrf.mxu0 }
 0x63c   :  { %v25080_v0 = vadd.f32 %v20525_v57, %v27643_v8 }
 0x63d   :  { %v25082_v16 = vpop.f32.mrf.mxu0 }
 0x63e   :  { %27644 = vst [vmem:[#allocation72_spill] sm:$0xff] %v25080_v0  ;;  %27645 = vst [vmem:[#allocation73_spill] sm:$0xff] %v25082_v16  ;;  %v10214_v0 = vadd.f32 %v20559_v9, %v20539_v50  ;;  %v27646_v16 = vld [vmem:[#allocation107_spill] sm:$0xff]  ;;  %v27652_v9 = vld [vmem:[#allocation5_spill] sm:$0xff] }
 0x63f   :  { %v20576_v61 = vpop.f32.mrf.mxu0 }
 0x640   :  { %v10379_v31 = vadd.f32 %v20576_v61, %v10204_v3  ;;  %v17661_v3 = vld [vmem:[%s27172_s5 + $0x208] sm:$0xff] }
 0x641   :  { %v10339_v15 = vpop.f32.mrf.mxu0 }
 0x643   :  { %v20579_v42 = vpop.f32.mrf.mxu0 }
 0x644   :  { %v10381_v20 = vadd.f32 %v20579_v42, %v10214_v0 }
 0x645   :  { %v10349_v41 = vpop.f32.mrf.mxu0 }
 0x646   :  { %v10380_v27 = vadd.f32 %v10349_v41, %v10209_v51  ;;  %v27657_v41 = vld [vmem:[#allocation120_spill] sm:$0xff] }
 0x647   :  { %v20582_v39 = vpop.f32.mrf.mxu0 }
 0x648   :  { %v10383_v1 = vadd.f32 %v20582_v39, %v10224_v34  ;;  %v27651_v39 = vld [vmem:[#allocation115_spill] sm:$0xff] }
 0x649   :  { %v10359_v63 = vpop.f32.mrf.mxu0 }
 0x64a   :  { %v10382_v13 = vadd.f32 %v10359_v63, %v10219_v25  ;;  %v10439_v43 = vadd.f32 %v27649_v12, %v10383_v1  ;;  %v27655_v12 = vld [vmem:[#allocation117_spill] sm:$0xff]  ;;  %v27658_v1 = vld [vmem:[#allocation79_spill] sm:$0xff] }
 0x64b   :  { %v20585_v35 = vpop.f32.mrf.mxu0  ;;  %v10437_v62 = vadd.f32 %v27655_v12, %v10381_v20 }
 0x64c   :  { %v10385_v57 = vadd.f32 %v20585_v35, %v10234_v55  ;;  %v10438_v7 = vadd.f32 %v27651_v39, %v10382_v13  ;;  %v27653_v55 = vld [vmem:[#allocation30_spill] sm:$0xff]  ;;  %v27654_v35 = vld [vmem:[#allocation83_spill] sm:$0xff]  ;;  %v10436_v13 = vadd.f32 %v27657_v41, %v10380_v27  ;;  %v27667_v27 = vld [vmem:[#allocation89_spill] sm:$0xff] }
 0x64d   :  { %v10369_v8 = vpop.f32.mrf.mxu0  ;;  %v3540_v25 = vadd.f32 %v27654_v35, %v3423_v29  ;;  %v27659_v29 = vld [vmem:[#allocation121_spill] sm:$0xff]  ;;  %v10445_v0 = vmax.f32 %v10437_v62, 0.0  ;;  %v17670_v41 = vld [vmem:[%s27172_s5 + $0x250] sm:$0xff] }
 0x64e   :  { %v10441_v10 = vadd.f32 %v27646_v16, %v10385_v57  ;;  %v10384_v46 = vadd.f32 %v10369_v8, %v10229_v5  ;;  %v3413_v5 = vadd.f32 %v27653_v55, %v27652_v9  ;;  %v10446_v17 = vmax.f32 %v10438_v7, 0.0  ;;  %v27665_v57 = vld [vmem:[#allocation87_spill] sm:$0xff]  ;;  %v27668_v39 = vld [vmem:[#allocation129_spill] sm:$0xff]  ;;  %v27669_v55 = vld [vmem:[#allocation132_spill] sm:$0xff] }
 0x64f   :  { %v3651_v51 = vadd.f32 %v27656_v47, %v3540_v25  ;;  %v10435_v21 = vadd.f32 %v27659_v29, %v10379_v31  ;;  %v10444_v61 = vmax.f32 %v10436_v13, 0.0  ;;  %v3790_v7 = vadd.f32 %v27668_v39, %v27667_v27  ;;  %v17662_v9 = vld [vmem:[%s27172_s5 + $0x210] sm:$0xff]  ;;  %v17663_v25 = vld [vmem:[%s27172_s5 + $0x218] sm:$0xff]  ;;  %v17664_v31 = vld [vmem:[%s27172_s5 + $0x220] sm:$0xff] }
 0x650   :  { %v10449_v45 = vmax.f32 %v10441_v10, 0.0  ;;  %v10440_v48 = vadd.f32 %v27650_v19, %v10384_v46  ;;  %v10447_v10 = vmax.f32 %v10439_v43, 0.0  ;;  %v10378_v46 = vadd.f32 %v10339_v15, %v10199_v59  ;;  %v27661_v43 = vld [vmem:[#allocation93_spill] sm:$0xff]  ;;  %v17667_v47 = vld [vmem:[%s27172_s5 + $0x238] sm:$0xff] }
 0x651   :  { %v3538_v42 = vadd.f32 %v27658_v1, %v3413_v5  ;;  %v3763_v33 = vadd.f32 %v27661_v43, %v3651_v51  ;;  %v27664_v15 = vld [vmem:[#allocation125_spill] sm:$0xff]  ;;  %v10443_v34 = vmax.f32 %v10435_v21, 0.0  ;;  %v25127_v59 = vmax.f32 %v3790_v7, 0.0  ;;  %v17671_v13 = vld [vmem:[%s27172_s5 + $0x258] sm:$0xff] }
 0x652   :  { %20586 = vmatprep.subr.mxu1 %v10449_v45  ;;  %v10448_v50 = vmax.f32 %v10440_v48, 0.0  ;;  %v10434_v16 = vadd.f32 %v27662_v52, %v10378_v46  ;;  %v3792_v63 = vadd.f32 %v27664_v15, %v27663_v49  ;;  %v17665_v62 = vld [vmem:[%s27172_s5 + $0x228] sm:$0xff]  ;;  %v17668_v51 = vld [vmem:[%s27172_s5 + $0x240] sm:$0xff]  ;;  %v17675_v29 = vld [vmem:[%s27172_s5 + $0x278] sm:$0xff] }
 0x653   :  { %20587 = vmatpush3.msra.mxu1 %v10449_v45  ;;  %v3649_v20 = vadd.f32 %v27660_v4, %v3538_v42  ;;  %v27666_v45 = vld [vmem:[#allocation128_spill] sm:$0xff]  ;;  %v17669_v46 = vld [vmem:[%s27172_s5 + $0x248] sm:$0xff]  ;;  %v17674_v42 = vld [vmem:[%s27172_s5 + $0x270] sm:$0xff] }
 0x654   :  { %20588 = vmatprep.subr.mxu1 %v10448_v50  ;;  %v3791_v19 = vadd.f32 %v27666_v45, %v3763_v33  ;;  %v10442_v48 = vmax.f32 %v10434_v16, 0.0  ;;  %v17673_v1 = vld [vmem:[%s27172_s5 + $0x268] sm:$0xff]  ;;  %v27678_v52 = vld [vmem:[#allocation12_spill] sm:$0xff] }
 0x655   :  { %20589 = vmatpush3.msra.mxu1 %v10448_v50  ;;  %v3761_v8 = vadd.f32 %v27665_v57, %v3649_v20  ;;  %v25112_v50 = vmax.f32 %v3792_v63, 0.0  ;;  %v27680_v63 = vld [vmem:[#allocation27_spill] sm:$0xff]  ;;  %v27684_v7 = vld [vmem:[#allocation84_spill] sm:$0xff] }
 0x656   :  { %20590 = vmatprep.subr.mxu1 %v10447_v10  ;;  %v25118_v35 = vmax.f32 %v3791_v19, 0.0  ;;  %v27682_v19 = vld [vmem:[#allocation81_spill] sm:$0xff] }
 0x657   :  { %20591 = vmatpush3.msra.mxu1 %v10447_v10  ;;  %v3789_v5 = vadd.f32 %v27669_v55, %v3761_v8  ;;  %v17666_v10 = vld [vmem:[%s27172_s5 + $0x230] sm:$0xff] }
 0x658   :  { %20592 = vmatprep.subr.mxu1 %v10446_v17 }
 0x659   :  { %20593 = vmatpush3.msra.mxu1 %v10446_v17  ;;  %v25134_v12 = vmax.f32 %v3789_v5, 0.0  ;;  %v17672_v17 = vld [vmem:[%s27172_s5 + $0x260] sm:$0xff] }
 0x65a   :  { %20594 = vmatprep.subr.mxu1 %v10445_v0 }
 0x65b   :  { %20595 = vmatpush3.msra.mxu1 %v10445_v0  ;;  %v27676_v0 = vld [vmem:[#allocation7_spill] sm:$0xff] }
 0x65c   :  { %20596 = vmatprep.subr.mxu1 %v10444_v61 }
 0x65d   :  { %20597 = vmatpush3.msra.mxu1 %v10444_v61 }
 0x65e   :  { %20598 = vmatprep.subr.mxu1 %v10443_v34 }
 0x65f   :  { %20599 = vmatpush3.msra.mxu1 %v10443_v34 }
 0x660   :  { %20600 = vmatprep.subr.mxu1 %v10442_v48 }
 0x661   :  { %20601 = vmatpush3.msra.mxu1 %v10442_v48 }
 0x662   :  { %20603 = vmatmul.mubr.msk.f32.vlgmr.msra.gmra.mxu1 %vm7470_vm3, %v17661_v3  ;;  %20666 = vmatprep.subr.mxu1 %v25112_v50 }
 0x663   :  { %20667 = vmatpush3.msra.mxu1 %v25112_v50  ;;  %20605 = vmatprep.mubr.msk.f32.mxu1 %vm7470_vm3, %v17662_v9 }
 0x664   :  { %20668 = vmatprep.subr.mxu1 %v25118_v35 }
 0x665   :  { %20669 = vmatpush3.msra.mxu1 %v25118_v35 }
 0x666   :  { %20606 = vmatmul.mubr.msk.f32.gmra.mxu1 %vm7470_vm3, %v17663_v25  ;;  %20670 = vmatprep.subr.mxu1 %v25127_v59 }
 0x667   :  { %20671 = vmatpush3.msra.mxu1 %v25127_v59  ;;  %20608 = vmatprep.mubr.msk.f32.mxu1 %vm7470_vm3, %v17664_v31  ;;  %v27686_v31 = vld [vmem:[#allocation77_spill] sm:$0xff] }
 0x668   :  { %20672 = vmatprep.subr.mxu1 %v25134_v12 }
 0x669   :  { %20673 = vmatpush3.msra.mxu1 %v25134_v12 }
 0x66a   :  { %20609 = vmatmul.mubr.msk.f32.gmra.mxu1 %vm7470_vm3, %v17665_v62  ;;  %20726 = vmatprep.subr.mxu1 %v25112_v50 }
 0x66b   :  { %20611 = vmatprep.mubr.msk.f32.mxu1 %vm7470_vm3, %v17666_v10 }
 0x66e   :  { %20612 = vmatmul.mubr.msk.f32.gmra.mxu1 %vm7470_vm3, %v17667_v47 }
 0x66f   :  { %20614 = vmatprep.mubr.msk.f32.mxu1 %vm7470_vm3, %v17668_v51 }
 0x672   :  { %20615 = vmatmul.mubr.msk.f32.gmra.mxu1 %vm7470_vm3, %v17669_v46  ;;  %v27688_v46 = vld [vmem:[#allocation10_spill] sm:$0xff] }
 0x673   :  { %20617 = vmatprep.mubr.msk.f32.mxu1 %vm7470_vm3, %v17670_v41 }
 0x676   :  { %20618 = vmatmul.mubr.msk.f32.gmra.mxu1 %vm7470_vm3, %v17671_v13 }
 0x677   :  { %20620 = vmatprep.mubr.msk.f32.mxu1 %vm7470_vm3, %v17672_v17 }
 0x67a   :  { %20621 = vmatmul.mubr.msk.f32.gmra.mxu1 %vm7470_vm3, %v17673_v1 }
 0x67b   :  { %20623 = vmatprep.mubr.msk.f32.mxu1 %vm7470_vm3, %v17674_v42  ;;  %v27690_v42 = vld [vmem:[#allocation72_spill] sm:$0xff] }
 0x67e   :  { %20624 = vmatmul.mubr.msk.f32.gmra.mxu1 %vm7470_vm3, %v17675_v29 }
 0x67f   :  { %20674 = vmatprep.mubr.msk.f32.mxu1 %vm7115_vm2, %v24925_v28 }
 0x682   :  { %20675 = vmatmul.mubr.msk.f32.vlgmr.msra.gmra.mxu1 %vm7115_vm2, %v24933_v60 }
 0x683   :  { %20727 = vmatpush3.msra.mxu1 %v25112_v50  ;;  %20677 = vmatprep.mubr.msk.f32.mxu1 %vm7115_vm2, %v24938_v53 }
 0x684   :  { %20728 = vmatprep.subr.mxu1 %v25118_v35 }
 0x685   :  { %20729 = vmatpush3.msra.mxu1 %v25118_v35 }
 0x686   :  { %20730 = vmatprep.subr.mxu1 %v25127_v59  ;;  %20678 = vmatmul.mubr.msk.f32.gmra.mxu1 %vm7115_vm2, %v24948_v26 }
 0x687   :  { %20731 = vmatpush3.msra.mxu1 %v25127_v59  ;;  %20680 = vmatprep.mubr.msk.f32.mxu1 %vm7115_vm2, %v24954_v23 }
 0x688   :  { %20732 = vmatprep.subr.mxu1 %v25134_v12 }
 0x689   :  { %20733 = vmatpush3.msra.mxu1 %v25134_v12 }
 0x68a   :  { %20746 = vmatprep.subr.mxu1 %v24848_v2  ;;  %20681 = vmatmul.mubr.msk.f32.gmra.mxu1 %vm7115_vm2, %v24966_v22 }
 0x68b   :  { %20683 = vmatprep.mubr.msk.f32.mxu1 %vm7115_vm2, %v24972_v54 }
 0x68e   :  { %20684 = vmatmul.mubr.msk.f32.gmra.mxu1 %vm7115_vm2, %v24983_v36 }
 0x68f   :  { %20734 = vmatprep.mubr.msk.f32.mxu1 %vm7115_vm2, %v24988_v38 }
 0x692   :  { %20735 = vmatmul.mubr.msk.f32.vlgmr.msra.gmra.mxu1 %vm7115_vm2, %v24997_v37 }
 0x693   :  { %20747 = vmatpush3.msra.mxu1 %v24848_v2  ;;  %20737 = vmatprep.mubr.msk.f32.mxu1 %vm7115_vm2, %v24680_v11  ;;  %v27670_v11 = vld [vmem:[#allocation75_spill] sm:$0xff] }
 0x694   :  { %20748 = vmatprep.subr.mxu1 %v24854_v18 }
 0x695   :  { %20749 = vmatpush3.msra.mxu1 %v24854_v18 }
 0x696   :  { %20750 = vmatprep.subr.mxu1 %v24863_v56  ;;  %20738 = vmatmul.mubr.msk.f32.gmra.mxu1 %vm7115_vm2, %v24688_v32  ;;  %v27671_v32 = vld [vmem:[#allocation59_spill] sm:$0xff] }
 0x697   :  { %20751 = vmatpush3.msra.mxu1 %v24863_v56  ;;  %20740 = vmatprep.mubr.msk.f32.mxu1 %vm7115_vm2, %v24695_v30  ;;  %v27672_v30 = vld [vmem:[#allocation62_spill] sm:$0xff] }
 0x698   :  { %20752 = vmatprep.subr.mxu1 %v24870_v58 }
 0x699   :  { %20753 = vmatpush3.msra.mxu1 %v24870_v58 }
 0x69a   :  { %20741 = vmatmul.mubr.msk.f32.gmra.mxu1 %vm7115_vm2, %v24702_v24  ;;  %v27673_v24 = vld [vmem:[#allocation16_spill] sm:$0xff] }
 0x69b   :  { %20743 = vmatprep.mubr.msk.f32.mxu1 %vm7115_vm2, %v24709_v44  ;;  %v27674_v44 = vld [vmem:[#allocation78_spill] sm:$0xff] }
 0x69e   :  { %20744 = vmatmul.mubr.msk.f32.gmra.mxu1 %vm7115_vm2, %v24716_v6  ;;  %v27675_v6 = vld [vmem:[#allocation15_spill] sm:$0xff] }
 0x69f   :  { %20754 = vmatprep.mubr.msk.f32.mxu1 %vm7115_vm2, %v24723_v14  ;;  %v17732_v14 = vld [vmem:[%s27172_s5 + $0x280] sm:$0xff] }
 0x6a0   :  { %20702 = vmatprep.mubr.msk.f32.mxu0 %vm7470_vm3, %v17732_v14 }
 0x6a2   :  { %20755 = vmatmul.mubr.msk.f32.vlgmr.msra.gmra.mxu1 %vm7115_vm2, %v24730_v40  ;;  %v25254_v40 = vpop.f32.mrf.mxu0 }
 0x6a3   :  { %20757 = vmatprep.mubr.msk.f32.mxu1 %vm7115_vm2, %v27670_v11 }
 0x6a4   :  { %v25256_v2 = vpop.f32.mrf.mxu0 }
 0x6a6   :  { %20758 = vmatmul.mubr.msk.f32.gmra.mxu1 %vm7115_vm2, %v27671_v32  ;;  %v20639_v18 = vpop.f32.mrf.mxu0 }
 0x6a7   :  { %20760 = vmatprep.mubr.msk.f32.mxu1 %vm7115_vm2, %v27672_v30 }
 0x6a8   :  { %v10832_v56 = vpop.f32.mrf.mxu0 }
 0x6aa   :  { %20761 = vmatmul.mubr.msk.f32.gmra.mxu1 %vm7115_vm2, %v27673_v24  ;;  %v20642_v58 = vpop.f32.mrf.mxu0 }
 0x6ab   :  { %20763 = vmatprep.mubr.msk.f32.mxu1 %vm7115_vm2, %v27674_v44 }
 0x6ac   :  { %v10842_v43 = vpop.f32.mrf.mxu0 }
 0x6ae   :  { %20764 = vmatmul.mubr.msk.f32.gmra.mxu1 %vm7115_vm2, %v27675_v6  ;;  %v20645_v49 = vpop.f32.mrf.mxu0 }
 0x6b0   :  { %v10852_v8 = vpop.f32.mrf.mxu0 }
 0x6b2   :  { %v20656_v3 = vpop.f32.mrf.mxu0 }
 0x6b4   :  { %v10951_v55 = vpop.f32.mrf.mxu0 }
 0x6b6   :  { %v20659_v10 = vpop.f32.mrf.mxu0 }
 0x6b8   :  { %v10961_v13 = vpop.f32.mrf.mxu0 }
 0x6ba   :  { %v20662_v11 = vpop.f32.mrf.mxu0 }
 0x6bc   :  { %v10971_v24 = vpop.f32.mrf.mxu0 }
 0x6be   :  { %v20665_v14 = vpop.f32.mrf.mxu0 }
 0x722   :  { %v20604_v21 = vpop.f32.mrf.mxu1 }
 0x723   :  { %v25259_v4 = vadd.f32 %v20604_v21, %v27676_v0 }
 0x724   :  { %v25261_v20 = vpop.f32.mrf.mxu1 }
 0x725   :  { %27677 = vst [vmem:[#allocation94_spill] sm:$0xff] %v25261_v20 }
 0x726   :  { %v20607_v33 = vpop.f32.mrf.mxu1 }
 0x727   :  { %v25264_v16 = vadd.f32 %v20607_v33, %v27678_v52  ;;  %v10981_v33 = vpop.f32.mrf.mxu0 }
 0x728   :  { %v25266_v61 = vpop.f32.mrf.mxu1 }
 0x729   :  { %27679 = vst [vmem:[#allocation24_spill] sm:$0xff] %v25266_v61  ;;  %v27693_v61 = vld [vmem:[#allocation139_spill] sm:$0xff] }
 0x72a   :  { %v20610_v15 = vpop.f32.mrf.mxu1 }
 0x72b   :  { %v25269_v34 = vadd.f32 %v20610_v15, %v27680_v63  ;;  %v10977_v15 = vadd.f32 %v20662_v11, %v20642_v58  ;;  %v10987_v63 = vadd.f32 %v20665_v14, %v20645_v49  ;;  %v27695_v58 = vld [vmem:[#allocation100_spill] sm:$0xff]  ;;  %v27696_v49 = vld [vmem:[#allocation101_spill] sm:$0xff] }
 0x72c   :  { %v25271_v57 = vpop.f32.mrf.mxu1  ;;  %v4008_v11 = vadd.f32 %v27696_v49, %v27695_v58 }
 0x72d   :  { %27681 = vst [vmem:[#allocation17_spill] sm:$0xff] %v25271_v57 }
 0x72e   :  { %v20613_v45 = vpop.f32.mrf.mxu1 }
 0x72f   :  { %v25274_v48 = vadd.f32 %v20613_v45, %v27682_v19  ;;  %v10972_v19 = vadd.f32 %v10971_v24, %v10842_v43  ;;  %v10957_v43 = vadd.f32 %v20656_v3, %v25254_v40  ;;  %v27697_v24 = vld [vmem:[#allocation142_spill] sm:$0xff] }
 0x730   :  { %v25276_v27 = vpop.f32.mrf.mxu1 }
 0x731   :  { %27683 = vst [vmem:[#allocation95_spill] sm:$0xff] %v25276_v27  ;;  %v10962_v27 = vadd.f32 %v10961_v13, %v10832_v56  ;;  %v10952_v56 = vadd.f32 %v10951_v55, %v25256_v2  ;;  %v27705_v55 = vld [vmem:[#allocation147_spill] sm:$0xff] }
 0x732   :  { %v20616_v39 = vpop.f32.mrf.mxu1 }
 0x733   :  { %v25279_v9 = vadd.f32 %v20616_v39, %v27684_v7  ;;  %v10982_v39 = vadd.f32 %v10981_v33, %v10852_v8 }
 0x734   :  { %v25281_v5 = vpop.f32.mrf.mxu1 }
 0x735   :  { %27685 = vst [vmem:[#allocation8_spill] sm:$0xff] %v25281_v5 }
 0x736   :  { %v20619_v25 = vpop.f32.mrf.mxu1 }
 0x737   :  { %v25284_v62 = vadd.f32 %v20619_v25, %v27686_v31 }
 0x738   :  { %v25286_v47 = vpop.f32.mrf.mxu1 }
 0x739   :  { %27687 = vst [vmem:[#allocation98_spill] sm:$0xff] %v25286_v47 }
 0x73a   :  { %v20622_v51 = vpop.f32.mrf.mxu1 }
 0x73b   :  { %v25289_v41 = vadd.f32 %v20622_v51, %v27688_v46  ;;  %v10967_v51 = vadd.f32 %v20659_v10, %v20639_v18  ;;  %v27698_v10 = vld [vmem:[#allocation108_spill] sm:$0xff] }
 0x73c   :  { %v25291_v17 = vpop.f32.mrf.mxu1 }
 0x73d   :  { %27689 = vst [vmem:[#allocation13_spill] sm:$0xff] %v25291_v17  ;;  %v27694_v17 = vld [vmem:[#allocation138_spill] sm:$0xff] }
 0x73e   :  { %v20625_v1 = vpop.f32.mrf.mxu1 }
 0x73f   :  { %v25294_v29 = vadd.f32 %v20625_v1, %v27690_v42  ;;  %v27692_v1 = vld [vmem:[#allocation134_spill] sm:$0xff] }
 0x740   :  { %v25296_v32 = vpop.f32.mrf.mxu1 }
 0x741   :  { %27691 = vst [vmem:[#allocation11_spill] sm:$0xff] %v25296_v32 }
 0x742   :  { %v20676_v30 = vpop.f32.mrf.mxu1 }
 0x743   :  { %v11132_v13 = vadd.f32 %v20676_v30, %v10957_v43  ;;  %v17733_v43 = vld [vmem:[%s27172_s5 + $0x288] sm:$0xff] }
 0x744   :  { %v11092_v44 = vpop.f32.mrf.mxu1 }
 0x745   :  { %v11131_v3 = vadd.f32 %v11092_v44, %v10952_v56  ;;  %v11188_v30 = vadd.f32 %v27705_v55, %v11132_v13  ;;  %v25531_v55 = vld [vmem:[%s27170_s3 + $0x38] sm:$0xff] }
 0x746   :  { %v20679_v6 = vpop.f32.mrf.mxu1  ;;  %27720 = vst [vmem:[#allocation61_spill] sm:$0xff] %v25531_v55 }
 0x747   :  { %v11134_v57 = vadd.f32 %v20679_v6, %v10967_v51  ;;  %v27709_v51 = vld [vmem:[#allocation22_spill] sm:$0xff] }
 0x748   :  { %v11102_v21 = vpop.f32.mrf.mxu1 }
 0x749   :  { %v11133_v8 = vadd.f32 %v11102_v21, %v10962_v27  ;;  %v27702_v27 = vld [vmem:[#allocation145_spill] sm:$0xff] }
 0x74a   :  { %v20682_v0 = vpop.f32.mrf.mxu1 }
 0x74b   :  { %v11136_v7 = vadd.f32 %v20682_v0, %v10977_v15  ;;  %v4125_v0 = vadd.f32 %v27698_v10, %v4008_v11  ;;  %v11189_v21 = vadd.f32 %v27702_v27, %v11133_v8  ;;  %v27703_v15 = vld [vmem:[#allocation104_spill] sm:$0xff]  ;;  %v17734_v10 = vld [vmem:[%s27172_s5 + $0x290] sm:$0xff]  ;;  %v17741_v27 = vld [vmem:[%s27172_s5 + $0x2c8] sm:$0xff] }
 0x74c   :  { %v11112_v52 = vpop.f32.mrf.mxu1  ;;  %v27711_v8 = vld [vmem:[#allocation112_spill] sm:$0xff] }
 0x74d   :  { %v11135_v46 = vadd.f32 %v11112_v52, %v10972_v19  ;;  %v11192_v20 = vadd.f32 %v27693_v61, %v11136_v7  ;;  %v27699_v61 = vld [vmem:[#allocation143_spill] sm:$0xff]  ;;  %v27701_v52 = vld [vmem:[#allocation97_spill] sm:$0xff] }
 0x74e   :  { %v20685_v45 = vpop.f32.mrf.mxu1  ;;  %v11190_v6 = vadd.f32 %v27699_v61, %v11134_v57  ;;  %v27707_v7 = vld [vmem:[#allocation105_spill] sm:$0xff]  ;;  %v17735_v61 = vld [vmem:[%s27172_s5 + $0x298] sm:$0xff] }
 0x74f   :  { %v11138_v25 = vadd.f32 %v20685_v45, %v10987_v63  ;;  %v11191_v14 = vadd.f32 %v27697_v24, %v11135_v46  ;;  %v11200_v33 = vmax.f32 %v11192_v20, 0.0  ;;  %v27704_v63 = vld [vmem:[#allocation109_spill] sm:$0xff]  ;;  %v27706_v20 = vld [vmem:[#allocation118_spill] sm:$0xff]  ;;  %v27712_v24 = vld [vmem:[#allocation28_spill] sm:$0xff] }
 0x750   :  { %v11122_v31 = vpop.f32.mrf.mxu1  ;;  %v4236_v2 = vadd.f32 %v27704_v63, %v4125_v0  ;;  %v11198_v57 = vmax.f32 %v11190_v6, 0.0  ;;  %v17746_v63 = vld [vmem:[%s27172_s5 + $0x2f0] sm:$0xff] }
 0x751   :  { %v11194_v42 = vadd.f32 %v27692_v1, %v11138_v25  ;;  %v11137_v5 = vadd.f32 %v11122_v31, %v10982_v39  ;;  %v11197_v39 = vmax.f32 %v11189_v21, 0.0  ;;  %v27708_v31 = vld [vmem:[#allocation116_spill] sm:$0xff]  ;;  %v11196_v1 = vmax.f32 %v11188_v30, 0.0  ;;  %v17742_v21 = vld [vmem:[%s27172_s5 + $0x2d0] sm:$0xff] }
 0x752   :  { %v4348_v45 = vadd.f32 %v27706_v20, %v4236_v2  ;;  %v4377_v46 = vadd.f32 %v27709_v51, %v27708_v31  ;;  %v17747_v2 = vld [vmem:[%s27172_s5 + $0x2f8] sm:$0xff]  ;;  %v25535_v30 = vpop.f32.mrf.mxu1 }
 0x753   :  { %v11202_v32 = vmax.f32 %v11194_v42, 0.0  ;;  %v11193_v47 = vadd.f32 %v27694_v17, %v11137_v5  ;;  %v11150_v5 = vpop.permute.xlu1 %11149  ;;  %v27700_v17 = vld [vmem:[#allocation96_spill] sm:$0xff]  ;;  %v27710_v42 = vld [vmem:[#allocation113_spill] sm:$0xff] }
 0x754   :  { %v3998_v40 = vadd.f32 %v27701_v52, %v27700_v17  ;;  %v11187_v19 = vadd.f32 %v11150_v5, %v11131_v3  ;;  %v17737_v17 = vld [vmem:[%s27172_s5 + $0x2a8] sm:$0xff]  ;;  %v17738_v52 = vld [vmem:[%s27172_s5 + $0x2b0] sm:$0xff]  ;;  %v17740_v3 = vld [vmem:[%s27172_s5 + $0x2c0] sm:$0xff] }
 0x755   :  { %20686 = vmatprep.subr.mxu0 %v11202_v32  ;;  %v11201_v18 = vmax.f32 %v11193_v47, 0.0  ;;  %v11199_v47 = vmax.f32 %v11191_v14, 0.0  ;;  %v4375_v14 = vadd.f32 %v27712_v24, %v27711_v8 }
 0x756   :  { %20687 = vmatpush3.msra.mxu0 %v11202_v32  ;;  %v4123_v32 = vadd.f32 %v27703_v15, %v3998_v40  ;;  %v11195_v11 = vmax.f32 %v11187_v19, 0.0  ;;  %v17739_v40 = vld [vmem:[%s27172_s5 + $0x2b8] sm:$0xff]  ;;  %v17744_v15 = vld [vmem:[%s27172_s5 + $0x2e0] sm:$0xff] }
 0x757   :  { %20688 = vmatprep.subr.mxu0 %v11201_v18  ;;  %v4367_v44 = vpop.permute.xlu1 %4366  ;;  %v25338_v6 = vmax.f32 %v4375_v14, 0.0 }
 0x758   :  { %20689 = vmatpush3.msra.mxu0 %v11201_v18  ;;  %v4234_v25 = vadd.f32 %v27707_v7, %v4123_v32  ;;  %v4376_v49 = vadd.f32 %v4367_v44, %v4348_v45  ;;  %v25324_v18 = vmax.f32 %v4377_v46, 0.0  ;;  %v17745_v32 = vld [vmem:[%s27172_s5 + $0x2e8] sm:$0xff] }
 0x759   :  { %20690 = vmatprep.subr.mxu0 %v11200_v33 }
 0x75a   :  { %20691 = vmatpush3.msra.mxu0 %v11200_v33  ;;  %v4346_v58 = vadd.f32 %v27710_v42, %v4234_v25  ;;  %v25329_v13 = vmax.f32 %v4376_v49, 0.0  ;;  %v17736_v33 = vld [vmem:[%s27172_s5 + $0x2a0] sm:$0xff] }
 0x75b   :  { %20692 = vmatprep.subr.mxu0 %v11199_v47  ;;  %v4357_v0 = vpop.permute.xlu1 %4356 }
 0x75c   :  { %20693 = vmatpush3.msra.mxu0 %v11199_v47  ;;  %v4374_v56 = vadd.f32 %v4357_v0, %v4346_v58  ;;  %v17743_v47 = vld [vmem:[%s27172_s5 + $0x2d8] sm:$0xff] }
 0x75d   :  { %20694 = vmatprep.subr.mxu0 %v11198_v57 }
 0x75e   :  { %20695 = vmatpush3.msra.mxu0 %v11198_v57  ;;  %v25345_v5 = vmax.f32 %v4374_v56, 0.0  ;;  %v25537_v57 = vpop.f32.mrf.mxu1 }
 0x75f   :  { %20696 = vmatprep.subr.mxu0 %v11197_v39 }
 0x760   :  { %20697 = vmatpush3.msra.mxu0 %v11197_v39  ;;  %v20739_v20 = vpop.f32.mrf.mxu1 }
 0x761   :  { %20698 = vmatprep.subr.mxu0 %v11196_v1 }
 0x762   :  { %20699 = vmatpush3.msra.mxu0 %v11196_v1  ;;  %v11585_v45 = vpop.f32.mrf.mxu1 }
 0x763   :  { %20700 = vmatprep.subr.mxu0 %v11195_v11 }
 0x764   :  { %20701 = vmatpush3.msra.mxu0 %v11195_v11  ;;  %v20742_v19 = vpop.f32.mrf.mxu1 }
 0x765   :  { %20703 = vmatmul.mubr.msk.f32.vlgmr.msra.gmra.mxu0 %vm7470_vm3, %v17733_v43  ;;  %20766 = vmatprep.subr.mxu0 %v25324_v18 }
 0x766   :  { %20767 = vmatpush3.msra.mxu0 %v25324_v18  ;;  %20705 = vmatprep.mubr.msk.f32.mxu0 %vm7470_vm3, %v17734_v10  ;;  %v11595_v25 = vpop.f32.mrf.mxu1 }
 0x767   :  { %20768 = vmatprep.subr.mxu0 %v25329_v13 }
 0x768   :  { %20769 = vmatpush3.msra.mxu0 %v25329_v13  ;;  %v20745_v1 = vpop.f32.mrf.mxu1 }
 0x769   :  { %20706 = vmatmul.mubr.msk.f32.gmra.mxu0 %vm7470_vm3, %v17735_v61  ;;  %20770 = vmatprep.subr.mxu0 %v25338_v6 }
 0x76a   :  { %20771 = vmatpush3.msra.mxu0 %v25338_v6  ;;  %20708 = vmatprep.mubr.msk.f32.mxu0 %vm7470_vm3, %v17736_v33  ;;  %v11605_v11 = vpop.f32.mrf.mxu1 }
 0x76b   :  { %20772 = vmatprep.subr.mxu0 %v25345_v5 }
 0x76c   :  { %20773 = vmatpush3.msra.mxu0 %v25345_v5  ;;  %v20756_v8 = vpop.f32.mrf.mxu1 }
 0x76d   :  { %20709 = vmatmul.mubr.msk.f32.gmra.mxu0 %vm7470_vm3, %v17737_v17  ;;  %20826 = vmatprep.subr.mxu0 %v25324_v18 }
 0x76e   :  { %20711 = vmatprep.mubr.msk.f32.mxu0 %vm7470_vm3, %v17738_v52  ;;  %v11704_v10 = vpop.f32.mrf.mxu1 }
 0x770   :  { %v20759_v61 = vpop.f32.mrf.mxu1 }
 0x771   :  { %20712 = vmatmul.mubr.msk.f32.gmra.mxu0 %vm7470_vm3, %v17739_v40 }
 0x772   :  { %20714 = vmatprep.mubr.msk.f32.mxu0 %vm7470_vm3, %v17740_v3  ;;  %v11714_v52 = vpop.f32.mrf.mxu1 }
 0x775   :  { %20715 = vmatmul.mubr.msk.f32.gmra.mxu0 %vm7470_vm3, %v17741_v27  ;;  %v20762_v27 = vpop.f32.mrf.mxu1 }
 0x776   :  { %20717 = vmatprep.mubr.msk.f32.mxu0 %vm7470_vm3, %v17742_v21 }
 0x779   :  { %20718 = vmatmul.mubr.msk.f32.gmra.mxu0 %vm7470_vm3, %v17743_v47 }
 0x77a   :  { %20720 = vmatprep.mubr.msk.f32.mxu0 %vm7470_vm3, %v17744_v15 }
 0x77d   :  { %20721 = vmatmul.mubr.msk.f32.gmra.mxu0 %vm7470_vm3, %v17745_v32  ;;  %v11933_v32 = vpop.permute.xlu1 %11932 }
 0x77e   :  { %20723 = vmatprep.mubr.msk.f32.mxu0 %vm7470_vm3, %v17746_v63 }
 0x781   :  { %20724 = vmatmul.mubr.msk.f32.gmra.mxu0 %vm7470_vm3, %v17747_v2 }
 0x782   :  { %20774 = vmatprep.mubr.msk.f32.mxu0 %vm7115_vm2, %v24925_v28  ;;  %v17804_v28 = vld [vmem:[%s27172_s5 + $0x300] sm:$0xff] }
 0x783   :  { %20802 = vmatprep.mubr.msk.f32.mxu1 %vm7470_vm3, %v17804_v28 }
 0x785   :  { %20775 = vmatmul.mubr.msk.f32.vlgmr.msra.gmra.mxu0 %vm7115_vm2, %v24933_v60  ;;  %v25439_v60 = vld [vmem:[%s27170_s3 + $0x50] sm:$0xff] }
 0x786   :  { %20827 = vmatpush3.msra.mxu0 %v25324_v18  ;;  %20777 = vmatprep.mubr.msk.f32.mxu0 %vm7115_vm2, %v24938_v53  ;;  %v25447_v53 = vld [vmem:[%s27170_s3 + $0x58] sm:$0xff] }
 0x787   :  { %20828 = vmatprep.subr.mxu0 %v25329_v13 }
 0x788   :  { %20829 = vmatpush3.msra.mxu0 %v25329_v13 }
 0x789   :  { %20830 = vmatprep.subr.mxu0 %v25338_v6  ;;  %20778 = vmatmul.mubr.msk.f32.gmra.mxu0 %vm7115_vm2, %v24948_v26  ;;  %v25454_v26 = vld [vmem:[%s27170_s3 + $0x60] sm:$0xff] }
 0x78a   :  { %20831 = vmatpush3.msra.mxu0 %v25338_v6  ;;  %20780 = vmatprep.mubr.msk.f32.mxu0 %vm7115_vm2, %v24954_v23  ;;  %v25461_v23 = vld [vmem:[%s27170_s3 + $0x68] sm:$0xff] }
 0x78b   :  { %20832 = vmatprep.subr.mxu0 %v25345_v5 }
 0x78c   :  { %20833 = vmatpush3.msra.mxu0 %v25345_v5 }
 0x78d   :  { %20846 = vmatprep.subr.mxu0 %v25112_v50  ;;  %20781 = vmatmul.mubr.msk.f32.gmra.mxu0 %vm7115_vm2, %v24966_v22  ;;  %v25468_v22 = vld [vmem:[%s27170_s3 + $0x70] sm:$0xff] }
 0x78e   :  { %20783 = vmatprep.mubr.msk.f32.mxu0 %vm7115_vm2, %v24972_v54  ;;  %v25475_v54 = vld [vmem:[%s27170_s3 + $0x78] sm:$0xff] }
 0x791   :  { %20784 = vmatmul.mubr.msk.f32.gmra.mxu0 %vm7115_vm2, %v24983_v36  ;;  %v25482_v36 = vld [vmem:[%s27170_s3] sm:$0xff] }
 0x792   :  { %20834 = vmatprep.mubr.msk.f32.mxu0 %vm7115_vm2, %v24988_v38  ;;  %27713 = vst [vmem:[#allocation99_spill] sm:$0xff] %v25482_v36  ;;  %v25489_v38 = vld [vmem:[%s27170_s3 + $0x8] sm:$0xff] }
 0x793   :  { %27714 = vst [vmem:[#allocation19_spill] sm:$0xff] %v25489_v38 }
 0x795   :  { %20835 = vmatmul.mubr.msk.f32.vlgmr.msra.gmra.mxu0 %vm7115_vm2, %v24997_v37  ;;  %v25496_v37 = vld [vmem:[%s27170_s3 + $0x10] sm:$0xff] }
 0x796   :  { %20847 = vmatpush3.msra.mxu0 %v25112_v50  ;;  %20837 = vmatprep.mubr.msk.f32.mxu0 %vm7115_vm2, %v25439_v60  ;;  %27715 = vst [vmem:[#allocation102_spill] sm:$0xff] %v25496_v37  ;;  %v25503_v50 = vld [vmem:[%s27170_s3 + $0x18] sm:$0xff] }
 0x797   :  { %20848 = vmatprep.subr.mxu0 %v25118_v35  ;;  %27716 = vst [vmem:[#allocation14_spill] sm:$0xff] %v25503_v50 }
 0x798   :  { %20849 = vmatpush3.msra.mxu0 %v25118_v35  ;;  %v25510_v35 = vld [vmem:[%s27170_s3 + $0x20] sm:$0xff] }
 0x799   :  { %20850 = vmatprep.subr.mxu0 %v25127_v59  ;;  %20838 = vmatmul.mubr.msk.f32.gmra.mxu0 %vm7115_vm2, %v25447_v53  ;;  %27717 = vst [vmem:[#allocation103_spill] sm:$0xff] %v25510_v35 }
 0x79a   :  { %20851 = vmatpush3.msra.mxu0 %v25127_v59  ;;  %20840 = vmatprep.mubr.msk.f32.mxu0 %vm7115_vm2, %v25454_v26  ;;  %v25517_v59 = vld [vmem:[%s27170_s3 + $0x28] sm:$0xff] }
 0x79b   :  { %20852 = vmatprep.subr.mxu0 %v25134_v12  ;;  %27718 = vst [vmem:[#allocation106_spill] sm:$0xff] %v25517_v59 }
 0x79c   :  { %20853 = vmatpush3.msra.mxu0 %v25134_v12  ;;  %v25524_v12 = vld [vmem:[%s27170_s3 + $0x30] sm:$0xff] }
 0x79d   :  { %20841 = vmatmul.mubr.msk.f32.gmra.mxu0 %vm7115_vm2, %v25461_v23  ;;  %27719 = vst [vmem:[#allocation68_spill] sm:$0xff] %v25524_v12 }
 0x79e   :  { %20843 = vmatprep.mubr.msk.f32.mxu0 %vm7115_vm2, %v25468_v22 }
 0x7a1   :  { %20844 = vmatmul.mubr.msk.f32.gmra.mxu0 %vm7115_vm2, %v25475_v54 }
 0x7a2   :  { %20854 = vmatprep.mubr.msk.f32.mxu0 %vm7115_vm2, %v25482_v36 }
 0x7a5   :  { %20855 = vmatmul.mubr.msk.f32.vlgmr.msra.gmra.mxu0 %vm7115_vm2, %v25489_v38 }
 0x7a6   :  { %20857 = vmatprep.mubr.msk.f32.mxu0 %vm7115_vm2, %v25496_v37 }
 0x7a9   :  { %20858 = vmatmul.mubr.msk.f32.gmra.mxu0 %vm7115_vm2, %v25503_v50 }
 0x7aa   :  { %20860 = vmatprep.mubr.msk.f32.mxu0 %vm7115_vm2, %v25510_v35 }
 0x7ad   :  { %20861 = vmatmul.mubr.msk.f32.gmra.mxu0 %vm7115_vm2, %v25517_v59 }
 0x7ae   :  { %20863 = vmatprep.mubr.msk.f32.mxu0 %vm7115_vm2, %v25524_v12 }
 0x7b1   :  { %20864 = vmatmul.mubr.msk.f32.gmra.mxu0 %vm7115_vm2, %v25531_v55 }
 0x825   :  { %v20704_v39 = vpop.f32.mrf.mxu0 }
 0x826   :  { %v25540_v44 = vadd.f32 %v20704_v39, %v25259_v4 }
 0x827   :  { %v25542_v7 = vpop.f32.mrf.mxu0 }
 0x828   :  { %27721 = vst [vmem:[#allocation64_spill] sm:$0xff] %v25542_v7  ;;  %v27735_v7 = vld [vmem:[#allocation39_spill] sm:$0xff] }
 0x829   :  { %v20707_v31 = vpop.f32.mrf.mxu0 }
 0x82a   :  { %v25545_v51 = vadd.f32 %v20707_v31, %v25264_v16 }
 0x82b   :  { %v25547_v46 = vpop.f32.mrf.mxu0 }
 0x82c   :  { %27722 = vst [vmem:[#allocation6_spill] sm:$0xff] %v25547_v46 }
 0x82d   :  { %v20710_v42 = vpop.f32.mrf.mxu0 }
 0x82e   :  { %v25550_v58 = vadd.f32 %v20710_v42, %v25269_v34 }
 0x82f   :  { %v25552_v49 = vpop.f32.mrf.mxu0 }
 0x830   :  { %27723 = vst [vmem:[#allocation107_spill] sm:$0xff] %v25550_v58  ;;  %27724 = vst [vmem:[#allocation23_spill] sm:$0xff] %v25552_v49  ;;  %v11720_v49 = vadd.f32 %v20759_v61, %v20739_v20  ;;  %v27738_v58 = vld [vmem:[#allocation38_spill] sm:$0xff] }
 0x831   :  { %v20713_v43 = vpop.f32.mrf.mxu0  ;;  %v27739_v61 = vld [vmem:[#allocation114_spill] sm:$0xff] }
 0x832   :  { %v25555_v4 = vadd.f32 %v20713_v43, %v25274_v48  ;;  %v11730_v43 = vadd.f32 %v20762_v27, %v20742_v19 }
 0x833   :  { %v25557_v24 = vpop.f32.mrf.mxu0 }
 0x834   :  { %27725 = vst [vmem:[#allocation82_spill] sm:$0xff] %v25555_v4  ;;  %27726 = vst [vmem:[#allocation111_spill] sm:$0xff] %v25557_v24 }
 0x835   :  { %v20716_v14 = vpop.f32.mrf.mxu0 }
 0x836   :  { %v25560_v16 = vadd.f32 %v20716_v14, %v25279_v9 }
 0x837   :  { %v25562_v0 = vpop.f32.mrf.mxu0 }
 0x838   :  { %27727 = vst [vmem:[#allocation110_spill] sm:$0xff] %v25560_v16  ;;  %27728 = vst [vmem:[#allocation115_spill] sm:$0xff] %v25562_v0  ;;  %v11715_v16 = vadd.f32 %v11714_v52, %v11585_v45 }
 0x839   :  { %v20719_v56 = vpop.f32.mrf.mxu0 }
 0x83a   :  { %v25565_v34 = vadd.f32 %v20719_v56, %v25284_v62  ;;  %v11724_v62 = vpop.f32.mrf.mxu1 }
 0x83b   :  { %v25567_v33 = vpop.f32.mrf.mxu0 }
 0x83c   :  { %27729 = vst [vmem:[#allocation5_spill] sm:$0xff] %v25565_v34  ;;  %27730 = vst [vmem:[#allocation30_spill] sm:$0xff] %v25567_v33  ;;  %v20765_v2 = vpop.f32.mrf.mxu1 }
 0x83d   :  { %v20722_v17 = vpop.f32.mrf.mxu0  ;;  %v11740_v14 = vadd.f32 %v20765_v2, %v20745_v1  ;;  %v27740_v2 = vld [vmem:[#allocation122_spill] sm:$0xff] }
 0x83e   :  { %v25570_v48 = vadd.f32 %v20722_v17, %v25289_v41  ;;  %v11923_v41 = vpop.permute.xlu1 %11922  ;;  %v11734_v31 = vpop.f32.mrf.mxu1  ;;  %v11725_v17 = vadd.f32 %v11724_v62, %v11595_v25  ;;  %v11710_v25 = vadd.f32 %v20756_v8, %v25535_v30  ;;  %v27743_v30 = vld [vmem:[#allocation136_spill] sm:$0xff] }
 0x83f   :  { %v25572_v40 = vpop.f32.mrf.mxu0 }
 0x840   :  { %27731 = vst [vmem:[#allocation83_spill] sm:$0xff] %v25570_v48  ;;  %27732 = vst [vmem:[#allocation117_spill] sm:$0xff] %v25572_v40  ;;  %v27737_v48 = vld [vmem:[#allocation126_spill] sm:$0xff] }
 0x841   :  { %v20725_v3 = vpop.f32.mrf.mxu0 }
 0x842   :  { %v25575_v9 = vadd.f32 %v20725_v3, %v25294_v29  ;;  %v11735_v29 = vadd.f32 %v11734_v31, %v11605_v11  ;;  %v11913_v33 = vpop.permute.xlu1 %11912 }
 0x843   :  { %v25577_v21 = vpop.f32.mrf.mxu0 }
 0x844   :  { %27733 = vst [vmem:[#allocation92_spill] sm:$0xff] %v25575_v9  ;;  %27734 = vst [vmem:[#allocation120_spill] sm:$0xff] %v25577_v21  ;;  %v27736_v9 = vld [vmem:[#allocation119_spill] sm:$0xff] }
 0x845   :  { %v20776_v47 = vpop.f32.mrf.mxu0  ;;  %v4593_v34 = vadd.f32 %v27737_v48, %v27736_v9  ;;  %v11705_v48 = vadd.f32 %v11704_v10, %v25537_v57  ;;  %v27746_v57 = vld [vmem:[#allocation130_spill] sm:$0xff]  ;;  %v27747_v10 = vld [vmem:[#allocation137_spill] sm:$0xff] }
 0x846   :  { %v11885_v45 = vadd.f32 %v20776_v47, %v11710_v25 }
 0x847   :  { %v11845_v15 = vpop.f32.mrf.mxu0 }
 0x849   :  { %v20779_v63 = vpop.f32.mrf.mxu0 }
 0x84a   :  { %v11887_v4 = vadd.f32 %v20779_v63, %v11720_v49  ;;  %v27742_v49 = vld [vmem:[#allocation42_spill] sm:$0xff] }
 0x84b   :  { %v11855_v28 = vpop.f32.mrf.mxu0 }
 0x84c   :  { %v11886_v11 = vadd.f32 %v11855_v28, %v11715_v16  ;;  %v11943_v52 = vadd.f32 %v27742_v49, %v11887_v4  ;;  %v17811_v49 = vld [vmem:[%s27172_s5 + $0x338] sm:$0xff] }
 0x84d   :  { %v20782_v39 = vpop.f32.mrf.mxu0 }
 0x84e   :  { %v11889_v3 = vadd.f32 %v20782_v39, %v11730_v43  ;;  %v11942_v16 = vadd.f32 %v11913_v33, %v11886_v11  ;;  %v11951_v28 = vmax.f32 %v11943_v52, 0.0  ;;  %v27748_v33 = vld [vmem:[#allocation135_spill] sm:$0xff]  ;;  %v17812_v52 = vld [vmem:[%s27172_s5 + $0x340] sm:$0xff] }
 0x84f   :  { %v11865_v42 = vpop.f32.mrf.mxu0  ;;  %v17806_v11 = vld [vmem:[%s27172_s5 + $0x310] sm:$0xff] }
 0x850   :  { %v11888_v46 = vadd.f32 %v11865_v42, %v11725_v17  ;;  %v11945_v19 = vadd.f32 %v27738_v58, %v11889_v3  ;;  %v17805_v3 = vld [vmem:[%s27172_s5 + $0x308] sm:$0xff] }
 0x851   :  { %v20785_v56 = vpop.f32.mrf.mxu0 }
 0x852   :  { %v11891_v0 = vadd.f32 %v20785_v56, %v11740_v14  ;;  %v11944_v62 = vadd.f32 %v11923_v41, %v11888_v46  ;;  %v11953_v58 = vmax.f32 %v11945_v19, 0.0  ;;  %v11884_v46 = vadd.f32 %v11845_v15, %v11705_v48  ;;  %v27749_v15 = vld [vmem:[#allocation47_spill] sm:$0xff]  ;;  %v27751_v19 = vld [vmem:[#allocation133_spill] sm:$0xff] }
 0x853   :  { %v11875_v24 = vpop.f32.mrf.mxu0  ;;  %v11950_v41 = vmax.f32 %v11942_v16, 0.0  ;;  %v4962_v42 = vadd.f32 %v27749_v15, %v27748_v33  ;;  %v27750_v14 = vld [vmem:[#allocation131_spill] sm:$0xff]  ;;  %v17809_v48 = vld [vmem:[%s27172_s5 + $0x328] sm:$0xff] }
 0x854   :  { %v11947_v21 = vadd.f32 %v27735_v7, %v11891_v0  ;;  %v11890_v40 = vadd.f32 %v11875_v24, %v11735_v29  ;;  %v4583_v7 = vadd.f32 %v27740_v2, %v27739_v61  ;;  %v27741_v24 = vld [vmem:[#allocation127_spill] sm:$0xff]  ;;  %v11952_v9 = vmax.f32 %v11944_v62, 0.0 }
 0x855   :  { %v4710_v0 = vadd.f32 %v27741_v24, %v4593_v34  ;;  %v27745_v34 = vld [vmem:[#allocation43_spill] sm:$0xff]  ;;  %v25602_v25 = vmax.f32 %v4962_v42, 0.0  ;;  %v17808_v24 = vld [vmem:[%s27172_s5 + $0x320] sm:$0xff] }
 0x856   :  { %v11955_v1 = vmax.f32 %v11947_v21, 0.0  ;;  %v11946_v27 = vadd.f32 %v11933_v32, %v11890_v40  ;;  %v11903_v40 = vpop.permute.xlu1 %11902  ;;  %v27744_v21 = vld [vmem:[#allocation123_spill] sm:$0xff]  ;;  %v11941_v63 = vadd.f32 %v27745_v34, %v11885_v45 }
 0x857   :  { %v4821_v8 = vadd.f32 %v27743_v30, %v4710_v0  ;;  %v4708_v32 = vadd.f32 %v27744_v21, %v4583_v7  ;;  %v11940_v39 = vadd.f32 %v11903_v40, %v11884_v46  ;;  %v17807_v2 = vld [vmem:[%s27172_s5 + $0x318] sm:$0xff]  ;;  %v17810_v45 = vld [vmem:[%s27172_s5 + $0x330] sm:$0xff]  ;;  %v17817_v46 = vld [vmem:[%s27172_s5 + $0x368] sm:$0xff] }
 0x858   :  { %20786 = vmatprep.subr.mxu1 %v11955_v1  ;;  %v11954_v20 = vmax.f32 %v11946_v27, 0.0  ;;  %v11949_v43 = vmax.f32 %v11941_v63, 0.0  ;;  %v17814_v40 = vld [vmem:[%s27172_s5 + $0x350] sm:$0xff]  ;;  %v17815_v30 = vld [vmem:[%s27172_s5 + $0x358] sm:$0xff]  ;;  %v25678_v21 = vld [vmem:[%s27170_s3 + $0x80] sm:$0xff] }
 0x859   :  { %20787 = vmatpush3.msra.mxu1 %v11955_v1  ;;  %v4819_v4 = vadd.f32 %v27746_v57, %v4708_v32  ;;  %v4933_v47 = vadd.f32 %v27747_v10, %v4821_v8  ;;  %v11948_v29 = vmax.f32 %v11940_v39, 0.0  ;;  %v27752_v1 = vld [vmem:[#allocation50_spill] sm:$0xff]  ;;  %v17816_v8 = vld [vmem:[%s27172_s5 + $0x360] sm:$0xff]  ;;  %v25701_v63 = vld [vmem:[%s27170_s3 + $0x98] sm:$0xff] }
 0x85a   :  { %20788 = vmatprep.subr.mxu1 %v11954_v20  ;;  %v4952_v31 = vpop.permute.xlu1 %4951  ;;  %v4960_v27 = vadd.f32 %v27752_v1, %v27751_v19  ;;  %v17818_v16 = vld [vmem:[%s27172_s5 + $0x370] sm:$0xff]  ;;  %v25686_v32 = vld [vmem:[%s27170_s3 + $0x88] sm:$0xff]  ;;  %v25736_v10 = vld [vmem:[%s27170_s3 + $0xb8] sm:$0xff] }
 0x85b   :  { %20789 = vmatpush3.msra.mxu1 %v11954_v20  ;;  %v4931_v56 = vadd.f32 %v27750_v14, %v4819_v4  ;;  %v4961_v17 = vadd.f32 %v4952_v31, %v4933_v47  ;;  %v25691_v34 = vld [vmem:[%s27170_s3 + $0x90] sm:$0xff]  ;;  %v25719_v57 = vld [vmem:[%s27170_s3 + $0xa8] sm:$0xff]  ;;  %v25741_v47 = vld [vmem:[%s27170_s3 + $0x40] sm:$0xff] }
 0x85c   :  { %20790 = vmatprep.subr.mxu1 %v11953_v58  ;;  %v25616_v7 = vmax.f32 %v4960_v27, 0.0  ;;  %v25725_v4 = vld [vmem:[%s27170_s3 + $0xb0] sm:$0xff]  ;;  %v25750_v39 = vld [vmem:[%s27170_s3 + $0x48] sm:$0xff] }
 0x85d   :  { %20791 = vmatpush3.msra.mxu1 %v11953_v58  ;;  %v25607_v61 = vmax.f32 %v4961_v17, 0.0  ;;  %v17813_v58 = vld [vmem:[%s27172_s5 + $0x348] sm:$0xff]  ;;  %v27757_v19 = vld [vmem:[#allocation107_spill] sm:$0xff] }
 0x85e   :  { %20792 = vmatprep.subr.mxu1 %v11952_v9  ;;  %v4942_v62 = vpop.permute.xlu1 %4941 }
 0x85f   :  { %20793 = vmatpush3.msra.mxu1 %v11952_v9  ;;  %v4959_v20 = vadd.f32 %v4942_v62, %v4931_v56  ;;  %v17819_v9 = vld [vmem:[%s27172_s5 + $0x378] sm:$0xff] }
 0x860   :  { %20794 = vmatprep.subr.mxu1 %v11951_v28 }
 0x861   :  { %20795 = vmatpush3.msra.mxu1 %v11951_v28  ;;  %v25623_v0 = vmax.f32 %v4959_v20, 0.0  ;;  %v25707_v28 = vld [vmem:[%s27170_s3 + $0xa0] sm:$0xff] }
 0x862   :  { %20796 = vmatprep.subr.mxu1 %v11950_v41 }
 0x863   :  { %20797 = vmatpush3.msra.mxu1 %v11950_v41 }
 0x864   :  { %20798 = vmatprep.subr.mxu1 %v11949_v43 }
 0x865   :  { %20799 = vmatpush3.msra.mxu1 %v11949_v43 }
 0x866   :  { %20800 = vmatprep.subr.mxu1 %v11948_v29 }
 0x867   :  { %20801 = vmatpush3.msra.mxu1 %v11948_v29 }
 0x868   :  { %20803 = vmatmul.mubr.msk.f32.vlgmr.msra.gmra.mxu1 %vm7470_vm3, %v17805_v3  ;;  %20866 = vmatprep.subr.mxu1 %v25602_v25 }
 0x869   :  { %20867 = vmatpush3.msra.mxu1 %v25602_v25  ;;  %20805 = vmatprep.mubr.msk.f32.mxu1 %vm7470_vm3, %v17806_v11 }
 0x86a   :  { %20868 = vmatprep.subr.mxu1 %v25607_v61 }
 0x86b   :  { %20869 = vmatpush3.msra.mxu1 %v25607_v61 }
 0x86c   :  { %20806 = vmatmul.mubr.msk.f32.gmra.mxu1 %vm7470_vm3, %v17807_v2  ;;  %20870 = vmatprep.subr.mxu1 %v25616_v7 }
 0x86d   :  { %20871 = vmatpush3.msra.mxu1 %v25616_v7  ;;  %20808 = vmatprep.mubr.msk.f32.mxu1 %vm7470_vm3, %v17808_v24 }
 0x86e   :  { %20872 = vmatprep.subr.mxu1 %v25623_v0 }
 0x86f   :  { %20873 = vmatpush3.msra.mxu1 %v25623_v0 }
 0x870   :  { %20809 = vmatmul.mubr.msk.f32.gmra.mxu1 %vm7470_vm3, %v17809_v48  ;;  %20926 = vmatprep.subr.mxu1 %v25602_v25 }
 0x871   :  { %20811 = vmatprep.mubr.msk.f32.mxu1 %vm7470_vm3, %v17810_v45 }
 0x874   :  { %20812 = vmatmul.mubr.msk.f32.gmra.mxu1 %vm7470_vm3, %v17811_v49 }
 0x875   :  { %20814 = vmatprep.mubr.msk.f32.mxu1 %vm7470_vm3, %v17812_v52 }
 0x878   :  { %20815 = vmatmul.mubr.msk.f32.gmra.mxu1 %vm7470_vm3, %v17813_v58 }
 0x879   :  { %20817 = vmatprep.mubr.msk.f32.mxu1 %vm7470_vm3, %v17814_v40  ;;  %v27766_v40 = vld [vmem:[#allocation5_spill] sm:$0xff] }
 0x87c   :  { %20818 = vmatmul.mubr.msk.f32.gmra.mxu1 %vm7470_vm3, %v17815_v30 }
 0x87d   :  { %20820 = vmatprep.mubr.msk.f32.mxu1 %vm7470_vm3, %v17816_v8 }
 0x880   :  { %20821 = vmatmul.mubr.msk.f32.gmra.mxu1 %vm7470_vm3, %v17817_v46 }
 0x881   :  { %20823 = vmatprep.mubr.msk.f32.mxu1 %vm7470_vm3, %v17818_v16 }
 0x884   :  { %20824 = vmatmul.mubr.msk.f32.gmra.mxu1 %vm7470_vm3, %v17819_v9  ;;  %v27769_v9 = vld [vmem:[#allocation83_spill] sm:$0xff] }
 0x885   :  { %20874 = vmatprep.mubr.msk.f32.mxu1 %vm7115_vm2, %v25678_v21 }
 0x888   :  { %20875 = vmatmul.mubr.msk.f32.vlgmr.msra.gmra.mxu1 %vm7115_vm2, %v25686_v32 }
 0x889   :  { %20927 = vmatpush3.msra.mxu1 %v25602_v25  ;;  %20877 = vmatprep.mubr.msk.f32.mxu1 %vm7115_vm2, %v25691_v34 }
 0x88a   :  { %20928 = vmatprep.subr.mxu1 %v25607_v61 }
 0x88b   :  { %20929 = vmatpush3.msra.mxu1 %v25607_v61 }
 0x88c   :  { %20930 = vmatprep.subr.mxu1 %v25616_v7  ;;  %20878 = vmatmul.mubr.msk.f32.gmra.mxu1 %vm7115_vm2, %v25701_v63 }
 0x88d   :  { %20931 = vmatpush3.msra.mxu1 %v25616_v7  ;;  %20880 = vmatprep.mubr.msk.f32.mxu1 %vm7115_vm2, %v25707_v28 }
 0x88e   :  { %20932 = vmatprep.subr.mxu1 %v25623_v0 }
 0x88f   :  { %20933 = vmatpush3.msra.mxu1 %v25623_v0 }
 0x890   :  { %20946 = vmatprep.subr.mxu1 %v25324_v18  ;;  %20881 = vmatmul.mubr.msk.f32.gmra.mxu1 %vm7115_vm2, %v25719_v57 }
 0x891   :  { %20883 = vmatprep.mubr.msk.f32.mxu1 %vm7115_vm2, %v25725_v4 }
 0x894   :  { %20884 = vmatmul.mubr.msk.f32.gmra.mxu1 %vm7115_vm2, %v25736_v10 }
 0x895   :  { %20934 = vmatprep.mubr.msk.f32.mxu1 %vm7115_vm2, %v25741_v47 }
 0x898   :  { %20935 = vmatmul.mubr.msk.f32.vlgmr.msra.gmra.mxu1 %vm7115_vm2, %v25750_v39 }
 0x899   :  { %20947 = vmatpush3.msra.mxu1 %v25324_v18  ;;  %20937 = vmatprep.mubr.msk.f32.mxu1 %vm7115_vm2, %v25439_v60  ;;  %v17876_v18 = vld [vmem:[%s27172_s5 + $0x380] sm:$0xff] }
 0x89a   :  { %20948 = vmatprep.subr.mxu1 %v25329_v13  ;;  %20902 = vmatprep.mubr.msk.f32.mxu0 %vm7470_vm3, %v17876_v18 }
 0x89b   :  { %20949 = vmatpush3.msra.mxu1 %v25329_v13  ;;  %v25793_v13 = vpop.f32.mrf.mxu0 }
 0x89c   :  { %20950 = vmatprep.subr.mxu1 %v25338_v6  ;;  %20938 = vmatmul.mubr.msk.f32.gmra.mxu1 %vm7115_vm2, %v25447_v53 }
 0x89d   :  { %20951 = vmatpush3.msra.mxu1 %v25338_v6  ;;  %20940 = vmatprep.mubr.msk.f32.mxu1 %vm7115_vm2, %v25454_v26  ;;  %v25795_v6 = vpop.f32.mrf.mxu0 }
 0x89e   :  { %20952 = vmatprep.subr.mxu1 %v25345_v5 }
 0x89f   :  { %20953 = vmatpush3.msra.mxu1 %v25345_v5  ;;  %v20839_v5 = vpop.f32.mrf.mxu0 }
 0x8a0   :  { %20941 = vmatmul.mubr.msk.f32.gmra.mxu1 %vm7115_vm2, %v25461_v23 }
 0x8a1   :  { %20943 = vmatprep.mubr.msk.f32.mxu1 %vm7115_vm2, %v25468_v22  ;;  %v12338_v41 = vpop.f32.mrf.mxu0 }
 0x8a3   :  { %v20842_v31 = vpop.f32.mrf.mxu0 }
 0x8a4   :  { %20944 = vmatmul.mubr.msk.f32.gmra.mxu1 %vm7115_vm2, %v25475_v54 }
 0x8a5   :  { %20954 = vmatprep.mubr.msk.f32.mxu1 %vm7115_vm2, %v25482_v36  ;;  %v12348_v43 = vpop.f32.mrf.mxu0 }
 0x8a7   :  { %v20845_v29 = vpop.f32.mrf.mxu0 }
 0x8a8   :  { %20955 = vmatmul.mubr.msk.f32.vlgmr.msra.gmra.mxu1 %vm7115_vm2, %v25489_v38 }
 0x8a9   :  { %20957 = vmatprep.mubr.msk.f32.mxu1 %vm7115_vm2, %v25496_v37  ;;  %v12358_v11 = vpop.f32.mrf.mxu0 }
 0x8ab   :  { %v20856_v2 = vpop.f32.mrf.mxu0 }
 0x8ac   :  { %20958 = vmatmul.mubr.msk.f32.gmra.mxu1 %vm7115_vm2, %v25503_v50  ;;  %v27776_v50 = vld [vmem:[#allocation201_spill] sm:$0xff] }
 0x8ad   :  { %20960 = vmatprep.mubr.msk.f32.mxu1 %vm7115_vm2, %v25510_v35  ;;  %v12457_v49 = vpop.f32.mrf.mxu0 }
 0x8af   :  { %v20859_v8 = vpop.f32.mrf.mxu0 }
 0x8b0   :  { %20961 = vmatmul.mubr.msk.f32.gmra.mxu1 %vm7115_vm2, %v25517_v59 }
 0x8b1   :  { %20963 = vmatprep.mubr.msk.f32.mxu1 %vm7115_vm2, %v25524_v12 }
 0x8b4   :  { %20964 = vmatmul.mubr.msk.f32.gmra.mxu1 %vm7115_vm2, %v25531_v55 }
 0x928   :  { %v20804_v33 = vpop.f32.mrf.mxu1 }
 0x929   :  { %v25798_v15 = vadd.f32 %v20804_v33, %v25540_v44  ;;  %v27760_v44 = vld [vmem:[#allocation82_spill] sm:$0xff]  ;;  %v12467_v33 = vpop.f32.mrf.mxu0 }
 0x92a   :  { %v25800_v42 = vpop.f32.mrf.mxu1  ;;  %v12468_v59 = vadd.f32 %v12467_v33, %v12338_v41 }
 0x92b   :  { %27753 = vst [vmem:[#allocation79_spill] sm:$0xff] %v25798_v15  ;;  %27754 = vst [vmem:[#allocation121_spill] sm:$0xff] %v25800_v42 }
 0x92c   :  { %v20807_v14 = vpop.f32.mrf.mxu1 }
 0x92d   :  { %v25803_v56 = vadd.f32 %v20807_v14, %v25545_v51  ;;  %v27763_v51 = vld [vmem:[#allocation110_spill] sm:$0xff] }
 0x92e   :  { %v25805_v17 = vpop.f32.mrf.mxu1 }
 0x92f   :  { %27755 = vst [vmem:[#allocation86_spill] sm:$0xff] %v25803_v56  ;;  %27756 = vst [vmem:[#allocation93_spill] sm:$0xff] %v25805_v17  ;;  %v27775_v56 = vld [vmem:[#allocation197_spill] sm:$0xff] }
 0x930   :  { %v20810_v3 = vpop.f32.mrf.mxu1 }
 0x931   :  { %v25808_v1 = vadd.f32 %v20810_v3, %v27757_v19  ;;  %v27772_v19 = vld [vmem:[#allocation92_spill] sm:$0xff] }
 0x932   :  { %v25810_v27 = vpop.f32.mrf.mxu1 }
 0x933   :  { %27758 = vst [vmem:[#allocation124_spill] sm:$0xff] %v25808_v1  ;;  %27759 = vst [vmem:[#allocation91_spill] sm:$0xff] %v25810_v27 }
 0x934   :  { %v20813_v62 = vpop.f32.mrf.mxu1 }
 0x935   :  { %v25813_v20 = vadd.f32 %v20813_v62, %v27760_v44  ;;  %v20862_v44 = vpop.f32.mrf.mxu0 }
 0x936   :  { %v25815_v24 = vpop.f32.mrf.mxu1 }
 0x937   :  { %27761 = vst [vmem:[#allocation125_spill] sm:$0xff] %v25813_v20  ;;  %27762 = vst [vmem:[#allocation87_spill] sm:$0xff] %v25815_v24 }
 0x938   :  { %v20816_v48 = vpop.f32.mrf.mxu1 }
 0x939   :  { %v25818_v45 = vadd.f32 %v20816_v48, %v27763_v51 }
 0x93a   :  { %v25820_v52 = vpop.f32.mrf.mxu1 }
 0x93b   :  { %27764 = vst [vmem:[#allocation128_spill] sm:$0xff] %v25818_v45  ;;  %27765 = vst [vmem:[#allocation89_spill] sm:$0xff] %v25820_v52  ;;  %v12686_v52 = vpop.permute.xlu1 %12685 }
 0x93c   :  { %v20819_v58 = vpop.f32.mrf.mxu1 }
 0x93d   :  { %v25823_v30 = vadd.f32 %v20819_v58, %v27766_v40  ;;  %v12477_v58 = vpop.f32.mrf.mxu0 }
 0x93e   :  { %v25825_v46 = vpop.f32.mrf.mxu1  ;;  %v12478_v45 = vadd.f32 %v12477_v58, %v12348_v43  ;;  %v12463_v43 = vadd.f32 %v20856_v2, %v25793_v13 }
 0x93f   :  { %27767 = vst [vmem:[#allocation129_spill] sm:$0xff] %v25823_v30  ;;  %27768 = vst [vmem:[#allocation132_spill] sm:$0xff] %v25825_v46  ;;  %v20865_v27 = vpop.f32.mrf.mxu0  ;;  %v12483_v30 = vadd.f32 %v20862_v44, %v20842_v31  ;;  %v27777_v31 = vld [vmem:[#allocation144_spill] sm:$0xff]  ;;  %v27788_v44 = vld [vmem:[#allocation161_spill] sm:$0xff] }
 0x940   :  { %v20822_v16 = vpop.f32.mrf.mxu1 }
 0x941   :  { %v25828_v18 = vadd.f32 %v20822_v16, %v27769_v9  ;;  %v12676_v16 = vpop.permute.xlu1 %12675  ;;  %v12487_v9 = vpop.f32.mrf.mxu0 }
 0x942   :  { %v25830_v14 = vpop.f32.mrf.mxu1 }
 0x943   :  { %27770 = vst [vmem:[#allocation75_spill] sm:$0xff] %v25828_v18  ;;  %27771 = vst [vmem:[#allocation59_spill] sm:$0xff] %v25830_v14  ;;  %v12493_v14 = vadd.f32 %v20865_v27, %v20845_v29  ;;  %v27778_v29 = vld [vmem:[#allocation146_spill] sm:$0xff] }
 0x944   :  { %v20825_v3 = vpop.f32.mrf.mxu1  ;;  %v5178_v27 = vadd.f32 %v27778_v29, %v27777_v31  ;;  %v27791_v31 = vld [vmem:[#allocation156_spill] sm:$0xff] }
 0x945   :  { %v25833_v62 = vadd.f32 %v20825_v3, %v27772_v19  ;;  %v12488_v3 = vadd.f32 %v12487_v9, %v12358_v11  ;;  %v12666_v12 = vpop.permute.xlu1 %12665  ;;  %v27792_v29 = vld [vmem:[#allocation44_spill] sm:$0xff] }
 0x946   :  { %v25835_v48 = vpop.f32.mrf.mxu1 }
 0x947   :  { %27773 = vst [vmem:[#allocation62_spill] sm:$0xff] %v25833_v62  ;;  %27774 = vst [vmem:[#allocation16_spill] sm:$0xff] %v25835_v48  ;;  %v12473_v48 = vadd.f32 %v20859_v8, %v20839_v5  ;;  %v27779_v5 = vld [vmem:[#allocation151_spill] sm:$0xff] }
 0x948   :  { %v20876_v51 = vpop.f32.mrf.mxu1 }
 0x949   :  { %v12638_v41 = vadd.f32 %v20876_v51, %v12463_v43 }
 0x94a   :  { %v12598_v40 = vpop.f32.mrf.mxu1 }
 0x94c   :  { %v20879_v24 = vpop.f32.mrf.mxu1 }
 0x94d   :  { %v12640_v35 = vadd.f32 %v20879_v24, %v12473_v48  ;;  %v27789_v48 = vld [vmem:[#allocation205_spill] sm:$0xff] }
 0x94e   :  { %v12608_v17 = vpop.f32.mrf.mxu1  ;;  %v5547_v51 = vadd.f32 %v27789_v48, %v27788_v44 }
 0x950   :  { %v20882_v42 = vpop.f32.mrf.mxu1  ;;  %v25860_v43 = vmax.f32 %v5547_v51, 0.0 }
 0x951   :  { %v12642_v19 = vadd.f32 %v20882_v42, %v12483_v30  ;;  %v12639_v42 = vadd.f32 %v12608_v17, %v12468_v59 }
 0x952   :  { %v12618_v18 = vpop.f32.mrf.mxu1 }
 0x953   :  { %v12641_v1 = vadd.f32 %v12618_v18, %v12478_v45  ;;  %v12698_v37 = vadd.f32 %v27776_v50, %v12642_v19  ;;  %v5295_v45 = vadd.f32 %v27779_v5, %v5178_v27  ;;  %v12695_v59 = vadd.f32 %v12666_v12, %v12639_v42  ;;  %v27787_v12 = vld [vmem:[#allocation149_spill] sm:$0xff]  ;;  %v17878_v42 = vld [vmem:[%s27172_s5 + $0x390] sm:$0xff] }
 0x954   :  { %v20885_v46 = vpop.f32.mrf.mxu1  ;;  %v17877_v19 = vld [vmem:[%s27172_s5 + $0x388] sm:$0xff]  ;;  %v5545_v27 = vadd.f32 %v27792_v29, %v27791_v31 }
 0x955   :  { %v12644_v62 = vadd.f32 %v20885_v46, %v12493_v14  ;;  %v12697_v11 = vadd.f32 %v12676_v16, %v12641_v1  ;;  %v12706_v50 = vmax.f32 %v12698_v37, 0.0  ;;  %v27786_v37 = vld [vmem:[#allocation163_spill] sm:$0xff]  ;;  %v12703_v33 = vmax.f32 %v12695_v59, 0.0  ;;  %v17888_v59 = vld [vmem:[%s27172_s5 + $0x3e0] sm:$0xff] }
 0x956   :  { %v12628_v20 = vpop.f32.mrf.mxu1 }
 0x957   :  { %v12700_v15 = vadd.f32 %v27775_v56, %v12644_v62  ;;  %v12643_v55 = vadd.f32 %v12628_v20, %v12488_v3  ;;  %v12458_v56 = vadd.f32 %v12457_v49, %v25795_v6  ;;  %v27780_v20 = vld [vmem:[#allocation203_spill] sm:$0xff]  ;;  %v12705_v17 = vmax.f32 %v12697_v11, 0.0  ;;  %v27785_v6 = vld [vmem:[#allocation204_spill] sm:$0xff] }
 0x958   :  { %v12696_v24 = vadd.f32 %v27780_v20, %v12640_v35  ;;  %v12694_v49 = vadd.f32 %v27785_v6, %v12638_v41  ;;  %v17880_v41 = vld [vmem:[%s27172_s5 + $0x3a0] sm:$0xff] }
 0x959   :  { %v12708_v38 = vmax.f32 %v12700_v15, 0.0  ;;  %v12699_v36 = vadd.f32 %v12686_v52, %v12643_v55  ;;  %v12656_v55 = vpop.permute.xlu1 %12655  ;;  %v27781_v15 = vld [vmem:[#allocation140_spill] sm:$0xff]  ;;  %v27782_v52 = vld [vmem:[#allocation141_spill] sm:$0xff]  ;;  %v12637_v13 = vadd.f32 %v12598_v40, %v12458_v56  ;;  %v25874_v56 = vmax.f32 %v5545_v27, 0.0  ;;  %v26049_v27 = vpop.f32.mrf.mxu1 }
 0x95a   :  { %v5168_v8 = vadd.f32 %v27782_v52, %v27781_v15  ;;  %v12704_v46 = vmax.f32 %v12696_v24, 0.0  ;;  %v12702_v58 = vmax.f32 %v12694_v49, 0.0  ;;  %v27790_v40 = vld [vmem:[#allocation157_spill] sm:$0xff] }
 0x95b   :  { %v12707_v30 = vmax.f32 %v12699_v36, 0.0  ;;  %20886 = vmatprep.subr.mxu0 %v12708_v38  ;;  %v27783_v36 = vld [vmem:[#allocation148_spill] sm:$0xff]  ;;  %v12693_v18 = vadd.f32 %v12656_v55, %v12637_v13  ;;  %v17881_v24 = vld [vmem:[%s27172_s5 + $0x3a8] sm:$0xff] }
 0x95c   :  { %20887 = vmatpush3.msra.mxu0 %v12708_v38  ;;  %v5293_v1 = vadd.f32 %v27783_v36, %v5168_v8  ;;  %v27784_v38 = vld [vmem:[#allocation152_spill] sm:$0xff]  ;;  %v17885_v52 = vld [vmem:[%s27172_s5 + $0x3c8] sm:$0xff]  ;;  %v17886_v8 = vld [vmem:[%s27172_s5 + $0x3d0] sm:$0xff] }
 0x95d   :  { %20888 = vmatprep.subr.mxu0 %v12707_v30  ;;  %v5406_v2 = vadd.f32 %v27784_v38, %v5295_v45  ;;  %v5537_v14 = vpop.permute.xlu1 %5536  ;;  %v12701_v3 = vmax.f32 %v12693_v18, 0.0  ;;  %v17879_v45 = vld [vmem:[%s27172_s5 + $0x398] sm:$0xff]  ;;  %v17884_v15 = vld [vmem:[%s27172_s5 + $0x3c0] sm:$0xff]  ;;  %v17890_v36 = vld [vmem:[%s27172_s5 + $0x3f0] sm:$0xff] }
 0x95e   :  { %20889 = vmatpush3.msra.mxu0 %v12707_v30  ;;  %v5404_v62 = vadd.f32 %v27787_v12, %v5293_v1  ;;  %v17883_v55 = vld [vmem:[%s27172_s5 + $0x3b8] sm:$0xff] }
 0x95f   :  { %20890 = vmatprep.subr.mxu0 %v12706_v50  ;;  %v5518_v35 = vadd.f32 %v27786_v37, %v5406_v2  ;;  %v17887_v13 = vld [vmem:[%s27172_s5 + $0x3d8] sm:$0xff]  ;;  %v27802_v37 = vld [vmem:[#allocation61_spill] sm:$0xff] }
 0x960   :  { %20891 = vmatpush3.msra.mxu0 %v12706_v50  ;;  %v5516_v16 = vadd.f32 %v27790_v40, %v5404_v62  ;;  %v17882_v50 = vld [vmem:[%s27172_s5 + $0x3b0] sm:$0xff]  ;;  %v17891_v1 = vld [vmem:[%s27172_s5 + $0x3f8] sm:$0xff] }
 0x961   :  { %20892 = vmatprep.subr.mxu0 %v12705_v17  ;;  %v5546_v9 = vadd.f32 %v5537_v14, %v5518_v35  ;;  %v5527_v11 = vpop.permute.xlu1 %5526 }
 0x962   :  { %20893 = vmatpush3.msra.mxu0 %v12705_v17  ;;  %v5544_v30 = vadd.f32 %v5527_v11, %v5516_v16  ;;  %v17889_v17 = vld [vmem:[%s27172_s5 + $0x3e8] sm:$0xff]  ;;  %v26053_v11 = vpop.f32.mrf.mxu1 }
 0x963   :  { %20894 = vmatprep.subr.mxu0 %v12704_v46  ;;  %v25865_v5 = vmax.f32 %v5546_v9, 0.0 }
 0x964   :  { %20895 = vmatpush3.msra.mxu0 %v12704_v46  ;;  %v25881_v20 = vmax.f32 %v5544_v30, 0.0  ;;  %v27801_v46 = vld [vmem:[#allocation68_spill] sm:$0xff] }
 0x965   :  { %20896 = vmatprep.subr.mxu0 %v12703_v33  ;;  %v25936_v38 = vpop.permute.xlu1 %13438 }
 0x966   :  { %20897 = vmatpush3.msra.mxu0 %v12703_v33 }
 0x967   :  { %20898 = vmatprep.subr.mxu0 %v12702_v58 }
 0x968   :  { %20899 = vmatpush3.msra.mxu0 %v12702_v58  ;;  %v17948_v58 = vld [vmem:[%s27172_s5 + $0x400] sm:$0xff] }
 0x969   :  { %20900 = vmatprep.subr.mxu0 %v12701_v3  ;;  %v25948_v2 = vpop.permute.xlu1 %13428  ;;  %21002 = vmatprep.mubr.msk.f32.mxu1 %vm7470_vm3, %v17948_v58 }
 0x96a   :  { %20901 = vmatpush3.msra.mxu0 %v12701_v3 }
 0x96b   :  { %20903 = vmatmul.mubr.msk.f32.vlgmr.msra.gmra.mxu0 %vm7470_vm3, %v17877_v19  ;;  %20966 = vmatprep.subr.mxu0 %v25860_v43 }
 0x96c   :  { %20967 = vmatpush3.msra.mxu0 %v25860_v43  ;;  %20905 = vmatprep.mubr.msk.f32.mxu0 %vm7470_vm3, %v17878_v42 }
 0x96d   :  { %20968 = vmatprep.subr.mxu0 %v25865_v5  ;;  %v25960_v6 = vpop.permute.xlu1 %13418 }
 0x96e   :  { %20969 = vmatpush3.msra.mxu0 %v25865_v5 }
 0x96f   :  { %20906 = vmatmul.mubr.msk.f32.gmra.mxu0 %vm7470_vm3, %v17879_v45  ;;  %20970 = vmatprep.subr.mxu0 %v25874_v56  ;;  %v26057_v45 = vpop.f32.mrf.mxu1 }
 0x970   :  { %20971 = vmatpush3.msra.mxu0 %v25874_v56  ;;  %20908 = vmatprep.mubr.msk.f32.mxu0 %vm7470_vm3, %v17880_v41 }
 0x971   :  { %20972 = vmatprep.subr.mxu0 %v25881_v20  ;;  %v25968_v49 = vpop.permute.xlu1 %13408  ;;  %v26059_v41 = vpop.f32.mrf.mxu1 }
 0x972   :  { %20973 = vmatpush3.msra.mxu0 %v25881_v20 }
 0x973   :  { %20909 = vmatmul.mubr.msk.f32.gmra.mxu0 %vm7470_vm3, %v17881_v24  ;;  %21026 = vmatprep.subr.mxu0 %v25860_v43 }
 0x974   :  { %20911 = vmatprep.mubr.msk.f32.mxu0 %vm7470_vm3, %v17882_v50  ;;  %v26061_v50 = vpop.f32.mrf.mxu1 }
 0x977   :  { %20912 = vmatmul.mubr.msk.f32.gmra.mxu0 %vm7470_vm3, %v17883_v55 }
 0x978   :  { %20914 = vmatprep.mubr.msk.f32.mxu0 %vm7470_vm3, %v17884_v15 }
 0x97b   :  { %20915 = vmatmul.mubr.msk.f32.gmra.mxu0 %vm7470_vm3, %v17885_v52  ;;  %v27821_v52 = vld [vmem:[#allocation79_spill] sm:$0xff] }
 0x97c   :  { %20917 = vmatprep.mubr.msk.f32.mxu0 %vm7470_vm3, %v17886_v8 }
 0x97f   :  { %20918 = vmatmul.mubr.msk.f32.gmra.mxu0 %vm7470_vm3, %v17887_v13 }
 0x980   :  { %20920 = vmatprep.mubr.msk.f32.mxu0 %vm7470_vm3, %v17888_v59  ;;  %v26068_v59 = vpop.f32.mrf.mxu1 }
 0x983   :  { %20921 = vmatmul.mubr.msk.f32.gmra.mxu0 %vm7470_vm3, %v17889_v17 }
 0x984   :  { %20923 = vmatprep.mubr.msk.f32.mxu0 %vm7470_vm3, %v17890_v36  ;;  %v27822_v36 = vld [vmem:[#allocation86_spill] sm:$0xff] }
 0x987   :  { %20924 = vmatmul.mubr.msk.f32.gmra.mxu0 %vm7470_vm3, %v17891_v1 }
 0x988   :  { %20974 = vmatprep.mubr.msk.f32.mxu0 %vm7115_vm2, %v25678_v21 }
 0x98b   :  { %20975 = vmatmul.mubr.msk.f32.vlgmr.msra.gmra.mxu0 %vm7115_vm2, %v25686_v32 }
 0x98c   :  { %21027 = vmatpush3.msra.mxu0 %v25860_v43  ;;  %20977 = vmatprep.mubr.msk.f32.mxu0 %vm7115_vm2, %v25691_v34 }
 0x98d   :  { %21028 = vmatprep.subr.mxu0 %v25865_v5 }
 0x98e   :  { %21029 = vmatpush3.msra.mxu0 %v25865_v5 }
 0x98f   :  { %21030 = vmatprep.subr.mxu0 %v25874_v56  ;;  %20978 = vmatmul.mubr.msk.f32.gmra.mxu0 %vm7115_vm2, %v25701_v63 }
 0x990   :  { %21031 = vmatpush3.msra.mxu0 %v25874_v56  ;;  %20980 = vmatprep.mubr.msk.f32.mxu0 %vm7115_vm2, %v25707_v28 }
 0x991   :  { %21032 = vmatprep.subr.mxu0 %v25881_v20 }
 0x992   :  { %21033 = vmatpush3.msra.mxu0 %v25881_v20 }
 0x993   :  { %21046 = vmatprep.subr.mxu0 %v25602_v25  ;;  %20981 = vmatmul.mubr.msk.f32.gmra.mxu0 %vm7115_vm2, %v25719_v57 }
 0x994   :  { %20983 = vmatprep.mubr.msk.f32.mxu0 %vm7115_vm2, %v25725_v4 }
 0x997   :  { %20984 = vmatmul.mubr.msk.f32.gmra.mxu0 %vm7115_vm2, %v25736_v10 }
 0x998   :  { %21034 = vmatprep.mubr.msk.f32.mxu0 %vm7115_vm2, %v25741_v47 }
 0x99b   :  { %21035 = vmatmul.mubr.msk.f32.vlgmr.msra.gmra.mxu0 %vm7115_vm2, %v25750_v39 }
 0x99c   :  { %21047 = vmatpush3.msra.mxu0 %v25602_v25  ;;  %21037 = vmatprep.mubr.msk.f32.mxu0 %vm7115_vm2, %v25439_v60  ;;  %v25982_v25 = vpop.permute.xlu1 %6121 }
 0x99d   :  { %21048 = vmatprep.subr.mxu0 %v25607_v61 }
 0x99e   :  { %21049 = vmatpush3.msra.mxu0 %v25607_v61  ;;  %v27795_v61 = vld [vmem:[#allocation102_spill] sm:$0xff] }
 0x99f   :  { %21050 = vmatprep.subr.mxu0 %v25616_v7  ;;  %21038 = vmatmul.mubr.msk.f32.gmra.mxu0 %vm7115_vm2, %v25447_v53  ;;  %v27793_v53 = vld [vmem:[#allocation99_spill] sm:$0xff] }
 0x9a0   :  { %21051 = vmatpush3.msra.mxu0 %v25616_v7  ;;  %21040 = vmatprep.mubr.msk.f32.mxu0 %vm7115_vm2, %v25454_v26  ;;  %v25991_v60 = vpop.permute.xlu1 %6111  ;;  %v27794_v26 = vld [vmem:[#allocation19_spill] sm:$0xff] }
 0x9a1   :  { %21052 = vmatprep.subr.mxu0 %v25623_v0 }
 0x9a2   :  { %21053 = vmatpush3.msra.mxu0 %v25623_v0 }
 0x9a3   :  { %21041 = vmatmul.mubr.msk.f32.gmra.mxu0 %vm7115_vm2, %v25461_v23  ;;  %v27797_v23 = vld [vmem:[#allocation14_spill] sm:$0xff] }
 0x9a4   :  { %21043 = vmatprep.mubr.msk.f32.mxu0 %vm7115_vm2, %v25468_v22  ;;  %v25999_v7 = vpop.permute.xlu1 %14191  ;;  %v27798_v22 = vld [vmem:[#allocation103_spill] sm:$0xff] }
 0x9a5   :  { %27796 = vst [vmem:[#allocation78_spill] sm:$0xff] %v25999_v7 }
 0x9a7   :  { %21044 = vmatmul.mubr.msk.f32.gmra.mxu0 %vm7115_vm2, %v25475_v54  ;;  %v27799_v54 = vld [vmem:[#allocation106_spill] sm:$0xff] }
 0x9a8   :  { %21054 = vmatprep.mubr.msk.f32.mxu0 %vm7115_vm2, %v27793_v53  ;;  %v26007_v0 = vpop.permute.xlu1 %14181 }
 0x9a9   :  { %27800 = vst [vmem:[#allocation15_spill] sm:$0xff] %v26007_v0  ;;  %v27849_v0 = vld [vmem:[#allocation117_spill] sm:$0xff] }
 0x9ab   :  { %21055 = vmatmul.mubr.msk.f32.vlgmr.msra.gmra.mxu0 %vm7115_vm2, %v27794_v26  ;;  %v20945_v26 = vpop.f32.mrf.mxu1 }
 0x9ac   :  { %21057 = vmatprep.mubr.msk.f32.mxu0 %vm7115_vm2, %v27795_v61  ;;  %v26013_v35 = vpop.permute.xlu1 %14171 }
 0x9ad   :  { %27803 = vst [vmem:[#allocation7_spill] sm:$0xff] %v26013_v35 }
 0x9af   :  { %21058 = vmatmul.mubr.msk.f32.gmra.mxu0 %vm7115_vm2, %v27797_v23 }
 0x9b0   :  { %21060 = vmatprep.mubr.msk.f32.mxu0 %vm7115_vm2, %v27798_v22  ;;  %v26015_v18 = vpop.permute.xlu1 %14161  ;;  %v27823_v22 = vld [vmem:[#allocation33_spill] sm:$0xff] }
 0x9b1   :  { %27804 = vst [vmem:[#allocation12_spill] sm:$0xff] %v26015_v18  ;;  %v27848_v18 = vld [vmem:[#allocation73_spill] sm:$0xff] }
 0x9b3   :  { %21061 = vmatmul.mubr.msk.f32.gmra.mxu0 %vm7115_vm2, %v27799_v54 }
 0x9b4   :  { %21063 = vmatprep.mubr.msk.f32.mxu0 %vm7115_vm2, %v27801_v46  ;;  %v26017_v33 = vpop.permute.xlu1 %6594  ;;  %v27824_v46 = vld [vmem:[#allocation124_spill] sm:$0xff] }
 0x9b5   :  { %27805 = vst [vmem:[#allocation27_spill] sm:$0xff] %v26017_v33 }
 0x9b7   :  { %21064 = vmatmul.mubr.msk.f32.gmra.mxu0 %vm7115_vm2, %v27802_v37 }
 0x9b8   :  { %v26019_v14 = vpop.permute.xlu1 %6584 }
 0x9b9   :  { %27806 = vst [vmem:[#allocation81_spill] sm:$0xff] %v26019_v14  ;;  %v27843_v14 = vld [vmem:[#allocation67_spill] sm:$0xff] }
 0x9bc   :  { %v26021_v12 = vpop.permute.xlu1 %14944 }
 0x9bd   :  { %27807 = vst [vmem:[#allocation84_spill] sm:$0xff] %v26021_v12  ;;  %v27841_v12 = vld [vmem:[#allocation90_spill] sm:$0xff] }
 0x9c0   :  { %v26023_v62 = vpop.permute.xlu1 %14934 }
 0x9c1   :  { %27808 = vst [vmem:[#allocation77_spill] sm:$0xff] %v26023_v62 }
 0x9c4   :  { %v26025_v44 = vpop.permute.xlu1 %14924 }
 0x9c5   :  { %27809 = vst [vmem:[#allocation10_spill] sm:$0xff] %v26025_v44  ;;  %v27836_v44 = vld [vmem:[#allocation98_spill] sm:$0xff] }
 0x9c8   :  { %v26027_v48 = vpop.permute.xlu1 %14914 }
 0x9c9   :  { %27810 = vst [vmem:[#allocation72_spill] sm:$0xff] %v26027_v48 }
 0x9cc   :  { %v26029_v51 = vpop.permute.xlu1 %6956 }
 0x9cd   :  { %27811 = vst [vmem:[#allocation134_spill] sm:$0xff] %v26029_v51  ;;  %v27834_v51 = vld [vmem:[#allocation202_spill] sm:$0xff] }
 0x9d0   :  { %v26035_v40 = vpop.permute.xlu1 %6946 }
 0x9d1   :  { %27812 = vst [vmem:[#allocation139_spill] sm:$0xff] %v26035_v40 }
 0x9d4   :  { %v26037_v16 = vpop.permute.xlu1 %15697 }
 0x9d5   :  { %27813 = vst [vmem:[#allocation138_spill] sm:$0xff] %v26037_v16 }
 0x9d8   :  { %v26039_v9 = vpop.permute.xlu1 %15687 }
 0x9d9   :  { %27814 = vst [vmem:[#allocation100_spill] sm:$0xff] %v26039_v9 }
 0x9dc   :  { %v26041_v3 = vpop.permute.xlu1 %15677 }
 0x9dd   :  { %27815 = vst [vmem:[#allocation101_spill] sm:$0xff] %v26041_v3 }
 0x9e0   :  { %v26043_v19 = vpop.permute.xlu1 %15667 }
 0x9e1   :  { %27816 = vst [vmem:[#allocation142_spill] sm:$0xff] %v26043_v19  ;;  %v27829_v19 = vld [vmem:[#allocation125_spill] sm:$0xff] }
 0x9e4   :  { %v26045_v31 = vpop.permute.xlu1 %16301 }
 0x9e5   :  { %27817 = vst [vmem:[#allocation108_spill] sm:$0xff] %v26045_v31 }
 0x9e8   :  { %v26047_v29 = vpop.permute.xlu1 %16291 }
 0x9e9   :  { %27818 = vst [vmem:[#allocation143_spill] sm:$0xff] %v26047_v29  ;;  %v27827_v29 = vld [vmem:[#allocation199_spill] sm:$0xff] }
 0x9ec   :  { %v26051_v42 = vpop.permute.xlu1 %16281 }
 0x9ed   :  { %27819 = vst [vmem:[#allocation96_spill] sm:$0xff] %v26051_v42 }
 0x9f0   :  { %v26055_v30 = vpop.permute.xlu1 %16271 }
 0x9f1   :  { %27820 = vst [vmem:[#allocation97_spill] sm:$0xff] %v26055_v30 }
 0x9f4   :  { %v7066_v24 = vpop.permute.xlu1 %7065 }
 0x9f5   :  { %v7678_v48 = vadd.f32 %v27834_v51, %v7066_v24  ;;  %v27844_v24 = vld [vmem:[#allocation13_spill] sm:$0xff] }
 0x9f8   :  { %v7056_v15 = vpop.permute.xlu1 %7055 }
 0x9f9   :  { %v7676_v31 = vadd.f32 %v27827_v29, %v7056_v15  ;;  %v27837_v15 = vld [vmem:[#allocation128_spill] sm:$0xff] }
 0x9fc   :  { %v7046_v61 = vpop.permute.xlu1 %7045 }
 0x9fd   :  { %v7674_v54 = vadd.f32 %v27823_v22, %v7046_v61  ;;  %v27832_v61 = vld [vmem:[#allocation198_spill] sm:$0xff]  ;;  %v27833_v22 = vld [vmem:[#allocation88_spill] sm:$0xff] }
 0xa2b   :  { %v20904_v55 = vpop.f32.mrf.mxu0 }
 0xa2c   :  { %v26064_v8 = vadd.f32 %v20904_v55, %v27821_v52  ;;  %v13111_v55 = vpop.f32.mrf.mxu1  ;;  %v27826_v52 = vld [vmem:[#allocation53_spill] sm:$0xff] }
 0xa2d   :  { %v26066_v13 = vpop.f32.mrf.mxu0  ;;  %v8427_v30 = vadd.f32 %v27826_v52, %v7674_v54  ;;  %v27835_v54 = vld [vmem:[#allocation69_spill] sm:$0xff] }
 0xa2e   :  { %v26087_v9 = vpop.f32.mrf.mxu1 }
 0xa2f   :  { %v20907_v17 = vpop.f32.mrf.mxu0 }
 0xa30   :  { %v26071_v1 = vadd.f32 %v20907_v17, %v27822_v36  ;;  %v27828_v17 = vld [vmem:[#allocation21_spill] sm:$0xff] }
 0xa31   :  { %v26073_v53 = vpop.f32.mrf.mxu0  ;;  %v9180_v36 = vadd.f32 %v27828_v17, %v8427_v30  ;;  %v27840_v17 = vld [vmem:[#allocation200_spill] sm:$0xff] }
 0xa32   :  { %v8431_v62 = vadd.f32 %v27840_v17, %v7678_v48 }
 0xa33   :  { %v20910_v23 = vpop.f32.mrf.mxu0 }
 0xa34   :  { %v26077_v37 = vadd.f32 %v20910_v23, %v27824_v46  ;;  %v8429_v23 = vadd.f32 %v27832_v61, %v7676_v31  ;;  %v9933_v46 = vadd.f32 %v27833_v22, %v9180_v36  ;;  %v27842_v61 = vld [vmem:[#allocation30_spill] sm:$0xff]  ;;  %v9184_v51 = vadd.f32 %v27843_v14, %v8431_v62  ;;  %v27853_v62 = vld [vmem:[#allocation75_spill] sm:$0xff] }
 0xa35   :  { %v26079_v58 = vpop.f32.mrf.mxu0 }
 0xa36   :  { %27825 = vst [vmem:[#allocation145_spill] sm:$0xff] %v26077_v37  ;;  %v9182_v52 = vadd.f32 %v27835_v54, %v8429_v23  ;;  %v10686_v29 = vadd.f32 %v27836_v44, %v9933_v46  ;;  %v27845_v54 = vld [vmem:[#allocation132_spill] sm:$0xff]  ;;  %v27846_v46 = vld [vmem:[#allocation129_spill] sm:$0xff]  ;;  %v9937_v35 = vadd.f32 %v27848_v18, %v9184_v51 }
 0xa37   :  { %v20913_v42 = vpop.f32.mrf.mxu0  ;;  %v27857_v18 = vld [vmem:[#allocation16_spill] sm:$0xff] }
 0xa38   :  { %v26085_v3 = vadd.f32 %v20913_v42, %v27829_v19  ;;  %v26099_v19 = vpop.f32.mrf.mxu1  ;;  %v9935_v31 = vadd.f32 %v27841_v12, %v9182_v52  ;;  %v11439_v36 = vadd.f32 %v27842_v61, %v10686_v29  ;;  %v27851_v52 = vld [vmem:[#allocation11_spill] sm:$0xff] }
 0xa39   :  { %v26089_v16 = vpop.f32.mrf.mxu0  ;;  %v10690_v29 = vadd.f32 %v27851_v52, %v9937_v35  ;;  %v27852_v61 = vld [vmem:[#allocation59_spill] sm:$0xff] }
 0xa3a   :  { %27830 = vst [vmem:[#allocation104_spill] sm:$0xff] %v26085_v3  ;;  %27831 = vst [vmem:[#allocation109_spill] sm:$0xff] %v26089_v16  ;;  %v10688_v23 = vadd.f32 %v27844_v24, %v9935_v31  ;;  %v12192_v44 = vadd.f32 %v27845_v54, %v11439_v36  ;;  %v27863_v3 = vld [vmem:[#allocation171_spill] sm:$0xff] }
 0xa3b   :  { %v20916_v40 = vpop.f32.mrf.mxu0 }
 0xa3c   :  { %v26097_v30 = vadd.f32 %v20916_v40, %v27837_v15  ;;  %v20959_v15 = vpop.f32.mrf.mxu1  ;;  %v11441_v48 = vadd.f32 %v27849_v0, %v10688_v23  ;;  %v27858_v0 = vld [vmem:[#allocation62_spill] sm:$0xff] }
 0xa3d   :  { %v26101_v42 = vpop.f32.mrf.mxu0 }
 0xa3e   :  { %27838 = vst [vmem:[#allocation147_spill] sm:$0xff] %v26097_v30  ;;  %27839 = vst [vmem:[#allocation118_spill] sm:$0xff] %v26101_v42  ;;  %v12194_v14 = vadd.f32 %v27852_v61, %v11441_v48  ;;  %v13220_v36 = vpop.f32.mrf.mxu1  ;;  %v27862_v42 = vld [vmem:[#allocation164_spill] sm:$0xff] }
 0xa3f   :  { %v20919_v22 = vpop.f32.mrf.mxu0  ;;  %v5763_v16 = vadd.f32 %v27863_v3, %v27862_v42  ;;  %v13221_v37 = vadd.f32 %v13220_v36, %v26059_v41  ;;  %v27867_v3 = vld [vmem:[#allocation172_spill] sm:$0xff]  ;;  %v13211_v41 = vadd.f32 %v26099_v19, %v26053_v11  ;;  %v27872_v11 = vld [vmem:[#allocation173_spill] sm:$0xff] }
 0xa40   :  { %v26110_v40 = vadd.f32 %v20919_v22, %v27846_v46  ;;  %v27855_v22 = vld [vmem:[#allocation120_spill] sm:$0xff]  ;;  %v20962_v23 = vpop.f32.mrf.mxu1 }
 0xa41   :  { %v12906_v33 = vpop.f32.mrf.mxu0  ;;  %v11443_v54 = vadd.f32 %v27855_v22, %v10690_v29  ;;  %v5880_v42 = vadd.f32 %v27867_v3, %v5763_v16  ;;  %v27868_v36 = vld [vmem:[#allocation40_spill] sm:$0xff] }
 0xa42   :  { %27847 = vst [vmem:[#allocation105_spill] sm:$0xff] %v26110_v40  ;;  %v26114_v17 = vadd.f32 %v12906_v33, %v12192_v44  ;;  %v13230_v52 = vpop.f32.mrf.mxu1  ;;  %v17955_v3 = vld [vmem:[%s27172_s5 + $0x438] sm:$0xff] }
 0xa43   :  { %v20922_v12 = vpop.f32.mrf.mxu0  ;;  %v12196_v51 = vadd.f32 %v27857_v18, %v11443_v54 }
 0xa44   :  { %27850 = vst [vmem:[#allocation116_spill] sm:$0xff] %v26114_v17  ;;  %v26119_v31 = vadd.f32 %v20922_v12, %v27853_v62  ;;  %v20965_v62 = vpop.f32.mrf.mxu1 }
 0xa45   :  { %v12916_v24 = vpop.f32.mrf.mxu0  ;;  %v13246_v22 = vadd.f32 %v20965_v62, %v20945_v26  ;;  %v27864_v26 = vld [vmem:[#allocation51_spill] sm:$0xff] }
 0xa46   :  { %27854 = vst [vmem:[#allocation22_spill] sm:$0xff] %v26119_v31  ;;  %v26122_v46 = vadd.f32 %v12916_v24, %v12194_v14  ;;  %v13240_v29 = vpop.f32.mrf.mxu1  ;;  %v13236_v24 = vadd.f32 %v20962_v23, %v26061_v50 }
 0xa47   :  { %v20925_v7 = vpop.f32.mrf.mxu0  ;;  %v13241_v18 = vadd.f32 %v13240_v29, %v13111_v55  ;;  %v13216_v55 = vadd.f32 %v26087_v9, %v26049_v27  ;;  %v27869_v9 = vld [vmem:[#allocation177_spill] sm:$0xff] }
 0xa48   :  { %27856 = vst [vmem:[#allocation113_spill] sm:$0xff] %v26122_v46  ;;  %v26126_v33 = vadd.f32 %v20925_v7, %v27858_v0  ;;  %v13231_v7 = vadd.f32 %v13230_v52, %v26068_v59  ;;  %v27861_v46 = vld [vmem:[#allocation45_spill] sm:$0xff]  ;;  %v5991_v27 = vadd.f32 %v27869_v9, %v5880_v42  ;;  %v17962_v9 = vld [vmem:[%s27172_s5 + $0x470] sm:$0xff] }
 0xa49   :  { %v12926_v44 = vpop.f32.mrf.mxu0  ;;  %v17956_v42 = vld [vmem:[%s27172_s5 + $0x440] sm:$0xff] }
 0xa4a   :  { %27859 = vst [vmem:[#allocation112_spill] sm:$0xff] %v26126_v33  ;;  %v26128_v35 = vadd.f32 %v12926_v44, %v12196_v51  ;;  %v13226_v44 = vadd.f32 %v20959_v15, %v26057_v45 }
 0xa4b   :  { %v20976_v48 = vpop.f32.mrf.mxu0 }
 0xa4c   :  { %27860 = vst [vmem:[#allocation28_spill] sm:$0xff] %v26128_v35 }
 0xa4d   :  { %v13351_v12 = vpop.f32.mrf.mxu0 }
 0xa4f   :  { %v20979_v61 = vpop.f32.mrf.mxu0 }
 0xa50   :  { %v13393_v50 = vadd.f32 %v20979_v61, %v13226_v44  ;;  %v27871_v61 = vld [vmem:[#allocation41_spill] sm:$0xff] }
 0xa51   :  { %v13361_v31 = vpop.f32.mrf.mxu0 }
 0xa53   :  { %v20982_v17 = vpop.f32.mrf.mxu0 }
 0xa54   :  { %v13395_v0 = vadd.f32 %v20982_v17, %v13236_v24  ;;  %v13392_v17 = vadd.f32 %v13361_v31, %v13221_v37 }
 0xa55   :  { %v13371_v14 = vpop.f32.mrf.mxu0 }
 0xa56   :  { %v13394_v35 = vadd.f32 %v13371_v14, %v13231_v7  ;;  %v13451_v23 = vadd.f32 %v27864_v26, %v13395_v0  ;;  %v13448_v37 = vadd.f32 %v25960_v6, %v13392_v17  ;;  %v27874_v6 = vld [vmem:[#allocation176_spill] sm:$0xff]  ;;  %v27876_v0 = vld [vmem:[#allocation174_spill] sm:$0xff]  ;;  %v27877_v26 = vld [vmem:[#allocation175_spill] sm:$0xff] }
 0xa57   :  { %v20985_v54 = vpop.f32.mrf.mxu0 }
 0xa58   :  { %v13397_v33 = vadd.f32 %v20985_v54, %v13246_v22  ;;  %v13450_v45 = vadd.f32 %v25948_v2, %v13394_v35  ;;  %v13390_v2 = vadd.f32 %v13351_v12, %v13211_v41  ;;  %v27870_v35 = vld [vmem:[#allocation169_spill] sm:$0xff]  ;;  %v13456_v54 = vmax.f32 %v13448_v37, 0.0  ;;  %v27875_v12 = vld [vmem:[#allocation48_spill] sm:$0xff] }
 0xa59   :  { %v13381_v51 = vpop.f32.mrf.mxu0  ;;  %v6132_v7 = vadd.f32 %v27875_v12, %v27874_v6  ;;  %v17957_v41 = vld [vmem:[%s27172_s5 + $0x448] sm:$0xff]  ;;  %v26372_v37 = vld [vmem:[%s27170_s3 + $0x38] sm:$0xff] }
 0xa5a   :  { %v13453_v40 = vadd.f32 %v27861_v46, %v13397_v33  ;;  %v13396_v30 = vadd.f32 %v13381_v51, %v13241_v18  ;;  %v27865_v46 = vld [vmem:[#allocation158_spill] sm:$0xff]  ;;  %v27866_v33 = vld [vmem:[#allocation168_spill] sm:$0xff]  ;;  %v13458_v31 = vmax.f32 %v13450_v45, 0.0  ;;  %v13446_v22 = vadd.f32 %v25968_v49, %v13390_v2  ;;  %v7036_v2 = vpop.permute.xlu1 %7035  ;;  %27883 = vst [vmem:[#allocation114_spill] sm:$0xff] %v26372_v37 }
 0xa5b   :  { %v5753_v52 = vadd.f32 %v27866_v33, %v27865_v46  ;;  %v17949_v49 = vld [vmem:[%s27172_s5 + $0x408] sm:$0xff]  ;;  %v17951_v45 = vld [vmem:[%s27172_s5 + $0x418] sm:$0xff] }
 0xa5c   :  { %v13461_v62 = vmax.f32 %v13453_v40, 0.0  ;;  %v13452_v59 = vadd.f32 %v25936_v38, %v13396_v30  ;;  %v13391_v40 = vadd.f32 %v20976_v48, %v13216_v55  ;;  %v13449_v38 = vadd.f32 %v27868_v36, %v13393_v50  ;;  %v27873_v48 = vld [vmem:[#allocation178_spill] sm:$0xff]  ;;  %v17959_v36 = vld [vmem:[%s27172_s5 + $0x458] sm:$0xff] }
 0xa5d   :  { %v13459_v30 = vmax.f32 %v13451_v23, 0.0  ;;  %v5878_v16 = vadd.f32 %v27870_v35, %v5753_v52  ;;  %v6103_v24 = vadd.f32 %v27873_v48, %v5991_v27  ;;  %v13454_v50 = vmax.f32 %v13446_v22, 0.0  ;;  %v27878_v23 = vld [vmem:[#allocation52_spill] sm:$0xff]  ;;  %v17950_v55 = vld [vmem:[%s27172_s5 + $0x410] sm:$0xff]  ;;  %v17953_v33 = vld [vmem:[%s27172_s5 + $0x428] sm:$0xff] }
 0xa5e   :  { %v13460_v15 = vmax.f32 %v13452_v59, 0.0  ;;  %20986 = vmatprep.subr.mxu1 %v13461_v62  ;;  %v13447_v29 = vadd.f32 %v27871_v61, %v13391_v40  ;;  %v13457_v14 = vmax.f32 %v13449_v38, 0.0  ;;  %v26164_v59 = vmax.f32 %v6132_v7, 0.0  ;;  %v17954_v52 = vld [vmem:[%s27172_s5 + $0x430] sm:$0xff]  ;;  %v17960_v38 = vld [vmem:[%s27172_s5 + $0x460] sm:$0xff]  ;;  %v17963_v27 = vld [vmem:[%s27172_s5 + $0x478] sm:$0xff]  ;;  %v26376_v61 = vpop.f32.mrf.mxu0 }
 0xa5f   :  { %20987 = vmatpush3.msra.mxu1 %v13461_v62  ;;  %v5989_v19 = vadd.f32 %v27872_v11, %v5878_v16  ;;  %v6131_v44 = vadd.f32 %v25982_v25, %v6103_v24  ;;  %v6130_v62 = vadd.f32 %v27878_v23, %v27877_v26  ;;  %v17958_v40 = vld [vmem:[%s27172_s5 + $0x450] sm:$0xff]  ;;  %v27884_v11 = vld [vmem:[#allocation25_spill] sm:$0xff]  ;;  %v27885_v48 = vld [vmem:[#allocation20_spill] sm:$0xff] }
 0xa60   :  { %20988 = vmatprep.subr.mxu1 %v13460_v15  ;;  %v13455_v18 = vmax.f32 %v13447_v29, 0.0  ;;  %v27887_v12 = vld [vmem:[#allocation56_spill] sm:$0xff] }
 0xa61   :  { %20989 = vmatpush3.msra.mxu1 %v13460_v15  ;;  %v6101_v51 = vadd.f32 %v27876_v0, %v5989_v19  ;;  %v26170_v17 = vmax.f32 %v6131_v44, 0.0  ;;  %v26179_v15 = vmax.f32 %v6130_v62, 0.0  ;;  %v27891_v23 = vld [vmem:[#allocation60_spill] sm:$0xff] }
 0xa62   :  { %20990 = vmatprep.subr.mxu1 %v13459_v30 }
 0xa63   :  { %20991 = vmatpush3.msra.mxu1 %v13459_v30  ;;  %v6129_v25 = vadd.f32 %v25991_v60, %v6101_v51  ;;  %v17952_v60 = vld [vmem:[%s27172_s5 + $0x420] sm:$0xff]  ;;  %v17961_v30 = vld [vmem:[%s27172_s5 + $0x468] sm:$0xff] }
 0xa64   :  { %20992 = vmatprep.subr.mxu1 %v13458_v31  ;;  %v27889_v51 = vld [vmem:[#allocation65_spill] sm:$0xff] }
 0xa65   :  { %20993 = vmatpush3.msra.mxu1 %v13458_v31  ;;  %v26186_v46 = vmax.f32 %v6129_v25, 0.0  ;;  %v7026_v31 = vpop.permute.xlu1 %7025 }
 0xa66   :  { %20994 = vmatprep.subr.mxu1 %v13457_v14 }
 0xa67   :  { %20995 = vmatpush3.msra.mxu1 %v13457_v14  ;;  %v26378_v14 = vpop.f32.mrf.mxu0 }
 0xa68   :  { %20996 = vmatprep.subr.mxu1 %v13456_v54 }
 0xa69   :  { %20997 = vmatpush3.msra.mxu1 %v13456_v54  ;;  %v7016_v35 = vpop.permute.xlu1 %7015  ;;  %v26382_v22 = vpop.f32.mrf.mxu0  ;;  %v27886_v54 = vld [vmem:[#allocation36_spill] sm:$0xff] }
 0xa6a   :  { %20998 = vmatprep.subr.mxu1 %v13455_v18 }
 0xa6b   :  { %20999 = vmatpush3.msra.mxu1 %v13455_v18  ;;  %v27888_v18 = vld [vmem:[#allocation29_spill] sm:$0xff] }
 0xa6c   :  { %21000 = vmatprep.subr.mxu1 %v13454_v50 }
 0xa6d   :  { %21001 = vmatpush3.msra.mxu1 %v13454_v50  ;;  %v7006_v16 = vpop.permute.xlu1 %7005  ;;  %v26388_v50 = vpop.f32.mrf.mxu0 }
 0xa6e   :  { %21003 = vmatmul.mubr.msk.f32.vlgmr.msra.gmra.mxu1 %vm7470_vm3, %v17949_v49  ;;  %21066 = vmatprep.subr.mxu1 %v26164_v59  ;;  %v7666_v6 = vadd.f32 %v27886_v54, %v7006_v16  ;;  %v27890_v49 = vld [vmem:[#allocation26_spill] sm:$0xff]  ;;  %v27900_v16 = vld [vmem:[#allocation31_spill] sm:$0xff] }
 0xa6f   :  { %21067 = vmatpush3.msra.mxu1 %v26164_v59  ;;  %21005 = vmatprep.mubr.msk.f32.mxu1 %vm7470_vm3, %v17950_v55  ;;  %v7668_v26 = vadd.f32 %v27890_v49, %v7016_v35  ;;  %v27892_v55 = vld [vmem:[#allocation94_spill] sm:$0xff]  ;;  %v27905_v49 = vld [vmem:[#allocation17_spill] sm:$0xff] }
 0xa70   :  { %21068 = vmatprep.subr.mxu1 %v26170_v17  ;;  %v8419_v0 = vadd.f32 %v27888_v18, %v7666_v6 }
 0xa71   :  { %21069 = vmatpush3.msra.mxu1 %v26170_v17  ;;  %v6996_v29 = vpop.permute.xlu1 %6995 }
 0xa72   :  { %21006 = vmatmul.mubr.msk.f32.gmra.mxu1 %vm7470_vm3, %v17951_v45  ;;  %21070 = vmatprep.subr.mxu1 %v26179_v15  ;;  %v7664_v19 = vadd.f32 %v27884_v11, %v6996_v29  ;;  %v9172_v62 = vadd.f32 %v27891_v23, %v8419_v0  ;;  %v27893_v45 = vld [vmem:[#allocation46_spill] sm:$0xff]  ;;  %v27906_v23 = vld [vmem:[#allocation93_spill] sm:$0xff] }
 0xa73   :  { %21071 = vmatpush3.msra.mxu1 %v26179_v15  ;;  %21008 = vmatprep.mubr.msk.f32.mxu1 %vm7470_vm3, %v17952_v60  ;;  %v8421_v60 = vadd.f32 %v27893_v45, %v7668_v26 }
 0xa74   :  { %21072 = vmatprep.subr.mxu1 %v26186_v46  ;;  %v8417_v24 = vadd.f32 %v27885_v48, %v7664_v19  ;;  %v27901_v19 = vld [vmem:[#allocation80_spill] sm:$0xff] }
 0xa75   :  { %21073 = vmatpush3.msra.mxu1 %v26186_v46 }
 0xa76   :  { %21009 = vmatmul.mubr.msk.f32.gmra.mxu1 %vm7470_vm3, %v17953_v33  ;;  %21126 = vmatprep.subr.mxu1 %v26164_v59  ;;  %v9170_v7 = vadd.f32 %v27887_v12, %v8417_v24  ;;  %v27894_v33 = vld [vmem:[#allocation66_spill] sm:$0xff] }
 0xa77   :  { %21011 = vmatprep.mubr.msk.f32.mxu1 %vm7470_vm3, %v17954_v52  ;;  %v9925_v52 = vadd.f32 %v27894_v33, %v9172_v62  ;;  %v27902_v24 = vld [vmem:[#allocation6_spill] sm:$0xff] }
 0xa78   :  { %v9923_v44 = vadd.f32 %v27889_v51, %v9170_v7  ;;  %v27904_v51 = vld [vmem:[#allocation9_spill] sm:$0xff] }
 0xa7a   :  { %21012 = vmatmul.mubr.msk.f32.gmra.mxu1 %vm7470_vm3, %v17955_v3  ;;  %v10676_v25 = vadd.f32 %v27892_v55, %v9923_v44  ;;  %v27895_v3 = vld [vmem:[#allocation64_spill] sm:$0xff] }
 0xa7b   :  { %21014 = vmatprep.mubr.msk.f32.mxu1 %vm7470_vm3, %v17956_v42 }
 0xa7c   :  { %v11429_v42 = vadd.f32 %v27895_v3, %v10676_v25  ;;  %v27907_v25 = vld [vmem:[#allocation35_spill] sm:$0xff] }
 0xa7e   :  { %21015 = vmatmul.mubr.msk.f32.gmra.mxu1 %vm7470_vm3, %v17957_v41  ;;  %v27896_v41 = vld [vmem:[#allocation37_spill] sm:$0xff] }
 0xa7f   :  { %21017 = vmatprep.mubr.msk.f32.mxu1 %vm7470_vm3, %v17958_v40  ;;  %v7670_v40 = vadd.f32 %v27896_v41, %v7026_v31  ;;  %v27903_v31 = vld [vmem:[#allocation32_spill] sm:$0xff] }
 0xa80   :  { %v7672_v7 = vadd.f32 %v27903_v31, %v7036_v2  ;;  %v27916_v31 = vld [vmem:[#allocation8_spill] sm:$0xff] }
 0xa81   :  { %v8423_v29 = vadd.f32 %v27900_v16, %v7670_v40  ;;  %v27910_v40 = vld [vmem:[#allocation18_spill] sm:$0xff] }
 0xa82   :  { %21018 = vmatmul.mubr.msk.f32.gmra.mxu1 %vm7470_vm3, %v17959_v36  ;;  %v26397_v36 = vpop.f32.mrf.mxu0  ;;  %v8425_v45 = vadd.f32 %v27907_v25, %v7672_v7 }
 0xa83   :  { %21020 = vmatprep.mubr.msk.f32.mxu1 %vm7470_vm3, %v17960_v38  ;;  %v27897_v38 = vld [vmem:[#allocation63_spill] sm:$0xff]  ;;  %v9176_v44 = vadd.f32 %v27904_v51, %v8423_v29  ;;  %v27913_v29 = vld [vmem:[#allocation76_spill] sm:$0xff] }
 0xa84   :  { %v26410_v0 = vpop.f32.mrf.mxu0 }
 0xa86   :  { %21021 = vmatmul.mubr.msk.f32.gmra.mxu1 %vm7470_vm3, %v17961_v30  ;;  %v9174_v30 = vadd.f32 %v27897_v38, %v8421_v60  ;;  %v21045_v41 = vpop.f32.mrf.mxu0  ;;  %v9178_v38 = vadd.f32 %v27910_v40, %v8425_v45  ;;  %v27920_v45 = vld [vmem:[#allocation104_spill] sm:$0xff] }
 0xa87   :  { %21023 = vmatprep.mubr.msk.f32.mxu1 %vm7470_vm3, %v17962_v9  ;;  %v27898_v9 = vld [vmem:[#allocation24_spill] sm:$0xff] }
 0xa88   :  { %v9927_v48 = vadd.f32 %v27901_v19, %v9174_v30  ;;  %v27911_v30 = vld [vmem:[#allocation95_spill] sm:$0xff] }
 0xa89   :  { %v27914_v19 = vld [vmem:[#allocation111_spill] sm:$0xff] }
 0xa8a   :  { %21024 = vmatmul.mubr.msk.f32.gmra.mxu1 %vm7470_vm3, %v17963_v27  ;;  %v10678_v27 = vadd.f32 %v27898_v9, %v9925_v52  ;;  %v10680_v26 = vadd.f32 %v27905_v49, %v9927_v48 }
 0xa8b   :  { %21074 = vmatprep.mubr.msk.f32.mxu1 %vm7115_vm2, %v25678_v21  ;;  %v18020_v21 = vld [vmem:[%s27172_s5 + $0x480] sm:$0xff] }
 0xa8c   :  { %21102 = vmatprep.mubr.msk.f32.mxu0 %vm7470_vm3, %v18020_v21  ;;  %v27899_v21 = vld [vmem:[#allocation121_spill] sm:$0xff]  ;;  %v11431_v54 = vadd.f32 %v27902_v24, %v10678_v27  ;;  %v27912_v27 = vld [vmem:[#allocation91_spill] sm:$0xff] }
 0xa8d   :  { %v12182_v35 = vadd.f32 %v27899_v21, %v11429_v42  ;;  %v27915_v24 = vld [vmem:[#allocation145_spill] sm:$0xff] }
 0xa8e   :  { %21075 = vmatmul.mubr.msk.f32.vlgmr.msra.gmra.mxu1 %vm7115_vm2, %v25686_v32  ;;  %v26280_v32 = vld [vmem:[%s27170_s3 + $0x50] sm:$0xff]  ;;  %v12184_v62 = vadd.f32 %v27906_v23, %v11431_v54 }
 0xa8f   :  { %21127 = vmatpush3.msra.mxu1 %v26164_v59  ;;  %21077 = vmatprep.mubr.msk.f32.mxu1 %vm7115_vm2, %v25691_v34  ;;  %v26288_v34 = vld [vmem:[%s27170_s3 + $0x58] sm:$0xff]  ;;  %v12935_v6 = vadd.f32 %v26066_v13, %v12182_v35  ;;  %v27908_v13 = vld [vmem:[#allocation85_spill] sm:$0xff] }
 0xa90   :  { %21128 = vmatprep.subr.mxu1 %v26170_v17  ;;  %v9929_v33 = vadd.f32 %v27908_v13, %v9176_v44  ;;  %v12937_v2 = vadd.f32 %v26073_v53, %v12184_v62  ;;  %v27919_v62 = vld [vmem:[#allocation109_spill] sm:$0xff] }
 0xa91   :  { %21129 = vmatpush3.msra.mxu1 %v26170_v17 }
 0xa92   :  { %21130 = vmatprep.subr.mxu1 %v26179_v15  ;;  %21078 = vmatmul.mubr.msk.f32.gmra.mxu1 %vm7115_vm2, %v25701_v63  ;;  %v26295_v63 = vld [vmem:[%s27170_s3 + $0x60] sm:$0xff]  ;;  %v10682_v9 = vadd.f32 %v27911_v30, %v9929_v33 }
 0xa93   :  { %21131 = vmatpush3.msra.mxu1 %v26179_v15  ;;  %21080 = vmatprep.mubr.msk.f32.mxu1 %vm7115_vm2, %v25707_v28  ;;  %v26302_v28 = vld [vmem:[%s27170_s3 + $0x68] sm:$0xff] }
 0xa94   :  { %21132 = vmatprep.subr.mxu1 %v26186_v46  ;;  %v11435_v48 = vadd.f32 %v27914_v19, %v10682_v9  ;;  %v27921_v33 = vld [vmem:[#allocation89_spill] sm:$0xff] }
 0xa95   :  { %21133 = vmatpush3.msra.mxu1 %v26186_v46 }
 0xa96   :  { %21146 = vmatprep.subr.mxu1 %v25860_v43  ;;  %21081 = vmatmul.mubr.msk.f32.gmra.mxu1 %vm7115_vm2, %v25719_v57  ;;  %v26309_v57 = vld [vmem:[%s27170_s3 + $0x70] sm:$0xff] }
 0xa97   :  { %21083 = vmatprep.mubr.msk.f32.mxu1 %vm7115_vm2, %v25725_v4  ;;  %v26316_v4 = vld [vmem:[%s27170_s3 + $0x78] sm:$0xff] }
 0xa9a   :  { %21084 = vmatmul.mubr.msk.f32.gmra.mxu1 %vm7115_vm2, %v25736_v10  ;;  %v26323_v10 = vld [vmem:[%s27170_s3] sm:$0xff] }
 0xa9b   :  { %21134 = vmatprep.mubr.msk.f32.mxu1 %vm7115_vm2, %v25741_v47  ;;  %v26330_v47 = vld [vmem:[%s27170_s3 + $0x8] sm:$0xff] }
 0xa9e   :  { %21135 = vmatmul.mubr.msk.f32.vlgmr.msra.gmra.mxu1 %vm7115_vm2, %v25750_v39  ;;  %v26337_v39 = vld [vmem:[%s27170_s3 + $0x10] sm:$0xff] }
 0xa9f   :  { %21147 = vmatpush3.msra.mxu1 %v25860_v43  ;;  %21137 = vmatprep.mubr.msk.f32.mxu1 %vm7115_vm2, %v26280_v32  ;;  %v26344_v43 = vld [vmem:[%s27170_s3 + $0x18] sm:$0xff] }
 0xaa0   :  { %21148 = vmatprep.subr.mxu1 %v25865_v5  ;;  %27879 = vst [vmem:[#allocation39_spill] sm:$0xff] %v26344_v43 }
 0xaa1   :  { %21149 = vmatpush3.msra.mxu1 %v25865_v5  ;;  %v26351_v5 = vld [vmem:[%s27170_s3 + $0x20] sm:$0xff] }
 0xaa2   :  { %21150 = vmatprep.subr.mxu1 %v25874_v56  ;;  %21138 = vmatmul.mubr.msk.f32.gmra.mxu1 %vm7115_vm2, %v26288_v34  ;;  %27880 = vst [vmem:[#allocation119_spill] sm:$0xff] %v26351_v5 }
 0xaa3   :  { %21151 = vmatpush3.msra.mxu1 %v25874_v56  ;;  %21140 = vmatprep.mubr.msk.f32.mxu1 %vm7115_vm2, %v26295_v63  ;;  %v26358_v56 = vld [vmem:[%s27170_s3 + $0x28] sm:$0xff] }
 0xaa4   :  { %21152 = vmatprep.subr.mxu1 %v25881_v20  ;;  %27881 = vst [vmem:[#allocation126_spill] sm:$0xff] %v26358_v56 }
 0xaa5   :  { %21153 = vmatpush3.msra.mxu1 %v25881_v20  ;;  %v26365_v20 = vld [vmem:[%s27170_s3 + $0x30] sm:$0xff] }
 0xaa6   :  { %21141 = vmatmul.mubr.msk.f32.gmra.mxu1 %vm7115_vm2, %v26302_v28  ;;  %27882 = vst [vmem:[#allocation38_spill] sm:$0xff] %v26365_v20 }
 0xaa7   :  { %21143 = vmatprep.mubr.msk.f32.mxu1 %vm7115_vm2, %v26309_v57 }
 0xaaa   :  { %21144 = vmatmul.mubr.msk.f32.gmra.mxu1 %vm7115_vm2, %v26316_v4 }
 0xaab   :  { %21154 = vmatprep.mubr.msk.f32.mxu1 %vm7115_vm2, %v26323_v10 }
 0xaae   :  { %21155 = vmatmul.mubr.msk.f32.vlgmr.msra.gmra.mxu1 %vm7115_vm2, %v26330_v47 }
 0xaaf   :  { %21157 = vmatprep.mubr.msk.f32.mxu1 %vm7115_vm2, %v26337_v39 }
 0xab2   :  { %21158 = vmatmul.mubr.msk.f32.gmra.mxu1 %vm7115_vm2, %v26344_v43 }
 0xab3   :  { %21160 = vmatprep.mubr.msk.f32.mxu1 %vm7115_vm2, %v26351_v5 }
 0xab6   :  { %21161 = vmatmul.mubr.msk.f32.gmra.mxu1 %vm7115_vm2, %v26358_v56 }
 0xab7   :  { %21163 = vmatprep.mubr.msk.f32.mxu1 %vm7115_vm2, %v26365_v20 }
 0xaba   :  { %21164 = vmatmul.mubr.msk.f32.gmra.mxu1 %vm7115_vm2, %v26372_v37 }
 0xb2e   :  { %v21004_v11 = vpop.f32.mrf.mxu1 }
 0xb2f   :  { %v26407_v12 = vadd.f32 %v21004_v11, %v26064_v8  ;;  %v27909_v8 = vld [vmem:[#allocation23_spill] sm:$0xff]  ;;  %v9931_v11 = vadd.f32 %v27913_v29, %v9178_v38  ;;  %v27927_v29 = vld [vmem:[#allocation105_spill] sm:$0xff] }
 0xb30   :  { %v13609_v18 = vpop.f32.mrf.mxu1  ;;  %v11433_v52 = vadd.f32 %v27909_v8, %v10680_v26  ;;  %v27918_v26 = vld [vmem:[#allocation115_spill] sm:$0xff] }
 0xb31   :  { %v26415_v55 = vadd.f32 %v13609_v18, %v12935_v6  ;;  %v13864_v6 = vpop.f32.mrf.mxu0  ;;  %v10684_v7 = vadd.f32 %v27916_v31, %v9931_v11  ;;  %v27917_v18 = vld [vmem:[#allocation87_spill] sm:$0xff]  ;;  %v27931_v31 = vld [vmem:[#allocation22_spill] sm:$0xff] }
 0xb32   :  { %v21007_v60 = vpop.f32.mrf.mxu1  ;;  %v12186_v21 = vadd.f32 %v27912_v27, %v11433_v52  ;;  %v12188_v51 = vadd.f32 %v27917_v18, %v11435_v48  ;;  %v27924_v38 = vld [vmem:[#allocation147_spill] sm:$0xff] }
 0xb33   :  { %v26422_v3 = vadd.f32 %v21007_v60, %v26071_v1  ;;  %v11437_v23 = vadd.f32 %v27918_v26, %v10684_v7 }
 0xb34   :  { %v13619_v42 = vpop.f32.mrf.mxu1  ;;  %v12939_v53 = vadd.f32 %v26079_v58, %v12186_v21  ;;  %v12941_v25 = vadd.f32 %v27919_v62, %v12188_v51  ;;  %v21056_v58 = vpop.f32.mrf.mxu0  ;;  %v27935_v62 = vld [vmem:[#allocation112_spill] sm:$0xff] }
 0xb35   :  { %v26427_v35 = vadd.f32 %v13619_v42, %v12937_v2  ;;  %v12190_v8 = vadd.f32 %v27921_v33, %v11437_v23  ;;  %v27923_v42 = vld [vmem:[#allocation118_spill] sm:$0xff]  ;;  %v27937_v33 = vld [vmem:[#allocation28_spill] sm:$0xff] }
 0xb36   :  { %v21010_v16 = vpop.f32.mrf.mxu1  ;;  %v13963_v9 = vpop.f32.mrf.mxu0 }
 0xb37   :  { %v26433_v1 = vadd.f32 %v21010_v16, %v27915_v24  ;;  %v12943_v40 = vadd.f32 %v27923_v42, %v12190_v8 }
 0xb38   :  { %v13629_v54 = vpop.f32.mrf.mxu1  ;;  %v21059_v19 = vpop.f32.mrf.mxu0 }
 0xb39   :  { %v26437_v44 = vadd.f32 %v13629_v54, %v12939_v53  ;;  %v27929_v53 = vld [vmem:[#allocation116_spill] sm:$0xff] }
 0xb3a   :  { %v21013_v49 = vpop.f32.mrf.mxu1  ;;  %v13973_v18 = vpop.f32.mrf.mxu0 }
 0xb3b   :  { %v26442_v60 = vadd.f32 %v21013_v49, %v27920_v45  ;;  %v27933_v49 = vld [vmem:[#allocation113_spill] sm:$0xff] }
 0xb3c   :  { %v13639_v13 = vpop.f32.mrf.mxu1  ;;  %v21062_v45 = vpop.f32.mrf.mxu0 }
 0xb3d   :  { %v26445_v52 = vadd.f32 %v13639_v13, %v12941_v25 }
 0xb3e   :  { %v21016_v2 = vpop.f32.mrf.mxu1  ;;  %v13983_v42 = vpop.f32.mrf.mxu0 }
 0xb3f   :  { %27922 = vst [vmem:[#allocation122_spill] sm:$0xff] %v26445_v52  ;;  %v26449_v30 = vadd.f32 %v21016_v2, %v27924_v38 }
 0xb40   :  { %v13649_v27 = vpop.f32.mrf.mxu1 }
 0xb41   :  { %27925 = vst [vmem:[#allocation127_spill] sm:$0xff] %v26449_v30  ;;  %v26451_v21 = vadd.f32 %v13649_v27, %v12943_v40  ;;  %v21065_v27 = vpop.f32.mrf.mxu0  ;;  %v27940_v30 = vld [vmem:[#allocation49_spill] sm:$0xff] }
 0xb42   :  { %v21019_v16 = vpop.f32.mrf.mxu1 }
 0xb43   :  { %27926 = vst [vmem:[#allocation42_spill] sm:$0xff] %v26451_v21  ;;  %v26454_v11 = vadd.f32 %v21019_v16, %v27927_v29 }
 0xb44   :  { %v13659_v48 = vpop.f32.mrf.mxu1 }
 0xb45   :  { %27928 = vst [vmem:[#allocation136_spill] sm:$0xff] %v26454_v11  ;;  %v26457_v24 = vadd.f32 %v13659_v48, %v27929_v53  ;;  %v13993_v48 = vpop.f32.mrf.mxu0  ;;  %v13974_v11 = vadd.f32 %v13973_v18, %v26388_v50  ;;  %v27945_v18 = vld [vmem:[#allocation57_spill] sm:$0xff] }
 0xb46   :  { %v21022_v54 = vpop.f32.mrf.mxu1 }
 0xb47   :  { %27930 = vst [vmem:[#allocation123_spill] sm:$0xff] %v26457_v24  ;;  %v26460_v7 = vadd.f32 %v21022_v54, %v27931_v31  ;;  %v13989_v54 = vadd.f32 %v21062_v45, %v26397_v36  ;;  %v13999_v31 = vadd.f32 %v21065_v27, %v21045_v41  ;;  %v27941_v41 = vld [vmem:[#allocation78_spill] sm:$0xff] }
 0xb48   :  { %v13669_v51 = vpop.f32.mrf.mxu1 }
 0xb49   :  { %27932 = vst [vmem:[#allocation43_spill] sm:$0xff] %v26460_v7  ;;  %v26463_v26 = vadd.f32 %v13669_v51, %v27933_v49  ;;  %v13984_v49 = vadd.f32 %v13983_v42, %v26410_v0  ;;  %v13969_v0 = vadd.f32 %v21056_v58, %v26376_v61  ;;  %v27942_v42 = vld [vmem:[#allocation15_spill] sm:$0xff] }
 0xb4a   :  { %v21025_v23 = vpop.f32.mrf.mxu1  ;;  %v27947_v58 = vld [vmem:[#allocation7_spill] sm:$0xff] }
 0xb4b   :  { %27934 = vst [vmem:[#allocation130_spill] sm:$0xff] %v26463_v26  ;;  %v26466_v25 = vadd.f32 %v21025_v23, %v27935_v62  ;;  %v13994_v23 = vadd.f32 %v13993_v48, %v13864_v6  ;;  %v27939_v26 = vld [vmem:[#allocation58_spill] sm:$0xff] }
 0xb4c   :  { %v13679_v13 = vpop.f32.mrf.mxu1 }
 0xb4d   :  { %27936 = vst [vmem:[#allocation137_spill] sm:$0xff] %v26466_v25  ;;  %v26469_v8 = vadd.f32 %v13679_v13, %v27937_v33  ;;  %v13979_v33 = vadd.f32 %v21059_v19, %v26382_v22  ;;  %v27943_v22 = vld [vmem:[#allocation181_spill] sm:$0xff]  ;;  %v27944_v19 = vld [vmem:[#allocation182_spill] sm:$0xff] }
 0xb4e   :  { %v21076_v2 = vpop.f32.mrf.mxu1  ;;  %v6348_v48 = vadd.f32 %v27944_v19, %v27943_v22 }
 0xb4f   :  { %27938 = vst [vmem:[#allocation135_spill] sm:$0xff] %v26469_v8  ;;  %v14144_v50 = vadd.f32 %v21076_v2, %v13969_v0 }
 0xb50   :  { %v14104_v40 = vpop.f32.mrf.mxu1 }
 0xb52   :  { %v21079_v38 = vpop.f32.mrf.mxu1 }
 0xb53   :  { %v14146_v21 = vadd.f32 %v21079_v38, %v13979_v33  ;;  %v27948_v38 = vld [vmem:[#allocation179_spill] sm:$0xff] }
 0xb54   :  { %v14114_v16 = vpop.f32.mrf.mxu1 }
 0xb55   :  { %v14145_v6 = vadd.f32 %v14114_v16, %v13974_v11  ;;  %v27949_v16 = vld [vmem:[#allocation180_spill] sm:$0xff] }
 0xb56   :  { %v21082_v29 = vpop.f32.mrf.mxu1 }
 0xb57   :  { %v14148_v62 = vadd.f32 %v21082_v29, %v13989_v54  ;;  %v14201_v11 = vadd.f32 %v27947_v58, %v14145_v6  ;;  %v27950_v54 = vld [vmem:[#allocation55_spill] sm:$0xff] }
 0xb58   :  { %v14124_v53 = vpop.f32.mrf.mxu1  ;;  %v18026_v58 = vld [vmem:[%s27172_s5 + $0x4b0] sm:$0xff] }
 0xb59   :  { %v14147_v8 = vadd.f32 %v14124_v53, %v13984_v49  ;;  %v14204_v52 = vadd.f32 %v27940_v30, %v14148_v62  ;;  %v6338_v53 = vadd.f32 %v27949_v16, %v27948_v38  ;;  %v27955_v62 = vld [vmem:[#allocation70_spill] sm:$0xff] }
 0xb5a   :  { %v21085_v51 = vpop.f32.mrf.mxu1  ;;  %v18029_v38 = vld [vmem:[%s27172_s5 + $0x4c8] sm:$0xff]  ;;  %v18030_v16 = vld [vmem:[%s27172_s5 + $0x4d0] sm:$0xff] }
 0xb5b   :  { %v14150_v25 = vadd.f32 %v21085_v51, %v13999_v31  ;;  %v14203_v27 = vadd.f32 %v27942_v42, %v14147_v8  ;;  %v14212_v30 = vmax.f32 %v14204_v52, 0.0  ;;  %v14200_v31 = vadd.f32 %v27950_v54, %v14144_v50  ;;  %v27953_v51 = vld [vmem:[#allocation12_spill] sm:$0xff]  ;;  %v18021_v42 = vld [vmem:[%s27172_s5 + $0x488] sm:$0xff] }
 0xb5c   :  { %v14134_v13 = vpop.f32.mrf.mxu1  ;;  %v18032_v54 = vld [vmem:[%s27172_s5 + $0x4e0] sm:$0xff] }
 0xb5d   :  { %v14206_v7 = vadd.f32 %v27939_v26, %v14150_v25  ;;  %v14149_v24 = vadd.f32 %v14134_v13, %v13994_v23  ;;  %v13964_v26 = vadd.f32 %v13963_v9, %v26378_v14  ;;  %v14202_v25 = vadd.f32 %v27945_v18, %v14146_v21  ;;  %v27951_v9 = vld [vmem:[#allocation183_spill] sm:$0xff]  ;;  %v27952_v21 = vld [vmem:[#allocation188_spill] sm:$0xff]  ;;  %v27954_v23 = vld [vmem:[#allocation186_spill] sm:$0xff] }
 0xb5e   :  { %v14211_v8 = vmax.f32 %v14203_v27, 0.0  ;;  %v6463_v52 = vadd.f32 %v27951_v9, %v6338_v53  ;;  %v6605_v13 = vadd.f32 %v27955_v62, %v27954_v23  ;;  %v14208_v33 = vmax.f32 %v14200_v31, 0.0  ;;  %v27958_v27 = vld [vmem:[#allocation184_spill] sm:$0xff]  ;;  %v18033_v31 = vld [vmem:[%s27172_s5 + $0x4e8] sm:$0xff]  ;;  %v26625_v23 = vld [vmem:[%s27170_s3 + $0xb0] sm:$0xff] }
 0xb5f   :  { %v14214_v36 = vmax.f32 %v14206_v7, 0.0  ;;  %v14205_v45 = vadd.f32 %v27941_v41, %v14149_v24  ;;  %v27946_v24 = vld [vmem:[#allocation187_spill] sm:$0xff]  ;;  %v14143_v61 = vadd.f32 %v14104_v40, %v13964_v26  ;;  %v14210_v14 = vmax.f32 %v14202_v25, 0.0  ;;  %v27960_v26 = vld [vmem:[#allocation81_spill] sm:$0xff] }
 0xb60   :  { %v6465_v7 = vadd.f32 %v27946_v24, %v6348_v48  ;;  %v14209_v40 = vmax.f32 %v14201_v11, 0.0  ;;  %v26501_v19 = vmax.f32 %v6605_v13, 0.0  ;;  %v18022_v48 = vld [vmem:[%s27172_s5 + $0x490] sm:$0xff]  ;;  %v18023_v25 = vld [vmem:[%s27172_s5 + $0x498] sm:$0xff]  ;;  %v18024_v24 = vld [vmem:[%s27172_s5 + $0x4a0] sm:$0xff] }
 0xb61   :  { %v14213_v29 = vmax.f32 %v14205_v45, 0.0  ;;  %21086 = vmatprep.subr.mxu0 %v14214_v36  ;;  %v14199_v49 = vadd.f32 %v27953_v51, %v14143_v61  ;;  %v27957_v45 = vld [vmem:[#allocation27_spill] sm:$0xff]  ;;  %v18025_v61 = vld [vmem:[%s27172_s5 + $0x4a8] sm:$0xff]  ;;  %v26641_v13 = vld [vmem:[%s27170_s3 + $0x40] sm:$0xff] }
 0xb62   :  { %21087 = vmatpush3.msra.mxu0 %v14214_v36  ;;  %v6576_v2 = vadd.f32 %v27952_v21, %v6465_v7  ;;  %v27956_v36 = vld [vmem:[#allocation185_spill] sm:$0xff]  ;;  %v18027_v11 = vld [vmem:[%s27172_s5 + $0x4b8] sm:$0xff] }
 0xb63   :  { %21088 = vmatprep.subr.mxu0 %v14213_v29  ;;  %v6574_v41 = vadd.f32 %v27956_v36, %v6463_v52  ;;  %v14207_v6 = vmax.f32 %v14199_v49, 0.0  ;;  %v18031_v53 = vld [vmem:[%s27172_s5 + $0x4d8] sm:$0xff]  ;;  %v26578_v52 = vld [vmem:[%s27170_s3 + $0x80] sm:$0xff]  ;;  %v26586_v21 = vld [vmem:[%s27170_s3 + $0x88] sm:$0xff] }
 0xb64   :  { %21089 = vmatpush3.msra.mxu0 %v14213_v29  ;;  %v6604_v0 = vadd.f32 %v27957_v45, %v6576_v2  ;;  %v27959_v29 = vld [vmem:[#allocation54_spill] sm:$0xff]  ;;  %v18035_v9 = vld [vmem:[%s27172_s5 + $0x4f8] sm:$0xff]  ;;  %v26607_v49 = vld [vmem:[%s27170_s3 + $0xa0] sm:$0xff] }
 0xb65   :  { %21090 = vmatprep.subr.mxu0 %v14212_v30  ;;  %v6603_v22 = vadd.f32 %v27959_v29, %v27958_v27  ;;  %v6602_v50 = vadd.f32 %v27960_v26, %v6574_v41  ;;  %v26591_v2 = vld [vmem:[%s27170_s3 + $0x90] sm:$0xff]  ;;  %v26601_v51 = vld [vmem:[%s27170_s3 + $0x98] sm:$0xff] }
 0xb66   :  { %21091 = vmatpush3.msra.mxu0 %v14212_v30  ;;  %v26507_v18 = vmax.f32 %v6604_v0, 0.0  ;;  %v26636_v62 = vld [vmem:[%s27170_s3 + $0xb8] sm:$0xff] }
 0xb67   :  { %21092 = vmatprep.subr.mxu0 %v14211_v8  ;;  %v26516_v30 = vmax.f32 %v6603_v22, 0.0  ;;  %v26523_v7 = vmax.f32 %v6602_v50, 0.0 }
 0xb68   :  { %21093 = vmatpush3.msra.mxu0 %v14211_v8  ;;  %v18028_v8 = vld [vmem:[%s27172_s5 + $0x4c0] sm:$0xff] }
 0xb69   :  { %21094 = vmatprep.subr.mxu0 %v14210_v14 }
 0xb6a   :  { %21095 = vmatpush3.msra.mxu0 %v14210_v14  ;;  %v18034_v14 = vld [vmem:[%s27172_s5 + $0x4f0] sm:$0xff] }
 0xb6b   :  { %21096 = vmatprep.subr.mxu0 %v14209_v40 }
 0xb6c   :  { %21097 = vmatpush3.msra.mxu0 %v14209_v40  ;;  %v26619_v40 = vld [vmem:[%s27170_s3 + $0xa8] sm:$0xff] }
 0xb6d   :  { %21098 = vmatprep.subr.mxu0 %v14208_v33 }
 0xb6e   :  { %21099 = vmatpush3.msra.mxu0 %v14208_v33  ;;  %v26650_v33 = vld [vmem:[%s27170_s3 + $0x48] sm:$0xff] }
 0xb6f   :  { %21100 = vmatprep.subr.mxu0 %v14207_v6 }
 0xb70   :  { %21101 = vmatpush3.msra.mxu0 %v14207_v6 }
 0xb71   :  { %21103 = vmatmul.mubr.msk.f32.vlgmr.msra.gmra.mxu0 %vm7470_vm3, %v18021_v42  ;;  %21166 = vmatprep.subr.mxu0 %v26501_v19 }
 0xb72   :  { %21167 = vmatpush3.msra.mxu0 %v26501_v19  ;;  %21105 = vmatprep.mubr.msk.f32.mxu0 %vm7470_vm3, %v18022_v48 }
 0xb73   :  { %21168 = vmatprep.subr.mxu0 %v26507_v18 }
 0xb74   :  { %21169 = vmatpush3.msra.mxu0 %v26507_v18 }
 0xb75   :  { %21106 = vmatmul.mubr.msk.f32.gmra.mxu0 %vm7470_vm3, %v18023_v25  ;;  %21170 = vmatprep.subr.mxu0 %v26516_v30 }
 0xb76   :  { %21171 = vmatpush3.msra.mxu0 %v26516_v30  ;;  %21108 = vmatprep.mubr.msk.f32.mxu0 %vm7470_vm3, %v18024_v24 }
 0xb77   :  { %21172 = vmatprep.subr.mxu0 %v26523_v7 }
 0xb78   :  { %21173 = vmatpush3.msra.mxu0 %v26523_v7 }
 0xb79   :  { %21109 = vmatmul.mubr.msk.f32.gmra.mxu0 %vm7470_vm3, %v18025_v61  ;;  %21226 = vmatprep.subr.mxu0 %v26501_v19 }
 0xb7a   :  { %21111 = vmatprep.mubr.msk.f32.mxu0 %vm7470_vm3, %v18026_v58 }
 0xb7d   :  { %21112 = vmatmul.mubr.msk.f32.gmra.mxu0 %vm7470_vm3, %v18027_v11 }
 0xb7e   :  { %21114 = vmatprep.mubr.msk.f32.mxu0 %vm7470_vm3, %v18028_v8 }
 0xb81   :  { %21115 = vmatmul.mubr.msk.f32.gmra.mxu0 %vm7470_vm3, %v18029_v38  ;;  %v27968_v38 = vld [vmem:[#allocation122_spill] sm:$0xff] }
 0xb82   :  { %21117 = vmatprep.mubr.msk.f32.mxu0 %vm7470_vm3, %v18030_v16 }
 0xb85   :  { %21118 = vmatmul.mubr.msk.f32.gmra.mxu0 %vm7470_vm3, %v18031_v53  ;;  %v27970_v53 = vld [vmem:[#allocation127_spill] sm:$0xff] }
 0xb86   :  { %21120 = vmatprep.mubr.msk.f32.mxu0 %vm7470_vm3, %v18032_v54 }
 0xb89   :  { %21121 = vmatmul.mubr.msk.f32.gmra.mxu0 %vm7470_vm3, %v18033_v31 }
 0xb8a   :  { %21123 = vmatprep.mubr.msk.f32.mxu0 %vm7470_vm3, %v18034_v14  ;;  %v27972_v14 = vld [vmem:[#allocation42_spill] sm:$0xff] }
 0xb8d   :  { %21124 = vmatmul.mubr.msk.f32.gmra.mxu0 %vm7470_vm3, %v18035_v9 }
 0xb8e   :  { %21174 = vmatprep.mubr.msk.f32.mxu0 %vm7115_vm2, %v26578_v52 }
 0xb91   :  { %21175 = vmatmul.mubr.msk.f32.vlgmr.msra.gmra.mxu0 %vm7115_vm2, %v26586_v21 }
 0xb92   :  { %21227 = vmatpush3.msra.mxu0 %v26501_v19  ;;  %21177 = vmatprep.mubr.msk.f32.mxu0 %vm7115_vm2, %v26591_v2 }
 0xb93   :  { %21228 = vmatprep.subr.mxu0 %v26507_v18 }
 0xb94   :  { %21229 = vmatpush3.msra.mxu0 %v26507_v18 }
 0xb95   :  { %21230 = vmatprep.subr.mxu0 %v26516_v30  ;;  %21178 = vmatmul.mubr.msk.f32.gmra.mxu0 %vm7115_vm2, %v26601_v51 }
 0xb96   :  { %21231 = vmatpush3.msra.mxu0 %v26516_v30  ;;  %21180 = vmatprep.mubr.msk.f32.mxu0 %vm7115_vm2, %v26607_v49 }
 0xb97   :  { %21232 = vmatprep.subr.mxu0 %v26523_v7 }
 0xb98   :  { %21233 = vmatpush3.msra.mxu0 %v26523_v7 }
 0xb99   :  { %21246 = vmatprep.subr.mxu0 %v26164_v59  ;;  %21181 = vmatmul.mubr.msk.f32.gmra.mxu0 %vm7115_vm2, %v26619_v40 }
 0xb9a   :  { %21183 = vmatprep.mubr.msk.f32.mxu0 %vm7115_vm2, %v26625_v23 }
 0xb9d   :  { %21184 = vmatmul.mubr.msk.f32.gmra.mxu0 %vm7115_vm2, %v26636_v62 }
 0xb9e   :  { %21234 = vmatprep.mubr.msk.f32.mxu0 %vm7115_vm2, %v26641_v13 }
 0xba1   :  { %21235 = vmatmul.mubr.msk.f32.vlgmr.msra.gmra.mxu0 %vm7115_vm2, %v26650_v33 }
 0xba2   :  { %21247 = vmatpush3.msra.mxu0 %v26164_v59  ;;  %21237 = vmatprep.mubr.msk.f32.mxu0 %vm7115_vm2, %v26280_v32  ;;  %v18092_v59 = vld [vmem:[%s27172_s5 + $0x500] sm:$0xff] }
 0xba3   :  { %21248 = vmatprep.subr.mxu0 %v26170_v17  ;;  %21202 = vmatprep.mubr.msk.f32.mxu1 %vm7470_vm3, %v18092_v59  ;;  %v27974_v59 = vld [vmem:[#allocation136_spill] sm:$0xff] }
 0xba4   :  { %21249 = vmatpush3.msra.mxu0 %v26170_v17  ;;  %v26693_v17 = vpop.f32.mrf.mxu1 }
 0xba5   :  { %21250 = vmatprep.subr.mxu0 %v26179_v15  ;;  %21238 = vmatmul.mubr.msk.f32.gmra.mxu0 %vm7115_vm2, %v26288_v34 }
 0xba6   :  { %21251 = vmatpush3.msra.mxu0 %v26179_v15  ;;  %21240 = vmatprep.mubr.msk.f32.mxu0 %vm7115_vm2, %v26295_v63  ;;  %v26695_v15 = vpop.f32.mrf.mxu1 }
 0xba7   :  { %21252 = vmatprep.subr.mxu0 %v26186_v46 }
 0xba8   :  { %21253 = vmatpush3.msra.mxu0 %v26186_v46  ;;  %v21139_v46 = vpop.f32.mrf.mxu1 }
 0xba9   :  { %21241 = vmatmul.mubr.msk.f32.gmra.mxu0 %vm7115_vm2, %v26302_v28 }
 0xbaa   :  { %21243 = vmatprep.mubr.msk.f32.mxu0 %vm7115_vm2, %v26309_v57  ;;  %v26697_v36 = vpop.f32.mrf.mxu1 }
 0xbac   :  { %v21142_v41 = vpop.f32.mrf.mxu1 }
 0xbad   :  { %21244 = vmatmul.mubr.msk.f32.gmra.mxu0 %vm7115_vm2, %v26316_v4 }
 0xbae   :  { %21254 = vmatprep.mubr.msk.f32.mxu0 %vm7115_vm2, %v26323_v10  ;;  %v14607_v42 = vpop.f32.mrf.mxu1 }
 0xbb0   :  { %v21145_v26 = vpop.f32.mrf.mxu1 }
 0xbb1   :  { %21255 = vmatmul.mubr.msk.f32.vlgmr.msra.gmra.mxu0 %vm7115_vm2, %v26330_v47 }
 0xbb2   :  { %21257 = vmatprep.mubr.msk.f32.mxu0 %vm7115_vm2, %v26337_v39  ;;  %v14617_v61 = vpop.f32.mrf.mxu1 }
 0xbb5   :  { %21258 = vmatmul.mubr.msk.f32.gmra.mxu0 %vm7115_vm2, %v26344_v43  ;;  %v27988_v43 = vld [vmem:[#allocation84_spill] sm:$0xff] }
 0xbb6   :  { %21260 = vmatprep.mubr.msk.f32.mxu0 %vm7115_vm2, %v26351_v5 }
 0xbb9   :  { %21261 = vmatmul.mubr.msk.f32.gmra.mxu0 %vm7115_vm2, %v26358_v56 }
 0xbba   :  { %21263 = vmatprep.mubr.msk.f32.mxu0 %vm7115_vm2, %v26365_v20  ;;  %v27987_v20 = vld [vmem:[#allocation74_spill] sm:$0xff] }
 0xbbd   :  { %21264 = vmatmul.mubr.msk.f32.gmra.mxu0 %vm7115_vm2, %v26372_v37 }
 0xc31   :  { %v21104_v45 = vpop.f32.mrf.mxu0 }
 0xc32   :  { %v26700_v0 = vadd.f32 %v21104_v45, %v26407_v12 }
 0xc33   :  { %v14362_v6 = vpop.f32.mrf.mxu0 }
 0xc34   :  { %27961 = vst [vmem:[#allocation47_spill] sm:$0xff] %v26700_v0  ;;  %v26703_v27 = vadd.f32 %v14362_v6, %v26415_v55 }
 0xc35   :  { %v21107_v29 = vpop.f32.mrf.mxu0 }
 0xc36   :  { %27962 = vst [vmem:[#allocation131_spill] sm:$0xff] %v26703_v27  ;;  %v26706_v22 = vadd.f32 %v21107_v29, %v26422_v3  ;;  %v21156_v3 = vpop.f32.mrf.mxu1  ;;  %v27976_v29 = vld [vmem:[#allocation123_spill] sm:$0xff] }
 0xc37   :  { %v14372_v48 = vpop.f32.mrf.mxu0 }
 0xc38   :  { %27963 = vst [vmem:[#allocation133_spill] sm:$0xff] %v26706_v22  ;;  %v26709_v50 = vadd.f32 %v14372_v48, %v26427_v35 }
 0xc39   :  { %v21110_v25 = vpop.f32.mrf.mxu0 }
 0xc3a   :  { %27964 = vst [vmem:[#allocation50_spill] sm:$0xff] %v26709_v50  ;;  %v26712_v24 = vadd.f32 %v21110_v25, %v26433_v1  ;;  %v14716_v1 = vpop.f32.mrf.mxu1 }
 0xc3b   :  { %v14382_v12 = vpop.f32.mrf.mxu0 }
 0xc3c   :  { %27965 = vst [vmem:[#allocation107_spill] sm:$0xff] %v26712_v24  ;;  %v26715_v58 = vadd.f32 %v14382_v12, %v26437_v44  ;;  %v27978_v12 = vld [vmem:[#allocation43_spill] sm:$0xff] }
 0xc3d   :  { %v21113_v55 = vpop.f32.mrf.mxu0 }
 0xc3e   :  { %27966 = vst [vmem:[#allocation82_spill] sm:$0xff] %v26715_v58  ;;  %v26718_v11 = vadd.f32 %v21113_v55, %v26442_v60  ;;  %v21159_v60 = vpop.f32.mrf.mxu1 }
 0xc3f   :  { %v14392_v8 = vpop.f32.mrf.mxu0  ;;  %v14732_v22 = vadd.f32 %v21159_v60, %v21139_v46  ;;  %v14717_v46 = vadd.f32 %v14716_v1, %v26695_v15  ;;  %v27995_v15 = vld [vmem:[#allocation196_spill] sm:$0xff]  ;;  %v27997_v60 = vld [vmem:[#allocation189_spill] sm:$0xff] }
 0xc40   :  { %27967 = vst [vmem:[#allocation110_spill] sm:$0xff] %v26718_v11  ;;  %v26721_v16 = vadd.f32 %v14392_v8, %v27968_v38  ;;  %v14726_v8 = vpop.f32.mrf.mxu1 }
 0xc41   :  { %v21116_v35 = vpop.f32.mrf.mxu0  ;;  %v14727_v0 = vadd.f32 %v14726_v8, %v26697_v36 }
 0xc42   :  { %27969 = vst [vmem:[#allocation5_spill] sm:$0xff] %v26721_v16  ;;  %v26724_v54 = vadd.f32 %v21116_v35, %v27970_v53  ;;  %v27980_v35 = vld [vmem:[#allocation130_spill] sm:$0xff] }
 0xc43   :  { %v14402_v31 = vpop.f32.mrf.mxu0 }
 0xc44   :  { %27971 = vst [vmem:[#allocation83_spill] sm:$0xff] %v26724_v54  ;;  %v26727_v9 = vadd.f32 %v14402_v31, %v27972_v14  ;;  %v27982_v14 = vld [vmem:[#allocation137_spill] sm:$0xff] }
 0xc45   :  { %v21119_v44 = vpop.f32.mrf.mxu0 }
 0xc46   :  { %27973 = vst [vmem:[#allocation92_spill] sm:$0xff] %v26727_v9  ;;  %v26730_v45 = vadd.f32 %v21119_v44, %v27974_v59  ;;  %v21162_v44 = vpop.f32.mrf.mxu1 }
 0xc47   :  { %v14412_v6 = vpop.f32.mrf.mxu0 }
 0xc48   :  { %27975 = vst [vmem:[#allocation197_spill] sm:$0xff] %v26730_v45  ;;  %v26733_v48 = vadd.f32 %v14412_v6, %v27976_v29  ;;  %v27984_v45 = vld [vmem:[#allocation135_spill] sm:$0xff]  ;;  %v14736_v29 = vpop.f32.mrf.mxu1 }
 0xc49   :  { %v21122_v25 = vpop.f32.mrf.mxu0  ;;  %v14737_v24 = vadd.f32 %v14736_v29, %v14607_v42 }
 0xc4a   :  { %27977 = vst [vmem:[#allocation201_spill] sm:$0xff] %v26733_v48  ;;  %v26736_v55 = vadd.f32 %v21122_v25, %v27978_v12  ;;  %v21165_v25 = vpop.f32.mrf.mxu1 }
 0xc4b   :  { %v14422_v38 = vpop.f32.mrf.mxu0 }
 0xc4c   :  { %27979 = vst [vmem:[#allocation144_spill] sm:$0xff] %v26736_v55  ;;  %v26739_v53 = vadd.f32 %v14422_v38, %v27980_v35  ;;  %v14746_v11 = vpop.f32.mrf.mxu1  ;;  %v14742_v38 = vadd.f32 %v21162_v44, %v21142_v41  ;;  %v14752_v35 = vadd.f32 %v21165_v25, %v21145_v26  ;;  %v14722_v26 = vadd.f32 %v21156_v3, %v26693_v17  ;;  %v27992_v17 = vld [vmem:[#allocation191_spill] sm:$0xff]  ;;  %v27994_v3 = vld [vmem:[#allocation150_spill] sm:$0xff]  ;;  %v28000_v44 = vld [vmem:[#allocation153_spill] sm:$0xff] }
 0xc4d   :  { %v21125_v31 = vpop.f32.mrf.mxu0  ;;  %v28001_v25 = vld [vmem:[#allocation193_spill] sm:$0xff] }
 0xc4e   :  { %27981 = vst [vmem:[#allocation146_spill] sm:$0xff] %v26739_v53  ;;  %v26742_v9 = vadd.f32 %v21125_v31, %v27982_v14  ;;  %v14747_v31 = vadd.f32 %v14746_v11, %v14617_v61  ;;  %v27989_v61 = vld [vmem:[#allocation77_spill] sm:$0xff] }
 0xc4f   :  { %v14432_v59 = vpop.f32.mrf.mxu0 }
 0xc50   :  { %27983 = vst [vmem:[#allocation151_spill] sm:$0xff] %v26742_v9  ;;  %v26745_v54 = vadd.f32 %v14432_v59, %v27984_v45  ;;  %v27986_v59 = vld [vmem:[#allocation71_spill] sm:$0xff] }
 0xc51   :  { %v21176_v6 = vpop.f32.mrf.mxu0 }
 0xc52   :  { %27985 = vst [vmem:[#allocation203_spill] sm:$0xff] %v26745_v54 }
 0xc53   :  { %v14857_v48 = vpop.f32.mrf.mxu0 }
 0xc55   :  { %v21179_v16 = vpop.f32.mrf.mxu0 }
 0xc56   :  { %v14899_v37 = vadd.f32 %v21179_v16, %v14732_v22  ;;  %v27991_v22 = vld [vmem:[#allocation10_spill] sm:$0xff] }
 0xc57   :  { %v14867_v12 = vpop.f32.mrf.mxu0 }
 0xc58   :  { %v14898_v42 = vadd.f32 %v14867_v12, %v14727_v0  ;;  %v27993_v0 = vld [vmem:[#allocation194_spill] sm:$0xff] }
 0xc59   :  { %v21182_v55 = vpop.f32.mrf.mxu0 }
 0xc5a   :  { %v14901_v14 = vadd.f32 %v21182_v55, %v14742_v38  ;;  %v14954_v16 = vadd.f32 %v27991_v22, %v14898_v42  ;;  %v28002_v38 = vld [vmem:[#allocation134_spill] sm:$0xff]  ;;  %v18099_v22 = vld [vmem:[%s27172_s5 + $0x538] sm:$0xff] }
 0xc5b   :  { %v14877_v58 = vpop.f32.mrf.mxu0  ;;  %v18094_v42 = vld [vmem:[%s27172_s5 + $0x510] sm:$0xff] }
 0xc5c   :  { %v14900_v45 = vadd.f32 %v14877_v58, %v14737_v24  ;;  %v14957_v56 = vadd.f32 %v27987_v20, %v14901_v14  ;;  %v14897_v24 = vadd.f32 %v21176_v6, %v14722_v26  ;;  %v14896_v20 = vadd.f32 %v14857_v48, %v14717_v46  ;;  %v27998_v48 = vld [vmem:[#allocation190_spill] sm:$0xff]  ;;  %v18095_v46 = vld [vmem:[%s27172_s5 + $0x518] sm:$0xff] }
 0xc5d   :  { %v21185_v53 = vpop.f32.mrf.mxu0  ;;  %v6811_v8 = vadd.f32 %v27998_v48, %v27997_v60  ;;  %v18093_v14 = vld [vmem:[%s27172_s5 + $0x508] sm:$0xff] }
 0xc5e   :  { %v14903_v9 = vadd.f32 %v21185_v53, %v14752_v35  ;;  %v14956_v11 = vadd.f32 %v27989_v61, %v14900_v45  ;;  %v14965_v36 = vmax.f32 %v14957_v56, 0.0  ;;  %v27999_v53 = vld [vmem:[#allocation195_spill] sm:$0xff]  ;;  %v28003_v45 = vld [vmem:[#allocation192_spill] sm:$0xff] }
 0xc5f   :  { %v14887_v50 = vpop.f32.mrf.mxu0  ;;  %v6967_v6 = vadd.f32 %v28000_v44, %v27999_v53  ;;  %v6936_v12 = vadd.f32 %v28001_v25, %v6811_v8  ;;  %v28005_v61 = vld [vmem:[#allocation139_spill] sm:$0xff]  ;;  %v28016_v8 = vld [vmem:[#allocation82_spill] sm:$0xff] }
 0xc60   :  { %v14959_v54 = vadd.f32 %v27986_v59, %v14903_v9  ;;  %v14902_v27 = vadd.f32 %v14887_v50, %v14747_v31  ;;  %v27990_v50 = vld [vmem:[#allocation34_spill] sm:$0xff]  ;;  %v14962_v9 = vmax.f32 %v14954_v16, 0.0  ;;  %v18100_v16 = vld [vmem:[%s27172_s5 + $0x540] sm:$0xff] }
 0xc61   :  { %v14955_v58 = vadd.f32 %v27990_v50, %v14899_v37  ;;  %v27996_v37 = vld [vmem:[#allocation72_spill] sm:$0xff]  ;;  %v28004_v59 = vld [vmem:[#allocation154_spill] sm:$0xff]  ;;  %v6971_v26 = vmax.f32 %v6967_v6, 0.0 }
 0xc62   :  { %v14967_v5 = vmax.f32 %v14959_v54, 0.0  ;;  %v14958_v41 = vadd.f32 %v27988_v43, %v14902_v27  ;;  %v14964_v43 = vmax.f32 %v14956_v11, 0.0  ;;  %v6821_v27 = vadd.f32 %v27993_v0, %v27992_v17  ;;  %v18096_v50 = vld [vmem:[%s27172_s5 + $0x520] sm:$0xff]  ;;  %v18102_v17 = vld [vmem:[%s27172_s5 + $0x550] sm:$0xff]  ;;  %v18103_v0 = vld [vmem:[%s27172_s5 + $0x558] sm:$0xff] }
 0xc63   :  { %v14953_v54 = vadd.f32 %v27994_v3, %v14897_v24  ;;  %v14952_v56 = vadd.f32 %v27996_v37, %v14896_v20  ;;  %v6964_v11 = vadd.f32 %v28005_v61, %v6936_v12  ;;  %v18098_v20 = vld [vmem:[%s27172_s5 + $0x530] sm:$0xff]  ;;  %v18105_v3 = vld [vmem:[%s27172_s5 + $0x568] sm:$0xff] }
 0xc64   :  { %v14966_v55 = vmax.f32 %v14958_v41, 0.0  ;;  %21186 = vmatprep.subr.mxu1 %v14967_v5  ;;  %v6938_v1 = vadd.f32 %v27995_v15, %v6821_v27  ;;  %v6965_v41 = vadd.f32 %v28004_v59, %v28003_v45  ;;  %v18104_v27 = vld [vmem:[%s27172_s5 + $0x560] sm:$0xff]  ;;  %v28014_v15 = vld [vmem:[#allocation50_spill] sm:$0xff] }
 0xc65   :  { %21187 = vmatpush3.msra.mxu1 %v14967_v5  ;;  %v14963_v5 = vmax.f32 %v14955_v58, 0.0  ;;  %v14961_v29 = vmax.f32 %v14953_v54, 0.0  ;;  %v14960_v31 = vmax.f32 %v14952_v56, 0.0  ;;  %v6968_v58 = vmax.f32 %v6964_v11, 0.0  ;;  %v18106_v54 = vld [vmem:[%s27172_s5 + $0x570] sm:$0xff]  ;;  %v28021_v11 = vld [vmem:[#allocation197_spill] sm:$0xff] }
 0xc66   :  { %21188 = vmatprep.subr.mxu1 %v14966_v55  ;;  %v6966_v35 = vadd.f32 %v28002_v38, %v6938_v1  ;;  %v6969_v24 = vmax.f32 %v6965_v41, 0.0  ;;  %v28015_v56 = vld [vmem:[#allocation107_spill] sm:$0xff]  ;;  %v28017_v6 = vld [vmem:[#allocation110_spill] sm:$0xff]  ;;  %v28018_v38 = vld [vmem:[#allocation5_spill] sm:$0xff] }
 0xc67   :  { %21189 = vmatpush3.msra.mxu1 %v14966_v55 }
 0xc68   :  { %21190 = vmatprep.subr.mxu1 %v14965_v36  ;;  %v6970_v55 = vmax.f32 %v6966_v35, 0.0 }
 0xc69   :  { %21191 = vmatpush3.msra.mxu1 %v14965_v36  ;;  %v18097_v36 = vld [vmem:[%s27172_s5 + $0x528] sm:$0xff] }
 0xc6a   :  { %21192 = vmatprep.subr.mxu1 %v14964_v43 }
 0xc6b   :  { %21193 = vmatpush3.msra.mxu1 %v14964_v43  ;;  %v18101_v43 = vld [vmem:[%s27172_s5 + $0x548] sm:$0xff] }
 0xc6c   :  { %21194 = vmatprep.subr.mxu1 %v14963_v5 }
 0xc6d   :  { %21195 = vmatpush3.msra.mxu1 %v14963_v5  ;;  %v18107_v5 = vld [vmem:[%s27172_s5 + $0x578] sm:$0xff] }
 0xc6e   :  { %21196 = vmatprep.subr.mxu1 %v14962_v9 }
 0xc6f   :  { %21197 = vmatpush3.msra.mxu1 %v14962_v9 }
 0xc70   :  { %21198 = vmatprep.subr.mxu1 %v14961_v29 }
 0xc71   :  { %21199 = vmatpush3.msra.mxu1 %v14961_v29 }
 0xc72   :  { %21200 = vmatprep.subr.mxu1 %v14960_v31 }
 0xc73   :  { %21201 = vmatpush3.msra.mxu1 %v14960_v31 }
 0xc74   :  { %21203 = vmatmul.mubr.msk.f32.vlgmr.msra.gmra.mxu1 %vm7470_vm3, %v18093_v14  ;;  %21266 = vmatprep.subr.mxu1 %v6971_v26  ;;  %v28019_v14 = vld [vmem:[#allocation83_spill] sm:$0xff] }
 0xc75   :  { %21267 = vmatpush3.msra.mxu1 %v6971_v26  ;;  %21205 = vmatprep.mubr.msk.f32.mxu1 %vm7470_vm3, %v18094_v42 }
 0xc76   :  { %21268 = vmatprep.subr.mxu1 %v6970_v55 }
 0xc77   :  { %21269 = vmatpush3.msra.mxu1 %v6970_v55 }
 0xc78   :  { %21206 = vmatmul.mubr.msk.f32.gmra.mxu1 %vm7470_vm3, %v18095_v46  ;;  %21270 = vmatprep.subr.mxu1 %v6969_v24 }
 0xc79   :  { %21271 = vmatpush3.msra.mxu1 %v6969_v24  ;;  %21208 = vmatprep.mubr.msk.f32.mxu1 %vm7470_vm3, %v18096_v50  ;;  %v28022_v50 = vld [vmem:[#allocation201_spill] sm:$0xff] }
 0xc7a   :  { %21272 = vmatprep.subr.mxu1 %v6968_v58 }
 0xc7b   :  { %21273 = vmatpush3.msra.mxu1 %v6968_v58 }
 0xc7c   :  { %21209 = vmatmul.mubr.msk.f32.gmra.mxu1 %vm7470_vm3, %v18097_v36  ;;  %21326 = vmatprep.subr.mxu1 %v6971_v26 }
 0xc7d   :  { %21211 = vmatprep.mubr.msk.f32.mxu1 %vm7470_vm3, %v18098_v20  ;;  %v28023_v20 = vld [vmem:[#allocation144_spill] sm:$0xff] }
 0xc80   :  { %21212 = vmatmul.mubr.msk.f32.gmra.mxu1 %vm7470_vm3, %v18099_v22 }
 0xc81   :  { %21214 = vmatprep.mubr.msk.f32.mxu1 %vm7470_vm3, %v18100_v16 }
 0xc84   :  { %21215 = vmatmul.mubr.msk.f32.gmra.mxu1 %vm7470_vm3, %v18101_v43 }
 0xc85   :  { %21217 = vmatprep.mubr.msk.f32.mxu1 %vm7470_vm3, %v18102_v17  ;;  %v28024_v17 = vld [vmem:[#allocation146_spill] sm:$0xff] }
 0xc88   :  { %21218 = vmatmul.mubr.msk.f32.gmra.mxu1 %vm7470_vm3, %v18103_v0 }
 0xc89   :  { %21220 = vmatprep.mubr.msk.f32.mxu1 %vm7470_vm3, %v18104_v27 }
 0xc8c   :  { %21221 = vmatmul.mubr.msk.f32.gmra.mxu1 %vm7470_vm3, %v18105_v3  ;;  %v28025_v3 = vld [vmem:[#allocation151_spill] sm:$0xff] }
 0xc8d   :  { %21223 = vmatprep.mubr.msk.f32.mxu1 %vm7470_vm3, %v18106_v54 }
 0xc90   :  { %21224 = vmatmul.mubr.msk.f32.gmra.mxu1 %vm7470_vm3, %v18107_v5 }
 0xc91   :  { %21274 = vmatprep.mubr.msk.f32.mxu1 %vm7115_vm2, %v26578_v52 }
 0xc94   :  { %21275 = vmatmul.mubr.msk.f32.vlgmr.msra.gmra.mxu1 %vm7115_vm2, %v26586_v21 }
 0xc95   :  { %21327 = vmatpush3.msra.mxu1 %v6971_v26  ;;  %21277 = vmatprep.mubr.msk.f32.mxu1 %vm7115_vm2, %v26591_v2  ;;  %v28020_v26 = vld [vmem:[#allocation92_spill] sm:$0xff] }
 0xc96   :  { %21328 = vmatprep.subr.mxu1 %v6970_v55 }
 0xc97   :  { %21329 = vmatpush3.msra.mxu1 %v6970_v55 }
 0xc98   :  { %21330 = vmatprep.subr.mxu1 %v6969_v24  ;;  %21278 = vmatmul.mubr.msk.f32.gmra.mxu1 %vm7115_vm2, %v26601_v51  ;;  %v28012_v51 = vld [vmem:[#allocation131_spill] sm:$0xff] }
 0xc99   :  { %21331 = vmatpush3.msra.mxu1 %v6969_v24  ;;  %21280 = vmatprep.mubr.msk.f32.mxu1 %vm7115_vm2, %v26607_v49 }
 0xc9a   :  { %21332 = vmatprep.subr.mxu1 %v6968_v58 }
 0xc9b   :  { %21333 = vmatpush3.msra.mxu1 %v6968_v58 }
 0xc9c   :  { %21346 = vmatprep.subr.mxu1 %v26501_v19  ;;  %21281 = vmatmul.mubr.msk.f32.gmra.mxu1 %vm7115_vm2, %v26619_v40 }
 0xc9d   :  { %21283 = vmatprep.mubr.msk.f32.mxu1 %vm7115_vm2, %v26625_v23  ;;  %v28013_v23 = vld [vmem:[#allocation133_spill] sm:$0xff] }
 0xca0   :  { %21284 = vmatmul.mubr.msk.f32.gmra.mxu1 %vm7115_vm2, %v26636_v62 }
 0xca1   :  { %21334 = vmatprep.mubr.msk.f32.mxu1 %vm7115_vm2, %v26641_v13 }
 0xca4   :  { %21335 = vmatmul.mubr.msk.f32.vlgmr.msra.gmra.mxu1 %vm7115_vm2, %v26650_v33 }
 0xca5   :  { %21347 = vmatpush3.msra.mxu1 %v26501_v19  ;;  %21337 = vmatprep.mubr.msk.f32.mxu1 %vm7115_vm2, %v26280_v32  ;;  %v28006_v32 = vld [vmem:[#allocation39_spill] sm:$0xff] }
 0xca6   :  { %21348 = vmatprep.subr.mxu1 %v26507_v18 }
 0xca7   :  { %21349 = vmatpush3.msra.mxu1 %v26507_v18 }
 0xca8   :  { %21350 = vmatprep.subr.mxu1 %v26516_v30  ;;  %21338 = vmatmul.mubr.msk.f32.gmra.mxu1 %vm7115_vm2, %v26288_v34  ;;  %v28007_v34 = vld [vmem:[#allocation119_spill] sm:$0xff] }
 0xca9   :  { %21351 = vmatpush3.msra.mxu1 %v26516_v30  ;;  %21340 = vmatprep.mubr.msk.f32.mxu1 %vm7115_vm2, %v26295_v63  ;;  %v28008_v63 = vld [vmem:[#allocation126_spill] sm:$0xff] }
 0xcaa   :  { %21352 = vmatprep.subr.mxu1 %v26523_v7 }
 0xcab   :  { %21353 = vmatpush3.msra.mxu1 %v26523_v7  ;;  %v28011_v7 = vld [vmem:[#allocation47_spill] sm:$0xff] }
 0xcac   :  { %21341 = vmatmul.mubr.msk.f32.gmra.mxu1 %vm7115_vm2, %v26302_v28  ;;  %v28009_v28 = vld [vmem:[#allocation38_spill] sm:$0xff] }
 0xcad   :  { %21343 = vmatprep.mubr.msk.f32.mxu1 %vm7115_vm2, %v26309_v57  ;;  %v28010_v57 = vld [vmem:[#allocation114_spill] sm:$0xff] }
 0xcb0   :  { %21344 = vmatmul.mubr.msk.f32.gmra.mxu1 %vm7115_vm2, %v26316_v4  ;;  %v18164_v4 = vld [vmem:[%s27172_s5 + $0x580] sm:$0xff] }
 0xcb1   :  { %21354 = vmatprep.mubr.msk.f32.mxu1 %vm7115_vm2, %v26323_v10  ;;  %21302 = vmatprep.mubr.msk.f32.mxu0 %vm7470_vm3, %v18164_v4  ;;  %v26890_v10 = vpop.f32.mrf.mxu0 }
 0xcb4   :  { %21355 = vmatmul.mubr.msk.f32.vlgmr.msra.gmra.mxu1 %vm7115_vm2, %v26330_v47  ;;  %v26892_v47 = vpop.f32.mrf.mxu0 }
 0xcb5   :  { %21357 = vmatprep.mubr.msk.f32.mxu1 %vm7115_vm2, %v26337_v39 }
 0xcb6   :  { %v21239_v39 = vpop.f32.mrf.mxu0 }
 0xcb8   :  { %21358 = vmatmul.mubr.msk.f32.gmra.mxu1 %vm7115_vm2, %v28006_v32  ;;  %v26894_v19 = vpop.f32.mrf.mxu0 }
 0xcb9   :  { %21360 = vmatprep.mubr.msk.f32.mxu1 %vm7115_vm2, %v28007_v34  ;;  %v28026_v34 = vld [vmem:[#allocation203_spill] sm:$0xff] }
 0xcba   :  { %v21242_v18 = vpop.f32.mrf.mxu0 }
 0xcbc   :  { %21361 = vmatmul.mubr.msk.f32.gmra.mxu1 %vm7115_vm2, %v28008_v63  ;;  %v15360_v2 = vpop.f32.mrf.mxu0 }
 0xcbd   :  { %21363 = vmatprep.mubr.msk.f32.mxu1 %vm7115_vm2, %v28009_v28 }
 0xcbe   :  { %v21245_v33 = vpop.f32.mrf.mxu0 }
 0xcc0   :  { %21364 = vmatmul.mubr.msk.f32.gmra.mxu1 %vm7115_vm2, %v28010_v57  ;;  %v15370_v48 = vpop.f32.mrf.mxu0 }
 0xcc2   :  { %v21256_v12 = vpop.f32.mrf.mxu0 }
 0xcc4   :  { %v15469_v41 = vpop.f32.mrf.mxu0 }
 0xcc6   :  { %v21259_v24 = vpop.f32.mrf.mxu0 }
 0xcc8   :  { %v15479_v43 = vpop.f32.mrf.mxu0 }
 0xcca   :  { %v21262_v32 = vpop.f32.mrf.mxu0 }
 0xccc   :  { %v15489_v4 = vpop.f32.mrf.mxu0 }
 0xd34   :  { %v21204_v30 = vpop.f32.mrf.mxu1 }
 0xd35   :  { %v26897_v52 = vadd.f32 %v21204_v30, %v28011_v7 }
 0xd36   :  { %v15115_v21 = vpop.f32.mrf.mxu1 }
 0xd37   :  { %v26900_v49 = vadd.f32 %v15115_v21, %v28012_v51  ;;  %v21265_v21 = vpop.f32.mrf.mxu0 }
 0xd38   :  { %v21207_v40 = vpop.f32.mrf.mxu1 }
 0xd39   :  { %v26903_v62 = vadd.f32 %v21207_v40, %v28013_v23  ;;  %v15499_v40 = vpop.f32.mrf.mxu0 }
 0xd3a   :  { %v15125_v13 = vpop.f32.mrf.mxu1 }
 0xd3b   :  { %v26906_v1 = vadd.f32 %v15125_v13, %v28014_v15  ;;  %v15495_v13 = vadd.f32 %v21262_v32, %v21242_v18  ;;  %v15505_v15 = vadd.f32 %v21265_v21, %v21245_v33  ;;  %v28029_v33 = vld [vmem:[#allocation138_spill] sm:$0xff] }
 0xd3c   :  { %v21210_v37 = vpop.f32.mrf.mxu1 }
 0xd3d   :  { %v26909_v9 = vadd.f32 %v21210_v37, %v28015_v56  ;;  %v15490_v56 = vadd.f32 %v15489_v4, %v15360_v2  ;;  %v28032_v4 = vld [vmem:[#allocation101_spill] sm:$0xff] }
 0xd3e   :  { %v15135_v60 = vpop.f32.mrf.mxu1 }
 0xd3f   :  { %v26912_v53 = vadd.f32 %v15135_v60, %v28016_v8  ;;  %v15500_v8 = vadd.f32 %v15499_v40, %v15370_v48  ;;  %v15475_v48 = vadd.f32 %v21256_v12, %v26890_v10 }
 0xd40   :  { %v21213_v44 = vpop.f32.mrf.mxu1 }
 0xd41   :  { %v26915_v29 = vadd.f32 %v21213_v44, %v28017_v6 }
 0xd42   :  { %v15145_v25 = vpop.f32.mrf.mxu1 }
 0xd43   :  { %v26918_v35 = vadd.f32 %v15145_v25, %v28018_v38  ;;  %v15485_v25 = vadd.f32 %v21259_v24, %v21239_v39  ;;  %v28030_v39 = vld [vmem:[#allocation100_spill] sm:$0xff] }
 0xd44   :  { %v21216_v31 = vpop.f32.mrf.mxu1 }
 0xd45   :  { %v26921_v45 = vadd.f32 %v21216_v31, %v28019_v14  ;;  %v28027_v31 = vld [vmem:[#allocation155_spill] sm:$0xff] }
 0xd46   :  { %v15155_v59 = vpop.f32.mrf.mxu1 }
 0xd47   :  { %v26924_v42 = vadd.f32 %v15155_v59, %v28020_v26  ;;  %v15480_v26 = vadd.f32 %v15479_v43, %v26894_v19  ;;  %v15470_v19 = vadd.f32 %v15469_v41, %v26892_v47  ;;  %v28034_v41 = vld [vmem:[#allocation142_spill] sm:$0xff] }
 0xd48   :  { %v21219_v61 = vpop.f32.mrf.mxu1 }
 0xd49   :  { %v26927_v55 = vadd.f32 %v21219_v61, %v28021_v11 }
 0xd4a   :  { %v15165_v46 = vpop.f32.mrf.mxu1 }
 0xd4b   :  { %v26930_v58 = vadd.f32 %v15165_v46, %v28022_v50  ;;  %v28028_v46 = vld [vmem:[#allocation159_spill] sm:$0xff] }
 0xd4c   :  { %v21222_v36 = vpop.f32.mrf.mxu1 }
 0xd4d   :  { %v26933_v22 = vadd.f32 %v21222_v36, %v28023_v20 }
 0xd4e   :  { %v15175_v16 = vpop.f32.mrf.mxu1 }
 0xd4f   :  { %v26936_v0 = vadd.f32 %v15175_v16, %v28024_v17 }
 0xd50   :  { %v21225_v27 = vpop.f32.mrf.mxu1 }
 0xd51   :  { %v26939_v54 = vadd.f32 %v21225_v27, %v28025_v3  ;;  %v28031_v27 = vld [vmem:[#allocation160_spill] sm:$0xff] }
 0xd52   :  { %v15185_v5 = vpop.f32.mrf.mxu1 }
 0xd53   :  { %v26942_v63 = vadd.f32 %v15185_v5, %v28026_v34 }
 0xd54   :  { %v21276_v28 = vpop.f32.mrf.mxu1 }
 0xd55   :  { %v15650_v43 = vadd.f32 %v21276_v28, %v15475_v48 }
 0xd56   :  { %v15610_v57 = vpop.f32.mrf.mxu1 }
 0xd57   :  { %v15649_v34 = vadd.f32 %v15610_v57, %v15470_v19 }
 0xd58   :  { %v21279_v30 = vpop.f32.mrf.mxu1 }
 0xd59   :  { %v15652_v11 = vadd.f32 %v21279_v30, %v15485_v25  ;;  %v15705_v28 = vadd.f32 %v28034_v41, %v15649_v34  ;;  %v18168_v25 = vld [vmem:[%s27172_s5 + $0x5a0] sm:$0xff] }
 0xd5a   :  { %v15620_v7 = vpop.f32.mrf.mxu1 }
 0xd5b   :  { %v15651_v20 = vadd.f32 %v15620_v7, %v15480_v26  ;;  %v15708_v3 = vadd.f32 %v28031_v27, %v15652_v11  ;;  %v28033_v7 = vld [vmem:[#allocation162_spill] sm:$0xff] }
 0xd5c   :  { %v21282_v51 = vpop.f32.mrf.mxu1  ;;  %v15706_v21 = vadd.f32 %v28033_v7, %v15650_v43  ;;  %v28036_v43 = vld [vmem:[#allocation166_spill] sm:$0xff] }
 0xd5d   :  { %v15654_v60 = vadd.f32 %v21282_v51, %v15495_v13  ;;  %v15707_v10 = vadd.f32 %v28032_v4, %v15651_v20  ;;  %v15716_v51 = vmax.f32 %v15708_v3, 0.0  ;;  %v28035_v20 = vld [vmem:[#allocation165_spill] sm:$0xff]  ;;  %v18174_v4 = vld [vmem:[%s27172_s5 + $0x5d0] sm:$0xff] }
 0xd5e   :  { %v15630_v23 = vpop.f32.mrf.mxu1  ;;  %v15714_v13 = vmax.f32 %v15706_v21, 0.0 }
 0xd5f   :  { %v15653_v38 = vadd.f32 %v15630_v23, %v15490_v56  ;;  %v15710_v50 = vadd.f32 %v28028_v46, %v15654_v60  ;;  %v15715_v40 = vmax.f32 %v15707_v10, 0.0  ;;  %v18165_v56 = vld [vmem:[%s27172_s5 + $0x588] sm:$0xff]  ;;  %v18166_v60 = vld [vmem:[%s27172_s5 + $0x590] sm:$0xff]  ;;  %v18171_v46 = vld [vmem:[%s27172_s5 + $0x5b8] sm:$0xff] }
 0xd60   :  { %v21285_v37 = vpop.f32.mrf.mxu1 }
 0xd61   :  { %v15656_v44 = vadd.f32 %v21285_v37, %v15505_v15  ;;  %v15709_v24 = vadd.f32 %v28030_v39, %v15653_v38  ;;  %v15718_v5 = vmax.f32 %v15710_v50, 0.0  ;;  %v15713_v15 = vmax.f32 %v15705_v28, 0.0 }
 0xd62   :  { %v15640_v6 = vpop.f32.mrf.mxu1 }
 0xd63   :  { %v15712_v14 = vadd.f32 %v28027_v31, %v15656_v44  ;;  %v15655_v59 = vadd.f32 %v15640_v6, %v15500_v8  ;;  %v15717_v12 = vmax.f32 %v15709_v24, 0.0  ;;  %v18167_v6 = vld [vmem:[%s27172_s5 + $0x598] sm:$0xff] }
 0xd64   :  { %v26946_v61 = vpop.f32.mrf.mxu1 }
 0xd65   :  { %v15720_v18 = vmax.f32 %v15712_v14, 0.0  ;;  %v15711_v36 = vadd.f32 %v28029_v33, %v15655_v59  ;;  %v18169_v14 = vld [vmem:[%s27172_s5 + $0x5a8] sm:$0xff]  ;;  %v18170_v59 = vld [vmem:[%s27172_s5 + $0x5b0] sm:$0xff]  ;;  %v18172_v33 = vld [vmem:[%s27172_s5 + $0x5c0] sm:$0xff] }
 0xd66   :  { %v26950_v2 = vpop.f32.mrf.mxu1 }
 0xd67   :  { %v15719_v16 = vmax.f32 %v15711_v36, 0.0  ;;  %21286 = vmatprep.subr.mxu0 %v15720_v18 }
 0xd68   :  { %21287 = vmatpush3.msra.mxu0 %v15720_v18  ;;  %v26954_v17 = vpop.f32.mrf.mxu1 }
 0xd69   :  { %21288 = vmatprep.subr.mxu0 %v15719_v16 }
 0xd6a   :  { %21289 = vmatpush3.msra.mxu0 %v15719_v16  ;;  %v16103_v32 = vpop.f32.mrf.mxu1  ;;  %v18173_v16 = vld [vmem:[%s27172_s5 + $0x5c8] sm:$0xff] }
 0xd6b   :  { %21290 = vmatprep.subr.mxu0 %v15718_v5 }
 0xd6c   :  { %21291 = vmatpush3.msra.mxu0 %v15718_v5  ;;  %v21342_v30 = vpop.f32.mrf.mxu1  ;;  %v28037_v5 = vld [vmem:[#allocation108_spill] sm:$0xff] }
 0xd6d   :  { %21292 = vmatprep.subr.mxu0 %v15717_v12 }
 0xd6e   :  { %21293 = vmatpush3.msra.mxu0 %v15717_v12  ;;  %v16113_v47 = vpop.f32.mrf.mxu1  ;;  %v28038_v12 = vld [vmem:[#allocation143_spill] sm:$0xff] }
 0xd6f   :  { %21294 = vmatprep.subr.mxu0 %v15716_v51 }
 0xd70   :  { %21295 = vmatpush3.msra.mxu0 %v15716_v51  ;;  %v21345_v23 = vpop.f32.mrf.mxu1  ;;  %v28039_v51 = vld [vmem:[#allocation167_spill] sm:$0xff] }
 0xd71   :  { %21296 = vmatprep.subr.mxu0 %v15715_v40 }
 0xd72   :  { %21297 = vmatpush3.msra.mxu0 %v15715_v40  ;;  %v16123_v57 = vpop.f32.mrf.mxu1  ;;  %v28040_v40 = vld [vmem:[#allocation96_spill] sm:$0xff] }
 0xd73   :  { %21298 = vmatprep.subr.mxu0 %v15714_v13 }
 0xd74   :  { %21299 = vmatpush3.msra.mxu0 %v15714_v13  ;;  %v21356_v37 = vpop.f32.mrf.mxu1 }
 0xd75   :  { %21300 = vmatprep.subr.mxu0 %v15713_v15  ;;  %v16228_v21 = vadd.f32 %v21356_v37, %v26946_v61  ;;  %v18177_v61 = vld [vmem:[%s27172_s5 + $0x5e8] sm:$0xff] }
 0xd76   :  { %21301 = vmatpush3.msra.mxu0 %v15713_v15  ;;  %v16222_v8 = vpop.f32.mrf.mxu1 }
 0xd77   :  { %21303 = vmatmul.mubr.msk.f32.vlgmr.msra.gmra.mxu0 %vm7470_vm3, %v18165_v56  ;;  %v16223_v28 = vadd.f32 %v16222_v8, %v26950_v2  ;;  %v18178_v2 = vld [vmem:[%s27172_s5 + $0x5f0] sm:$0xff]  ;;  %v28042_v56 = vld [vmem:[#allocation97_spill] sm:$0xff] }
 0xd78   :  { %v21359_v44 = vpop.f32.mrf.mxu1  ;;  %21305 = vmatprep.mubr.msk.f32.mxu0 %vm7470_vm3, %v18166_v60 }
 0xd79   :  { %v16238_v19 = vadd.f32 %v21359_v44, %v26954_v17  ;;  %v18175_v17 = vld [vmem:[%s27172_s5 + $0x5d8] sm:$0xff]  ;;  %v16309_v60 = vadd.f32 %v28042_v56, %v16223_v28 }
 0xd7a   :  { %v16232_v38 = vpop.f32.mrf.mxu1  ;;  %v18179_v44 = vld [vmem:[%s27172_s5 + $0x5f8] sm:$0xff] }
 0xd7b   :  { %21306 = vmatmul.mubr.msk.f32.gmra.mxu0 %vm7470_vm3, %v18167_v6  ;;  %v16233_v10 = vadd.f32 %v16232_v38, %v16103_v32  ;;  %v18176_v32 = vld [vmem:[%s27172_s5 + $0x5e0] sm:$0xff]  ;;  %v16317_v38 = vmax.f32 %v16309_v60, 0.0 }
 0xd7c   :  { %v21362_v31 = vpop.f32.mrf.mxu1  ;;  %21308 = vmatprep.mubr.msk.f32.mxu0 %vm7470_vm3, %v18168_v25  ;;  %v18220_v25 = vld [vmem:[%s27172_s5 + $0x600] sm:$0xff] }
 0xd7d   :  { %v16248_v50 = vadd.f32 %v21362_v31, %v21342_v30  ;;  %v18221_v31 = vld [vmem:[%s27172_s5 + $0x608] sm:$0xff] }
 0xd7e   :  { %v16242_v26 = vpop.f32.mrf.mxu1 }
 0xd7f   :  { %21309 = vmatmul.mubr.msk.f32.gmra.mxu0 %vm7470_vm3, %v18169_v14  ;;  %v16243_v48 = vadd.f32 %v16242_v26, %v16113_v47  ;;  %v16314_v27 = vadd.f32 %v28036_v43, %v16248_v50  ;;  %v16312_v47 = vadd.f32 %v28039_v51, %v16238_v19  ;;  %v18222_v14 = vld [vmem:[%s27172_s5 + $0x610] sm:$0xff]  ;;  %v18224_v26 = vld [vmem:[%s27172_s5 + $0x620] sm:$0xff]  ;;  %v18227_v50 = vld [vmem:[%s27172_s5 + $0x638] sm:$0xff]  ;;  %v21447_v19 = vmov 0.0  }
 0xd80   :  { %v21365_v11 = vpop.f32.mrf.mxu1  ;;  %21311 = vmatprep.mubr.msk.f32.mxu0 %vm7470_vm3, %v18170_v59  ;;  %v18223_v59 = vld [vmem:[%s27172_s5 + $0x618] sm:$0xff]  ;;  %21406 = vmatprep.subr.mxu1 %v21447_v19 }
 0xd81   :  { %v16258_v18 = vadd.f32 %v21365_v11, %v21345_v23  ;;  %v16313_v30 = vadd.f32 %v28038_v12, %v16243_v48  ;;  %v16322_v41 = vmax.f32 %v16314_v27, 0.0  ;;  %v16311_v23 = vadd.f32 %v28040_v40, %v16233_v10  ;;  %v18225_v11 = vld [vmem:[%s27172_s5 + $0x628] sm:$0xff]  ;;  %v18231_v48 = vld [vmem:[%s27172_s5 + $0x658] sm:$0xff]  ;;  %21438 = vmatprep.mubr.msk.f32.mxu1 %vm21448_vm4, %v21447_v19 }
 0xd82   :  { %v16252_v36 = vpop.f32.mrf.mxu1  ;;  %v16320_v37 = vmax.f32 %v16312_v47, 0.0 }
 0xd83   :  { %v16316_v39 = vadd.f32 %v28035_v20, %v16258_v18  ;;  %v16253_v24 = vadd.f32 %v16252_v36, %v16123_v57  ;;  %21312 = vmatmul.mubr.msk.f32.gmra.mxu0 %vm7470_vm3, %v18171_v46  ;;  %v16321_v13 = vmax.f32 %v16313_v30, 0.0  ;;  %v28041_v57 = vld [vmem:[#allocation170_spill] sm:$0xff]  ;;  %v16319_v8 = vmax.f32 %v16311_v23, 0.0  ;;  %v18228_v18 = vld [vmem:[%s27172_s5 + $0x640] sm:$0xff] }
 0xd84   :  { %21314 = vmatprep.mubr.msk.f32.mxu0 %vm7470_vm3, %v18172_v33  ;;  %v16310_v15 = vadd.f32 %v28041_v57, %v16228_v21  ;;  %v18226_v46 = vld [vmem:[%s27172_s5 + $0x630] sm:$0xff]  ;;  %v18229_v33 = vld [vmem:[%s27172_s5 + $0x648] sm:$0xff]  ;;  %v18232_v20 = vld [vmem:[%s27172_s5 + $0x660] sm:$0xff] }
 0xd85   :  { %v16324_v3 = vmax.f32 %v16316_v39, 0.0  ;;  %v16315_v34 = vadd.f32 %v28037_v5, %v16253_v24  ;;  %v18230_v36 = vld [vmem:[%s27172_s5 + $0x650] sm:$0xff]  ;;  %v18233_v39 = vld [vmem:[%s27172_s5 + $0x668] sm:$0xff] }
 0xd86   :  { %v16318_v6 = vmax.f32 %v16310_v15, 0.0  ;;  %v18234_v24 = vld [vmem:[%s27172_s5 + $0x670] sm:$0xff] }
 0xd87   :  { %v16323_v7 = vmax.f32 %v16315_v34, 0.0  ;;  %21315 = vmatmul.mubr.msk.f32.gmra.mxu0 %vm7470_vm3, %v18173_v16  ;;  %21366 = vmatprep.subr.mxu0 %v16324_v3  ;;  %v18235_v16 = vld [vmem:[%s27172_s5 + $0x678] sm:$0xff] }
 0xd88   :  { %21367 = vmatpush3.msra.mxu0 %v16324_v3  ;;  %21317 = vmatprep.mubr.msk.f32.mxu0 %vm7470_vm3, %v18174_v4 }
 0xd89   :  { %21368 = vmatprep.subr.mxu0 %v16323_v7 }
 0xd8a   :  { %21369 = vmatpush3.msra.mxu0 %v16323_v7 }
 0xd8b   :  { %21318 = vmatmul.mubr.msk.f32.gmra.mxu0 %vm7470_vm3, %v18175_v17  ;;  %21370 = vmatprep.subr.mxu0 %v16322_v41 }
 0xd8c   :  { %21371 = vmatpush3.msra.mxu0 %v16322_v41  ;;  %21320 = vmatprep.mubr.msk.f32.mxu0 %vm7470_vm3, %v18176_v32 }
 0xd8d   :  { %21372 = vmatprep.subr.mxu0 %v16321_v13 }
 0xd8e   :  { %21373 = vmatpush3.msra.mxu0 %v16321_v13 }
 0xd8f   :  { %21321 = vmatmul.mubr.msk.f32.gmra.mxu0 %vm7470_vm3, %v18177_v61  ;;  %21374 = vmatprep.subr.mxu0 %v16320_v37 }
 0xd90   :  { %21375 = vmatpush3.msra.mxu0 %v16320_v37  ;;  %21323 = vmatprep.mubr.msk.f32.mxu0 %vm7470_vm3, %v18178_v2 }
 0xd91   :  { %21376 = vmatprep.subr.mxu0 %v16319_v8 }
 0xd92   :  { %21377 = vmatpush3.msra.mxu0 %v16319_v8 }
 0xd93   :  { %21324 = vmatmul.mubr.msk.f32.gmra.mxu0 %vm7470_vm3, %v18179_v44  ;;  %21378 = vmatprep.subr.mxu0 %v16318_v6 }
 0xd94   :  { %21379 = vmatpush3.msra.mxu0 %v16318_v6  ;;  %21382 = vmatprep.mubr.msk.f32.mxu0 %vm7470_vm3, %v18220_v25 }
 0xd95   :  { %21380 = vmatprep.subr.mxu0 %v16317_v38 }
 0xd96   :  { %21381 = vmatpush3.msra.mxu0 %v16317_v38 }
 0xd97   :  { %21383 = vmatmul.mubr.msk.f32.vlgmr.msra.gmra.mxu0 %vm7470_vm3, %v18221_v31 }
 0xd98   :  { %21385 = vmatprep.mubr.msk.f32.mxu0 %vm7470_vm3, %v18222_v14 }
 0xd9b   :  { %21386 = vmatmul.mubr.msk.f32.gmra.mxu0 %vm7470_vm3, %v18223_v59 }
 0xd9c   :  { %21388 = vmatprep.mubr.msk.f32.mxu0 %vm7470_vm3, %v18224_v26 }
 0xd9f   :  { %21389 = vmatmul.mubr.msk.f32.gmra.mxu0 %vm7470_vm3, %v18225_v11 }
 0xda0   :  { %21391 = vmatprep.mubr.msk.f32.mxu0 %vm7470_vm3, %v18226_v46 }
 0xda3   :  { %21392 = vmatmul.mubr.msk.f32.gmra.mxu0 %vm7470_vm3, %v18227_v50 }
 0xda4   :  { %21394 = vmatprep.mubr.msk.f32.mxu0 %vm7470_vm3, %v18228_v18 }
 0xda7   :  { %21395 = vmatmul.mubr.msk.f32.gmra.mxu0 %vm7470_vm3, %v18229_v33 }
 0xda8   :  { %21397 = vmatprep.mubr.msk.f32.mxu0 %vm7470_vm3, %v18230_v36 }
 0xdab   :  { %21398 = vmatmul.mubr.msk.f32.gmra.mxu0 %vm7470_vm3, %v18231_v48 }
 0xdac   :  { %21400 = vmatprep.mubr.msk.f32.mxu0 %vm7470_vm3, %v18232_v20 }
 0xdaf   :  { %21401 = vmatmul.mubr.msk.f32.gmra.mxu0 %vm7470_vm3, %v18233_v39 }
 0xdb0   :  { %21403 = vmatprep.mubr.msk.f32.mxu0 %vm7470_vm3, %v18234_v24 }
 0xdb3   :  { %21404 = vmatmul.mubr.msk.f32.gmra.mxu0 %vm7470_vm3, %v18235_v16 }
 0xe37   :  { %v21304_v43 = vpop.f32.mrf.mxu0 }
 0xe38   :  { %v27099_v27 = vadd.f32 %v21304_v43, %v26897_v52 }
 0xe39   :  { %v15868_v3 = vpop.f32.mrf.mxu0 }
 0xe3a   :  { %v27102_v5 = vadd.f32 %v15868_v3, %v26900_v49 }
 0xe3b   :  { %v21307_v34 = vpop.f32.mrf.mxu0 }
 0xe3c   :  { %v27105_v4 = vadd.f32 %v21307_v34, %v26903_v62 }
 0xe3d   :  { %v15878_v10 = vpop.f32.mrf.mxu0 }
 0xe3e   :  { %v27108_v12 = vadd.f32 %v15878_v10, %v26906_v1 }
 0xe3f   :  { %v21310_v30 = vpop.f32.mrf.mxu0 }
 0xe40   :  { %v27111_v7 = vadd.f32 %v21310_v30, %v26909_v9 }
 0xe41   :  { %v15888_v17 = vpop.f32.mrf.mxu0 }
 0xe42   :  { %v27114_v52 = vadd.f32 %v15888_v17, %v26912_v53 }
 0xe43   :  { %v21313_v21 = vpop.f32.mrf.mxu0 }
 0xe45   :  { %v15898_v51 = vpop.f32.mrf.mxu0 }
 0xe47   :  { %v21316_v49 = vpop.f32.mrf.mxu0 }
 0xe49   :  { %v15908_v47 = vpop.f32.mrf.mxu0 }
 0xe4b   :  { %v21319_v41 = vpop.f32.mrf.mxu0 }
 0xe4c   :  { %v15958_v33 = vadd.f32 %v21319_v41, %v26927_v55  ;;  %v15955_v55 = vadd.f32 %v15908_v47, %v26924_v42 }
 0xe4d   :  { %v15918_v32 = vpop.f32.mrf.mxu0 }
 0xe4f   :  { %v21322_v62 = vpop.f32.mrf.mxu0 }
 0xe50   :  { %v15960_v31 = vadd.f32 %v21322_v62, %v26933_v22 }
 0xe51   :  { %v15928_v28 = vpop.f32.mrf.mxu0 }
 0xe52   :  { %v15959_v11 = vadd.f32 %v15928_v28, %v26936_v0  ;;  %v16622_v28 = vlaneseq }
 0xe53   :  { %v21325_v40 = vpop.f32.mrf.mxu0 }
 0xe54   :  { %v15962_v25 = vadd.f32 %v21325_v40, %v26939_v54  ;;  %v15957_v54 = vadd.f32 %v15918_v32, %v26930_v58  ;;  %v15954_v58 = vadd.f32 %v21313_v21, %v26915_v29 }
 0xe55   :  { %v15938_v23 = vpop.f32.mrf.mxu0 }
 0xe56   :  { %v15961_v14 = vadd.f32 %v15938_v23, %v26942_v63  ;;  %v15956_v63 = vadd.f32 %v21316_v49, %v26921_v45  ;;  %v15953_v45 = vadd.f32 %v15898_v51, %v26918_v35  ;;  %v16620_v23 = vpop.permute.xlu0 %16619 }
 0xe57   :  { %v27116_v1 = vpop.f32.mrf.mxu0 }
 0xe59   :  { %v27118_v13 = vpop.f32.mrf.mxu0 }
 0xe5b   :  { %v27120_v9 = vpop.f32.mrf.mxu0 }
 0xe5c   :  { %v16554_v35 = vadd.f32 %v27120_v9, %v27105_v4  ;;  %v16551_v4 = vadd.f32 %v27118_v13, %v27102_v5  ;;  %v16623_v5 = vshrl.u32 %v16622_v28, 7 }
 0xe5d   :  { %v27122_v61 = vpop.f32.mrf.mxu0 }
 0xe5e   :  { %v16602_v41 = vmax.f32 %v16554_v35, 0.0  ;;  %v16624_v40 = vsub.s32 0, %v16623_v5 }
 0xe5f   :  { %v21390_v53 = vpop.f32.mrf.mxu0 }
 0xe60   :  { %v16556_v17 = vadd.f32 %v21390_v53, %v27111_v7  ;;  %v16553_v7 = vadd.f32 %v27122_v61, %v27108_v12  ;;  %v16599_v12 = vmax.f32 %v16551_v4, 0.0 }
 0xe61   :  { %v16492_v57 = vpop.f32.mrf.mxu0 }
 0xe62   :  { %v16555_v21 = vadd.f32 %v16492_v57, %v27114_v52  ;;  %v16604_v51 = vmax.f32 %v16556_v17, 0.0  ;;  %v16552_v52 = vadd.f32 %v27116_v1, %v27099_v27  ;;  %v16601_v32 = vmax.f32 %v16553_v7, 0.0  ;;  %v16615_v27 = vld [vmem:[%s27173_s7] sm:$0x1] }
 0xe63   :  { %v21393_v15 = vpop.f32.mrf.mxu0  ;;  %v16625_v1 = vrot.slane %v16620_v23, %v16624_v40 }
 0xe64   :  { %v16558_v34 = vadd.f32 %v21393_v15, %v15954_v58  ;;  %v16603_v47 = vmax.f32 %v16555_v21, 0.0  ;;  %v16600_v62 = vmax.f32 %v16552_v52, 0.0 }
 0xe65   :  { %v16502_v37 = vpop.f32.mrf.mxu0 }
 0xe66   :  { %v16557_v42 = vadd.f32 %v16502_v37, %v15953_v45  ;;  %v16606_v29 = vmax.f32 %v16558_v34, 0.0 }
 0xe67   :  { %v21396_v2 = vpop.f32.mrf.mxu0 }
 0xe68   :  { %v16560_v24 = vadd.f32 %v21396_v2, %v15956_v63  ;;  %v16605_v49 = vmax.f32 %v16557_v42, 0.0 }
 0xe69   :  { %v16512_v56 = vpop.f32.mrf.mxu0 }
 0xe6a   :  { %v16559_v43 = vadd.f32 %v16512_v56, %v15955_v55  ;;  %v16608_v10 = vmax.f32 %v16560_v24, 0.0 }
 0xe6b   :  { %v21399_v60 = vpop.f32.mrf.mxu0 }
 0xe6c   :  { %v16562_v20 = vadd.f32 %v21399_v60, %v15958_v33  ;;  %v16607_v30 = vmax.f32 %v16559_v43, 0.0 }
 0xe6d   :  { %v16522_v8 = vpop.f32.mrf.mxu0 }
 0xe6e   :  { %v16561_v0 = vadd.f32 %v16522_v8, %v15957_v54  ;;  %v16610_v16 = vmax.f32 %v16562_v20, 0.0 }
 0xe6f   :  { %v21402_v44 = vpop.f32.mrf.mxu0 }
 0xe70   :  { %v16564_v46 = vadd.f32 %v21402_v44, %v15960_v31  ;;  %v16609_v3 = vmax.f32 %v16561_v0, 0.0 }
 0xe71   :  { %v16532_v6 = vpop.f32.mrf.mxu0 }
 0xe72   :  { %v16563_v36 = vadd.f32 %v16532_v6, %v15959_v11  ;;  %v16612_v22 = vmax.f32 %v16564_v46, 0.0 }
 0xe73   :  { %v21405_v38 = vpop.f32.mrf.mxu0 }
 0xe74   :  { %v16566_v59 = vadd.f32 %v21405_v38, %v15962_v25  ;;  %v16611_v39 = vmax.f32 %v16563_v36, 0.0 }
 0xe75   :  { %v16542_v26 = vpop.f32.mrf.mxu0 }
 0xe76   :  { %v16614_v50 = vmax.f32 %v16566_v59, 0.0  ;;  %v16565_v18 = vadd.f32 %v16542_v26, %v15961_v14 }
 0xe78   :  { %v16613_v48 = vmax.f32 %v16565_v18, 0.0  ;;  %21407 = vmatpush3.msra.mxu1 %v16614_v50 }
 0xe79   :  { %21408 = vmatprep.subr.mxu1 %v21447_v19 }
 0xe7a   :  { %21409 = vmatpush3.msra.mxu1 %v16613_v48 }
 0xe7b   :  { %21410 = vmatprep.subr.mxu1 %v21447_v19 }
 0xe7c   :  { %21411 = vmatpush3.msra.mxu1 %v16612_v22 }
 0xe7d   :  { %21412 = vmatprep.subr.mxu1 %v21447_v19 }
 0xe7e   :  { %21413 = vmatpush3.msra.mxu1 %v16611_v39 }
 0xe7f   :  { %21414 = vmatprep.subr.mxu1 %v21447_v19 }
 0xe80   :  { %21415 = vmatpush3.msra.mxu1 %v16610_v16 }
 0xe81   :  { %21416 = vmatprep.subr.mxu1 %v21447_v19 }
 0xe82   :  { %21417 = vmatpush3.msra.mxu1 %v16609_v3 }
 0xe83   :  { %21418 = vmatprep.subr.mxu1 %v21447_v19 }
 0xe84   :  { %21419 = vmatpush3.msra.mxu1 %v16608_v10 }
 0xe85   :  { %21420 = vmatprep.subr.mxu1 %v21447_v19 }
 0xe86   :  { %21421 = vmatpush3.msra.mxu1 %v16607_v30 }
 0xe87   :  { %21422 = vmatprep.subr.mxu1 %v21447_v19 }
 0xe88   :  { %21423 = vmatpush3.msra.mxu1 %v16606_v29 }
 0xe89   :  { %21424 = vmatprep.subr.mxu1 %v21447_v19 }
 0xe8a   :  { %21425 = vmatpush3.msra.mxu1 %v16605_v49 }
 0xe8b   :  { %21426 = vmatprep.subr.mxu1 %v21447_v19 }
 0xe8c   :  { %21427 = vmatpush3.msra.mxu1 %v16604_v51 }
 0xe8d   :  { %21428 = vmatprep.subr.mxu1 %v21447_v19 }
 0xe8e   :  { %21429 = vmatpush3.msra.mxu1 %v16603_v47 }
 0xe8f   :  { %21430 = vmatprep.subr.mxu1 %v21447_v19 }
 0xe90   :  { %21431 = vmatpush3.msra.mxu1 %v16602_v41 }
 0xe91   :  { %21432 = vmatprep.subr.mxu1 %v21447_v19 }
 0xe92   :  { %21433 = vmatpush3.msra.mxu1 %v16601_v32 }
 0xe93   :  { %21434 = vmatprep.subr.mxu1 %v21447_v19 }
 0xe94   :  { %21435 = vmatpush3.msra.mxu1 %v16600_v62 }
 0xe95   :  { %21436 = vmatprep.subr.mxu1 %v21447_v19 }
 0xe96   :  { %21437 = vmatpush3.msra.mxu1 %v16599_v12 }
 0xe97   :  { %21439 = vmatmul.mubr.f32.vlgmr.msra.gmra.mxu1 %v16615_v27 }
 0xf57   :  { %v16692_v13 = vpop.f32.mrf.mxu1 }
 0xf58   :  { %v16693_v9 = vadd.f32 %v16692_v13, %v16625_v1 }
 0xf59   :  { %v21440_v61 = vpop.f32.mrf.mxu1 }
 0xf5a   :  { %16696 = vst [vmem:[%s27174_s9] sm:$0x1] %v16693_v9 }

</bundles_post_ra>
